<compile_context>
chip_gen: v7x
topology: tpu7x:2x2x1
jax: 0.10.0
libtpu: 0.0.40
codegen_flags: <defaults>
</compile_context>

<pallas_src>
import functools

import jax
import jax.numpy as jnp
from jax.experimental import pallas as pl
from jax.experimental.pallas import tpu as pltpu

# Left margin (in W / sublane units) of the padded activation scratch.  Using 8 keeps the
# interior store tile-aligned on the sublane axis; columns _LEFT-1 and _LEFT+W stay zero and
# provide the conv 'same' zero padding.  Tap reads then use cheap unaligned value slices.
_LEFT = 8


def _im2col_3x3(xpad, H, W, left):
    """(B, H+2, Wpad, C) zero-padded activations -> (B*H*W, 9*C) patch matrix.

    Tap order is (ky, kx) row-major, matching the (9*C, Cout) packed conv weight layout.
    """
    B, _, _, C = xpad.shape
    cols = []
    for ky in range(3):
        for kx in range(3):
            tap = xpad[:, ky:ky + H, left - 1 + kx:left - 1 + kx + W, :]   # (B, H, W, C)
            cols.append(tap.reshape(B * H * W, C))
    return jnp.concatenate(cols, axis=1)                                    # (B*H*W, 9*C)


def _fused_forward_kernel(
    # inputs
    x_ref,             # (B, H, W, Cin)  f32  NHWC image
    onehot_ref,        # (B, TC)         f32  one-hot labels, all attributes concatenated
    c1w_ref, c1b_ref,  # (9*Cin, C1) bf16, (1, C1)  f32
    c2w_ref, c2b_ref,  # (9*C1, C2)  bf16, (1, C2)  f32
    fcw_ref, fcb_ref,  # (C2, L)     bf16, (1, L)   f32
    m1w_ref, m1b_ref,  # (L, A*L)    bf16, (1, A*L) f32   heads side-by-side
    m2w_ref, m2b_ref,  # (A*L, A*L)  bf16, (1, A*L) f32   block-diagonal
    m3w_ref, m3b_ref,  # (A*L, TC)   bf16, (1, TC)  f32   block-diagonal
    # outputs
    logits_ref,        # (B, TC) f32
    loss_ref,          # (1, 1)  f32
    # scratch
    xpad1_ref,         # (B, H+2, W+2*_LEFT, Cin) f32
    xpad2_ref,         # (B, H+2, W+2*_LEFT, C1)  f32
    *, class_sizes,
):
    B, H, W, _ = x_ref.shape

    def mxu(a, w_ref):  # bf16 MXU matmul with f32 accumulation
        return jnp.dot(a.astype(jnp.bfloat16), w_ref[...],
                       preferred_element_type=jnp.float32)

    # ---- conv1: 3x3 'same' + bias + ReLU, whole batch as one im2col matmul -------------
    xpad1_ref[...] = jnp.zeros_like(xpad1_ref)                       # zero border padding
    xpad1_ref[:, 1:H + 1, _LEFT:_LEFT + W, :] = x_ref[...]           # tile-aligned interior
    p1 = _im2col_3x3(xpad1_ref[...], H, W, _LEFT)                    # (B*H*W, 9*Cin)
    h1 = jnp.maximum(mxu(p1, c1w_ref) + c1b_ref[...], 0.0)           # (B*H*W, C1)
    C1 = h1.shape[1]

    # ---- conv2 --------------------------------------------------------------------------
    xpad2_ref[...] = jnp.zeros_like(xpad2_ref)
    xpad2_ref[:, 1:H + 1, _LEFT:_LEFT + W, :] = h1.reshape(B, H, W, C1)
    p2 = _im2col_3x3(xpad2_ref[...], H, W, _LEFT)                    # (B*H*W, 9*C1)
    h2 = jnp.maximum(mxu(p2, c2w_ref) + c2b_ref[...], 0.0)           # (B*H*W, C2)
    C2 = h2.shape[1]

    # ---- encoder head: global average pool + Linear -> latent z -------------------------
    pooled = jnp.mean(h2.reshape(B, H * W, C2), axis=1)              # (B, C2)
    z = mxu(pooled, fcw_ref) + fcb_ref[...]                          # (B, latent)

    # ---- all attribute classifier MLPs, packed block(-diagonal): 3 matmuls total --------
    a1 = jnp.maximum(mxu(z, m1w_ref) + m1b_ref[...], 0.0)            # (B, A*L)
    a2 = jnp.maximum(mxu(a1, m2w_ref) + m2b_ref[...], 0.0)           # (B, A*L)
    logits = mxu(a2, m3w_ref) + m3b_ref[...]                         # (B, TC)
    logits_ref[...] = logits

    # ---- per-attribute mean cross-entropy, 'sum' combinator, / num_attrs ----------------
    onehot = onehot_ref[...]
    loss_sum = jnp.float32(0.0)
    off = 0
    for n in class_sizes:
        lg = logits[:, off:off + n]
        oh = onehot[:, off:off + n]
        m = jnp.max(lg, axis=-1, keepdims=True)
        lse = jnp.log(jnp.sum(jnp.exp(lg - m), axis=-1, keepdims=True)) + m
        tgt = jnp.sum(lg * oh, axis=-1, keepdims=True)
        loss_sum = loss_sum + jnp.mean(lse - tgt)                    # F.cross_entropy mean
        off += n
    loss_ref[...] = (loss_sum / jnp.float32(len(class_sizes))).reshape(1, 1)


def fused_cnn_forward(packed, x_nhwc, onehot_all, class_sizes):
    B, H, W, cin = x_nhwc.shape
    c1 = packed['conv1_w'].shape[1]
    tc = int(sum(class_sizes))
    kernel = functools.partial(_fused_forward_kernel, class_sizes=tuple(class_sizes))
    logits, loss = pl.pallas_call(
        kernel,
        out_shape=(
            jax.ShapeDtypeStruct((B, tc), jnp.float32),
            jax.ShapeDtypeStruct((1, 1), jnp.float32),
        ),
        scratch_shapes=[
            pltpu.VMEM((B, H + 2, W + 2 * _LEFT, cin), jnp.float32),
            pltpu.VMEM((B, H + 2, W + 2 * _LEFT, c1), jnp.float32),
        ],
        # Footprint is < 1 MiB; limit documented explicitly so the kernel stays safely inside
        # v7x's smaller (64 MiB physical / 32 MiB scoped) VMEM if the model is scaled up.
        compiler_params=pltpu.CompilerParams(vmem_limit_bytes=32 * 1024 * 1024),
    )(x_nhwc, onehot_all,
      packed['conv1_w'], packed['conv1_b'],
      packed['conv2_w'], packed['conv2_b'],
      packed['fc_w'], packed['fc_b'],
      packed['mlp_w1'], packed['mlp_b1'],
      packed['mlp_w2'], packed['mlp_b2'],
      packed['mlp_w3'], packed['mlp_b3'])
    return logits, loss[0, 0]


# ---------------------------------------------------------------------------------------
# Parameters (deterministic, synthetic) packed for the fused kernel
# ---------------------------------------------------------------------------------------
def _block_diag(blocks):
    rows = sum(b.shape[0] for b in blocks)
    cols = sum(b.shape[1] for b in blocks)
    out = jnp.zeros((rows, cols), blocks[0].dtype)
    r = c = 0
    for b in blocks:
        out = out.at[r:r + b.shape[0], c:c + b.shape[1]].set(b)
        r += b.shape[0]
        c += b.shape[1]
    return out


def init_params(key, in_ch, latent_dim, attr_num_ids_list, c1=8, c2=16):
    A = len(attr_num_ids_list)
    keys = jax.random.split(key, 3 + A)

    def dense(k, shape, scale=0.2):
        return scale * jax.random.normal(k, shape, jnp.float32)

    w1s, b1s, w2s, b2s, w3s, b3s = [], [], [], [], [], []
    for i, n in enumerate(attr_num_ids_list):
        k1, k2, k3 = jax.random.split(keys[3 + i], 3)
        w1s.append(dense(k1, (latent_dim, latent_dim)))
        b1s.append(jnp.zeros((latent_dim,), jnp.float32))
        w2s.append(dense(k2, (latent_dim, latent_dim)))
        b2s.append(jnp.zeros((latent_dim,), jnp.float32))
        w3s.append(dense(k3, (latent_dim, n)))
        b3s.append(jnp.zeros((n,), jnp.float32))

    bf = jnp.bfloat16
    tc = int(sum(attr_num_ids_list))
    packed = {
        # conv weights: row index = (ky*3+kx)*Cin + cin (matches im2col tap order)
        'conv1_w': dense(keys[0], (9 * in_ch, c1)).astype(bf),
        'conv1_b': jnp.zeros((1, c1), jnp.float32),
        'conv2_w': dense(keys[1], (9 * c1, c2), 0.1).astype(bf),
        'conv2_b': jnp.zeros((1, c2), jnp.float32),
        'fc_w': dense(keys[2], (c2, latent_dim)).astype(bf),
        'fc_b': jnp.zeros((1, latent_dim), jnp.float32),
        # all attribute-classifier heads packed so the multi-head MLP is 3 matmuls in-kernel
        'mlp_w1': jnp.concatenate(w1s, axis=1).astype(bf),                    # (L, A*L)
        'mlp_b1': jnp.concatenate(b1s).reshape(1, A * latent_dim),
        'mlp_w2': _block_diag(w2s).astype(bf),                                # (A*L, A*L)
        'mlp_b2': jnp.concatenate(b2s).reshape(1, A * latent_dim),
        'mlp_w3': _block_diag(w3s).astype(bf),                                # (A*L, TC)
        'mlp_b3': jnp.concatenate(b3s).reshape(1, tc),
    }
    return packed


# ---------------------------------------------------------------------------------------
# CNNModel.forward (training mode / train_forward) equivalent
# ---------------------------------------------------------------------------------------
def make_cnn_model_forward(attr_num_ids_list):
    class_sizes = tuple(int(n) for n in attr_num_ids_list)
    offsets, off = [], 0
    for n in class_sizes:
        offsets.append(off)
        off += n

    # TODO(synk): val_forward's iid-sample filtering (get_iid_sample_indices) is not defined
    # in the provided source; only the training-mode forward path is implemented.
    @jax.jit
    def forward(packed_params, imgs_nchw, attrs):
        # NCHW -> NHWC: one tiny XLA transpose of the raw input; everything downstream runs
        # inside the single fused Pallas kernel.
        x = jnp.transpose(imgs_nchw, (0, 2, 3, 1)).astype(jnp.float32)
        onehot_all = jnp.concatenate(
            [jax.nn.one_hot(attrs[:, i], n, dtype=jnp.float32)
             for i, n in enumerate(class_sizes)], axis=1)

        logits_all, loss = fused_cnn_forward(packed_params, x, onehot_all, class_sizes)

        attr_logit_list = [logits_all[:, o:o + n] for o, n in zip(offsets, class_sizes)]
        # aux metrics stay as device arrays: no .item()/float() host syncs in the hot path.
        aux_dict = {'loss_data': loss}
        for i, lg in enumerate(attr_logit_list):
            aux_dict[f'attr_{i}_acc'] = jnp.mean(
                (jnp.argmax(lg, axis=1) == attrs[:, i]).astype(jnp.float32))
        return loss, attr_logit_list, aux_dict

    return forward


if __name__ == "__main__":
    key = jax.random.PRNGKey(0)
    attr_num_ids_list = [5, 7]
    latent_dim = 32
    B, C, H, W = 2, 4, 16, 16

    k_img, k_attr, k_param = jax.random.split(key, 3)
    imgs = jax.random.normal(k_img, (B, C, H, W), jnp.float32)
    attrs = jnp.stack(
        [jax.random.randint(jax.random.fold_in(k_attr, i), (B,), 0, n)
         for i, n in enumerate(attr_num_ids_list)], axis=1).astype(jnp.int32)

    params = init_params(k_param, C, latent_dim, attr_num_ids_list)
    forward = make_cnn_model_forward(attr_num_ids_list)

    loss, attr_logit_list, aux_dict = forward(params, imgs, attrs)
    jax.block_until_ready((loss, attr_logit_list, aux_dict))

    assert bool(jnp.isfinite(loss)), "non-finite loss"
    print("KERNEL_OK")
</pallas_src>

<mosaic_0001>
module attributes {stable_mosaic.version = 11 : i64} {
  func.func @_fused_forward_kernel(%arg0: memref<2x16x16x4xf32, #tpu.memory_space<vmem>>, %arg1: memref<2x12xf32, #tpu.memory_space<vmem>>, %arg2: memref<36x8xbf16, #tpu.memory_space<vmem>>, %arg3: memref<1x8xf32, #tpu.memory_space<vmem>>, %arg4: memref<72x16xbf16, #tpu.memory_space<vmem>>, %arg5: memref<1x16xf32, #tpu.memory_space<vmem>>, %arg6: memref<16x32xbf16, #tpu.memory_space<vmem>>, %arg7: memref<1x32xf32, #tpu.memory_space<vmem>>, %arg8: memref<32x64xbf16, #tpu.memory_space<vmem>>, %arg9: memref<1x64xf32, #tpu.memory_space<vmem>>, %arg10: memref<64x64xbf16, #tpu.memory_space<vmem>>, %arg11: memref<1x64xf32, #tpu.memory_space<vmem>>, %arg12: memref<64x12xbf16, #tpu.memory_space<vmem>>, %arg13: memref<1x12xf32, #tpu.memory_space<vmem>>, %arg14: memref<2x12xf32, #tpu.memory_space<vmem>>, %arg15: memref<1x1xf32, #tpu.memory_space<vmem>>, %arg16: memref<2x18x32x4xf32, #tpu.memory_space<vmem>>, %arg17: memref<2x18x32x8xf32, #tpu.memory_space<vmem>>) attributes {dimension_semantics = [], scalar_prefetch = 0 : i64, scratch_operands = 2 : i64, tpu.core_type = #tpu.core_type<tc>} {
    %cst = arith.constant 0.000000e+00 : f32
    %0 = vector.broadcast %cst : f32 to vector<2x18x32x4xf32>
    %c0 = arith.constant 0 : index
    %c0_0 = arith.constant 0 : index
    %c0_1 = arith.constant 0 : index
    %c0_2 = arith.constant 0 : index
    %1 = vector.load %arg16[%c0, %c0_0, %c0_1, %c0_2] : memref<2x18x32x4xf32, #tpu.memory_space<vmem>>, vector<2x18x32x4xf32>
    tpu.vector_store %arg16[%c0, %c0_0, %c0_1, %c0_2], %0 {strides = array<i32>} : memref<2x18x32x4xf32, #tpu.memory_space<vmem>>, vector<2x18x32x4xf32>,
    %c0_3 = arith.constant 0 : index
    %c0_4 = arith.constant 0 : index
    %c0_5 = arith.constant 0 : index
    %c0_6 = arith.constant 0 : index
    %2 = vector.load %arg0[%c0_3, %c0_4, %c0_5, %c0_6] : memref<2x16x16x4xf32, #tpu.memory_space<vmem>>, vector<2x16x16x4xf32>
    %c0_7 = arith.constant 0 : index
    %c1 = arith.constant 1 : index
    %c8 = arith.constant 8 : index
    %c0_8 = arith.constant 0 : index
    %3 = vector.load %arg16[%c0_7, %c1, %c8, %c0_8] : memref<2x18x32x4xf32, #tpu.memory_space<vmem>>, vector<2x16x16x4xf32>
    tpu.vector_store %arg16[%c0_7, %c1, %c8, %c0_8], %2 {strides = array<i32>} : memref<2x18x32x4xf32, #tpu.memory_space<vmem>>, vector<2x16x16x4xf32>,
    %c0_9 = arith.constant 0 : index
    %c0_10 = arith.constant 0 : index
    %c0_11 = arith.constant 0 : index
    %c0_12 = arith.constant 0 : index
    %4 = vector.load %arg16[%c0_9, %c0_10, %c0_11, %c0_12] : memref<2x18x32x4xf32, #tpu.memory_space<vmem>>, vector<2x18x32x4xf32>
    %5 = vector.extract_strided_slice %4 {offsets = [0, 0, 7, 0], sizes = [2, 16, 16, 4], strides = [1, 1, 1, 1]} : vector<2x18x32x4xf32> to vector<2x16x16x4xf32>
    %6 = vector.shape_cast %5 : vector<2x16x16x4xf32> to vector<512x4xf32>
    %7 = vector.extract_strided_slice %4 {offsets = [0, 0, 8, 0], sizes = [2, 16, 16, 4], strides = [1, 1, 1, 1]} : vector<2x18x32x4xf32> to vector<2x16x16x4xf32>
    %8 = vector.shape_cast %7 : vector<2x16x16x4xf32> to vector<512x4xf32>
    %9 = vector.extract_strided_slice %4 {offsets = [0, 0, 9, 0], sizes = [2, 16, 16, 4], strides = [1, 1, 1, 1]} : vector<2x18x32x4xf32> to vector<2x16x16x4xf32>
    %10 = vector.shape_cast %9 : vector<2x16x16x4xf32> to vector<512x4xf32>
    %11 = vector.extract_strided_slice %4 {offsets = [0, 1, 7, 0], sizes = [2, 16, 16, 4], strides = [1, 1, 1, 1]} : vector<2x18x32x4xf32> to vector<2x16x16x4xf32>
    %12 = vector.shape_cast %11 : vector<2x16x16x4xf32> to vector<512x4xf32>
    %13 = vector.extract_strided_slice %4 {offsets = [0, 1, 8, 0], sizes = [2, 16, 16, 4], strides = [1, 1, 1, 1]} : vector<2x18x32x4xf32> to vector<2x16x16x4xf32>
    %14 = vector.shape_cast %13 : vector<2x16x16x4xf32> to vector<512x4xf32>
    %15 = vector.extract_strided_slice %4 {offsets = [0, 1, 9, 0], sizes = [2, 16, 16, 4], strides = [1, 1, 1, 1]} : vector<2x18x32x4xf32> to vector<2x16x16x4xf32>
    %16 = vector.shape_cast %15 : vector<2x16x16x4xf32> to vector<512x4xf32>
    %17 = vector.extract_strided_slice %4 {offsets = [0, 2, 7, 0], sizes = [2, 16, 16, 4], strides = [1, 1, 1, 1]} : vector<2x18x32x4xf32> to vector<2x16x16x4xf32>
    %18 = vector.shape_cast %17 : vector<2x16x16x4xf32> to vector<512x4xf32>
    %19 = vector.extract_strided_slice %4 {offsets = [0, 2, 8, 0], sizes = [2, 16, 16, 4], strides = [1, 1, 1, 1]} : vector<2x18x32x4xf32> to vector<2x16x16x4xf32>
    %20 = vector.shape_cast %19 : vector<2x16x16x4xf32> to vector<512x4xf32>
    %21 = vector.extract_strided_slice %4 {offsets = [0, 2, 9, 0], sizes = [2, 16, 16, 4], strides = [1, 1, 1, 1]} : vector<2x18x32x4xf32> to vector<2x16x16x4xf32>
    %22 = vector.shape_cast %21 : vector<2x16x16x4xf32> to vector<512x4xf32>
    %23 = tpu.concatenate %6, %8, %10, %12, %14, %16, %18, %20, %22 in 1 : vector<512x4xf32>, vector<512x4xf32>, vector<512x4xf32>, vector<512x4xf32>, vector<512x4xf32>, vector<512x4xf32>, vector<512x4xf32>, vector<512x4xf32>, vector<512x4xf32> -> vector<512x36xf32>
    %24 = arith.truncf %23 : vector<512x36xf32> to vector<512x36xbf16>
    %c0_13 = arith.constant 0 : index
    %c0_14 = arith.constant 0 : index
    %25 = vector.load %arg2[%c0_13, %c0_14] : memref<36x8xbf16, #tpu.memory_space<vmem>>, vector<36x8xbf16>
    %cst_15 = arith.constant dense<0.000000e+00> : vector<512x8xf32>
    %26 = tpu.matmul %24, %25, %cst_15 {dimension_numbers = #tpu.dot_dimension_numbers<[1], [0], [0], [1], [0, 0, 1, 1], [], []>} : vector<512x36xbf16>, vector<36x8xbf16>, vector<512x8xf32> -> vector<512x8xf32>
    %c0_16 = arith.constant 0 : index
    %c0_17 = arith.constant 0 : index
    %27 = vector.load %arg3[%c0_16, %c0_17] : memref<1x8xf32, #tpu.memory_space<vmem>>, vector<1x8xf32>
    %28 = vector.broadcast %27 : vector<1x8xf32> to vector<512x8xf32>
    %29 = arith.addf %26, %28 : vector<512x8xf32>
    %cst_18 = arith.constant 0.000000e+00 : f32
    %30 = vector.broadcast %cst_18 : f32 to vector<512x8xf32>
    %31 = arith.maximumf %29, %30 : vector<512x8xf32>
    %cst_19 = arith.constant 0.000000e+00 : f32
    %32 = vector.broadcast %cst_19 : f32 to vector<2x18x32x8xf32>
    %c0_20 = arith.constant 0 : index
    %c0_21 = arith.constant 0 : index
    %c0_22 = arith.constant 0 : index
    %c0_23 = arith.constant 0 : index
    %33 = vector.load %arg17[%c0_20, %c0_21, %c0_22, %c0_23] : memref<2x18x32x8xf32, #tpu.memory_space<vmem>>, vector<2x18x32x8xf32>
    tpu.vector_store %arg17[%c0_20, %c0_21, %c0_22, %c0_23], %32 {strides = array<i32>} : memref<2x18x32x8xf32, #tpu.memory_space<vmem>>, vector<2x18x32x8xf32>,
    %34 = vector.shape_cast %31 : vector<512x8xf32> to vector<2x16x16x8xf32>
    %c0_24 = arith.constant 0 : index
    %c1_25 = arith.constant 1 : index
    %c8_26 = arith.constant 8 : index
    %c0_27 = arith.constant 0 : index
    %35 = vector.load %arg17[%c0_24, %c1_25, %c8_26, %c0_27] : memref<2x18x32x8xf32, #tpu.memory_space<vmem>>, vector<2x16x16x8xf32>
    tpu.vector_store %arg17[%c0_24, %c1_25, %c8_26, %c0_27], %34 {strides = array<i32>} : memref<2x18x32x8xf32, #tpu.memory_space<vmem>>, vector<2x16x16x8xf32>,
    %c0_28 = arith.constant 0 : index
    %c0_29 = arith.constant 0 : index
    %c0_30 = arith.constant 0 : index
    %c0_31 = arith.constant 0 : index
    %36 = vector.load %arg17[%c0_28, %c0_29, %c0_30, %c0_31] : memref<2x18x32x8xf32, #tpu.memory_space<vmem>>, vector<2x18x32x8xf32>
    %37 = vector.extract_strided_slice %36 {offsets = [0, 0, 7, 0], sizes = [2, 16, 16, 8], strides = [1, 1, 1, 1]} : vector<2x18x32x8xf32> to vector<2x16x16x8xf32>
    %38 = vector.shape_cast %37 : vector<2x16x16x8xf32> to vector<512x8xf32>
    %39 = vector.extract_strided_slice %36 {offsets = [0, 0, 8, 0], sizes = [2, 16, 16, 8], strides = [1, 1, 1, 1]} : vector<2x18x32x8xf32> to vector<2x16x16x8xf32>
    %40 = vector.shape_cast %39 : vector<2x16x16x8xf32> to vector<512x8xf32>
    %41 = vector.extract_strided_slice %36 {offsets = [0, 0, 9, 0], sizes = [2, 16, 16, 8], strides = [1, 1, 1, 1]} : vector<2x18x32x8xf32> to vector<2x16x16x8xf32>
    %42 = vector.shape_cast %41 : vector<2x16x16x8xf32> to vector<512x8xf32>
    %43 = vector.extract_strided_slice %36 {offsets = [0, 1, 7, 0], sizes = [2, 16, 16, 8], strides = [1, 1, 1, 1]} : vector<2x18x32x8xf32> to vector<2x16x16x8xf32>
    %44 = vector.shape_cast %43 : vector<2x16x16x8xf32> to vector<512x8xf32>
    %45 = vector.extract_strided_slice %36 {offsets = [0, 1, 8, 0], sizes = [2, 16, 16, 8], strides = [1, 1, 1, 1]} : vector<2x18x32x8xf32> to vector<2x16x16x8xf32>
    %46 = vector.shape_cast %45 : vector<2x16x16x8xf32> to vector<512x8xf32>
    %47 = vector.extract_strided_slice %36 {offsets = [0, 1, 9, 0], sizes = [2, 16, 16, 8], strides = [1, 1, 1, 1]} : vector<2x18x32x8xf32> to vector<2x16x16x8xf32>
    %48 = vector.shape_cast %47 : vector<2x16x16x8xf32> to vector<512x8xf32>
    %49 = vector.extract_strided_slice %36 {offsets = [0, 2, 7, 0], sizes = [2, 16, 16, 8], strides = [1, 1, 1, 1]} : vector<2x18x32x8xf32> to vector<2x16x16x8xf32>
    %50 = vector.shape_cast %49 : vector<2x16x16x8xf32> to vector<512x8xf32>
    %51 = vector.extract_strided_slice %36 {offsets = [0, 2, 8, 0], sizes = [2, 16, 16, 8], strides = [1, 1, 1, 1]} : vector<2x18x32x8xf32> to vector<2x16x16x8xf32>
    %52 = vector.shape_cast %51 : vector<2x16x16x8xf32> to vector<512x8xf32>
    %53 = vector.extract_strided_slice %36 {offsets = [0, 2, 9, 0], sizes = [2, 16, 16, 8], strides = [1, 1, 1, 1]} : vector<2x18x32x8xf32> to vector<2x16x16x8xf32>
    %54 = vector.shape_cast %53 : vector<2x16x16x8xf32> to vector<512x8xf32>
    %55 = tpu.concatenate %38, %40, %42, %44, %46, %48, %50, %52, %54 in 1 : vector<512x8xf32>, vector<512x8xf32>, vector<512x8xf32>, vector<512x8xf32>, vector<512x8xf32>, vector<512x8xf32>, vector<512x8xf32>, vector<512x8xf32>, vector<512x8xf32> -> vector<512x72xf32>
    %56 = arith.truncf %55 : vector<512x72xf32> to vector<512x72xbf16>
    %c0_32 = arith.constant 0 : index
    %c0_33 = arith.constant 0 : index
    %57 = vector.load %arg4[%c0_32, %c0_33] : memref<72x16xbf16, #tpu.memory_space<vmem>>, vector<72x16xbf16>
    %cst_34 = arith.constant dense<0.000000e+00> : vector<512x16xf32>
    %58 = tpu.matmul %56, %57, %cst_34 {dimension_numbers = #tpu.dot_dimension_numbers<[1], [0], [0], [1], [0, 0, 1, 1], [], []>} : vector<512x72xbf16>, vector<72x16xbf16>, vector<512x16xf32> -> vector<512x16xf32>
    %c0_35 = arith.constant 0 : index
    %c0_36 = arith.constant 0 : index
    %59 = vector.load %arg5[%c0_35, %c0_36] : memref<1x16xf32, #tpu.memory_space<vmem>>, vector<1x16xf32>
    %60 = vector.broadcast %59 : vector<1x16xf32> to vector<512x16xf32>
    %61 = arith.addf %58, %60 : vector<512x16xf32>
    %cst_37 = arith.constant 0.000000e+00 : f32
    %62 = vector.broadcast %cst_37 : f32 to vector<512x16xf32>
    %63 = arith.maximumf %61, %62 : vector<512x16xf32>
    %64 = vector.shape_cast %63 : vector<512x16xf32> to vector<2x256x16xf32>
    %cst_38 = arith.constant dense<0.000000e+00> : vector<2x16xf32>
    %65 = vector.multi_reduction <add>, %64, %cst_38 [1] : vector<2x256x16xf32> to vector<2x16xf32>
    %cst_39 = arith.constant 2.560000e+02 : f32
    %66 = vector.broadcast %cst_39 : f32 to vector<2x16xf32>
    %67 = arith.divf %65, %66 : vector<2x16xf32>
    %68 = arith.truncf %67 : vector<2x16xf32> to vector<2x16xbf16>
    %c0_40 = arith.constant 0 : index
    %c0_41 = arith.constant 0 : index
    %69 = vector.load %arg6[%c0_40, %c0_41] : memref<16x32xbf16, #tpu.memory_space<vmem>>, vector<16x32xbf16>
    %cst_42 = arith.constant dense<0.000000e+00> : vector<2x32xf32>
    %70 = tpu.matmul %68, %69, %cst_42 {dimension_numbers = #tpu.dot_dimension_numbers<[1], [0], [0], [1], [0, 0, 1, 1], [], []>} : vector<2x16xbf16>, vector<16x32xbf16>, vector<2x32xf32> -> vector<2x32xf32>
    %c0_43 = arith.constant 0 : index
    %c0_44 = arith.constant 0 : index
    %71 = vector.load %arg7[%c0_43, %c0_44] : memref<1x32xf32, #tpu.memory_space<vmem>>, vector<1x32xf32>
    %72 = vector.broadcast %71 : vector<1x32xf32> to vector<2x32xf32>
    %73 = arith.addf %70, %72 : vector<2x32xf32>
    %74 = arith.truncf %73 : vector<2x32xf32> to vector<2x32xbf16>
    %c0_45 = arith.constant 0 : index
    %c0_46 = arith.constant 0 : index
    %75 = vector.load %arg8[%c0_45, %c0_46] : memref<32x64xbf16, #tpu.memory_space<vmem>>, vector<32x64xbf16>
    %cst_47 = arith.constant dense<0.000000e+00> : vector<2x64xf32>
    %76 = tpu.matmul %74, %75, %cst_47 {dimension_numbers = #tpu.dot_dimension_numbers<[1], [0], [0], [1], [0, 0, 1, 1], [], []>} : vector<2x32xbf16>, vector<32x64xbf16>, vector<2x64xf32> -> vector<2x64xf32>
    %c0_48 = arith.constant 0 : index
    %c0_49 = arith.constant 0 : index
    %77 = vector.load %arg9[%c0_48, %c0_49] : memref<1x64xf32, #tpu.memory_space<vmem>>, vector<1x64xf32>
    %78 = vector.broadcast %77 : vector<1x64xf32> to vector<2x64xf32>
    %79 = arith.addf %76, %78 : vector<2x64xf32>
    %cst_50 = arith.constant 0.000000e+00 : f32
    %80 = vector.broadcast %cst_50 : f32 to vector<2x64xf32>
    %81 = arith.maximumf %79, %80 : vector<2x64xf32>
    %82 = arith.truncf %81 : vector<2x64xf32> to vector<2x64xbf16>
    %c0_51 = arith.constant 0 : index
    %c0_52 = arith.constant 0 : index
    %83 = vector.load %arg10[%c0_51, %c0_52] : memref<64x64xbf16, #tpu.memory_space<vmem>>, vector<64x64xbf16>
    %cst_53 = arith.constant dense<0.000000e+00> : vector<2x64xf32>
    %84 = tpu.matmul %82, %83, %cst_53 {dimension_numbers = #tpu.dot_dimension_numbers<[1], [0], [0], [1], [0, 0, 1, 1], [], []>} : vector<2x64xbf16>, vector<64x64xbf16>, vector<2x64xf32> -> vector<2x64xf32>
    %c0_54 = arith.constant 0 : index
    %c0_55 = arith.constant 0 : index
    %85 = vector.load %arg11[%c0_54, %c0_55] : memref<1x64xf32, #tpu.memory_space<vmem>>, vector<1x64xf32>
    %86 = vector.broadcast %85 : vector<1x64xf32> to vector<2x64xf32>
    %87 = arith.addf %84, %86 : vector<2x64xf32>
    %cst_56 = arith.constant 0.000000e+00 : f32
    %88 = vector.broadcast %cst_56 : f32 to vector<2x64xf32>
    %89 = arith.maximumf %87, %88 : vector<2x64xf32>
    %90 = arith.truncf %89 : vector<2x64xf32> to vector<2x64xbf16>
    %c0_57 = arith.constant 0 : index
    %c0_58 = arith.constant 0 : index
    %91 = vector.load %arg12[%c0_57, %c0_58] : memref<64x12xbf16, #tpu.memory_space<vmem>>, vector<64x12xbf16>
    %cst_59 = arith.constant dense<0.000000e+00> : vector<2x12xf32>
    %92 = tpu.matmul %90, %91, %cst_59 {dimension_numbers = #tpu.dot_dimension_numbers<[1], [0], [0], [1], [0, 0, 1, 1], [], []>} : vector<2x64xbf16>, vector<64x12xbf16>, vector<2x12xf32> -> vector<2x12xf32>
    %c0_60 = arith.constant 0 : index
    %c0_61 = arith.constant 0 : index
    %93 = vector.load %arg13[%c0_60, %c0_61] : memref<1x12xf32, #tpu.memory_space<vmem>>, vector<1x12xf32>
    %94 = vector.broadcast %93 : vector<1x12xf32> to vector<2x12xf32>
    %95 = arith.addf %92, %94 : vector<2x12xf32>
    %c0_62 = arith.constant 0 : index
    %c0_63 = arith.constant 0 : index
    %96 = vector.load %arg14[%c0_62, %c0_63] : memref<2x12xf32, #tpu.memory_space<vmem>>, vector<2x12xf32>
    tpu.vector_store %arg14[%c0_62, %c0_63], %95 {strides = array<i32>} : memref<2x12xf32, #tpu.memory_space<vmem>>, vector<2x12xf32>,
    %c0_64 = arith.constant 0 : index
    %c0_65 = arith.constant 0 : index
    %97 = vector.load %arg1[%c0_64, %c0_65] : memref<2x12xf32, #tpu.memory_space<vmem>>, vector<2x12xf32>
    %98 = vector.extract_strided_slice %95 {offsets = [0, 0], sizes = [2, 5], strides = [1, 1]} : vector<2x12xf32> to vector<2x5xf32>
    %99 = vector.extract_strided_slice %97 {offsets = [0, 0], sizes = [2, 5], strides = [1, 1]} : vector<2x12xf32> to vector<2x5xf32>
    %cst_66 = arith.constant dense<0xFF800000> : vector<2xf32>
    %100 = vector.multi_reduction <maximumf>, %98, %cst_66 [1] : vector<2x5xf32> to vector<2xf32>
    %101 = vector.shape_cast %100 : vector<2xf32> to vector<2x1xf32>
    %102 = vector.broadcast %101 : vector<2x1xf32> to vector<2x5xf32>
    %103 = arith.subf %98, %102 : vector<2x5xf32>
    %104 = math.exp %103 : vector<2x5xf32>
    %cst_67 = arith.constant dense<0.000000e+00> : vector<2xf32>
    %105 = vector.multi_reduction <add>, %104, %cst_67 [1] : vector<2x5xf32> to vector<2xf32>
    %106 = vector.shape_cast %105 : vector<2xf32> to vector<2x1xf32>
    %107 = math.log %106 : vector<2x1xf32>
    %108 = arith.addf %107, %101 : vector<2x1xf32>
    %109 = arith.mulf %98, %99 : vector<2x5xf32>
    %cst_68 = arith.constant dense<0.000000e+00> : vector<2xf32>
    %110 = vector.multi_reduction <add>, %109, %cst_68 [1] : vector<2x5xf32> to vector<2xf32>
    %111 = vector.shape_cast %110 : vector<2xf32> to vector<2x1xf32>
    %112 = arith.subf %108, %111 : vector<2x1xf32>
    %113 = vector.shape_cast %112 : vector<2x1xf32> to vector<1x2x1xf32>
    %cst_69 = arith.constant dense<0.000000e+00> : vector<1xf32>
    %114 = vector.multi_reduction <add>, %113, %cst_69 [1, 2] : vector<1x2x1xf32> to vector<1xf32>
    %115 = vector.shape_cast %114 : vector<1xf32> to vector<1x1x1xf32>
    %116 = vector.extract %115[0, 0, 0] : f32 from vector<1x1x1xf32>
    %cst_70 = arith.constant 2.000000e+00 : f32
    %117 = arith.divf %116, %cst_70 : f32
    %cst_71 = arith.constant 0.000000e+00 : f32
    %118 = arith.addf %cst_71, %117 : f32
    %119 = vector.extract_strided_slice %95 {offsets = [0, 5], sizes = [2, 7], strides = [1, 1]} : vector<2x12xf32> to vector<2x7xf32>
    %120 = vector.extract_strided_slice %97 {offsets = [0, 5], sizes = [2, 7], strides = [1, 1]} : vector<2x12xf32> to vector<2x7xf32>
    %cst_72 = arith.constant dense<0xFF800000> : vector<2xf32>
    %121 = vector.multi_reduction <maximumf>, %119, %cst_72 [1] : vector<2x7xf32> to vector<2xf32>
    %122 = vector.shape_cast %121 : vector<2xf32> to vector<2x1xf32>
    %123 = vector.broadcast %122 : vector<2x1xf32> to vector<2x7xf32>
    %124 = arith.subf %119, %123 : vector<2x7xf32>
    %125 = math.exp %124 : vector<2x7xf32>
    %cst_73 = arith.constant dense<0.000000e+00> : vector<2xf32>
    %126 = vector.multi_reduction <add>, %125, %cst_73 [1] : vector<2x7xf32> to vector<2xf32>
    %127 = vector.shape_cast %126 : vector<2xf32> to vector<2x1xf32>
    %128 = math.log %127 : vector<2x1xf32>
    %129 = arith.addf %128, %122 : vector<2x1xf32>
    %130 = arith.mulf %119, %120 : vector<2x7xf32>
    %cst_74 = arith.constant dense<0.000000e+00> : vector<2xf32>
    %131 = vector.multi_reduction <add>, %130, %cst_74 [1] : vector<2x7xf32> to vector<2xf32>
    %132 = vector.shape_cast %131 : vector<2xf32> to vector<2x1xf32>
    %133 = arith.subf %129, %132 : vector<2x1xf32>
    %134 = vector.shape_cast %133 : vector<2x1xf32> to vector<1x2x1xf32>
    %cst_75 = arith.constant dense<0.000000e+00> : vector<1xf32>
    %135 = vector.multi_reduction <add>, %134, %cst_75 [1, 2] : vector<1x2x1xf32> to vector<1xf32>
    %136 = vector.shape_cast %135 : vector<1xf32> to vector<1x1x1xf32>
    %137 = vector.extract %136[0, 0, 0] : f32 from vector<1x1x1xf32>
    %cst_76 = arith.constant 2.000000e+00 : f32
    %138 = arith.divf %137, %cst_76 : f32
    %139 = arith.addf %118, %138 : f32
    %cst_77 = arith.constant 2.000000e+00 : f32
    %140 = arith.divf %139, %cst_77 : f32
    %141 = vector.broadcast %140 : f32 to vector<1x1xf32>
    %c0_78 = arith.constant 0 : index
    %c0_79 = arith.constant 0 : index
    %142 = vector.load %arg15[%c0_78, %c0_79] : memref<1x1xf32, #tpu.memory_space<vmem>>, vector<1x1xf32>
    tpu.vector_store %arg15[%c0_78, %c0_79], %141 {strides = array<i32>} : memref<1x1xf32, #tpu.memory_space<vmem>>, vector<1x1xf32>,
    return
  }
}

</mosaic_0001>

<bundles_post_ra>
// kernel: forward.1
= control target key start
LH: loop header
LB: loop body
LE: loop exit
PB: predicated region body
PF: predicated region fallthrough
CT: control target
= control target key end

     0   :  { %vm51_vm0 = vcmask 31744   ;;  %v16827_v3 = vmov 0.0   ;;  %s10697_s23 = smov 4   ;;  %vm822_vm1 = vcmask 1046528   ;;  %vm565_vm2 = vcmask 1040384   ;;  %s16803_s0 = inlined_call_operand.vmem [shape: f32[2,16,16,4], index: 0, kind: input, shape index: {}]   ;;  %s16804_s1 = inlined_call_operand.vmem [shape: f32[2,12], index: 1, kind: input, shape index: {}]   ;;  %s16805_s2 = inlined_call_operand.vmem [shape: bf16[36,8], index: 2, kind: input, shape index: {}]   ;;  %s16806_s3 = inlined_call_operand.vmem [shape: f32[1,8], index: 3, kind: input, shape index: {}]   ;;  %s16807_s4 = inlined_call_operand.vmem [shape: bf16[72,16], index: 4, kind: input, shape index: {}]   ;;  %s16808_s5 = inlined_call_operand.vmem [shape: f32[1,16], index: 5, kind: input, shape index: {}]   ;;  %s16809_s6 = inlined_call_operand.vmem [shape: bf16[16,32], index: 6, kind: input, shape index: {}]   ;;  %s16810_s7 = inlined_call_operand.vmem [shape: f32[1,32], index: 7, kind: input, shape index: {}]   ;;  %s16811_s8 = inlined_call_operand.vmem [shape: bf16[32,64], index: 8, kind: input, shape index: {}]   ;;  %s16812_s9 = inlined_call_operand.vmem [shape: f32[1,64], index: 9, kind: input, shape index: {}]   ;;  %s16813_s10 = inlined_call_operand.vmem [shape: bf16[64,64], index: 10, kind: input, shape index: {}]   ;;  %s16814_s11 = inlined_call_operand.vmem [shape: f32[1,64], index: 11, kind: input, shape index: {}]   ;;  %s16815_s12 = inlined_call_operand.vmem [shape: bf16[64,12], index: 12, kind: input, shape index: {}]   ;;  %s16816_s13 = inlined_call_operand.vmem [shape: f32[1,12], index: 13, kind: input, shape index: {}]   ;;  %s16817_s14 = inlined_call_operand.vmem [shape: f32[2,12], index: 14, kind: output, shape index: {0}]   ;;  %s16818_s15 = inlined_call_operand.hbm [shape: f32[1,1], index: 15, kind: output, shape index: {1}]  }
   0x1   :  { %v10795_v0 = vld [vmem:[%s16803_s0 + $0x10] sm:$0xff]  ;;  %v10800_v1 = vld [vmem:[%s16803_s0 + $0x18] sm:$0xff]  ;;  %v10805_v2 = vld [vmem:[%s16803_s0] sm:$0xff]  ;;  %53 = vst.msk [vmem:[#allocation2 + $0x8] sm:$0xff] %vm51_vm0, %v16827_v3 }
   0x2   :  { %54 = vst.msk [vmem:[#allocation2 + $0x10] sm:$0xff] %vm51_vm0, %v16827_v3  ;;  %52 = vst.msk [vmem:[#allocation2] sm:$0xff] %vm51_vm0, %v16827_v3  ;;  %v197_v4 = vld [vmem:[%s16803_s0 + $0x8] sm:$0xff]  ;;  %v200_v5 = vld [vmem:[%s16803_s0 + $0x20] sm:$0xff] }
   0x3   :  { %55 = vst.msk [vmem:[#allocation2 + $0x18] sm:$0xff] %vm51_vm0, %v16827_v3  ;;  %56 = vst.msk [vmem:[#allocation2 + $0x20] sm:$0xff] %vm51_vm0, %v16827_v3  ;;  %v201_v6 = vld [vmem:[%s16803_s0 + $0x28] sm:$0xff]  ;;  %v202_v7 = vld [vmem:[%s16803_s0 + $0x30] sm:$0xff] }
   0x4   :  { %57 = vst.msk [vmem:[#allocation2 + $0x28] sm:$0xff] %vm51_vm0, %v16827_v3  ;;  %58 = vst.msk [vmem:[#allocation2 + $0x30] sm:$0xff] %vm51_vm0, %v16827_v3  ;;  %v203_v8 = vld [vmem:[%s16803_s0 + $0x38] sm:$0xff]  ;;  %v204_v9 = vld [vmem:[%s16803_s0 + $0x40] sm:$0xff] }
   0x5   :  { %59 = vst.msk [vmem:[#allocation2 + $0x38] sm:$0xff] %vm51_vm0, %v16827_v3  ;;  %60 = vst.msk [vmem:[#allocation2 + $0x40] sm:$0xff] %vm51_vm0, %v16827_v3  ;;  %v205_v10 = vld [vmem:[%s16803_s0 + $0x48] sm:$0xff]  ;;  %v206_v11 = vld [vmem:[%s16803_s0 + $0x50] sm:$0xff] }
   0x6   :  { %61 = vst.msk [vmem:[#allocation2 + $0x48] sm:$0xff] %vm51_vm0, %v16827_v3  ;;  %62 = vst.msk [vmem:[#allocation2 + $0x50] sm:$0xff] %vm51_vm0, %v16827_v3  ;;  %v207_v12 = vld [vmem:[%s16803_s0 + $0x58] sm:$0xff]  ;;  %v208_v13 = vld [vmem:[%s16803_s0 + $0x60] sm:$0xff] }
   0x7   :  { %63 = vst.msk [vmem:[#allocation2 + $0x58] sm:$0xff] %vm51_vm0, %v16827_v3  ;;  %64 = vst.msk [vmem:[#allocation2 + $0x60] sm:$0xff] %vm51_vm0, %v16827_v3  ;;  %v209_v14 = vld [vmem:[%s16803_s0 + $0x68] sm:$0xff]  ;;  %v210_v15 = vld [vmem:[%s16803_s0 + $0x70] sm:$0xff] }
   0x8   :  { %65 = vst.msk [vmem:[#allocation2 + $0x68] sm:$0xff] %vm51_vm0, %v16827_v3  ;;  %66 = vst.msk [vmem:[#allocation2 + $0x70] sm:$0xff] %vm51_vm0, %v16827_v3  ;;  %v211_v16 = vld [vmem:[%s16803_s0 + $0x78] sm:$0xff]  ;;  %v212_v17 = vld [vmem:[%s16803_s0 + $0x80] sm:$0xff] }
   0x9   :  { %67 = vst.msk [vmem:[#allocation2 + $0x78] sm:$0xff] %vm51_vm0, %v16827_v3  ;;  %68 = vst.msk [vmem:[#allocation2 + $0x80] sm:$0xff] %vm51_vm0, %v16827_v3  ;;  %v213_v18 = vld [vmem:[%s16803_s0 + $0x88] sm:$0xff]  ;;  %v214_v19 = vld [vmem:[%s16803_s0 + $0x90] sm:$0xff] }
   0xa   :  { %69 = vst.msk [vmem:[#allocation2 + $0x88] sm:$0xff] %vm51_vm0, %v16827_v3  ;;  %70 = vst.msk [vmem:[#allocation2 + $0x90] sm:$0xff] %vm51_vm0, %v16827_v3  ;;  %v215_v20 = vld [vmem:[%s16803_s0 + $0x98] sm:$0xff]  ;;  %v216_v21 = vld [vmem:[%s16803_s0 + $0xa0] sm:$0xff] }
   0xb   :  { %71 = vst.msk [vmem:[#allocation2 + $0x98] sm:$0xff] %vm51_vm0, %v16827_v3  ;;  %72 = vst.msk [vmem:[#allocation2 + $0xa0] sm:$0xff] %vm51_vm0, %v16827_v3  ;;  %v217_v22 = vld [vmem:[%s16803_s0 + $0xa8] sm:$0xff]  ;;  %v218_v23 = vld [vmem:[%s16803_s0 + $0xb0] sm:$0xff] }
   0xc   :  { %73 = vst.msk [vmem:[#allocation2 + $0xa8] sm:$0xff] %vm51_vm0, %v16827_v3  ;;  %74 = vst.msk [vmem:[#allocation2 + $0xb0] sm:$0xff] %vm51_vm0, %v16827_v3  ;;  %v219_v24 = vld [vmem:[%s16803_s0 + $0xb8] sm:$0xff]  ;;  %v11182_v25 = vld [vmem:[#allocation2 + $0x8] sm:$0xff] }
   0xd   :  { %75 = vst.msk [vmem:[#allocation2 + $0xb8] sm:$0xff] %vm51_vm0, %v16827_v3  ;;  %76 = vst.msk [vmem:[#allocation2 + $0xc0] sm:$0xff] %vm51_vm0, %v16827_v3  ;;  %v11184_v26 = vld [vmem:[#allocation2 + $0x10] sm:$0xff]  ;;  %v220_v27 = vld [vmem:[%s16803_s0 + $0xc0] sm:$0xff]  ;;  %v16819_v59 = vrot.slane %v11182_v25, 7 }
   0xe   :  { %77 = vst.msk [vmem:[#allocation2 + $0xc8] sm:$0xff] %vm51_vm0, %v16827_v3  ;;  %78 = vst.msk [vmem:[#allocation2 + $0xd0] sm:$0xff] %vm51_vm0, %v16827_v3  ;;  %v8036_v28 = vpack.i.bf16 %v11184_v26, %v11182_v25  ;;  %v569_v52 = vrot.slane %v11184_v26, 7  ;;  %v221_v62 = vld [vmem:[%s16803_s0 + $0xc8] sm:$0xff]  ;;  %v222_v63 = vld [vmem:[%s16803_s0 + $0xd0] sm:$0xff] }
   0xf   :  { %79 = vst.msk [vmem:[#allocation2 + $0xd8] sm:$0xff] %vm51_vm0, %v16827_v3  ;;  %80 = vst.msk [vmem:[#allocation2 + $0xe0] sm:$0xff] %vm51_vm0, %v16827_v3 }
  0x10   :  { %81 = vst.msk [vmem:[#allocation2 + $0xe8] sm:$0xff] %vm51_vm0, %v16827_v3  ;;  %82 = vst.msk [vmem:[#allocation2 + $0xf0] sm:$0xff] %vm51_vm0, %v16827_v3  ;;  %8037 = vrot.lane.b32.xlu0 %v8036_v28, %s10697_s23  ;;  %v237_v28 = vld [vmem:[%s16803_s0 + $0x148] sm:$0xff] }
  0x11   :  { %83 = vst.msk [vmem:[#allocation2 + $0xf8] sm:$0xff] %vm51_vm0, %v16827_v3  ;;  %84 = vst.msk [vmem:[#allocation2 + $0x100] sm:$0xff] %vm51_vm0, %v16827_v3 }
  0x12   :  { %85 = vst.msk [vmem:[#allocation2 + $0x108] sm:$0xff] %vm51_vm0, %v16827_v3  ;;  %86 = vst.msk [vmem:[#allocation2 + $0x110] sm:$0xff] %vm51_vm0, %v16827_v3 }
  0x13   :  { %87 = vst.msk [vmem:[#allocation2 + $0x118] sm:$0xff] %vm51_vm0, %v16827_v3  ;;  %88 = vst.msk [vmem:[#allocation2 + $0x120] sm:$0xff] %vm51_vm0, %v16827_v3 }
  0x14   :  { %89 = vst.msk [vmem:[#allocation2 + $0x128] sm:$0xff] %vm51_vm0, %v16827_v3  ;;  %90 = vst.msk [vmem:[#allocation2 + $0x130] sm:$0xff] %vm51_vm0, %v16827_v3 }
  0x15   :  { %91 = vst.msk [vmem:[#allocation2 + $0x138] sm:$0xff] %vm51_vm0, %v16827_v3  ;;  %92 = vst.msk [vmem:[#allocation2 + $0x140] sm:$0xff] %vm51_vm0, %v16827_v3 }
  0x16   :  { %93 = vst.msk [vmem:[#allocation2 + $0x148] sm:$0xff] %vm51_vm0, %v16827_v3  ;;  %94 = vst.msk [vmem:[#allocation2 + $0x150] sm:$0xff] %vm51_vm0, %v16827_v3 }
  0x17   :  { %95 = vst.msk [vmem:[#allocation2 + $0x158] sm:$0xff] %vm51_vm0, %v16827_v3  ;;  %96 = vst.msk [vmem:[#allocation2 + $0x160] sm:$0xff] %vm51_vm0, %v16827_v3 }
  0x18   :  { %97 = vst.msk [vmem:[#allocation2 + $0x168] sm:$0xff] %vm51_vm0, %v16827_v3  ;;  %98 = vst.msk [vmem:[#allocation2 + $0x170] sm:$0xff] %vm51_vm0, %v16827_v3 }
  0x19   :  { %99 = vst.msk [vmem:[#allocation2 + $0x178] sm:$0xff] %vm51_vm0, %v16827_v3  ;;  %100 = vst.msk [vmem:[#allocation2 + $0x180] sm:$0xff] %vm51_vm0, %v16827_v3 }
  0x1a   :  { %101 = vst.msk [vmem:[#allocation2 + $0x188] sm:$0xff] %vm51_vm0, %v16827_v3  ;;  %102 = vst.msk [vmem:[#allocation2 + $0x190] sm:$0xff] %vm51_vm0, %v16827_v3 }
  0x1b   :  { %103 = vst.msk [vmem:[#allocation2 + $0x198] sm:$0xff] %vm51_vm0, %v16827_v3  ;;  %104 = vst.msk [vmem:[#allocation2 + $0x1a0] sm:$0xff] %vm51_vm0, %v16827_v3 }
  0x1c   :  { %105 = vst.msk [vmem:[#allocation2 + $0x1a8] sm:$0xff] %vm51_vm0, %v16827_v3  ;;  %106 = vst.msk [vmem:[#allocation2 + $0x1b0] sm:$0xff] %vm51_vm0, %v16827_v3 }
  0x1d   :  { %107 = vst.msk [vmem:[#allocation2 + $0x1b8] sm:$0xff] %vm51_vm0, %v16827_v3  ;;  %108 = vst.msk [vmem:[#allocation2 + $0x1c0] sm:$0xff] %vm51_vm0, %v16827_v3 }
  0x1e   :  { %109 = vst.msk [vmem:[#allocation2 + $0x1c8] sm:$0xff] %vm51_vm0, %v16827_v3  ;;  %110 = vst.msk [vmem:[#allocation2 + $0x1d0] sm:$0xff] %vm51_vm0, %v16827_v3 }
  0x1f   :  { %111 = vst.msk [vmem:[#allocation2 + $0x1d8] sm:$0xff] %vm51_vm0, %v16827_v3  ;;  %112 = vst.msk [vmem:[#allocation2 + $0x1e0] sm:$0xff] %vm51_vm0, %v16827_v3 }
  0x20   :  { %113 = vst.msk [vmem:[#allocation2 + $0x1e8] sm:$0xff] %vm51_vm0, %v16827_v3  ;;  %114 = vst.msk [vmem:[#allocation2 + $0x1f0] sm:$0xff] %vm51_vm0, %v16827_v3 }
  0x21   :  { %115 = vst.msk [vmem:[#allocation2 + $0x1f8] sm:$0xff] %vm51_vm0, %v16827_v3  ;;  %116 = vst.msk [vmem:[#allocation2 + $0x200] sm:$0xff] %vm51_vm0, %v16827_v3 }
  0x22   :  { %117 = vst.msk [vmem:[#allocation2 + $0x208] sm:$0xff] %vm51_vm0, %v16827_v3  ;;  %118 = vst.msk [vmem:[#allocation2 + $0x210] sm:$0xff] %vm51_vm0, %v16827_v3 }
  0x23   :  { %119 = vst.msk [vmem:[#allocation2 + $0x218] sm:$0xff] %vm51_vm0, %v16827_v3  ;;  %120 = vst.msk [vmem:[#allocation2 + $0x220] sm:$0xff] %vm51_vm0, %v16827_v3 }
  0x24   :  { %121 = vst.msk [vmem:[#allocation2 + $0x228] sm:$0xff] %vm51_vm0, %v16827_v3  ;;  %122 = vst.msk [vmem:[#allocation2 + $0x230] sm:$0xff] %vm51_vm0, %v16827_v3 }
  0x25   :  { %123 = vst.msk [vmem:[#allocation2 + $0x238] sm:$0xff] %vm51_vm0, %v16827_v3  ;;  %124 = vst.msk [vmem:[#allocation2 + $0x240] sm:$0xff] %vm51_vm0, %v16827_v3 }
  0x26   :  { %125 = vst.msk [vmem:[#allocation2 + $0x248] sm:$0xff] %vm51_vm0, %v16827_v3  ;;  %126 = vst.msk [vmem:[#allocation2 + $0x250] sm:$0xff] %vm51_vm0, %v16827_v3 }
  0x27   :  { %127 = vst.msk [vmem:[#allocation2 + $0x258] sm:$0xff] %vm51_vm0, %v16827_v3  ;;  %128 = vst.msk [vmem:[#allocation2 + $0x260] sm:$0xff] %vm51_vm0, %v16827_v3 }
  0x28   :  { %129 = vst.msk [vmem:[#allocation2 + $0x268] sm:$0xff] %vm51_vm0, %v16827_v3  ;;  %130 = vst.msk [vmem:[#allocation2 + $0x270] sm:$0xff] %vm51_vm0, %v16827_v3 }
  0x29   :  { %131 = vst.msk [vmem:[#allocation2 + $0x278] sm:$0xff] %vm51_vm0, %v16827_v3  ;;  %132 = vst.msk [vmem:[#allocation2 + $0x280] sm:$0xff] %vm51_vm0, %v16827_v3 }
  0x2a   :  { %133 = vst.msk [vmem:[#allocation2 + $0x288] sm:$0xff] %vm51_vm0, %v16827_v3  ;;  %134 = vst.msk [vmem:[#allocation2 + $0x290] sm:$0xff] %vm51_vm0, %v16827_v3 }
  0x2b   :  { %135 = vst.msk [vmem:[#allocation2 + $0x298] sm:$0xff] %vm51_vm0, %v16827_v3  ;;  %136 = vst.msk [vmem:[#allocation2 + $0x2a0] sm:$0xff] %vm51_vm0, %v16827_v3 }
  0x2c   :  { %137 = vst.msk [vmem:[#allocation2 + $0x2a8] sm:$0xff] %vm51_vm0, %v16827_v3  ;;  %138 = vst.msk [vmem:[#allocation2 + $0x2b0] sm:$0xff] %vm51_vm0, %v16827_v3 }
  0x2d   :  { %139 = vst.msk [vmem:[#allocation2 + $0x2b8] sm:$0xff] %vm51_vm0, %v16827_v3  ;;  %140 = vst.msk [vmem:[#allocation2 + $0x2c0] sm:$0xff] %vm51_vm0, %v16827_v3 }
  0x2e   :  { %141 = vst.msk [vmem:[#allocation2 + $0x2c8] sm:$0xff] %vm51_vm0, %v16827_v3  ;;  %142 = vst.msk [vmem:[#allocation2 + $0x2d0] sm:$0xff] %vm51_vm0, %v16827_v3 }
  0x2f   :  { %143 = vst.msk [vmem:[#allocation2 + $0x2d8] sm:$0xff] %vm51_vm0, %v16827_v3  ;;  %144 = vst.msk [vmem:[#allocation2 + $0x2e0] sm:$0xff] %vm51_vm0, %v16827_v3 }
  0x30   :  { %145 = vst.msk [vmem:[#allocation2 + $0x2e8] sm:$0xff] %vm51_vm0, %v16827_v3  ;;  %146 = vst.msk [vmem:[#allocation2 + $0x2f0] sm:$0xff] %vm51_vm0, %v16827_v3 }
  0x31   :  { %147 = vst.msk [vmem:[#allocation2 + $0x2f8] sm:$0xff] %vm51_vm0, %v16827_v3  ;;  %148 = vst.msk [vmem:[#allocation2 + $0x300] sm:$0xff] %vm51_vm0, %v16827_v3 }
  0x32   :  { %149 = vst.msk [vmem:[#allocation2 + $0x308] sm:$0xff] %vm51_vm0, %v16827_v3  ;;  %150 = vst.msk [vmem:[#allocation2 + $0x310] sm:$0xff] %vm51_vm0, %v16827_v3 }
  0x33   :  { %151 = vst.msk [vmem:[#allocation2 + $0x318] sm:$0xff] %vm51_vm0, %v16827_v3  ;;  %152 = vst.msk [vmem:[#allocation2 + $0x320] sm:$0xff] %vm51_vm0, %v16827_v3 }
  0x34   :  { %153 = vst.msk [vmem:[#allocation2 + $0x328] sm:$0xff] %vm51_vm0, %v16827_v3  ;;  %154 = vst.msk [vmem:[#allocation2 + $0x330] sm:$0xff] %vm51_vm0, %v16827_v3 }
  0x35   :  { %155 = vst.msk [vmem:[#allocation2 + $0x338] sm:$0xff] %vm51_vm0, %v16827_v3  ;;  %156 = vst.msk [vmem:[#allocation2 + $0x340] sm:$0xff] %vm51_vm0, %v16827_v3 }
  0x36   :  { %157 = vst.msk [vmem:[#allocation2 + $0x348] sm:$0xff] %vm51_vm0, %v16827_v3  ;;  %158 = vst.msk [vmem:[#allocation2 + $0x350] sm:$0xff] %vm51_vm0, %v16827_v3 }
  0x37   :  { %159 = vst.msk [vmem:[#allocation2 + $0x358] sm:$0xff] %vm51_vm0, %v16827_v3  ;;  %160 = vst.msk [vmem:[#allocation2 + $0x360] sm:$0xff] %vm51_vm0, %v16827_v3 }
  0x38   :  { %161 = vst.msk [vmem:[#allocation2 + $0x368] sm:$0xff] %vm51_vm0, %v16827_v3  ;;  %162 = vst.msk [vmem:[#allocation2 + $0x370] sm:$0xff] %vm51_vm0, %v16827_v3 }
  0x39   :  { %163 = vst.msk [vmem:[#allocation2 + $0x378] sm:$0xff] %vm51_vm0, %v16827_v3  ;;  %164 = vst.msk [vmem:[#allocation2 + $0x380] sm:$0xff] %vm51_vm0, %v16827_v3 }
  0x3a   :  { %165 = vst.msk [vmem:[#allocation2 + $0x388] sm:$0xff] %vm51_vm0, %v16827_v3  ;;  %166 = vst.msk [vmem:[#allocation2 + $0x390] sm:$0xff] %vm51_vm0, %v16827_v3 }
  0x3b   :  { %167 = vst.msk [vmem:[#allocation2 + $0x398] sm:$0xff] %vm51_vm0, %v16827_v3  ;;  %168 = vst.msk [vmem:[#allocation2 + $0x3a0] sm:$0xff] %vm51_vm0, %v16827_v3 }
  0x3c   :  { %169 = vst.msk [vmem:[#allocation2 + $0x3a8] sm:$0xff] %vm51_vm0, %v16827_v3  ;;  %170 = vst.msk [vmem:[#allocation2 + $0x3b0] sm:$0xff] %vm51_vm0, %v16827_v3 }
  0x3d   :  { %171 = vst.msk [vmem:[#allocation2 + $0x3b8] sm:$0xff] %vm51_vm0, %v16827_v3  ;;  %172 = vst.msk [vmem:[#allocation2 + $0x3c0] sm:$0xff] %vm51_vm0, %v16827_v3 }
  0x3e   :  { %173 = vst.msk [vmem:[#allocation2 + $0x3c8] sm:$0xff] %vm51_vm0, %v16827_v3  ;;  %174 = vst.msk [vmem:[#allocation2 + $0x3d0] sm:$0xff] %vm51_vm0, %v16827_v3 }
  0x3f   :  { %175 = vst.msk [vmem:[#allocation2 + $0x3d8] sm:$0xff] %vm51_vm0, %v16827_v3  ;;  %176 = vst.msk [vmem:[#allocation2 + $0x3e0] sm:$0xff] %vm51_vm0, %v16827_v3 }
  0x40   :  { %177 = vst.msk [vmem:[#allocation2 + $0x3e8] sm:$0xff] %vm51_vm0, %v16827_v3  ;;  %178 = vst.msk [vmem:[#allocation2 + $0x3f0] sm:$0xff] %vm51_vm0, %v16827_v3 }
  0x41   :  { %179 = vst.msk [vmem:[#allocation2 + $0x3f8] sm:$0xff] %vm51_vm0, %v16827_v3  ;;  %180 = vst.msk [vmem:[#allocation2 + $0x400] sm:$0xff] %vm51_vm0, %v16827_v3 }
  0x42   :  { %181 = vst.msk [vmem:[#allocation2 + $0x408] sm:$0xff] %vm51_vm0, %v16827_v3  ;;  %182 = vst.msk [vmem:[#allocation2 + $0x410] sm:$0xff] %vm51_vm0, %v16827_v3 }
  0x43   :  { %183 = vst.msk [vmem:[#allocation2 + $0x418] sm:$0xff] %vm51_vm0, %v16827_v3  ;;  %184 = vst.msk [vmem:[#allocation2 + $0x420] sm:$0xff] %vm51_vm0, %v16827_v3 }
  0x44   :  { %185 = vst.msk [vmem:[#allocation2 + $0x428] sm:$0xff] %vm51_vm0, %v16827_v3  ;;  %186 = vst.msk [vmem:[#allocation2 + $0x430] sm:$0xff] %vm51_vm0, %v16827_v3 }
  0x45   :  { %187 = vst.msk [vmem:[#allocation2 + $0x438] sm:$0xff] %vm51_vm0, %v16827_v3  ;;  %188 = vst.msk [vmem:[#allocation2 + $0x440] sm:$0xff] %vm51_vm0, %v16827_v3 }
  0x46   :  { %189 = vst.msk [vmem:[#allocation2 + $0x448] sm:$0xff] %vm51_vm0, %v16827_v3  ;;  %190 = vst.msk [vmem:[#allocation2 + $0x450] sm:$0xff] %vm51_vm0, %v16827_v3 }
  0x47   :  { %191 = vst.msk [vmem:[#allocation2 + $0x458] sm:$0xff] %vm51_vm0, %v16827_v3  ;;  %192 = vst.msk [vmem:[#allocation2 + $0x460] sm:$0xff] %vm51_vm0, %v16827_v3 }
  0x48   :  { %193 = vst.msk [vmem:[#allocation2 + $0x468] sm:$0xff] %vm51_vm0, %v16827_v3  ;;  %194 = vst.msk [vmem:[#allocation2 + $0x470] sm:$0xff] %vm51_vm0, %v16827_v3 }
  0x49   :  { %195 = vst.msk [vmem:[#allocation2 + $0x478] sm:$0xff] %vm51_vm0, %v16827_v3  ;;  %263 = vst.msk [vmem:[#allocation2 + $0x48] sm:$0xff] %vm51_vm0, %v10795_v0  ;;  %v348_v3 = vld [vmem:[#allocation2 + $0xb8] sm:$0xff] }
  0x4a   :  { %264 = vst.msk [vmem:[#allocation2 + $0x50] sm:$0xff] %vm51_vm0, %v10800_v1  ;;  %261 = vst.msk [vmem:[#allocation2 + $0x28] sm:$0xff] %vm51_vm0, %v10805_v2  ;;  %v223_v1 = vld [vmem:[%s16803_s0 + $0xd8] sm:$0xff]  ;;  %v224_v2 = vld [vmem:[%s16803_s0 + $0xe0] sm:$0xff] }
  0x4b   :  { %262 = vst.msk [vmem:[#allocation2 + $0x30] sm:$0xff] %vm51_vm0, %v197_v4  ;;  %265 = vst.msk [vmem:[#allocation2 + $0x68] sm:$0xff] %vm51_vm0, %v200_v5  ;;  %v225_v4 = vld [vmem:[%s16803_s0 + $0xe8] sm:$0xff] }
  0x4c   :  { %266 = vst.msk [vmem:[#allocation2 + $0x70] sm:$0xff] %vm51_vm0, %v201_v6  ;;  %267 = vst.msk [vmem:[#allocation2 + $0x88] sm:$0xff] %vm51_vm0, %v202_v7 }
  0x4d   :  { %268 = vst.msk [vmem:[#allocation2 + $0x90] sm:$0xff] %vm51_vm0, %v203_v8  ;;  %269 = vst.msk [vmem:[#allocation2 + $0xa8] sm:$0xff] %vm51_vm0, %v204_v9  ;;  %v228_v8 = vld [vmem:[%s16803_s0 + $0x100] sm:$0xff] }
  0x4e   :  { %270 = vst.msk [vmem:[#allocation2 + $0xb0] sm:$0xff] %vm51_vm0, %v205_v10  ;;  %271 = vst.msk [vmem:[#allocation2 + $0xc8] sm:$0xff] %vm51_vm0, %v206_v11 }
  0x4f   :  { %272 = vst.msk [vmem:[#allocation2 + $0xd0] sm:$0xff] %vm51_vm0, %v207_v12  ;;  %273 = vst.msk [vmem:[#allocation2 + $0xe8] sm:$0xff] %vm51_vm0, %v208_v13  ;;  %v229_v13 = vld [vmem:[%s16803_s0 + $0x108] sm:$0xff] }
  0x50   :  { %274 = vst.msk [vmem:[#allocation2 + $0xf0] sm:$0xff] %vm51_vm0, %v209_v14  ;;  %275 = vst.msk [vmem:[#allocation2 + $0x108] sm:$0xff] %vm51_vm0, %v210_v15  ;;  %v11194_v29 = vld [vmem:[#allocation2 + $0x48] sm:$0xff]  ;;  %v230_v14 = vld [vmem:[%s16803_s0 + $0x110] sm:$0xff] }
  0x51   :  { %276 = vst.msk [vmem:[#allocation2 + $0x110] sm:$0xff] %vm51_vm0, %v211_v16  ;;  %277 = vst.msk [vmem:[#allocation2 + $0x128] sm:$0xff] %vm51_vm0, %v212_v17  ;;  %v11196_v30 = vld [vmem:[#allocation2 + $0x50] sm:$0xff]  ;;  %v11198_v31 = vld [vmem:[#allocation2 + $0x28] sm:$0xff]  ;;  %v833_v36 = vrot.slane %v11194_v29, 1  ;;  %v16829_v57 = vrot.slane %v11194_v29, 7 }
  0x52   :  { %278 = vst.msk [vmem:[#allocation2 + $0x130] sm:$0xff] %vm51_vm0, %v213_v18  ;;  %279 = vst.msk [vmem:[#allocation2 + $0x148] sm:$0xff] %vm51_vm0, %v214_v19  ;;  %v11203_v32 = vpack.i.bf16 %v11196_v30, %v11194_v29  ;;  %v11205_v33 = vld [vmem:[#allocation2 + $0x30] sm:$0xff]  ;;  %v11207_v34 = vld [vmem:[#allocation2 + $0x68] sm:$0xff]  ;;  %v834_v38 = vrot.slane %v11196_v30, 1  ;;  %v572_v50 = vrot.slane %v11198_v31, 7 }
  0x53   :  { %280 = vst.msk [vmem:[#allocation2 + $0x150] sm:$0xff] %vm51_vm0, %v215_v20  ;;  %281 = vst.msk [vmem:[#allocation2 + $0x168] sm:$0xff] %vm51_vm0, %v216_v21  ;;  %v11209_v35 = vld [vmem:[#allocation2 + $0x70] sm:$0xff]  ;;  %v11215_v37 = vpack.i.bf16 %v11205_v33, %v11198_v31  ;;  %v11224_v40 = vld [vmem:[#allocation2 + $0x88] sm:$0xff]  ;;  %v574_v51 = vrot.slane %v11205_v33, 7  ;;  %v579_v58 = vrot.slane %v11196_v30, 7 }
  0x54   :  { %282 = vst.msk [vmem:[#allocation2 + $0x170] sm:$0xff] %vm51_vm0, %v217_v22  ;;  %283 = vst.msk [vmem:[#allocation2 + $0x188] sm:$0xff] %vm51_vm0, %v218_v23  ;;  %8047 = vrot.lane.b32.xlu1 %v11203_v32, %s10697_s23  ;;  %v11222_v39 = vpack.i.bf16 %v11209_v35, %v11207_v34  ;;  %v11226_v41 = vld [vmem:[#allocation2 + $0x90] sm:$0xff]  ;;  %v11228_v42 = vld [vmem:[#allocation2 + $0xa8] sm:$0xff]  ;;  %v11235_v44 = vsel %vm822_vm1, %v833_v36, %v834_v38  ;;  %v16825_v6 = vrot.slane %v11207_v34, 7  ;;  %v584_v7 = vrot.slane %v11209_v35, 7 }
  0x55   :  { %284 = vst.msk [vmem:[#allocation2 + $0x190] sm:$0xff] %vm51_vm0, %v219_v24  ;;  %285 = vst.msk [vmem:[#allocation2 + $0x1a8] sm:$0xff] %vm51_vm0, %v220_v27  ;;  %v11230_v43 = vld [vmem:[#allocation2 + $0xb0] sm:$0xff]  ;;  %v11237_v45 = vld [vmem:[#allocation2 + $0xc8] sm:$0xff]  ;;  %8042 = vrot.lane.b32.xlu0 %v11215_v37, %s10697_s23  ;;  %v11245_v47 = vpack.i.bf16 %v11226_v41, %v11224_v40  ;;  %v11284_v0 = vsel %vm565_vm2, %v572_v50, %v574_v51  ;;  %v11300_v5 = vsel %vm565_vm2, %v16829_v57, %v579_v58 }
  0x56   :  { %v11239_v46 = vld [vmem:[#allocation2 + $0xd0] sm:$0xff]  ;;  %v11247_v48 = vld [vmem:[#allocation2 + $0xe8] sm:$0xff]  ;;  %v11258_v53 = vpack.i.bf16 %v11230_v43, %v11228_v42  ;;  %286 = vst.msk [vmem:[#allocation2 + $0x1b0] sm:$0xff] %vm51_vm0, %v221_v62  ;;  %287 = vst.msk [vmem:[#allocation2 + $0x1c8] sm:$0xff] %vm51_vm0, %v222_v63  ;;  %v16823_v9 = vrot.slane %v11224_v40, 7  ;;  %v589_v10 = vrot.slane %v11226_v41, 7  ;;  %v11351_v20 = vsel %vm565_vm2, %v16825_v6, %v584_v7 }
  0x57   :  { %v11249_v49 = vld [vmem:[#allocation2 + $0xf0] sm:$0xff]  ;;  %v11260_v54 = vld [vmem:[#allocation2 + $0x108] sm:$0xff]  ;;  %v11271_v60 = vpack.i.bf16 %v11239_v46, %v11237_v45  ;;  %288 = vst.msk [vmem:[#allocation2 + $0x1d0] sm:$0xff] %vm51_vm0, %v223_v1  ;;  %289 = vst.msk [vmem:[#allocation2 + $0x1e8] sm:$0xff] %vm51_vm0, %v224_v2  ;;  %v16822_v36 = vrot.slane %v11228_v42, 7  ;;  %v594_v51 = vrot.slane %v11230_v43, 7  ;;  %v11391_v62 = vsel %vm565_vm2, %v16819_v59, %v569_v52 }
  0x58   :  { %8052 = vrot.lane.b32.xlu1 %v11222_v39, %s10697_s23  ;;  %v11262_v55 = vld [vmem:[#allocation2 + $0x110] sm:$0xff]  ;;  %v11264_v56 = vld [vmem:[#allocation2 + $0x128] sm:$0xff]  ;;  %290 = vst.msk [vmem:[#allocation2 + $0x1f0] sm:$0xff] %vm51_vm0, %v225_v4  ;;  %v11318_v11 = vpack.i.bf16 %v11249_v49, %v11247_v48  ;;  %293 = vst.msk [vmem:[#allocation2 + $0x268] sm:$0xff] %vm51_vm0, %v228_v8  ;;  %v11356_v21 = vsel %vm565_vm2, %v16823_v9, %v589_v10  ;;  %v848_v63 = vrot.slane %v11228_v42, 1  ;;  %v849_v1 = vrot.slane %v11230_v43, 1 }
  0x59   :  { %v11273_v61 = vld [vmem:[#allocation2 + $0x130] sm:$0xff]  ;;  %8057 = vrot.lane.b32.xlu0 %v11245_v47, %s10697_s23  ;;  %v11322_v12 = vpack.i.bf16 %v11262_v55, %v11260_v54  ;;  %v231_v15 = vld [vmem:[%s16803_s0 + $0x118] sm:$0xff]  ;;  %294 = vst.msk [vmem:[#allocation2 + $0x270] sm:$0xff] %vm51_vm0, %v229_v13  ;;  %295 = vst.msk [vmem:[#allocation2 + $0x288] sm:$0xff] %vm51_vm0, %v230_v14  ;;  %v11412_v7 = vsel %vm565_vm2, %v16822_v36, %v594_v51  ;;  %v16821_v8 = vrot.slane %v11237_v45, 7  ;;  %v599_v10 = vrot.slane %v11239_v46, 7 }
  0x5a   :  { %v8081_v16 = vpack.i.bf16 %v11273_v61, %v11264_v56  ;;  %296 = vst.msk [vmem:[#allocation2 + $0x290] sm:$0xff] %vm51_vm0, %v231_v15  ;;  %v232_v17 = vld [vmem:[%s16803_s0 + $0x120] sm:$0xff]  ;;  %v233_v18 = vld [vmem:[%s16803_s0 + $0x128] sm:$0xff]  ;;  %v234_v19 = vld [vmem:[%s16803_s0 + $0x130] sm:$0xff] }
  0x5b   :  { %v366_v22 = vld [vmem:[#allocation2 + $0x148] sm:$0xff]  ;;  %v367_v23 = vld [vmem:[#allocation2 + $0x150] sm:$0xff]  ;;  %297 = vst.msk [vmem:[#allocation2 + $0x2a8] sm:$0xff] %vm51_vm0, %v232_v17  ;;  %298 = vst.msk [vmem:[#allocation2 + $0x2b0] sm:$0xff] %vm51_vm0, %v233_v18  ;;  %v11425_v17 = vsel %vm822_vm1, %v848_v63, %v849_v1  ;;  %v853_v18 = vrot.slane %v11237_v45, 1 }
  0x5c   :  { %8062 = vrot.lane.b32.xlu1 %v11258_v53, %s10697_s23  ;;  %v235_v24 = vld [vmem:[%s16803_s0 + $0x138] sm:$0xff]  ;;  %299 = vst.msk [vmem:[#allocation2 + $0x2c8] sm:$0xff] %vm51_vm0, %v234_v19  ;;  %v236_v27 = vld [vmem:[%s16803_s0 + $0x140] sm:$0xff]  ;;  %302 = vst.msk [vmem:[#allocation2 + $0x2f0] sm:$0xff] %vm51_vm0, %v237_v28  ;;  %v854_v19 = vrot.slane %v11239_v46, 1  ;;  %v604_v28 = vrot.slane %v11249_v49, 7  ;;  %v8086_v51 = vpack.i.bf16 %v367_v23, %v366_v22 }
  0x5d   :  { %8067 = vrot.lane.b32.xlu0 %v11271_v60, %s10697_s23  ;;  %300 = vst.msk [vmem:[#allocation2 + $0x2d0] sm:$0xff] %vm51_vm0, %v235_v24  ;;  %301 = vst.msk [vmem:[#allocation2 + $0x2e8] sm:$0xff] %vm51_vm0, %v236_v27  ;;  %v238_v56 = vld [vmem:[%s16803_s0 + $0x150] sm:$0xff]  ;;  %v239_v58 = vld [vmem:[%s16803_s0 + $0x158] sm:$0xff]  ;;  %v11433_v24 = vsel %vm565_vm2, %v16821_v8, %v599_v10  ;;  %v16820_v27 = vrot.slane %v11247_v48, 7  ;;  %v824_v46 = vrot.slane %v11184_v26, 1 }
  0x5e   :  { %v240_v61 = vld [vmem:[%s16803_s0 + $0x160] sm:$0xff]  ;;  %303 = vst.msk [vmem:[#allocation2 + $0x308] sm:$0xff] %vm51_vm0, %v238_v56  ;;  %304 = vst.msk [vmem:[#allocation2 + $0x310] sm:$0xff] %vm51_vm0, %v239_v58  ;;  %v241_v2 = vld [vmem:[%s16803_s0 + $0x168] sm:$0xff] }
  0x5f   :  { %305 = vst.msk [vmem:[#allocation2 + $0x328] sm:$0xff] %vm51_vm0, %v240_v61  ;;  %v242_v52 = vld [vmem:[%s16803_s0 + $0x170] sm:$0xff]  ;;  %v243_v4 = vld [vmem:[%s16803_s0 + $0x178] sm:$0xff]  ;;  %v370_v13 = vld [vmem:[#allocation2 + $0x168] sm:$0xff]  ;;  %v11448_v61 = vsel %vm822_vm1, %v853_v18, %v854_v19  ;;  %v11456_v22 = vsel %vm565_vm2, %v16820_v27, %v604_v28 }
  0x60   :  { %8072 = vrot.lane.b32.xlu1 %v11318_v11, %s10697_s23  ;;  %v371_v14 = vld [vmem:[#allocation2 + $0x170] sm:$0xff]  ;;  %306 = vst.msk [vmem:[#allocation2 + $0x330] sm:$0xff] %vm51_vm0, %v241_v2  ;;  %307 = vst.msk [vmem:[#allocation2 + $0x348] sm:$0xff] %vm51_vm0, %v242_v52  ;;  %v244_v15 = vld [vmem:[%s16803_s0 + $0x180] sm:$0xff] }
  0x61   :  { %308 = vst.msk [vmem:[#allocation2 + $0x350] sm:$0xff] %vm51_vm0, %v243_v4  ;;  %309 = vst.msk [vmem:[#allocation2 + $0x368] sm:$0xff] %vm51_vm0, %v244_v15  ;;  %8077 = vrot.lane.b32.xlu0 %v11322_v12, %s10697_s23  ;;  %v245_v56 = vld [vmem:[%s16803_s0 + $0x188] sm:$0xff]  ;;  %v246_v58 = vld [vmem:[%s16803_s0 + $0x190] sm:$0xff]  ;;  %v8091_v63 = vpack.i.bf16 %v371_v14, %v370_v13 }
  0x62   :  { %v374_v2 = vld [vmem:[#allocation2 + $0x188] sm:$0xff]  ;;  %v375_v52 = vld [vmem:[#allocation2 + $0x190] sm:$0xff]  ;;  %310 = vst.msk [vmem:[#allocation2 + $0x370] sm:$0xff] %vm51_vm0, %v245_v56  ;;  %311 = vst.msk [vmem:[#allocation2 + $0x388] sm:$0xff] %vm51_vm0, %v246_v58 }
  0x63   :  { %v378_v4 = vld [vmem:[#allocation2 + $0x1a8] sm:$0xff]  ;;  %v379_v23 = vld [vmem:[#allocation2 + $0x1b0] sm:$0xff]  ;;  %v8096_v14 = vpack.i.bf16 %v375_v52, %v374_v2  ;;  %v247_v27 = vld [vmem:[%s16803_s0 + $0x198] sm:$0xff]  ;;  %v858_v52 = vrot.slane %v11247_v48, 1 }
  0x64   :  { %8082 = vrot.lane.b32.xlu1 %v8081_v16, %s10697_s23  ;;  %v11458_v10 = vld [vmem:[#allocation2 + $0x248] sm:$0xff]  ;;  %v11460_v15 = vld [vmem:[#allocation2 + $0x250] sm:$0xff]  ;;  %v8101_v18 = vpack.i.bf16 %v379_v23, %v378_v4  ;;  %v248_v8 = vld [vmem:[%s16803_s0 + $0x1a0] sm:$0xff]  ;;  %312 = vst.msk [vmem:[#allocation2 + $0x390] sm:$0xff] %vm51_vm0, %v247_v27  ;;  %v859_v4 = vrot.slane %v11249_v49, 1 }
  0x65   :  { %16869 = vst [vmem:[#allocation7_spill] sm:$0xff] %v11458_v10  ;;  %v649_v16 = vrot.slane %v11460_v15, 7  ;;  %v16824_v13 = vrot.slane %v11458_v10, 7  ;;  %8087 = vrot.lane.b32.xlu0 %v8086_v51, %s10697_s23  ;;  %v382_v56 = vld [vmem:[#allocation2 + $0x1c8] sm:$0xff]  ;;  %v383_v58 = vld [vmem:[#allocation2 + $0x1d0] sm:$0xff]  ;;  %313 = vst.msk [vmem:[#allocation2 + $0x3a8] sm:$0xff] %vm51_vm0, %v248_v8 }
  0x66   :  { %v386_v59 = vld [vmem:[#allocation2 + $0x1e8] sm:$0xff]  ;;  %v387_v28 = vld [vmem:[#allocation2 + $0x1f0] sm:$0xff]  ;;  %v251_v2 = vld [vmem:[%s16803_s0 + $0x1b8] sm:$0xff]  ;;  %v8106_v8 = vpack.i.bf16 %v383_v58, %v382_v56  ;;  %v11511_v58 = vsel %vm822_vm1, %v858_v52, %v859_v4 }
  0x67   :  { %v249_v51 = vld [vmem:[%s16803_s0 + $0x1a8] sm:$0xff]  ;;  %v11488_v27 = vsel %vm565_vm2, %v16824_v13, %v649_v16  ;;  %316 = vst.msk [vmem:[#allocation2 + $0x3d0] sm:$0xff] %vm51_vm0, %v251_v2  ;;  %v252_v36 = vld [vmem:[%s16803_s0 + $0x1c0] sm:$0xff]  ;;  %v8111_v9 = vpack.i.bf16 %v387_v28, %v386_v59  ;;  %v255_v56 = vld [vmem:[%s16803_s0 + $0x1d8] sm:$0xff]  ;;  %v16826_v28 = vrot.slane %v11260_v54, 7  ;;  %v8116_v2 = vpack.i.bf16 %v11460_v15, %v11458_v10 }
  0x68   :  { %8092 = vrot.lane.b32.xlu1 %v8091_v63, %s10697_s23  ;;  %v250_v63 = vld [vmem:[%s16803_s0 + $0x1b0] sm:$0xff]  ;;  %16870 = vst [vmem:[#allocation8_spill] sm:$0xff] %v11488_v27  ;;  %v402_v23 = vld [vmem:[#allocation2 + $0x268] sm:$0xff]  ;;  %314 = vst.msk [vmem:[#allocation2 + $0x3b0] sm:$0xff] %vm51_vm0, %v249_v51  ;;  %v609_v51 = vrot.slane %v11262_v55, 7 }
  0x69   :  { %8097 = vrot.lane.b32.xlu0 %v8096_v14, %s10697_s23  ;;  %315 = vst.msk [vmem:[#allocation2 + $0x3c8] sm:$0xff] %vm51_vm0, %v250_v63  ;;  %v253_v16 = vld [vmem:[%s16803_s0 + $0x1c8] sm:$0xff]  ;;  %317 = vst.msk [vmem:[#allocation2 + $0x3e8] sm:$0xff] %vm51_vm0, %v252_v36  ;;  %v254_v14 = vld [vmem:[%s16803_s0 + $0x1d0] sm:$0xff] }
  0x6a   :  { %v403_v59 = vld [vmem:[#allocation2 + $0x270] sm:$0xff]  ;;  %318 = vst.msk [vmem:[#allocation2 + $0x3f0] sm:$0xff] %vm51_vm0, %v253_v16  ;;  %319 = vst.msk [vmem:[#allocation2 + $0x408] sm:$0xff] %vm51_vm0, %v254_v14  ;;  %v256_v36 = vld [vmem:[%s16803_s0 + $0x1e0] sm:$0xff]  ;;  %v11532_v16 = vsel %vm565_vm2, %v16826_v28, %v609_v51 }
  0x6b   :  { %320 = vst.msk [vmem:[#allocation2 + $0x410] sm:$0xff] %vm51_vm0, %v255_v56  ;;  %321 = vst.msk [vmem:[#allocation2 + $0x428] sm:$0xff] %vm51_vm0, %v256_v36  ;;  %v336_v63 = vld [vmem:[#allocation2 + $0x58] sm:$0xff]  ;;  %v8121_v14 = vpack.i.bf16 %v403_v59, %v402_v23  ;;  %v406_v56 = vld [vmem:[#allocation2 + $0x288] sm:$0xff] }
  0x6c   :  { %8102 = vrot.lane.b32.xlu1 %v8101_v18, %s10697_s23  ;;  %v257_v18 = vld [vmem:[%s16803_s0 + $0x1e8] sm:$0xff]  ;;  %v836_v52 = vrot.slane %v336_v63, 1  ;;  %16871 = vst [vmem:[#allocation9_spill] sm:$0xff] %v11532_v16  ;;  %v407_v13 = vld [vmem:[#allocation2 + $0x290] sm:$0xff]  ;;  %v360_v49 = vld [vmem:[#allocation2 + $0x118] sm:$0xff] }
  0x6d   :  { %322 = vst.msk [vmem:[#allocation2 + $0x430] sm:$0xff] %vm51_vm0, %v257_v18  ;;  %8107 = vrot.lane.b32.xlu0 %v8106_v8, %s10697_s23  ;;  %v410_v36 = vld [vmem:[#allocation2 + $0x2a8] sm:$0xff]  ;;  %v411_v6 = vld [vmem:[#allocation2 + $0x2b0] sm:$0xff]  ;;  %v8126_v63 = vpack.i.bf16 %v407_v13, %v406_v56  ;;  %v352_v13 = vld [vmem:[#allocation2 + $0xd8] sm:$0xff] }
  0x6e   :  { %v837_v8 = vsel %vm822_vm1, %v834_v38, %v836_v52  ;;  %v8131_v51 = vpack.i.bf16 %v411_v6, %v410_v36  ;;  %v414_v28 = vld [vmem:[#allocation2 + $0x2c8] sm:$0xff]  ;;  %v419_v59 = vld [vmem:[#allocation2 + $0x2f0] sm:$0xff] }
  0x6f   :  { %v11539_v18 = vpack.i.bf16 %v837_v8, %v11235_v44  ;;  %v418_v23 = vld [vmem:[#allocation2 + $0x2e8] sm:$0xff]  ;;  %v423_v44 = vld [vmem:[#allocation2 + $0x310] sm:$0xff] }
  0x70   :  { %8112 = vrot.lane.b32.xlu1 %v8111_v9, %s10697_s23  ;;  %v415_v9 = vld [vmem:[#allocation2 + $0x2d0] sm:$0xff]  ;;  %v422_v30 = vld [vmem:[#allocation2 + $0x308] sm:$0xff]  ;;  %v8141_v38 = vpack.i.bf16 %v419_v59, %v418_v23  ;;  %v356_v59 = vld [vmem:[#allocation2 + $0xf8] sm:$0xff] }
  0x71   :  { %8117 = vrot.lane.b32.xlu0 %v8116_v2, %s10697_s23  ;;  %v8136_v57 = vpack.i.bf16 %v415_v9, %v414_v28  ;;  %v426_v52 = vld [vmem:[#allocation2 + $0x328] sm:$0xff]  ;;  %v427_v8 = vld [vmem:[#allocation2 + $0x330] sm:$0xff]  ;;  %v851_v2 = vrot.slane %v348_v3, 1  ;;  %v8146_v6 = vpack.i.bf16 %v423_v44, %v422_v30 }
  0x72   :  { %v430_v28 = vld [vmem:[#allocation2 + $0x348] sm:$0xff]  ;;  %v431_v36 = vld [vmem:[#allocation2 + $0x350] sm:$0xff] }
  0x73   :  { %v852_v56 = vsel %vm822_vm1, %v849_v1, %v851_v2  ;;  %v434_v9 = vld [vmem:[#allocation2 + $0x368] sm:$0xff]  ;;  %v435_v23 = vld [vmem:[#allocation2 + $0x370] sm:$0xff]  ;;  %v8156_v43 = vpack.i.bf16 %v431_v36, %v430_v28  ;;  %v823_v36 = vrot.slane %v11182_v25, 1 }
  0x74   :  { %8122 = vrot.lane.b32.xlu1 %v8121_v14, %s10697_s23  ;;  %v8151_v14 = vpack.i.bf16 %v427_v8, %v426_v52  ;;  %v438_v3 = vld [vmem:[#allocation2 + $0x388] sm:$0xff]  ;;  %v8161_v30 = vpack.i.bf16 %v435_v23, %v434_v9  ;;  %v443_v44 = vld [vmem:[#allocation2 + $0x3b0] sm:$0xff]  ;;  %v861_v52 = vrot.slane %v356_v59, 1  ;;  %v828_v9 = vrot.slane %v11198_v31, 1 }
  0x75   :  { %8127 = vrot.lane.b32.xlu0 %v8126_v63, %s10697_s23  ;;  %v11551_v63 = vpack.i.bf16 %v852_v56, %v11425_v17  ;;  %v439_v17 = vld [vmem:[#allocation2 + $0x390] sm:$0xff]  ;;  %v446_v8 = vld [vmem:[#allocation2 + $0x3c8] sm:$0xff]  ;;  %v332_v56 = vld [vmem:[#allocation2 + $0x38] sm:$0xff] }
  0x76   :  { %v447_v2 = vld [vmem:[#allocation2 + $0x3d0] sm:$0xff]  ;;  %v454_v26 = vld [vmem:[#allocation2 + $0x408] sm:$0xff] }
  0x77   :  { %v8176_v23 = vpack.i.bf16 %v447_v2, %v446_v8  ;;  %v458_v59 = vld [vmem:[#allocation2 + $0x428] sm:$0xff]  ;;  %v838_v2 = vrot.slane %v11207_v34, 1 }
  0x78   :  { %8132 = vrot.lane.b32.xlu1 %v8131_v51, %s10697_s23  ;;  %v856_v51 = vrot.slane %v352_v13, 1  ;;  %v450_v13 = vld [vmem:[#allocation2 + $0x3e8] sm:$0xff] }
  0x79   :  { %8137 = vrot.lane.b32.xlu0 %v8136_v57, %s10697_s23 }
  0x7a   :  { %v857_v57 = vsel %vm822_vm1, %v854_v19, %v856_v51  ;;  %v8166_v19 = vpack.i.bf16 %v439_v17, %v438_v3  ;;  %v451_v51 = vld [vmem:[#allocation2 + $0x3f0] sm:$0xff]  ;;  %v829_v3 = vrot.slane %v11205_v33, 1  ;;  %v863_v17 = vrot.slane %v11260_v54, 1 }
  0x7b   :  { %v11558_v1 = vpack.i.bf16 %v857_v57, %v11448_v61  ;;  %v862_v61 = vsel %vm822_vm1, %v859_v4, %v861_v52  ;;  %v8181_v4 = vpack.i.bf16 %v451_v51, %v450_v13  ;;  %v455_v57 = vld [vmem:[#allocation2 + $0x410] sm:$0xff]  ;;  %v866_v52 = vrot.slane %v360_v49, 1 }
  0x7c   :  { %8142 = vrot.lane.b32.xlu1 %v8141_v38, %s10697_s23  ;;  %v442_v38 = vld [vmem:[#allocation2 + $0x3a8] sm:$0xff]  ;;  %v11568_v28 = vpack.i.bf16 %v862_v61, %v11511_v58  ;;  %v831_v58 = vrot.slane %v332_v56, 1  ;;  %v8186_v8 = vpack.i.bf16 %v455_v57, %v454_v26  ;;  %v825_v33 = vsel %vm822_vm1, %v823_v36, %v824_v46  ;;  %v344_v26 = vld [vmem:[#allocation2 + $0x98] sm:$0xff] }
  0x7d   :  { %8147 = vrot.lane.b32.xlu0 %v8146_v6, %s10697_s23  ;;  %v328_v6 = vld [vmem:[#allocation2 + $0x18] sm:$0xff]  ;;  %v843_v49 = vrot.slane %v11224_v40, 1  ;;  %v846_v57 = vrot.slane %v344_v26, 1 }
  0x80   :  { %8152 = vrot.lane.b32.xlu1 %v8151_v14, %s10697_s23  ;;  %v8171_v14 = vpack.i.bf16 %v443_v44, %v442_v38  ;;  %v340_v38 = vld [vmem:[#allocation2 + $0x78] sm:$0xff]  ;;  %v864_v44 = vrot.slane %v11262_v55, 1  ;;  %v830_v55 = vsel %vm822_vm1, %v828_v9, %v829_v3 }
  0x81   :  { %8157 = vrot.lane.b32.xlu0 %v8156_v43, %s10697_s23  ;;  %v826_v43 = vrot.slane %v328_v6, 1  ;;  %v841_v51 = vrot.slane %v340_v38, 1 }
  0x82   :  { %v865_v56 = vsel %vm822_vm1, %v863_v17, %v864_v44  ;;  %v867_v61 = vsel %vm822_vm1, %v864_v44, %v866_v52 }
  0x83   :  { %v827_v6 = vsel %vm822_vm1, %v824_v46, %v826_v43  ;;  %v11587_v36 = vpack.i.bf16 %v867_v61, %v865_v56  ;;  %v844_v46 = vrot.slane %v11226_v41, 1  ;;  %v333_v43 = vld [vmem:[#allocation2 + $0x40] sm:$0xff] }
  0x84   :  { %8162 = vrot.lane.b32.xlu1 %v8161_v30, %s10697_s23  ;;  %v459_v30 = vld [vmem:[#allocation2 + $0x430] sm:$0xff] }
  0x85   :  { %8167 = vrot.lane.b32.xlu0 %v8166_v19, %s10697_s23  ;;  %v839_v19 = vrot.slane %v11209_v35, 1  ;;  %v8191_v13 = vpack.i.bf16 %v459_v30, %v458_v59  ;;  %v8196_v35 = vpack.i.bf16 %v827_v6, %v825_v33 }
  0x87   :  { %v840_v9 = vsel %vm822_vm1, %v838_v2, %v839_v19 }
  0x88   :  { %8172 = vrot.lane.b32.xlu1 %v8171_v14, %s10697_s23  ;;  %v832_v14 = vsel %vm822_vm1, %v829_v3, %v831_v58  ;;  %v842_v3 = vsel %vm822_vm1, %v839_v19, %v841_v51 }
  0x89   :  { %8177 = vrot.lane.b32.xlu0 %v8176_v23, %s10697_s23  ;;  %v329_v23 = vld [vmem:[#allocation2 + $0x20] sm:$0xff] }
  0x8a   :  { %v571_v59 = vrot.slane %v329_v23, 7 }
  0x8c   :  { %8182 = vrot.lane.b32.xlu1 %v8181_v4, %s10697_s23  ;;  %v11593_v4 = vpack.i.bf16 %v832_v14, %v830_v55 }
  0x8d   :  { %8187 = vrot.lane.b32.xlu0 %v8186_v8, %s10697_s23 }
  0x90   :  { %8192 = vrot.lane.b32.xlu1 %v8191_v13, %s10697_s23 }
  0x91   :  { %21 = vsyncpa [#allocation5], 0  ;;  %s10698_s24 = smov 8   ;;  %v845_v58 = vsel %vm822_vm1, %v843_v49, %v844_v46  ;;  %v11601_v41 = vpack.i.bf16 %v842_v3, %v840_v9  ;;  %v847_v30 = vsel %vm822_vm1, %v844_v46, %v846_v57  ;;  %v576_v17 = vrot.slane %v333_v43, 7  ;;  %s10699_s23 = smov 12   ;;  %v10596_v2 = vld [vmem:[%s16805_s2] sm:$0xff]   ;;  %v11986_v46 = vpop.permute.xlu0 %8037 }
  0x92   :  { %8197 = vrot.lane.b32.xlu0 %v8196_v35, %s10698_s24  ;;  %v11607_v38 = vsel %vm565_vm2, %v571_v59, %v572_v50  ;;  %v11611_v44 = vpack.i.bf16 %v847_v30, %v845_v58  ;;  %v16872_v8 = vrot.slane %v11194_v29, 7  ;;  %vm2639_vm3 = vcmask 64512   ;;  %v337_v29 = vld [vmem:[#allocation2 + $0x60] sm:$0xff]  ;;  %7832 = vmatprep.subr.bf16.mxu0 %v10596_v2  ;;  %s10700_s27 = smov 16   ;;  %v10597_v13 = vld [vmem:[%s16805_s2 + $0x8] sm:$0xff]   ;;  %s10701_s30 = smov 20  }
  0x93   :  { %v8221_v52 = vpack.i.bf16 %v11284_v0, %v11607_v38  ;;  %v16873_v50 = vmov 0.0   ;;  %v581_v19 = vrot.slane %v337_v29, 7  ;;  %7833 = vmatpush3.bf16.msra.mxu0 %v10596_v2  ;;  %v16874_v6 = vrot.slane %v11207_v34, 7  ;;  %s10702_s18 = smov 24   ;;  %v341_v34 = vld [vmem:[#allocation2 + $0x80] sm:$0xff]  ;;  %s10704_s19 = smov 32  }
  0x94   :  { %8202 = vrot.lane.b32.xlu1 %v11593_v4, %s10698_s24  ;;  %v11620_v33 = vsel %vm565_vm2, %v576_v17, %v16872_v8  ;;  %3607 = vst.msk [vmem:[#allocation3] sm:$0xff] %vm2639_vm3, %v16873_v50  ;;  %3608 = vst.msk [vmem:[#allocation3 + $0x8] sm:$0xff] %vm2639_vm3, %v16873_v50  ;;  %7834 = vmatprep.subr.bf16.mxu0 %v10597_v13  ;;  %vm3250_vm4 = vcmask 1041408   ;;  %v586_v14 = vrot.slane %v341_v34, 7  ;;  %v16875_v51 = vrot.slane %v11224_v40, 7  ;;  %v353_v30 = vld [vmem:[#allocation2 + $0xe0] sm:$0xff] }
  0x95   :  { %v11626_v31 = vpack.i.bf16 %v11300_v5, %v11620_v33  ;;  %3609 = vst.msk [vmem:[#allocation3 + $0x10] sm:$0xff] %vm2639_vm3, %v16873_v50  ;;  %3610 = vst.msk [vmem:[#allocation3 + $0x18] sm:$0xff] %vm2639_vm3, %v16873_v50  ;;  %v11937_v56 = vsel %vm565_vm2, %v581_v19, %v16874_v6  ;;  %v16876_v40 = vrot.slane %v11228_v42, 7  ;;  %v16877_v9 = vrot.slane %v11237_v45, 7  ;;  %v226_v45 = vld [vmem:[%s16803_s0 + $0xf0] sm:$0xff]  ;;  %v357_v6 = vld [vmem:[#allocation2 + $0x100] sm:$0xff] }
  0x96   :  { %8207 = vrot.lane.b32.xlu0 %v11539_v18, %s10698_s24  ;;  %3611 = vst.msk [vmem:[#allocation3 + $0x20] sm:$0xff] %vm2639_vm3, %v16873_v50  ;;  %3612 = vst.msk [vmem:[#allocation3 + $0x28] sm:$0xff] %vm2639_vm3, %v16873_v50  ;;  %v8256_v61 = vpack.i.bf16 %v11351_v20, %v11937_v56  ;;  %v11959_v26 = vsel %vm565_vm2, %v586_v14, %v16875_v51  ;;  %v16880_v29 = vrot.slane %v11247_v48, 7  ;;  %v10627_v27 = vld [vmem:[#allocation2 + $0x168] sm:$0xff]  ;;  %vm2704_vm5 = vcmask 97280   ;;  %s10705_s21 = smov 40  }
  0x97   :  { %3613 = vst.msk [vmem:[#allocation3 + $0x30] sm:$0xff] %vm2639_vm3, %v16873_v50  ;;  %3614 = vst.msk [vmem:[#allocation3 + $0x38] sm:$0xff] %vm2639_vm3, %v16873_v50  ;;  %7835 = vmatpush3.bf16.msra.mxu0 %v10597_v13  ;;  %v8286_v23 = vpack.i.bf16 %v11356_v21, %v11959_v26  ;;  %vm2769_vm6 = vcmask 130048   ;;  %vm2834_vm7 = vcmask 162816   ;;  %vm2899_vm8 = vcmask 195584   ;;  %s10706_s26 = smov 48  }
  0x98   :  { %8212 = vrot.lane.b32.xlu1 %v11601_v41, %s10698_s24  ;;  %3615 = vst.msk [vmem:[#allocation3 + $0x40] sm:$0xff] %vm2639_vm3, %v16873_v50  ;;  %3616 = vst.msk [vmem:[#allocation3 + $0x48] sm:$0xff] %vm2639_vm3, %v16873_v50  ;;  %vm2964_vm9 = vcmask 228352   ;;  %vm3029_vm10 = vcmask 261120   ;;  %vm3153_vm11 = vcmask 293888   ;;  %s10707_s17 = smov 56  }
  0x99   :  { %3617 = vst.msk [vmem:[#allocation3 + $0x50] sm:$0xff] %vm2639_vm3, %v16873_v50  ;;  %3618 = vst.msk [vmem:[#allocation3 + $0x58] sm:$0xff] %vm2639_vm3, %v16873_v50  ;;  %vm6752_vm12 = vcmask 1043456   ;;  %vm6320_vm13 = vcmask 326656   ;;  %vm6385_vm14 = vcmask 392192   ;;  %vm6450_vm15 = vcmask 457728  }
  0x9a   :  { %8217 = vrot.lane.b32.xlu0 %v11611_v44, %s10698_s24  ;;  %3619 = vst.msk [vmem:[#allocation3 + $0x60] sm:$0xff] %vm2639_vm3, %v16873_v50  ;;  %3620 = vst.msk [vmem:[#allocation3 + $0x68] sm:$0xff] %vm2639_vm3, %v16873_v50 }
  0x9b   :  { %3621 = vst.msk [vmem:[#allocation3 + $0x70] sm:$0xff] %vm2639_vm3, %v16873_v50  ;;  %3622 = vst.msk [vmem:[#allocation3 + $0x78] sm:$0xff] %vm2639_vm3, %v16873_v50 }
  0x9c   :  { %3623 = vst.msk [vmem:[#allocation3 + $0x80] sm:$0xff] %vm2639_vm3, %v16873_v50  ;;  %3624 = vst.msk [vmem:[#allocation3 + $0x88] sm:$0xff] %vm2639_vm3, %v16873_v50  ;;  %8222 = vrot.lane.b32.xlu1 %v8221_v52, %s10699_s23  ;;  %v601_v52 = vrot.slane %v353_v30, 7  ;;  %v10624_v30 = vld [vmem:[#allocation2 + $0x130] sm:$0xff] }
  0x9d   :  { %3625 = vst.msk [vmem:[#allocation3 + $0x90] sm:$0xff] %vm2639_vm3, %v16873_v50  ;;  %3626 = vst.msk [vmem:[#allocation3 + $0x98] sm:$0xff] %vm2639_vm3, %v16873_v50 }
  0x9e   :  { %3627 = vst.msk [vmem:[#allocation3 + $0xa0] sm:$0xff] %vm2639_vm3, %v16873_v50  ;;  %3628 = vst.msk [vmem:[#allocation3 + $0xa8] sm:$0xff] %vm2639_vm3, %v16873_v50  ;;  %8227 = vrot.lane.b32.xlu0 %v11626_v31, %s10699_s23  ;;  %v12040_v2 = vsel %vm565_vm2, %v601_v52, %v16880_v29  ;;  %v614_v52 = vrot.slane %v10624_v30, 7 }
  0x9f   :  { %3629 = vst.msk [vmem:[#allocation3 + $0xb0] sm:$0xff] %vm2639_vm3, %v16873_v50  ;;  %3630 = vst.msk [vmem:[#allocation3 + $0xb8] sm:$0xff] %vm2639_vm3, %v16873_v50 }
  0xa0   :  { %3631 = vst.msk [vmem:[#allocation3 + $0xc0] sm:$0xff] %vm2639_vm3, %v16873_v50  ;;  %3632 = vst.msk [vmem:[#allocation3 + $0xc8] sm:$0xff] %vm2639_vm3, %v16873_v50  ;;  %8232 = vrot.lane.b32.xlu1 %v11215_v37, %s10700_s27  ;;  %v10598_v37 = vld [vmem:[%s16805_s2 + $0x10] ss:$0 sps:$4 sm:$0x33]   ;;  %s10703_s2 = smov 28  }
  0xa1   :  { %3633 = vst.msk [vmem:[#allocation3 + $0xd0] sm:$0xff] %vm2639_vm3, %v16873_v50  ;;  %3634 = vst.msk [vmem:[#allocation3 + $0xd8] sm:$0xff] %vm2639_vm3, %v16873_v50  ;;  %8014 = vmatprep.subr.msk.bf16.mxu0 %vm3250_vm4, %v10598_v37  ;;  %v3252_v55 = vsel %vm3250_vm4, %v10598_v37, 0  ;;  %vm6655_vm4 = vcmask 588800  }
  0xa2   :  { %3635 = vst.msk [vmem:[#allocation3 + $0xe0] sm:$0xff] %vm2639_vm3, %v16873_v50  ;;  %3636 = vst.msk [vmem:[#allocation3 + $0xe8] sm:$0xff] %vm2639_vm3, %v16873_v50  ;;  %8237 = vrot.lane.b32.xlu0 %v11203_v32, %s10700_s27  ;;  %7837 = vmatpush3.bf16.msra.mxu0 %v3252_v55  ;;  %v606_v55 = vrot.slane %v357_v6, 7 }
  0xa3   :  { %3637 = vst.msk [vmem:[#allocation3 + $0xf0] sm:$0xff] %vm2639_vm3, %v16873_v50  ;;  %3638 = vst.msk [vmem:[#allocation3 + $0xf8] sm:$0xff] %vm2639_vm3, %v16873_v50  ;;  %7976 = vmatprep.subr.bf16.mxu0 %v16873_v50 }
  0xa4   :  { %3639 = vst.msk [vmem:[#allocation3 + $0x100] sm:$0xff] %vm2639_vm3, %v16873_v50  ;;  %3640 = vst.msk [vmem:[#allocation3 + $0x108] sm:$0xff] %vm2639_vm3, %v16873_v50  ;;  %8242 = vrot.lane.b32.xlu1 %v11593_v4, %s10701_s30 }
  0xa5   :  { %3641 = vst.msk [vmem:[#allocation3 + $0x110] sm:$0xff] %vm2639_vm3, %v16873_v50  ;;  %3642 = vst.msk [vmem:[#allocation3 + $0x118] sm:$0xff] %vm2639_vm3, %v16873_v50 }
  0xa6   :  { %3643 = vst.msk [vmem:[#allocation3 + $0x120] sm:$0xff] %vm2639_vm3, %v16873_v50  ;;  %3644 = vst.msk [vmem:[#allocation3 + $0x128] sm:$0xff] %vm2639_vm3, %v16873_v50  ;;  %8247 = vrot.lane.b32.xlu0 %v11539_v18, %s10701_s30 }
  0xa7   :  { %3645 = vst.msk [vmem:[#allocation3 + $0x130] sm:$0xff] %vm2639_vm3, %v16873_v50  ;;  %3646 = vst.msk [vmem:[#allocation3 + $0x138] sm:$0xff] %vm2639_vm3, %v16873_v50 }
  0xa8   :  { %3647 = vst.msk [vmem:[#allocation3 + $0x140] sm:$0xff] %vm2639_vm3, %v16873_v50  ;;  %3648 = vst.msk [vmem:[#allocation3 + $0x148] sm:$0xff] %vm2639_vm3, %v16873_v50  ;;  %8252 = vrot.lane.b32.xlu1 %v11626_v31, %s10702_s18 }
  0xa9   :  { %3649 = vst.msk [vmem:[#allocation3 + $0x150] sm:$0xff] %vm2639_vm3, %v16873_v50  ;;  %3650 = vst.msk [vmem:[#allocation3 + $0x158] sm:$0xff] %vm2639_vm3, %v16873_v50 }
  0xaa   :  { %3651 = vst.msk [vmem:[#allocation3 + $0x160] sm:$0xff] %vm2639_vm3, %v16873_v50  ;;  %3652 = vst.msk [vmem:[#allocation3 + $0x168] sm:$0xff] %vm2639_vm3, %v16873_v50  ;;  %8257 = vrot.lane.b32.xlu0 %v8256_v61, %s10702_s18 }
  0xab   :  { %3653 = vst.msk [vmem:[#allocation3 + $0x170] sm:$0xff] %vm2639_vm3, %v16873_v50  ;;  %3654 = vst.msk [vmem:[#allocation3 + $0x178] sm:$0xff] %vm2639_vm3, %v16873_v50 }
  0xac   :  { %3655 = vst.msk [vmem:[#allocation3 + $0x180] sm:$0xff] %vm2639_vm3, %v16873_v50  ;;  %3656 = vst.msk [vmem:[#allocation3 + $0x188] sm:$0xff] %vm2639_vm3, %v16873_v50  ;;  %8262 = vrot.lane.b32.xlu1 %v11203_v32, %s10703_s2  ;;  %v345_v32 = vld [vmem:[#allocation2 + $0xa0] sm:$0xff] }
  0xad   :  { %3657 = vst.msk [vmem:[#allocation3 + $0x190] sm:$0xff] %vm2639_vm3, %v16873_v50  ;;  %3658 = vst.msk [vmem:[#allocation3 + $0x198] sm:$0xff] %vm2639_vm3, %v16873_v50 }
  0xae   :  { %3659 = vst.msk [vmem:[#allocation3 + $0x1a0] sm:$0xff] %vm2639_vm3, %v16873_v50  ;;  %3660 = vst.msk [vmem:[#allocation3 + $0x1a8] sm:$0xff] %vm2639_vm3, %v16873_v50  ;;  %8267 = vrot.lane.b32.xlu0 %v11222_v39, %s10703_s2 }
  0xaf   :  { %3661 = vst.msk [vmem:[#allocation3 + $0x1b0] sm:$0xff] %vm2639_vm3, %v16873_v50  ;;  %3662 = vst.msk [vmem:[#allocation3 + $0x1b8] sm:$0xff] %vm2639_vm3, %v16873_v50 }
  0xb0   :  { %3663 = vst.msk [vmem:[#allocation3 + $0x1c0] sm:$0xff] %vm2639_vm3, %v16873_v50  ;;  %3664 = vst.msk [vmem:[#allocation3 + $0x1c8] sm:$0xff] %vm2639_vm3, %v16873_v50  ;;  %8272 = vrot.lane.b32.xlu1 %v11539_v18, %s10704_s19  ;;  %v591_v18 = vrot.slane %v345_v32, 7 }
  0xb1   :  { %3665 = vst.msk [vmem:[#allocation3 + $0x1d0] sm:$0xff] %vm2639_vm3, %v16873_v50  ;;  %3666 = vst.msk [vmem:[#allocation3 + $0x1d8] sm:$0xff] %vm2639_vm3, %v16873_v50 }
  0xb2   :  { %3667 = vst.msk [vmem:[#allocation3 + $0x1e0] sm:$0xff] %vm2639_vm3, %v16873_v50  ;;  %3668 = vst.msk [vmem:[#allocation3 + $0x1e8] sm:$0xff] %vm2639_vm3, %v16873_v50  ;;  %8277 = vrot.lane.b32.xlu0 %v11601_v41, %s10704_s19  ;;  %v11976_v35 = vsel %vm565_vm2, %v591_v18, %v16876_v40  ;;  %v904_v40 = vrot.slane %v11460_v15, 1 }
  0xb3   :  { %3669 = vst.msk [vmem:[#allocation3 + $0x1f0] sm:$0xff] %vm2639_vm3, %v16873_v50  ;;  %3670 = vst.msk [vmem:[#allocation3 + $0x1f8] sm:$0xff] %vm2639_vm3, %v16873_v50  ;;  %v8316_v49 = vpack.i.bf16 %v11412_v7, %v11976_v35 }
  0xb4   :  { %3671 = vst.msk [vmem:[#allocation3 + $0x200] sm:$0xff] %vm2639_vm3, %v16873_v50  ;;  %3672 = vst.msk [vmem:[#allocation3 + $0x208] sm:$0xff] %vm2639_vm3, %v16873_v50  ;;  %8282 = vrot.lane.b32.xlu1 %v8256_v61, %s10699_s23 }
  0xb5   :  { %3673 = vst.msk [vmem:[#allocation3 + $0x210] sm:$0xff] %vm2639_vm3, %v16873_v50  ;;  %3674 = vst.msk [vmem:[#allocation3 + $0x218] sm:$0xff] %vm2639_vm3, %v16873_v50 }
  0xb6   :  { %3675 = vst.msk [vmem:[#allocation3 + $0x220] sm:$0xff] %vm2639_vm3, %v16873_v50  ;;  %3676 = vst.msk [vmem:[#allocation3 + $0x228] sm:$0xff] %vm2639_vm3, %v16873_v50  ;;  %8287 = vrot.lane.b32.xlu0 %v8286_v23, %s10699_s23 }
  0xb7   :  { %3677 = vst.msk [vmem:[#allocation3 + $0x230] sm:$0xff] %vm2639_vm3, %v16873_v50  ;;  %3678 = vst.msk [vmem:[#allocation3 + $0x238] sm:$0xff] %vm2639_vm3, %v16873_v50 }
  0xb8   :  { %3679 = vst.msk [vmem:[#allocation3 + $0x240] sm:$0xff] %vm2639_vm3, %v16873_v50  ;;  %3680 = vst.msk [vmem:[#allocation3 + $0x248] sm:$0xff] %vm2639_vm3, %v16873_v50  ;;  %8292 = vrot.lane.b32.xlu1 %v11222_v39, %s10700_s27  ;;  %v349_v39 = vld [vmem:[#allocation2 + $0xc0] sm:$0xff] }
  0xb9   :  { %3681 = vst.msk [vmem:[#allocation3 + $0x250] sm:$0xff] %vm2639_vm3, %v16873_v50  ;;  %3682 = vst.msk [vmem:[#allocation3 + $0x258] sm:$0xff] %vm2639_vm3, %v16873_v50  ;;  %v596_v42 = vrot.slane %v349_v39, 7  ;;  %v400_v39 = vld [vmem:[#allocation2 + $0x258] sm:$0xff] }
  0xba   :  { %3683 = vst.msk [vmem:[#allocation3 + $0x260] sm:$0xff] %vm2639_vm3, %v16873_v50  ;;  %3684 = vst.msk [vmem:[#allocation3 + $0x268] sm:$0xff] %vm2639_vm3, %v16873_v50  ;;  %8297 = vrot.lane.b32.xlu0 %v11245_v47, %s10700_s27 }
  0xbb   :  { %3685 = vst.msk [vmem:[#allocation3 + $0x270] sm:$0xff] %vm2639_vm3, %v16873_v50  ;;  %3686 = vst.msk [vmem:[#allocation3 + $0x278] sm:$0xff] %vm2639_vm3, %v16873_v50  ;;  %v11999_v3 = vsel %vm565_vm2, %v596_v42, %v16877_v9  ;;  %v906_v9 = vrot.slane %v400_v39, 1 }
  0xbc   :  { %3687 = vst.msk [vmem:[#allocation3 + $0x280] sm:$0xff] %vm2639_vm3, %v16873_v50  ;;  %3688 = vst.msk [vmem:[#allocation3 + $0x288] sm:$0xff] %vm2639_vm3, %v16873_v50  ;;  %8302 = vrot.lane.b32.xlu1 %v11601_v41, %s10701_s30  ;;  %v227_v41 = vld [vmem:[%s16803_s0 + $0xf8] sm:$0xff] }
  0xbd   :  { %3689 = vst.msk [vmem:[#allocation3 + $0x290] sm:$0xff] %vm2639_vm3, %v16873_v50  ;;  %3690 = vst.msk [vmem:[#allocation3 + $0x298] sm:$0xff] %vm2639_vm3, %v16873_v50  ;;  %v12103_v29 = vsel %vm822_vm1, %v904_v40, %v906_v9  ;;  %v869_v9 = vrot.slane %v10624_v30, 1 }
  0xbe   :  { %3691 = vst.msk [vmem:[#allocation3 + $0x2a0] sm:$0xff] %vm2639_vm3, %v16873_v50  ;;  %3692 = vst.msk [vmem:[#allocation3 + $0x2a8] sm:$0xff] %vm2639_vm3, %v16873_v50  ;;  %8307 = vrot.lane.b32.xlu0 %v11611_v44, %s10701_s30 }
  0xbf   :  { %3693 = vst.msk [vmem:[#allocation3 + $0x2b0] sm:$0xff] %vm2639_vm3, %v16873_v50  ;;  %3694 = vst.msk [vmem:[#allocation3 + $0x2b8] sm:$0xff] %vm2639_vm3, %v16873_v50 }
  0xc0   :  { %3695 = vst.msk [vmem:[#allocation3 + $0x2c0] sm:$0xff] %vm2639_vm3, %v16873_v50  ;;  %3696 = vst.msk [vmem:[#allocation3 + $0x2c8] sm:$0xff] %vm2639_vm3, %v16873_v50  ;;  %8312 = vrot.lane.b32.xlu1 %v8286_v23, %s10702_s18 }
  0xc1   :  { %3697 = vst.msk [vmem:[#allocation3 + $0x2d0] sm:$0xff] %vm2639_vm3, %v16873_v50  ;;  %3698 = vst.msk [vmem:[#allocation3 + $0x2d8] sm:$0xff] %vm2639_vm3, %v16873_v50 }
  0xc2   :  { %3699 = vst.msk [vmem:[#allocation3 + $0x2e0] sm:$0xff] %vm2639_vm3, %v16873_v50  ;;  %3700 = vst.msk [vmem:[#allocation3 + $0x2e8] sm:$0xff] %vm2639_vm3, %v16873_v50  ;;  %8317 = vrot.lane.b32.xlu0 %v8316_v49, %s10702_s18 }
  0xc3   :  { %3701 = vst.msk [vmem:[#allocation3 + $0x2f0] sm:$0xff] %vm2639_vm3, %v16873_v50  ;;  %3702 = vst.msk [vmem:[#allocation3 + $0x2f8] sm:$0xff] %vm2639_vm3, %v16873_v50 }
  0xc4   :  { %3703 = vst.msk [vmem:[#allocation3 + $0x300] sm:$0xff] %vm2639_vm3, %v16873_v50  ;;  %3704 = vst.msk [vmem:[#allocation3 + $0x308] sm:$0xff] %vm2639_vm3, %v16873_v50  ;;  %8322 = vrot.lane.b32.xlu1 %v11245_v47, %s10703_s2  ;;  %v8351_v47 = vpack.i.bf16 %v11433_v24, %v11999_v3 }
  0xc5   :  { %3705 = vst.msk [vmem:[#allocation3 + $0x310] sm:$0xff] %vm2639_vm3, %v16873_v50  ;;  %3706 = vst.msk [vmem:[#allocation3 + $0x318] sm:$0xff] %vm2639_vm3, %v16873_v50 }
  0xc6   :  { %3707 = vst.msk [vmem:[#allocation3 + $0x320] sm:$0xff] %vm2639_vm3, %v16873_v50  ;;  %3708 = vst.msk [vmem:[#allocation3 + $0x328] sm:$0xff] %vm2639_vm3, %v16873_v50  ;;  %v11988_v4 = vpop.permute.xlu1 %8047  ;;  %8327 = vrot.lane.b32.xlu0 %v11258_v53, %s10703_s2 }
  0xc7   :  { %3709 = vst.msk [vmem:[#allocation3 + $0x330] sm:$0xff] %vm2639_vm3, %v16873_v50  ;;  %3710 = vst.msk [vmem:[#allocation3 + $0x338] sm:$0xff] %vm2639_vm3, %v16873_v50  ;;  %v11994_v57 = vpop.permute.xlu0 %8042 }
  0xc8   :  { %3711 = vst.msk [vmem:[#allocation3 + $0x340] sm:$0xff] %vm2639_vm3, %v16873_v50  ;;  %3712 = vst.msk [vmem:[#allocation3 + $0x348] sm:$0xff] %vm2639_vm3, %v16873_v50  ;;  %8332 = vrot.lane.b32.xlu1 %v11611_v44, %s10704_s19 }
  0xc9   :  { %3713 = vst.msk [vmem:[#allocation3 + $0x350] sm:$0xff] %vm2639_vm3, %v16873_v50  ;;  %3714 = vst.msk [vmem:[#allocation3 + $0x358] sm:$0xff] %vm2639_vm3, %v16873_v50 }
  0xca   :  { %3715 = vst.msk [vmem:[#allocation3 + $0x360] sm:$0xff] %vm2639_vm3, %v16873_v50  ;;  %3716 = vst.msk [vmem:[#allocation3 + $0x368] sm:$0xff] %vm2639_vm3, %v16873_v50  ;;  %v12001_v59 = vpop.permute.xlu1 %8052  ;;  %8337 = vrot.lane.b32.xlu0 %v11551_v63, %s10704_s19 }
  0xcb   :  { %3717 = vst.msk [vmem:[#allocation3 + $0x370] sm:$0xff] %vm2639_vm3, %v16873_v50  ;;  %3718 = vst.msk [vmem:[#allocation3 + $0x378] sm:$0xff] %vm2639_vm3, %v16873_v50  ;;  %v12009_v43 = vpop.permute.xlu0 %8057 }
  0xcc   :  { %3719 = vst.msk [vmem:[#allocation3 + $0x380] sm:$0xff] %vm2639_vm3, %v16873_v50  ;;  %3720 = vst.msk [vmem:[#allocation3 + $0x388] sm:$0xff] %vm2639_vm3, %v16873_v50  ;;  %8342 = vrot.lane.b32.xlu1 %v11551_v63, %s10698_s24 }
  0xcd   :  { %3721 = vst.msk [vmem:[#allocation3 + $0x390] sm:$0xff] %vm2639_vm3, %v16873_v50  ;;  %3722 = vst.msk [vmem:[#allocation3 + $0x398] sm:$0xff] %vm2639_vm3, %v16873_v50 }
  0xce   :  { %3723 = vst.msk [vmem:[#allocation3 + $0x3a0] sm:$0xff] %vm2639_vm3, %v16873_v50  ;;  %3724 = vst.msk [vmem:[#allocation3 + $0x3a8] sm:$0xff] %vm2639_vm3, %v16873_v50  ;;  %v12011_v58 = vpop.permute.xlu1 %8062  ;;  %8347 = vrot.lane.b32.xlu0 %v8316_v49, %s10699_s23 }
  0xcf   :  { %3725 = vst.msk [vmem:[#allocation3 + $0x3b0] sm:$0xff] %vm2639_vm3, %v16873_v50  ;;  %3726 = vst.msk [vmem:[#allocation3 + $0x3b8] sm:$0xff] %vm2639_vm3, %v16873_v50  ;;  %v12023_v17 = vpop.permute.xlu0 %8067 }
  0xd0   :  { %3727 = vst.msk [vmem:[#allocation3 + $0x3c0] sm:$0xff] %vm2639_vm3, %v16873_v50  ;;  %3728 = vst.msk [vmem:[#allocation3 + $0x3c8] sm:$0xff] %vm2639_vm3, %v16873_v50  ;;  %8352 = vrot.lane.b32.xlu1 %v8351_v47, %s10699_s23 }
  0xd1   :  { %3729 = vst.msk [vmem:[#allocation3 + $0x3d0] sm:$0xff] %vm2639_vm3, %v16873_v50  ;;  %3730 = vst.msk [vmem:[#allocation3 + $0x3d8] sm:$0xff] %vm2639_vm3, %v16873_v50 }
  0xd2   :  { %3731 = vst.msk [vmem:[#allocation3 + $0x3e0] sm:$0xff] %vm2639_vm3, %v16873_v50  ;;  %3732 = vst.msk [vmem:[#allocation3 + $0x3e8] sm:$0xff] %vm2639_vm3, %v16873_v50  ;;  %v12025_v44 = vpop.permute.xlu1 %8072  ;;  %8357 = vrot.lane.b32.xlu0 %v11258_v53, %s10700_s27  ;;  %v8381_v53 = vpack.i.bf16 %v11456_v22, %v12040_v2 }
  0xd3   :  { %3733 = vst.msk [vmem:[#allocation3 + $0x3f0] sm:$0xff] %vm2639_vm3, %v16873_v50  ;;  %3734 = vst.msk [vmem:[#allocation3 + $0x3f8] sm:$0xff] %vm2639_vm3, %v16873_v50  ;;  %v12031_v8 = vpop.permute.xlu0 %8077 }
  0xd4   :  { %3735 = vst.msk [vmem:[#allocation3 + $0x400] sm:$0xff] %vm2639_vm3, %v16873_v50  ;;  %3736 = vst.msk [vmem:[#allocation3 + $0x408] sm:$0xff] %vm2639_vm3, %v16873_v50  ;;  %8362 = vrot.lane.b32.xlu1 %v11271_v60, %s10700_s27 }
  0xd5   :  { %3737 = vst.msk [vmem:[#allocation3 + $0x410] sm:$0xff] %vm2639_vm3, %v16873_v50  ;;  %3738 = vst.msk [vmem:[#allocation3 + $0x418] sm:$0xff] %vm2639_vm3, %v16873_v50 }
  0xd6   :  { %3739 = vst.msk [vmem:[#allocation3 + $0x420] sm:$0xff] %vm2639_vm3, %v16873_v50  ;;  %3740 = vst.msk [vmem:[#allocation3 + $0x428] sm:$0xff] %vm2639_vm3, %v16873_v50  ;;  %v12033_v31 = vpop.permute.xlu1 %8082  ;;  %8367 = vrot.lane.b32.xlu0 %v11551_v63, %s10701_s30 }
  0xd7   :  { %3741 = vst.msk [vmem:[#allocation3 + $0x430] sm:$0xff] %vm2639_vm3, %v16873_v50  ;;  %3742 = vst.msk [vmem:[#allocation3 + $0x438] sm:$0xff] %vm2639_vm3, %v16873_v50  ;;  %v12046_v19 = vpop.permute.xlu0 %8087 }
  0xd8   :  { %3743 = vst.msk [vmem:[#allocation3 + $0x440] sm:$0xff] %vm2639_vm3, %v16873_v50  ;;  %3744 = vst.msk [vmem:[#allocation3 + $0x448] sm:$0xff] %vm2639_vm3, %v16873_v50  ;;  %8372 = vrot.lane.b32.xlu1 %v11558_v1, %s10701_s30 }
  0xd9   :  { %3745 = vst.msk [vmem:[#allocation3 + $0x450] sm:$0xff] %vm2639_vm3, %v16873_v50  ;;  %3746 = vst.msk [vmem:[#allocation3 + $0x458] sm:$0xff] %vm2639_vm3, %v16873_v50 }
  0xda   :  { %3747 = vst.msk [vmem:[#allocation3 + $0x460] sm:$0xff] %vm2639_vm3, %v16873_v50  ;;  %3748 = vst.msk [vmem:[#allocation3 + $0x468] sm:$0xff] %vm2639_vm3, %v16873_v50  ;;  %v12048_v13 = vpop.permute.xlu1 %8092  ;;  %8377 = vrot.lane.b32.xlu0 %v8351_v47, %s10702_s18 }
  0xdb   :  { %3749 = vst.msk [vmem:[#allocation3 + $0x470] sm:$0xff] %vm2639_vm3, %v16873_v50  ;;  %3750 = vst.msk [vmem:[#allocation3 + $0x478] sm:$0xff] %vm2639_vm3, %v16873_v50  ;;  %v12052_v63 = vpop.permute.xlu0 %8097 }
  0xdc   :  { %291 = vst.msk [vmem:[#allocation2 + $0x208] sm:$0xff] %vm51_vm0, %v226_v45  ;;  %292 = vst.msk [vmem:[#allocation2 + $0x210] sm:$0xff] %vm51_vm0, %v227_v41  ;;  %8382 = vrot.lane.b32.xlu1 %v8381_v53, %s10702_s18  ;;  %v10623_v45 = vld [vmem:[#allocation2 + $0x128] sm:$0xff] }
  0xdd   :  { %16878 = vst [vmem:[#allocation10_spill] sm:$0xff] %v12031_v8  ;;  %16879 = vst [vmem:[#allocation11_spill] sm:$0xff] %v12033_v31  ;;  %v612_v41 = vrot.slane %v10623_v45, 7  ;;  %v868_v39 = vrot.slane %v10623_v45, 1 }
  0xde   :  { %16881 = vst [vmem:[#allocation12_spill] sm:$0xff] %v12046_v19  ;;  %16882 = vst [vmem:[#allocation13_spill] sm:$0xff] %v12048_v13  ;;  %v12054_v48 = vpop.permute.xlu1 %8102  ;;  %8387 = vrot.lane.b32.xlu0 %v11271_v60, %s10703_s2  ;;  %v16889_v60 = vrot.slane %v11260_v54, 7  ;;  %v361_v54 = vld [vmem:[#allocation2 + $0x120] sm:$0xff]  ;;  %v12211_v19 = vld [vmem:[#allocation2 + $0x1d0] sm:$0xff] }
  0xdf   :  { %16883 = vst [vmem:[#allocation14_spill] sm:$0xff] %v12052_v63  ;;  %16884 = vst [vmem:[#allocation15_spill] sm:$0xff] %v12054_v48  ;;  %v12060_v37 = vpop.permute.xlu0 %8107  ;;  %v611_v47 = vrot.slane %v361_v54, 7 }
  0xe0   :  { %8392 = vrot.lane.b32.xlu1 %v11318_v11, %s10703_s2  ;;  %16885 = vst [vmem:[#allocation16_spill] sm:$0xff] %v12060_v37  ;;  %v12077_v51 = vsel %vm565_vm2, %v606_v55, %v16889_v60  ;;  %v364_v55 = vld [vmem:[#allocation2 + $0x138] sm:$0xff] }
  0xe1   :  { %16890 = vst [vmem:[#allocation20_spill] sm:$0xff] %v12077_v51  ;;  %v8421_v23 = vpack.i.bf16 %v11532_v16, %v12077_v51  ;;  %v12114_v60 = vsel %vm565_vm2, %v611_v47, %v612_v41  ;;  %v871_v6 = vrot.slane %v364_v55, 1  ;;  %v12239_v16 = vld [vmem:[#allocation2 + $0x1b8] sm:$0xff] }
  0xe2   :  { %v12062_v61 = vpop.permute.xlu1 %8112  ;;  %8397 = vrot.lane.b32.xlu0 %v11558_v1, %s10704_s19  ;;  %16898 = vst [vmem:[#allocation28_spill] sm:$0xff] %v12114_v60 }
  0xe3   :  { %16886 = vst [vmem:[#allocation17_spill] sm:$0xff] %v12062_v61  ;;  %v12068_v34 = vpop.permute.xlu0 %8117  ;;  %v10630_v61 = vld [vmem:[#allocation2 + $0x190] sm:$0xff] }
  0xe4   :  { %8402 = vrot.lane.b32.xlu1 %v11568_v28, %s10704_s19  ;;  %16887 = vst [vmem:[#allocation18_spill] sm:$0xff] %v12068_v34  ;;  %v629_v37 = vrot.slane %v10630_v61, 7 }
  0xe6   :  { %v12070_v14 = vpop.permute.xlu1 %8122  ;;  %8407 = vrot.lane.b32.xlu0 %v11558_v1, %s10698_s24  ;;  %v903_v1 = vrot.slane %v11458_v10, 1 }
  0xe7   :  { %16888 = vst [vmem:[#allocation19_spill] sm:$0xff] %v12070_v14  ;;  %v12083_v32 = vpop.permute.xlu0 %8127  ;;  %v10628_v14 = vld [vmem:[#allocation2 + $0x170] sm:$0xff] }
  0xe8   :  { %8412 = vrot.lane.b32.xlu1 %v11568_v28, %s10698_s24  ;;  %16891 = vst [vmem:[#allocation21_spill] sm:$0xff] %v12083_v32  ;;  %v12100_v15 = vsel %vm822_vm1, %v903_v1, %v904_v40  ;;  %v12117_v1 = vsel %vm565_vm2, %v612_v41, %v614_v52  ;;  %v870_v41 = vsel %vm822_vm1, %v868_v39, %v869_v9  ;;  %v373_v32 = vld [vmem:[#allocation2 + $0x180] sm:$0xff]  ;;  %v624_v34 = vrot.slane %v10628_v14, 7 }
  0xe9   :  { %16895 = vst [vmem:[#allocation25_spill] sm:$0xff] %v12100_v15  ;;  %16899 = vst [vmem:[#allocation29_spill] sm:$0xff] %v12117_v1  ;;  %v8451_v40 = vpack.i.bf16 %v12117_v1, %v12114_v60  ;;  %v872_v52 = vsel %vm822_vm1, %v869_v9, %v871_v6  ;;  %v10626_v6 = vld [vmem:[#allocation2 + $0x150] sm:$0xff]  ;;  %v626_v48 = vrot.slane %v373_v32, 7  ;;  %v879_v63 = vrot.slane %v10628_v14, 1 }
  0xea   :  { %v12085_v18 = vpop.permute.xlu1 %8132  ;;  %8417 = vrot.lane.b32.xlu0 %v8381_v53, %s10699_s23  ;;  %v8471_v55 = vpack.i.bf16 %v872_v52, %v870_v41  ;;  %v619_v9 = vrot.slane %v10626_v6, 7  ;;  %v368_v41 = vld [vmem:[#allocation2 + $0x158] sm:$0xff]  ;;  %v884_v32 = vrot.slane %v10630_v61, 1  ;;  %v12226_v1 = vpack.i.bf16 %v10628_v14, %v10627_v27 }
  0xeb   :  { %16892 = vst [vmem:[#allocation22_spill] sm:$0xff] %v12085_v18  ;;  %v12091_v49 = vpop.permute.xlu0 %8137 }
  0xec   :  { %8422 = vrot.lane.b32.xlu1 %v8421_v23, %s10699_s23  ;;  %16893 = vst [vmem:[#allocation23_spill] sm:$0xff] %v12091_v49  ;;  %v325_v49 = vld [vmem:[#allocation2] sm:$0xff] }
  0xee   :  { %v12093_v42 = vpop.permute.xlu1 %8142  ;;  %8427 = vrot.lane.b32.xlu0 %v11318_v11, %s10700_s27 }
  0xef   :  { %16894 = vst [vmem:[#allocation24_spill] sm:$0xff] %v12093_v42  ;;  %v12105_v53 = vpop.permute.xlu0 %8147 }
  0xf0   :  { %8432 = vrot.lane.b32.xlu1 %v11322_v12, %s10700_s27  ;;  %16896 = vst [vmem:[#allocation26_spill] sm:$0xff] %v12105_v53 }
  0xf2   :  { %v12109_v11 = vpop.permute.xlu1 %8152  ;;  %8437 = vrot.lane.b32.xlu0 %v11568_v28, %s10701_s30  ;;  %v8461_v28 = vpack.i.bf16 %v10624_v30, %v10623_v45  ;;  %v10625_v30 = vld [vmem:[#allocation2 + $0x148] sm:$0xff] }
  0xf3   :  { %16897 = vst [vmem:[#allocation27_spill] sm:$0xff] %v12109_v11  ;;  %v12123_v54 = vpop.permute.xlu0 %8157  ;;  %v617_v39 = vrot.slane %v10625_v30, 7 }
  0xf4   :  { %8442 = vrot.lane.b32.xlu1 %v11587_v36, %s10701_s30  ;;  %16900 = vst [vmem:[#allocation30_spill] sm:$0xff] %v12123_v54 }
  0xf6   :  { %v12125_v50 = vpop.permute.xlu1 %8162  ;;  %8447 = vrot.lane.b32.xlu0 %v8421_v23, %s10702_s18 }
  0xf7   :  { %16901 = vst [vmem:[#allocation31_spill] sm:$0xff] %v12125_v50  ;;  %v12129_v47 = vpop.permute.xlu0 %8167  ;;  %v365_v50 = vld [vmem:[#allocation2 + $0x140] sm:$0xff] }
  0xf8   :  { %8452 = vrot.lane.b32.xlu1 %v8451_v40, %s10702_s18  ;;  %16902 = vst [vmem:[#allocation32_spill] sm:$0xff] %v12129_v47  ;;  %v616_v45 = vrot.slane %v365_v50, 7  ;;  %v874_v47 = vrot.slane %v10626_v6, 1 }
  0xfa   :  { %v12133_v11 = vpop.permute.xlu1 %8172  ;;  %8457 = vrot.lane.b32.xlu0 %v11322_v12, %s10703_s2  ;;  %v12152_v52 = vsel %vm565_vm2, %v616_v45, %v617_v39  ;;  %v369_v45 = vld [vmem:[#allocation2 + $0x160] sm:$0xff] }
  0xfb   :  { %16903 = vst [vmem:[#allocation33_spill] sm:$0xff] %v12133_v11  ;;  %v12138_v54 = vpop.permute.xlu0 %8177  ;;  %16908 = vst [vmem:[#allocation38_spill] sm:$0xff] %v12152_v52 }
  0xfc   :  { %8462 = vrot.lane.b32.xlu1 %v8461_v28, %s10703_s2  ;;  %16904 = vst [vmem:[#allocation34_spill] sm:$0xff] %v12138_v54 }
  0xfe   :  { %v12140_v23 = vpop.permute.xlu1 %8182  ;;  %8467 = vrot.lane.b32.xlu0 %v11587_v36, %s10704_s19 }
  0xff   :  { %16905 = vst [vmem:[#allocation35_spill] sm:$0xff] %v12140_v23  ;;  %v12145_v11 = vpop.permute.xlu0 %8187  ;;  %v12155_v23 = vsel %vm565_vm2, %v617_v39, %v619_v9 }
 0x100   :  { %8472 = vrot.lane.b32.xlu1 %v8471_v55, %s10704_s19  ;;  %16906 = vst [vmem:[#allocation36_spill] sm:$0xff] %v12145_v11  ;;  %16909 = vst [vmem:[#allocation39_spill] sm:$0xff] %v12155_v23  ;;  %v8491_v50 = vpack.i.bf16 %v12155_v23, %v12152_v52  ;;  %v873_v11 = vrot.slane %v10625_v30, 1 }
 0x102   :  { %v12147_v12 = vpop.permute.xlu1 %8192  ;;  %8477 = vrot.lane.b32.xlu0 %v11587_v36, %s10698_s24  ;;  %v12166_v36 = vpack.i.bf16 %v10626_v6, %v10625_v30  ;;  %v875_v9 = vsel %vm822_vm1, %v873_v11, %v874_v47  ;;  %v372_v30 = vld [vmem:[#allocation2 + $0x178] sm:$0xff]  ;;  %v10629_v6 = vld [vmem:[#allocation2 + $0x188] sm:$0xff] }
 0x103   :  { %16907 = vst [vmem:[#allocation37_spill] sm:$0xff] %v12147_v12  ;;  %v876_v12 = vrot.slane %v368_v41, 1  ;;  %v621_v41 = vrot.slane %v369_v45, 7  ;;  %v627_v10 = vrot.slane %v10629_v6, 7  ;;  %v878_v45 = vrot.slane %v10627_v27, 1 }
 0x104   :  { %8482 = vrot.lane.b32.xlu1 %v8471_v55, %s10698_s24  ;;  %v12160_v54 = vpop.permute.xlu0 %8197  ;;  %v881_v23 = vrot.slane %v372_v30, 1  ;;  %v12208_v30 = vld [vmem:[#allocation2 + $0x1c8] sm:$0xff] }
 0x105   :  { %v877_v42 = vsel %vm822_vm1, %v874_v47, %v876_v12  ;;  %v566_v47 = vrot.slane %v325_v49, 7  ;;  %v12193_v49 = vld [vmem:[#allocation2 + $0x1a8] sm:$0xff] }
 0x106   :  { %v12162_v53 = vpop.permute.xlu1 %8202  ;;  %8487 = vrot.lane.b32.xlu0 %v8451_v40, %s10699_s23  ;;  %v622_v40 = vrot.slane %v10627_v27, 7  ;;  %v12177_v11 = vpack.i.bf16 %v877_v42, %v875_v9  ;;  %v12191_v42 = vsel %vm565_vm2, %v627_v10, %v629_v37  ;;  %v883_v37 = vrot.slane %v10629_v6, 1 }
 0x107   :  { %16912 = vst [vmem:[#allocation42_spill] sm:$0xff] %v12191_v42  ;;  %v12243_v27 = vpack.i.bf16 %v10630_v61, %v10629_v6  ;;  %v8204_v51 = vunpack.i.l.bf16 %v12162_v53  ;;  %v8205_v61 = vunpack.i.h.bf16 %v12162_v53 }
 0x108   :  { %8492 = vrot.lane.b32.xlu1 %v8491_v50, %s10699_s23  ;;  %v12168_v39 = vpop.permute.xlu0 %8207  ;;  %v12185_v52 = vsel %vm565_vm2, %v621_v41, %v622_v40  ;;  %v12188_v13 = vsel %vm565_vm2, %v622_v40, %v624_v34  ;;  %v16913_v41 = vrot.slane %v11182_v25, 7  ;;  %v12205_v40 = vld [vmem:[#allocation2 + $0x1b0] sm:$0xff]  ;;  %v12246_v14 = vsel %vm822_vm1, %v883_v37, %v884_v32 }
 0x109   :  { %16910 = vst [vmem:[#allocation40_spill] sm:$0xff] %v12185_v52  ;;  %16911 = vst [vmem:[#allocation41_spill] sm:$0xff] %v12188_v13  ;;  %v12200_v9 = vpack.i.bf16 %v12188_v13, %v12185_v52  ;;  %v12217_v13 = vsel %vm565_vm2, %v626_v48, %v627_v10 }
 0x10a   :  { %v12172_v18 = vpop.permute.xlu1 %8212  ;;  %8497 = vrot.lane.b32.xlu0 %v8461_v28, %s10700_s27  ;;  %v568_v34 = vsel %vm565_vm2, %v566_v47, %v16913_v41  ;;  %16914 = vst [vmem:[#allocation43_spill] sm:$0xff] %v12217_v13  ;;  %v880_v47 = vsel %vm822_vm1, %v878_v45, %v879_v63  ;;  %v882_v41 = vsel %vm822_vm1, %v879_v63, %v881_v23  ;;  %v8040_v63 = vunpack.i.h.bf16 %v11986_v46 }
 0x10b   :  { %v12230_v48 = vpack.i.bf16 %v882_v41, %v880_v47  ;;  %v12234_v45 = vpack.i.bf16 %v12191_v42, %v12217_v13  ;;  %v8039_v23 = vunpack.i.l.bf16 %v11986_v46  ;;  %v8045_v41 = vunpack.i.h.bf16 %v11994_v57 }
 0x10c   :  { %8502 = vrot.lane.b32.xlu1 %v12166_v36, %s10700_s27  ;;  %v12179_v12 = vpop.permute.xlu0 %8217  ;;  %v8200_v13 = vunpack.i.h.bf16 %v12160_v54  ;;  %v8199_v42 = vunpack.i.l.bf16 %v12160_v54  ;;  %v2576_v54 = vsel %vm51_vm0, %v11391_v62, %v8040_v63 }
 0x10d   :  { %v2578_v62 = vsel %vm51_vm0, %v11284_v0, %v8045_v41 }
 0x10e   :  { %v12181_v28 = vpop.permute.xlu1 %8222  ;;  %8507 = vrot.lane.b32.xlu0 %v8471_v55, %s10701_s30  ;;  %v376_v55 = vld [vmem:[#allocation2 + $0x198] sm:$0xff] }
 0x10f   :  { %v886_v52 = vrot.slane %v376_v55, 1  ;;  %v8225_v46 = vunpack.i.h.bf16 %v12181_v28 }
 0x110   :  { %8512 = vrot.lane.b32.xlu1 %v12177_v11, %s10701_s30  ;;  %v12214_v60 = vpop.permute.xlu0 %8227 }
 0x111   :  { %v12249_v47 = vsel %vm822_vm1, %v884_v32, %v886_v52  ;;  %v2575_v32 = vsel %vm51_vm0, %v568_v34, %v8039_v23  ;;  %v8230_v31 = vunpack.i.h.bf16 %v12214_v60  ;;  %v8229_v8 = vunpack.i.l.bf16 %v12214_v60 }
 0x112   :  { %v12219_v25 = vpop.permute.xlu1 %8232  ;;  %8517 = vrot.lane.b32.xlu0 %v8491_v50, %s10702_s18  ;;  %v8044_v50 = vunpack.i.l.bf16 %v11994_v57  ;;  %v2643_v60 = vsel %vm2639_vm3, %v2578_v62, %v8205_v61 }
 0x113   :  { %v8235_v52 = vunpack.i.h.bf16 %v12219_v25  ;;  %v8234_v57 = vunpack.i.l.bf16 %v12219_v25 }
 0x114   :  { %8522 = vrot.lane.b32.xlu1 %v12200_v9, %s10702_s18  ;;  %v12228_v10 = vpop.permute.xlu0 %8237  ;;  %v2577_v37 = vsel %vm51_vm0, %v11607_v38, %v8044_v50  ;;  %v2640_v38 = vsel %vm2639_vm3, %v2575_v32, %v8199_v42 }
 0x115   :  { %v2642_v34 = vsel %vm2639_vm3, %v2577_v37, %v8204_v51  ;;  %v8239_v0 = vunpack.i.l.bf16 %v12228_v10  ;;  %v2708_v51 = vsel %vm2704_vm5, %v2643_v60, %v8230_v31 }
 0x116   :  { %v8243_v55 = vpop.permute.xlu1 %8242  ;;  %8527 = vrot.lane.b32.xlu0 %v12166_v36, %s10703_s2  ;;  %v8224_v36 = vunpack.i.l.bf16 %v12181_v28  ;;  %v2641_v28 = vsel %vm2639_vm3, %v2576_v54, %v8200_v13  ;;  %v2707_v32 = vsel %vm2704_vm5, %v2642_v34, %v8229_v8 }
 0x117   :  { %v8245_v25 = vunpack.i.h.bf16 %v8243_v55  ;;  %v8244_v23 = vunpack.i.l.bf16 %v8243_v55  ;;  %v2706_v15 = vsel %vm2704_vm5, %v2641_v28, %v8225_v46  ;;  %v8240_v55 = vunpack.i.h.bf16 %v12228_v10 }
 0x118   :  { %8532 = vrot.lane.b32.xlu1 %v12226_v1, %s10703_s2  ;;  %v12260_v6 = vpop.permute.xlu0 %8247  ;;  %v2705_v63 = vsel %vm2704_vm5, %v2640_v38, %v8224_v36  ;;  %v2771_v61 = vsel %vm2769_vm6, %v2706_v15, %v8235_v52  ;;  %v2772_v52 = vsel %vm2769_vm6, %v2707_v32, %v8239_v0 }
 0x119   :  { %v2770_v54 = vsel %vm2769_vm6, %v2705_v63, %v8234_v57  ;;  %v8249_v46 = vunpack.i.l.bf16 %v12260_v6  ;;  %v2836_v8 = vsel %vm2834_vm7, %v2771_v61, %v8245_v25  ;;  %v8250_v57 = vunpack.i.h.bf16 %v12260_v6  ;;  %v377_v25 = vld [vmem:[#allocation2 + $0x1a0] sm:$0xff] }
 0x11a   :  { %v8253_v53 = vpop.permute.xlu1 %8252  ;;  %8537 = vrot.lane.b32.xlu0 %v12177_v11, %s10704_s19  ;;  %v2835_v31 = vsel %vm2834_vm7, %v2770_v54, %v8244_v23  ;;  %v2773_v6 = vsel %vm2769_vm6, %v2708_v51, %v8240_v55 }
 0x11b   :  { %v8255_v42 = vunpack.i.h.bf16 %v8253_v53  ;;  %v8254_v41 = vunpack.i.l.bf16 %v8253_v53  ;;  %v2837_v23 = vsel %vm2834_vm7, %v2772_v52, %v8249_v46  ;;  %v12329_v52 = vpack.i.bf16 %v12249_v47, %v12246_v14 }
 0x11c   :  { %8542 = vrot.lane.b32.xlu1 %v12230_v48, %s10704_s19  ;;  %v8258_v50 = vpop.permute.xlu0 %8257  ;;  %v16919_v14 = vrot.slane %v12193_v49, 7 }
 0x11d   :  { %v8259_v53 = vunpack.i.l.bf16 %v8258_v50  ;;  %v2900_v10 = vsel %vm2899_vm8, %v2835_v31, %v8254_v41  ;;  %v2901_v38 = vsel %vm2899_vm8, %v2836_v8, %v8255_v42  ;;  %v381_v42 = vld [vmem:[#allocation2 + $0x1c0] sm:$0xff]  ;;  %v2838_v41 = vsel %vm2834_vm7, %v2773_v6, %v8250_v57 }
 0x11e   :  { %v8263_v13 = vpop.permute.xlu1 %8262  ;;  %8547 = vrot.lane.b32.xlu0 %v12177_v11, %s10698_s24  ;;  %v8260_v11 = vunpack.i.h.bf16 %v8258_v50  ;;  %v636_v57 = vrot.slane %v381_v42, 7  ;;  %v16921_v6 = vmov %v16919_v14 }
 0x11f   :  { %v8265_v36 = vunpack.i.h.bf16 %v8263_v13  ;;  %v8264_v37 = vunpack.i.l.bf16 %v8263_v13  ;;  %v2902_v13 = vsel %vm2899_vm8, %v2837_v23, %v8259_v53 }
 0x120   :  { %8552 = vrot.lane.b32.xlu1 %v12230_v48, %s10698_s24  ;;  %v8268_v15 = vpop.permute.xlu0 %8267  ;;  %v2903_v51 = vsel %vm2899_vm8, %v2838_v41, %v8260_v11  ;;  %v16923_v41 = vrot.slane %v12211_v19, 7 }
 0x121   :  { %v8270_v28 = vunpack.i.h.bf16 %v8268_v15  ;;  %v8269_v34 = vunpack.i.l.bf16 %v8268_v15  ;;  %v2965_v50 = vsel %vm2964_vm9, %v2900_v10, %v8264_v37  ;;  %v2966_v0 = vsel %vm2964_vm9, %v2901_v38, %v8265_v36 }
 0x122   :  { %v8273_v62 = vpop.permute.xlu1 %8272  ;;  %8557 = vrot.lane.b32.xlu0 %v12200_v9, %s10699_s23  ;;  %v631_v37 = vrot.slane %v377_v25, 7  ;;  %v16916_v38 = vrot.slane %v12193_v49, 1  ;;  %v16920_v25 = vrot.slane %v12205_v40, 7 }
 0x123   :  { %v8275_v60 = vunpack.i.h.bf16 %v8273_v62  ;;  %v8274_v63 = vunpack.i.l.bf16 %v8273_v62  ;;  %v2967_v36 = vsel %vm2964_vm9, %v2902_v13, %v8269_v34  ;;  %v2968_v8 = vsel %vm2964_vm9, %v2903_v51, %v8270_v28 }
 0x124   :  { %8562 = vrot.lane.b32.xlu1 %v12234_v45, %s10699_s23  ;;  %v8278_v32 = vpop.permute.xlu0 %8277  ;;  %v16917_v34 = vrot.slane %v12239_v16, 1  ;;  %v12348_v47 = vsel %vm565_vm2, %v631_v37, %v16919_v14  ;;  %v12355_v23 = vsel %vm565_vm2, %v16921_v6, %v16920_v25  ;;  %v8049_v37 = vunpack.i.l.bf16 %v11988_v4 }
 0x125   :  { %v3030_v9 = vsel %vm3029_vm10, %v2965_v50, %v8274_v63  ;;  %v3031_v54 = vsel %vm3029_vm10, %v2966_v0, %v8275_v60  ;;  %v8280_v61 = vunpack.i.h.bf16 %v8278_v32  ;;  %v8279_v55 = vunpack.i.l.bf16 %v8278_v32  ;;  %v12357_v50 = vld [vmem:[#allocation2 + $0x1e8] sm:$0xff] }
 0x126   :  { %v12316_v46 = vpop.permute.xlu1 %8282  ;;  %v3094_v31 = vpack.c.bf16 %v3031_v54, %v3030_v9  ;;  %8567 = vrot.lane.b32.xlu0 %v12226_v1, %s10700_s27  ;;  %v16915_v1 = vrot.slane %v12205_v40, 1  ;;  %v642_v16 = vrot.slane %v12357_v50, 7  ;;  %v16922_v0 = vrot.slane %v12208_v30, 7  ;;  %v12375_v9 = vld [vmem:[#allocation2 + $0x1f0] sm:$0xff] }
 0x127   :  { %v3032_v53 = vsel %vm3029_vm10, %v2967_v36, %v8279_v55  ;;  %v3033_v15 = vsel %vm3029_vm10, %v2968_v8, %v8280_v61  ;;  %v644_v54 = vrot.slane %v12375_v9, 7  ;;  %v12388_v61 = vpack.i.bf16 %v12205_v40, %v12193_v49 }
 0x128   :  { %8572 = vrot.lane.b32.xlu1 %v12243_v27, %s10700_s27  ;;  %7838 = vmatprep.mubr.msk.bf16.mxu0 %vm3153_vm11, %v3094_v31  ;;  %v12331_v11 = vpop.permute.xlu0 %8287  ;;  %v3095_v62 = vpack.c.bf16 %v3033_v15, %v3032_v53  ;;  %v890_v28 = vsel %vm822_vm1, %v16916_v38, %v16915_v1  ;;  %v16918_v60 = vmov %v16915_v1  ;;  %v12366_v42 = vsel %vm565_vm2, %v636_v57, %v16922_v0  ;;  %v12395_v57 = vld [vmem:[#allocation2 + $0x1d8] sm:$0xff] }
 0x129   :  { %v892_v63 = vsel %vm822_vm1, %v16918_v60, %v16917_v34  ;;  %v16924_v13 = vmov %v16922_v0  ;;  %v8050_v31 = vunpack.i.h.bf16 %v11988_v4  ;;  %v8055_v36 = vunpack.i.h.bf16 %v12001_v59 }
 0x12a   :  { %v12333_v10 = vpop.permute.xlu1 %8292  ;;  %8577 = vrot.lane.b32.xlu0 %v12230_v48, %s10701_s30  ;;  %7839 = vmatmul.mubr.msk.bf16.vlgmr.msra.gmra.mrb[0].mxu0 %vm3153_vm11, %v3095_v62  ;;  %v12373_v32 = vsel %vm565_vm2, %v16924_v13, %v16923_v41  ;;  %v12382_v48 = vpack.i.bf16 %v12355_v23, %v12348_v47  ;;  %v12390_v55 = vpack.i.bf16 %v892_v63, %v890_v28  ;;  %v893_v49 = vrot.slane %v12208_v30, 1 }
 0x12b   :  { %v12401_v53 = vpack.i.bf16 %v12373_v32, %v12366_v42  ;;  %v8054_v40 = vunpack.i.l.bf16 %v12001_v59  ;;  %v8210_v15 = vunpack.i.h.bf16 %v12168_v39  ;;  %v8209_v4 = vunpack.i.l.bf16 %v12168_v39 }
 0x12c   :  { %8582 = vrot.lane.b32.xlu1 %v12329_v52, %s10701_s30  ;;  %v12384_v51 = vpop.permute.xlu0 %8297  ;;  %v8215_v62 = vunpack.i.h.bf16 %v12172_v18  ;;  %v8214_v1 = vunpack.i.l.bf16 %v12172_v18  ;;  %v894_v28 = vrot.slane %v12211_v19, 1  ;;  %v896_v34 = vrot.slane %v12395_v57, 1 }
 0x12d   :  { %v2579_v59 = vsel %vm51_vm0, %v11620_v33, %v8049_v37  ;;  %v2580_v39 = vsel %vm51_vm0, %v11300_v5, %v8050_v31  ;;  %v2582_v60 = vsel %vm51_vm0, %v11351_v20, %v8055_v36  ;;  %v8285_v63 = vunpack.i.h.bf16 %v12316_v46 }
 0x12e   :  { %v8303_v8 = vpop.permute.xlu1 %8302  ;;  %8587 = vrot.lane.b32.xlu0 %v12234_v45, %s10702_s18  ;;  %v8284_v45 = vunpack.i.l.bf16 %v12316_v46  ;;  %v8290_v18 = vunpack.i.h.bf16 %v12331_v11  ;;  %v8289_v25 = vunpack.i.l.bf16 %v12331_v11  ;;  %v8295_v6 = vunpack.i.h.bf16 %v12333_v10 }
 0x12f   :  { %v8294_v0 = vunpack.i.l.bf16 %v12333_v10  ;;  %v2581_v5 = vsel %vm51_vm0, %v11937_v56, %v8054_v40  ;;  %v2645_v33 = vsel %vm2639_vm3, %v2580_v39, %v8210_v15  ;;  %v2644_v20 = vsel %vm2639_vm3, %v2579_v59, %v8209_v4 }
 0x130   :  { %8592 = vrot.lane.b32.xlu1 %v12382_v48, %s10702_s18  ;;  %v8308_v38 = vpop.permute.xlu0 %8307  ;;  %v2647_v46 = vsel %vm2639_vm3, %v2582_v60, %v8215_v62  ;;  %v2646_v11 = vsel %vm2639_vm3, %v2581_v5, %v8214_v1  ;;  %v2709_v41 = vsel %vm2704_vm5, %v2644_v20, %v8284_v45  ;;  %v8305_v10 = vunpack.i.h.bf16 %v8303_v8 }
 0x131   :  { %v8304_v13 = vunpack.i.l.bf16 %v8303_v8  ;;  %v8299_v56 = vunpack.i.l.bf16 %v12384_v51  ;;  %v2712_v15 = vsel %vm2704_vm5, %v2647_v46, %v8290_v18  ;;  %v2711_v4 = vsel %vm2704_vm5, %v2646_v11, %v8289_v25 }
 0x132   :  { %v8313_v14 = vpop.permute.xlu1 %8312  ;;  %8597 = vrot.lane.b32.xlu0 %v12243_v27, %s10703_s2  ;;  %v2710_v27 = vsel %vm2704_vm5, %v2645_v33, %v8285_v63  ;;  %v2774_v62 = vsel %vm2769_vm6, %v2709_v41, %v8294_v0  ;;  %v8300_v8 = vunpack.i.h.bf16 %v12384_v51  ;;  %v8309_v45 = vunpack.i.l.bf16 %v8308_v38 }
 0x133   :  { %v8315_v37 = vunpack.i.h.bf16 %v8313_v14  ;;  %v8314_v36 = vunpack.i.l.bf16 %v8313_v14  ;;  %v2775_v1 = vsel %vm2769_vm6, %v2710_v27, %v8295_v6  ;;  %v2839_v60 = vsel %vm2834_vm7, %v2774_v62, %v8304_v13 }
 0x134   :  { %8602 = vrot.lane.b32.xlu1 %v12388_v61, %s10703_s2  ;;  %v8318_v31 = vpop.permute.xlu0 %8317  ;;  %v2840_v63 = vsel %vm2834_vm7, %v2775_v1, %v8305_v10  ;;  %v8310_v14 = vunpack.i.h.bf16 %v8308_v38  ;;  %v2776_v6 = vsel %vm2769_vm6, %v2711_v4, %v8299_v56  ;;  %v2777_v10 = vsel %vm2769_vm6, %v2712_v15, %v8300_v8 }
 0x135   :  { %v8319_v18 = vunpack.i.l.bf16 %v8318_v31  ;;  %v2904_v0 = vsel %vm2899_vm8, %v2839_v60, %v8314_v36  ;;  %v2905_v5 = vsel %vm2899_vm8, %v2840_v63, %v8315_v37  ;;  %v8320_v51 = vunpack.i.h.bf16 %v8318_v31 }
 0x136   :  { %v8323_v40 = vpop.permute.xlu1 %8322  ;;  %8607 = vrot.lane.b32.xlu0 %v12329_v52, %s10704_s19  ;;  %v2841_v38 = vsel %vm2834_vm7, %v2776_v6, %v8309_v45  ;;  %v2842_v31 = vsel %vm2834_vm7, %v2777_v10, %v8310_v14  ;;  %v12478_v63 = vpack.i.bf16 %v12211_v19, %v12208_v30  ;;  %v388_v14 = vld [vmem:[#allocation2 + $0x1f8] sm:$0xff]  ;;  %v12503_v30 = vld [vmem:[#allocation2 + $0x210] sm:$0xff]  ;;  %v8060_v57 = vunpack.i.h.bf16 %v12009_v43 }
 0x137   :  { %v8325_v59 = vunpack.i.h.bf16 %v8323_v40  ;;  %v8324_v39 = vunpack.i.l.bf16 %v8323_v40  ;;  %v2906_v56 = vsel %vm2899_vm8, %v2841_v38, %v8319_v18  ;;  %v385_v40 = vld [vmem:[#allocation2 + $0x1e0] sm:$0xff]  ;;  %v2907_v15 = vsel %vm2899_vm8, %v2842_v31, %v8320_v51 }
 0x138   :  { %8612 = vrot.lane.b32.xlu1 %v12390_v55, %s10704_s19  ;;  %v8328_v25 = vpop.permute.xlu0 %8327  ;;  %v641_v18 = vrot.slane %v385_v40, 7  ;;  %v898_v19 = vrot.slane %v12357_v50, 1 }
 0x139   :  { %v8330_v20 = vunpack.i.h.bf16 %v8328_v25  ;;  %v8329_v46 = vunpack.i.l.bf16 %v8328_v25  ;;  %v2969_v13 = vsel %vm2964_vm9, %v2904_v0, %v8324_v39  ;;  %v2970_v27 = vsel %vm2964_vm9, %v2905_v5, %v8325_v59 }
 0x13a   :  { %v8333_v33 = vpop.permute.xlu1 %8332  ;;  %8617 = vrot.lane.b32.xlu0 %v12329_v52, %s10698_s24  ;;  %v897_v0 = vsel %vm822_vm1, %v894_v28, %v896_v34  ;;  %v12497_v5 = vsel %vm565_vm2, %v642_v16, %v644_v54  ;;  %v901_v54 = vrot.slane %v388_v14, 1  ;;  %v8065_v34 = vunpack.i.h.bf16 %v12011_v58 }
 0x13b   :  { %v8335_v11 = vunpack.i.h.bf16 %v8333_v33  ;;  %v8334_v41 = vunpack.i.l.bf16 %v8333_v33  ;;  %v2971_v45 = vsel %vm2964_vm9, %v2906_v56, %v8329_v46  ;;  %v2972_v59 = vsel %vm2964_vm9, %v2907_v15, %v8330_v20  ;;  %v389_v33 = vld [vmem:[#allocation2 + $0x200] sm:$0xff]  ;;  %v12501_v20 = vld [vmem:[#allocation2 + $0x208] sm:$0xff] }
 0x13c   :  { %8622 = vrot.lane.b32.xlu1 %v12390_v55, %s10698_s24  ;;  %v8338_v52 = vpop.permute.xlu0 %8337  ;;  %v8064_v46 = vunpack.i.l.bf16 %v12011_v58  ;;  %v989_v10 = vrot.slane %v389_v33, 7  ;;  %v990_v38 = vrot.slane %v12501_v20, 7 }
 0x13d   :  { %v3034_v37 = vsel %vm3029_vm10, %v2969_v13, %v8334_v41  ;;  %v3035_v36 = vsel %vm3029_vm10, %v2970_v27, %v8335_v11  ;;  %v8340_v4 = vunpack.i.h.bf16 %v8338_v52  ;;  %v8339_v62 = vunpack.i.l.bf16 %v8338_v52 }
 0x13e   :  { %v12465_v1 = vpop.permute.xlu1 %8342  ;;  %v3096_v8 = vpack.c.bf16 %v3035_v36, %v3034_v37  ;;  %8627 = vrot.lane.b32.xlu0 %v12382_v48, %s10699_s23  ;;  %v895_v48 = vsel %vm822_vm1, %v893_v49, %v894_v28  ;;  %v899_v49 = vrot.slane %v12375_v9, 1  ;;  %v8059_v28 = vunpack.i.l.bf16 %v12009_v43 }
 0x13f   :  { %v3036_v39 = vsel %vm3029_vm10, %v2971_v45, %v8339_v62  ;;  %v3037_v60 = vsel %vm3029_vm10, %v2972_v59, %v8340_v4  ;;  %v12516_v11 = vpack.i.bf16 %v897_v0, %v895_v48  ;;  %v992_v43 = vrot.slane %v12503_v30, 7 }
 0x140   :  { %8632 = vrot.lane.b32.xlu1 %v12401_v53, %s10699_s23  ;;  %7842 = vmatprep.mubr.msk.bf16.mxu0 %vm3153_vm11, %v3096_v8  ;;  %v12480_v25 = vpop.permute.xlu0 %8347  ;;  %v3097_v6 = vpack.c.bf16 %v3037_v60, %v3036_v39  ;;  %v2584_v27 = vsel %vm51_vm0, %v11356_v21, %v8060_v57  ;;  %v900_v31 = vsel %vm822_vm1, %v898_v19, %v899_v49  ;;  %v8344_v15 = vunpack.i.l.bf16 %v12465_v1 }
 0x141   :  { %v902_v56 = vsel %vm822_vm1, %v899_v49, %v901_v54  ;;  %v2583_v37 = vsel %vm51_vm0, %v11959_v26, %v8059_v28  ;;  %v2586_v36 = vsel %vm51_vm0, %v11412_v7, %v8065_v34  ;;  %v2585_v21 = vsel %vm51_vm0, %v11976_v35, %v8064_v46  ;;  %v12555_v35 = vld [vmem:[#allocation2 + $0x218] sm:$0xff] }
 0x142   :  { %v12499_v51 = vpop.permute.xlu1 %8352  ;;  %8637 = vrot.lane.b32.xlu0 %v12388_v61, %s10700_s27  ;;  %7843 = vmatmul.mubr.msk.bf16.gmra.mrb[4].mxu0 %vm3153_vm11, %v3097_v6  ;;  %v12521_v61 = vsel %vm565_vm2, %v641_v18, %v642_v16  ;;  %v12535_v16 = vpack.i.bf16 %v12375_v9, %v12357_v50  ;;  %v8219_v50 = vunpack.i.l.bf16 %v12179_v12  ;;  %v991_v52 = vsel %vm565_vm2, %v989_v10, %v990_v38 }
 0x143   :  { %v12527_v58 = vpack.i.bf16 %v12497_v5, %v12521_v61  ;;  %v993_v40 = vsel %vm565_vm2, %v990_v38, %v992_v43  ;;  %v8345_v26 = vunpack.i.h.bf16 %v12465_v1  ;;  %v12553_v4 = vpack.i.bf16 %v902_v56, %v900_v31 }
 0x144   :  { %8642 = vrot.lane.b32.xlu1 %v12478_v63, %s10700_s27  ;;  %v8358_v41 = vpop.permute.xlu0 %8357  ;;  %v8350_v62 = vunpack.i.h.bf16 %v12480_v25  ;;  %v8349_v8 = vunpack.i.l.bf16 %v12480_v25  ;;  %v8354_v45 = vunpack.i.l.bf16 %v12499_v51  ;;  %v12565_v1 = vpack.i.bf16 %v993_v40, %v991_v52 }
 0x145   :  { %v1001_v59 = vrot.slane %v12501_v20, 1  ;;  %v2648_v60 = vsel %vm2639_vm3, %v2583_v37, %v8219_v50  ;;  %v1002_v18 = vrot.slane %v12503_v30, 1  ;;  %v2651_v25 = vsel %vm2639_vm3, %v2586_v36, %v8345_v26 }
 0x146   :  { %v8363_v13 = vpop.permute.xlu1 %8362  ;;  %8647 = vrot.lane.b32.xlu0 %v12390_v55, %s10701_s30  ;;  %v8220_v55 = vunpack.i.h.bf16 %v12179_v12  ;;  %v8355_v12 = vunpack.i.h.bf16 %v12499_v51  ;;  %v2650_v6 = vsel %vm2639_vm3, %v2585_v21, %v8344_v15  ;;  %v8360_v48 = vunpack.i.h.bf16 %v8358_v41 }
 0x147   :  { %v8359_v0 = vunpack.i.l.bf16 %v8358_v41  ;;  %v2713_v33 = vsel %vm2704_vm5, %v2648_v60, %v8349_v8  ;;  %v8365_v19 = vunpack.i.h.bf16 %v8363_v13  ;;  %v8364_v49 = vunpack.i.l.bf16 %v8363_v13 }
 0x148   :  { %8652 = vrot.lane.b32.xlu1 %v12516_v11, %s10701_s30  ;;  %v8368_v9 = vpop.permute.xlu0 %8367  ;;  %v2649_v39 = vsel %vm2639_vm3, %v2584_v27, %v8220_v55  ;;  %v2715_v54 = vsel %vm2704_vm5, %v2650_v6, %v8354_v45  ;;  %v2716_v28 = vsel %vm2704_vm5, %v2651_v25, %v8355_v12 }
 0x149   :  { %v2714_v57 = vsel %vm2704_vm5, %v2649_v39, %v8350_v62  ;;  %v8370_v34 = vunpack.i.h.bf16 %v8368_v9  ;;  %v8369_v46 = vunpack.i.l.bf16 %v8368_v9  ;;  %v2778_v31 = vsel %vm2769_vm6, %v2713_v33, %v8359_v0 }
 0x14a   :  { %v8373_v7 = vpop.permute.xlu1 %8372  ;;  %8657 = vrot.lane.b32.xlu0 %v12401_v53, %s10702_s18  ;;  %v1004_v53 = vrot.slane %v12555_v35, 1  ;;  %v2779_v13 = vsel %vm2769_vm6, %v2714_v57, %v8360_v48  ;;  %v2780_v36 = vsel %vm2769_vm6, %v2715_v54, %v8364_v49  ;;  %v2781_v21 = vsel %vm2769_vm6, %v2716_v28, %v8365_v19  ;;  %v393_v54 = vld [vmem:[#allocation2 + $0x220] sm:$0xff]  ;;  %v12608_v28 = vld [vmem:[#allocation2 + $0x228] sm:$0xff] }
 0x14b   :  { %v8375_v41 = vunpack.i.h.bf16 %v8373_v7  ;;  %v8374_v10 = vunpack.i.l.bf16 %v8373_v7  ;;  %v2843_v9 = vsel %vm2834_vm7, %v2778_v31, %v8369_v46  ;;  %v2844_v52 = vsel %vm2834_vm7, %v2779_v13, %v8370_v34  ;;  %v12610_v34 = vld [vmem:[#allocation2 + $0x230] sm:$0xff]  ;;  %v401_v31 = vld [vmem:[#allocation2 + $0x260] sm:$0xff] }
 0x14c   :  { %8662 = vrot.lane.b32.xlu1 %v12527_v58, %s10702_s18  ;;  %v8378_v14 = vpop.permute.xlu0 %8377  ;;  %v8070_v35 = vunpack.i.h.bf16 %v12023_v17 }
 0x14d   :  { %v8380_v38 = vunpack.i.h.bf16 %v8378_v14  ;;  %v8379_v43 = vunpack.i.l.bf16 %v8378_v14  ;;  %v2845_v15 = vsel %vm2834_vm7, %v2780_v36, %v8374_v10  ;;  %v2846_v7 = vsel %vm2834_vm7, %v2781_v21, %v8375_v41 }
 0x14e   :  { %v8383_v51 = vpop.permute.xlu1 %8382  ;;  %8667 = vrot.lane.b32.xlu0 %v12478_v63, %s10703_s2  ;;  %v1018_v36 = vrot.slane %v12608_v28, 7  ;;  %v1020_v21 = vrot.slane %v12610_v34, 7 }
 0x14f   :  { %v8385_v56 = vunpack.i.h.bf16 %v8383_v51  ;;  %v8384_v63 = vunpack.i.l.bf16 %v8383_v51  ;;  %v2908_v62 = vsel %vm2899_vm8, %v2843_v9, %v8379_v43  ;;  %v2909_v8 = vsel %vm2899_vm8, %v2844_v52, %v8380_v38  ;;  %v12616_v38 = vld [vmem:[#allocation2 + $0x268] sm:$0xff] }
 0x150   :  { %8672 = vrot.lane.b32.xlu1 %v12535_v16, %s10703_s2  ;;  %v8388_v27 = vpop.permute.xlu0 %8387  ;;  %v652_v43 = vrot.slane %v12616_v38, 7  ;;  %v12635_v9 = vpack.i.bf16 %v12503_v30, %v12501_v20  ;;  %v1005_v52 = vsel %vm822_vm1, %v1002_v18, %v1004_v53  ;;  %v8069_v30 = vunpack.i.l.bf16 %v12023_v17 }
 0x151   :  { %v8390_v55 = vunpack.i.h.bf16 %v8388_v27  ;;  %v8389_v50 = vunpack.i.l.bf16 %v8388_v27  ;;  %v2910_v45 = vsel %vm2899_vm8, %v2845_v15, %v8384_v63  ;;  %v2911_v39 = vsel %vm2899_vm8, %v2846_v7, %v8385_v56  ;;  %v405_v63 = vld [vmem:[#allocation2 + $0x280] sm:$0xff]  ;;  %v12648_v15 = vld [vmem:[#allocation2 + $0x288] sm:$0xff] }
 0x152   :  { %v8393_v37 = vpop.permute.xlu1 %8392  ;;  %8677 = vrot.lane.b32.xlu0 %v12516_v11, %s10704_s19  ;;  %v908_v27 = vrot.slane %v12616_v38, 1  ;;  %v657_v7 = vrot.slane %v12648_v15, 7  ;;  %v656_v53 = vrot.slane %v405_v63, 7  ;;  %v1030_v17 = vrot.slane %v12610_v34, 1 }
 0x153   :  { %v8395_v40 = vunpack.i.h.bf16 %v8393_v37  ;;  %v8394_v26 = vunpack.i.l.bf16 %v8393_v37  ;;  %v2973_v6 = vsel %vm2964_vm9, %v2908_v62, %v8389_v50  ;;  %v2974_v48 = vsel %vm2964_vm9, %v2909_v8, %v8390_v55  ;;  %v12627_v55 = vld [vmem:[#allocation2 + $0x270] sm:$0xff] }
 0x154   :  { %8682 = vrot.lane.b32.xlu1 %v12553_v4, %s10704_s19  ;;  %v8398_v12 = vpop.permute.xlu0 %8397  ;;  %v1017_v37 = vrot.slane %v393_v54, 7  ;;  %v654_v50 = vrot.slane %v12627_v55, 7  ;;  %v12651_v62 = vld [vmem:[#allocation2 + $0x290] sm:$0xff] }
 0x155   :  { %v8400_v60 = vunpack.i.h.bf16 %v8398_v12  ;;  %v8399_v14 = vunpack.i.l.bf16 %v8398_v12  ;;  %v2975_v33 = vsel %vm2964_vm9, %v2910_v45, %v8394_v26  ;;  %v2976_v57 = vsel %vm2964_vm9, %v2911_v39, %v8395_v40  ;;  %v404_v12 = vld [vmem:[#allocation2 + $0x278] sm:$0xff] }
 0x156   :  { %v8403_v25 = vpop.permute.xlu1 %8402  ;;  %8687 = vrot.lane.b32.xlu0 %v12516_v11, %s10698_s24  ;;  %v909_v40 = vrot.slane %v12627_v55, 1  ;;  %v651_v26 = vrot.slane %v401_v31, 7  ;;  %v659_v8 = vrot.slane %v12651_v62, 7 }
 0x157   :  { %v8405_v0 = vunpack.i.h.bf16 %v8403_v25  ;;  %v8404_v51 = vunpack.i.l.bf16 %v8403_v25  ;;  %v3038_v19 = vsel %vm3029_vm10, %v2973_v6, %v8399_v14  ;;  %v3039_v49 = vsel %vm3029_vm10, %v2974_v48, %v8400_v60 }
 0x158   :  { %8692 = vrot.lane.b32.xlu1 %v12553_v4, %s10698_s24  ;;  %v12614_v41 = vpop.permute.xlu0 %8407  ;;  %v3098_v10 = vpack.c.bf16 %v3039_v49, %v3038_v19  ;;  %v1019_v60 = vsel %vm565_vm2, %v1017_v37, %v1018_v36  ;;  %v1021_v14 = vsel %vm565_vm2, %v1018_v36, %v1020_v21  ;;  %v1029_v25 = vrot.slane %v12608_v28, 1 }
 0x159   :  { %v3040_v46 = vsel %vm3029_vm10, %v2975_v33, %v8404_v51  ;;  %v3041_v11 = vsel %vm3029_vm10, %v2976_v57, %v8405_v0  ;;  %v911_v48 = vrot.slane %v404_v12, 1  ;;  %v8075_v0 = vunpack.i.h.bf16 %v12025_v44 }
 0x15a   :  { %v12620_v13 = vpop.permute.xlu1 %8412  ;;  %v3099_v56 = vpack.c.bf16 %v3041_v11, %v3040_v46  ;;  %8697 = vrot.lane.b32.xlu0 %v12527_v58, %s10699_s23  ;;  %7846 = vmatprep.mubr.msk.bf16.mxu0 %vm3153_vm11, %v3098_v10  ;;  %v1003_v58 = vsel %vm822_vm1, %v1001_v59, %v1002_v18  ;;  %v396_v59 = vld [vmem:[#allocation2 + $0x238] sm:$0xff]  ;;  %v8074_v18 = vunpack.i.l.bf16 %v12025_v44  ;;  %v12673_v51 = vsel %vm565_vm2, %v652_v43, %v654_v50 }
 0x15b   :  { %v12663_v39 = vpack.i.bf16 %v1005_v52, %v1003_v58  ;;  %v1032_v6 = vrot.slane %v396_v59, 1  ;;  %v2588_v33 = vsel %vm51_vm0, %v11433_v24, %v8070_v35  ;;  %v12678_v57 = vsel %vm565_vm2, %v651_v26, %v652_v43 }
 0x15c   :  { %8702 = vrot.lane.b32.xlu1 %v12565_v1, %s10699_s23  ;;  %7847 = vmatmul.mubr.msk.bf16.gmra.mrb[8].mxu0 %vm3153_vm11, %v3099_v56  ;;  %v12654_v20 = vpop.permute.xlu0 %8417  ;;  %v12681_v19 = vsel %vm565_vm2, %v656_v53, %v657_v7  ;;  %v12684_v49 = vsel %vm565_vm2, %v657_v7, %v659_v8  ;;  %v2587_v44 = vsel %vm51_vm0, %v11999_v3, %v8069_v30  ;;  %v8409_v56 = vunpack.i.l.bf16 %v12614_v41 }
 0x15d   :  { %v2589_v46 = vsel %vm51_vm0, %v12040_v2, %v8074_v18  ;;  %v8731_v24 = vpack.i.bf16 %v1021_v14, %v1019_v60  ;;  %v1031_v11 = vsel %vm822_vm1, %v1029_v25, %v1030_v17  ;;  %v1033_v10 = vsel %vm822_vm1, %v1030_v17, %v1032_v6 }
 0x15e   :  { %v12659_v45 = vpop.permute.xlu1 %8422  ;;  %8707 = vrot.lane.b32.xlu0 %v12535_v16, %s10700_s27  ;;  %v910_v43 = vsel %vm822_vm1, %v908_v27, %v909_v40  ;;  %v912_v31 = vsel %vm822_vm1, %v909_v40, %v911_v48  ;;  %v2590_v3 = vsel %vm51_vm0, %v11456_v22, %v8075_v0  ;;  %v8410_v2 = vunpack.i.h.bf16 %v12614_v41 }
 0x15f   :  { %v8415_v63 = vunpack.i.h.bf16 %v12620_v13  ;;  %v8414_v37 = vunpack.i.l.bf16 %v12620_v13  ;;  %v8741_v21 = vpack.i.bf16 %v12610_v34, %v12608_v28  ;;  %v8420_v27 = vunpack.i.h.bf16 %v12654_v20 }
 0x160   :  { %8712 = vrot.lane.b32.xlu1 %v12635_v9, %s10700_s27  ;;  %v8428_v16 = vpop.permute.xlu0 %8427  ;;  %v8419_v50 = vunpack.i.l.bf16 %v12654_v20  ;;  %v8751_v22 = vpack.i.bf16 %v1033_v10, %v1031_v11  ;;  %v12710_v58 = vpack.i.bf16 %v912_v31, %v910_v43  ;;  %v8425_v41 = vunpack.i.h.bf16 %v12659_v45 }
 0x161   :  { %v8424_v52 = vunpack.i.l.bf16 %v12659_v45  ;;  %v8766_v13 = vpack.i.bf16 %v12673_v51, %v12678_v57  ;;  %v12719_v28 = vpack.i.bf16 %v12684_v49, %v12681_v19  ;;  %v2653_v34 = vsel %vm2639_vm3, %v2588_v33, %v8410_v2 }
 0x162   :  { %v8433_v54 = vpop.permute.xlu1 %8432  ;;  %8717 = vrot.lane.b32.xlu0 %v12553_v4, %s10701_s30  ;;  %v913_v26 = vrot.slane %v12648_v15, 1  ;;  %v914_v7 = vrot.slane %v12651_v62, 1  ;;  %v2655_v8 = vsel %vm2639_vm3, %v2590_v3, %v8415_v63  ;;  %v2654_v20 = vsel %vm2639_vm3, %v2589_v46, %v8414_v37 }
 0x163   :  { %v8430_v59 = vunpack.i.h.bf16 %v8428_v16  ;;  %v8429_v12 = vunpack.i.l.bf16 %v8428_v16  ;;  %v2718_v18 = vsel %vm2704_vm5, %v2653_v34, %v8420_v27  ;;  %v8435_v53 = vunpack.i.h.bf16 %v8433_v54 }
 0x164   :  { %8722 = vrot.lane.b32.xlu1 %v12663_v39, %s10701_s30  ;;  %v8438_v4 = vpop.permute.xlu0 %8437  ;;  %v8434_v45 = vunpack.i.l.bf16 %v8433_v54  ;;  %v2719_v60 = vsel %vm2704_vm5, %v2654_v20, %v8424_v52  ;;  %v2720_v14 = vsel %vm2704_vm5, %v2655_v8, %v8425_v41 }
 0x165   :  { %v8440_v25 = vunpack.i.h.bf16 %v8438_v4  ;;  %v8439_v17 = vunpack.i.l.bf16 %v8438_v4  ;;  %v2783_v54 = vsel %vm2769_vm6, %v2718_v18, %v8430_v59  ;;  %v2785_v10 = vsel %vm2769_vm6, %v2720_v14, %v8435_v53  ;;  %v16925_v59 = vld [vmem:[#allocation25_spill] sm:$0xff] }
 0x166   :  { %v8443_v36 = vpop.permute.xlu1 %8442  ;;  %8727 = vrot.lane.b32.xlu0 %v12565_v1, %s10702_s18  ;;  %v2652_v1 = vsel %vm2639_vm3, %v2587_v44, %v8409_v56  ;;  %v2784_v11 = vsel %vm2769_vm6, %v2719_v60, %v8434_v45 }
 0x167   :  { %v2717_v30 = vsel %vm2704_vm5, %v2652_v1, %v8419_v50  ;;  %v8445_v6 = vunpack.i.h.bf16 %v8443_v36  ;;  %v8444_v48 = vunpack.i.l.bf16 %v8443_v36  ;;  %v2848_v2 = vsel %vm2834_vm7, %v2783_v54, %v8440_v25  ;;  %v408_v1 = vld [vmem:[#allocation2 + $0x298] sm:$0xff] }
 0x168   :  { %8732 = vrot.lane.b32.xlu1 %v8731_v24, %s10702_s18  ;;  %v8448_v40 = vpop.permute.xlu0 %8447  ;;  %v2782_v44 = vsel %vm2769_vm6, %v2717_v30, %v8429_v12  ;;  %v16926_v12 = vpack.i.bf16 %v12103_v29, %v16925_v59  ;;  %v916_v29 = vrot.slane %v408_v1, 1  ;;  %v12779_v54 = vpack.i.bf16 %v12651_v62, %v12648_v15  ;;  %v16930_v59 = vld [vmem:[#allocation9_spill] sm:$0xff] }
 0x169   :  { %v8450_v0 = vunpack.i.h.bf16 %v8448_v40  ;;  %v8449_v16 = vunpack.i.l.bf16 %v8448_v40  ;;  %v2847_v3 = vsel %vm2834_vm7, %v2782_v44, %v8439_v17  ;;  %v2849_v63 = vsel %vm2834_vm7, %v2784_v11, %v8444_v48  ;;  %v409_v48 = vld [vmem:[#allocation2 + $0x2a0] sm:$0xff] }
 0x16a   :  { %v8453_v35 = vpop.permute.xlu1 %8452  ;;  %8737 = vrot.lane.b32.xlu0 %v12635_v9, %s10703_s2  ;;  %v2850_v37 = vsel %vm2834_vm7, %v2785_v10, %v8445_v6 }
 0x16b   :  { %v8455_v46 = vunpack.i.h.bf16 %v8453_v35  ;;  %v8454_v24 = vunpack.i.l.bf16 %v8453_v35  ;;  %v2912_v36 = vsel %vm2899_vm8, %v2847_v3, %v8449_v16  ;;  %v8776_v16 = vpack.i.bf16 %v12627_v55, %v12616_v38 }
 0x16c   :  { %8742 = vrot.lane.b32.xlu1 %v8741_v21, %s10703_s2  ;;  %v8458_v33 = vpop.permute.xlu0 %8457  ;;  %v2913_v21 = vsel %vm2899_vm8, %v2848_v2, %v8450_v0  ;;  %v413_v0 = vld [vmem:[#allocation2 + $0x2c0] sm:$0xff]  ;;  %v915_v38 = vsel %vm822_vm1, %v913_v26, %v914_v7  ;;  %v917_v55 = vsel %vm822_vm1, %v914_v7, %v916_v29  ;;  %v661_v3 = vrot.slane %v409_v48, 7 }
 0x16d   :  { %v8460_v43 = vunpack.i.h.bf16 %v8458_v33  ;;  %v8459_v31 = vunpack.i.l.bf16 %v8458_v33  ;;  %v2914_v50 = vsel %vm2899_vm8, %v2849_v63, %v8454_v24  ;;  %v10641_v33 = vld [vmem:[#allocation2 + $0x2a8] sm:$0xff]  ;;  %v10642_v24 = vld [vmem:[#allocation2 + $0x2b0] sm:$0xff]  ;;  %v666_v2 = vrot.slane %v413_v0, 7 }
 0x16e   :  { %v8463_v9 = vpop.permute.xlu1 %8462  ;;  %8747 = vrot.lane.b32.xlu0 %v12663_v39, %s10704_s19  ;;  %v2915_v39 = vsel %vm2899_vm8, %v2850_v37, %v8455_v46  ;;  %v662_v44 = vrot.slane %v10641_v33, 7  ;;  %v412_v46 = vld [vmem:[#allocation2 + $0x2b8] sm:$0xff]  ;;  %v918_v37 = vrot.slane %v10641_v33, 1  ;;  %v12836_v29 = vpack.i.bf16 %v10642_v24, %v10641_v33 }
 0x16f   :  { %v8465_v56 = vunpack.i.h.bf16 %v8463_v9  ;;  %v8464_v4 = vunpack.i.l.bf16 %v8463_v9  ;;  %v2977_v40 = vsel %vm2964_vm9, %v2912_v36, %v8459_v31  ;;  %v664_v9 = vrot.slane %v10642_v24, 7 }
 0x170   :  { %8752 = vrot.lane.b32.xlu1 %v8751_v22, %s10704_s19  ;;  %v8468_v27 = vpop.permute.xlu0 %8467  ;;  %v2978_v22 = vsel %vm2964_vm9, %v2913_v21, %v8460_v43  ;;  %v16927_v43 = vld [vmem:[#allocation10_spill] sm:$0xff]  ;;  %v919_v36 = vrot.slane %v10642_v24, 1  ;;  %v921_v15 = vrot.slane %v412_v46, 1  ;;  %v16928_v21 = vld [vmem:[#allocation11_spill] sm:$0xff] }
 0x171   :  { %v8470_v41 = vunpack.i.h.bf16 %v8468_v27  ;;  %v8469_v52 = vunpack.i.l.bf16 %v8468_v27  ;;  %v2979_v35 = vsel %vm2964_vm9, %v2914_v50, %v8464_v4  ;;  %v2980_v30 = vsel %vm2964_vm9, %v2915_v39, %v8465_v56  ;;  %v12793_v56 = vld [vmem:[#allocation2 + $0x2d0] sm:$0xff] }
 0x172   :  { %v8473_v34 = vpop.permute.xlu1 %8472  ;;  %8757 = vrot.lane.b32.xlu0 %v16926_v12, %s10698_s24  ;;  %v8079_v31 = vunpack.i.l.bf16 %v16927_v43  ;;  %v669_v4 = vrot.slane %v12793_v56, 7  ;;  %v8080_v26 = vunpack.i.h.bf16 %v16927_v43  ;;  %v8085_v62 = vunpack.i.h.bf16 %v16928_v21 }
 0x173   :  { %v8475_v8 = vunpack.i.h.bf16 %v8473_v34  ;;  %v8474_v20 = vunpack.i.l.bf16 %v8473_v34  ;;  %v3042_v18 = vsel %vm3029_vm10, %v2977_v40, %v8469_v52  ;;  %v3043_v53 = vsel %vm3029_vm10, %v2978_v22, %v8470_v41  ;;  %v16929_v40 = vld [vmem:[#allocation20_spill] sm:$0xff] }
 0x174   :  { %8762 = vrot.lane.b32.xlu1 %v12710_v58, %s10698_s24  ;;  %v12763_v14 = vpop.permute.xlu0 %8477  ;;  %v3100_v25 = vpack.c.bf16 %v3043_v53, %v3042_v18  ;;  %v8084_v7 = vunpack.i.l.bf16 %v16928_v21  ;;  %v12802_v27 = vpack.i.bf16 %v917_v55, %v915_v38  ;;  %v12805_v39 = vsel %vm565_vm2, %v661_v3, %v662_v44  ;;  %v16932_v18 = vld [vmem:[#allocation29_spill] sm:$0xff] }
 0x175   :  { %v3044_v45 = vsel %vm3029_vm10, %v2979_v35, %v8474_v20  ;;  %v3045_v60 = vsel %vm3029_vm10, %v2980_v30, %v8475_v8  ;;  %v12808_v41 = vsel %vm565_vm2, %v662_v44, %v664_v9  ;;  %v2591_v22 = vsel %vm51_vm0, %v16929_v40, %v8079_v31  ;;  %v16931_v35 = vld [vmem:[#allocation28_spill] sm:$0xff] }
 0x176   :  { %v12765_v17 = vpop.permute.xlu1 %8482  ;;  %v3101_v6 = vpack.c.bf16 %v3045_v60, %v3044_v45  ;;  %8767 = vrot.lane.b32.xlu0 %v8766_v13, %s10699_s23  ;;  %7850 = vmatprep.mubr.msk.bf16.mxu0 %vm3153_vm11, %v3100_v25  ;;  %v12781_v13 = vld [vmem:[#allocation2 + $0x2c8] sm:$0xff]  ;;  %v920_v8 = vsel %vm822_vm1, %v918_v37, %v919_v36  ;;  %v922_v20 = vsel %vm822_vm1, %v919_v36, %v921_v15  ;;  %v8479_v60 = vunpack.i.l.bf16 %v12763_v14 }
 0x177   :  { %v667_v11 = vrot.slane %v12781_v13, 7  ;;  %v2592_v12 = vsel %vm51_vm0, %v16930_v59, %v8080_v26  ;;  %v2593_v30 = vsel %vm51_vm0, %v16931_v35, %v8084_v7  ;;  %v2594_v53 = vsel %vm51_vm0, %v16932_v18, %v8085_v62 }
 0x178   :  { %8772 = vrot.lane.b32.xlu1 %v12719_v28, %s10699_s23  ;;  %7851 = vmatmul.mubr.msk.bf16.gmra.mrb[12].mxu0 %vm3153_vm11, %v3101_v6  ;;  %v8488_v10 = vpop.permute.xlu0 %8487  ;;  %v12832_v45 = vpack.i.bf16 %v12808_v41, %v12805_v39  ;;  %v8485_v6 = vunpack.i.h.bf16 %v12765_v17  ;;  %v8484_v48 = vunpack.i.l.bf16 %v12765_v17  ;;  %v2656_v17 = vsel %vm2639_vm3, %v2591_v22, %v8479_v60 }
 0x179   :  { %v12811_v52 = vsel %vm565_vm2, %v666_v2, %v667_v11  ;;  %v12814_v34 = vsel %vm565_vm2, %v667_v11, %v669_v4  ;;  %v8490_v44 = vunpack.i.h.bf16 %v8488_v10  ;;  %v8489_v46 = vunpack.i.l.bf16 %v8488_v10 }
 0x17a   :  { %v8493_v63 = vpop.permute.xlu1 %8492  ;;  %8777 = vrot.lane.b32.xlu0 %v8776_v16, %s10700_s27  ;;  %v12840_v16 = vpack.i.bf16 %v922_v20, %v920_v8  ;;  %v923_v38 = vrot.slane %v12781_v13, 1  ;;  %v924_v10 = vrot.slane %v12793_v56, 1  ;;  %v2658_v55 = vsel %vm2639_vm3, %v2593_v30, %v8484_v48 }
 0x17b   :  { %v8495_v9 = vunpack.i.h.bf16 %v8493_v63  ;;  %v8494_v11 = vunpack.i.l.bf16 %v8493_v63  ;;  %v2721_v2 = vsel %vm2704_vm5, %v2656_v17, %v8489_v46 }
 0x17c   :  { %8782 = vrot.lane.b32.xlu1 %v12779_v54, %s10700_s27  ;;  %v8498_v50 = vpop.permute.xlu0 %8497 }
 0x17d   :  { %v8500_v43 = vunpack.i.h.bf16 %v8498_v50  ;;  %v8499_v31 = vunpack.i.l.bf16 %v8498_v50  ;;  %v2723_v36 = vsel %vm2704_vm5, %v2658_v55, %v8494_v11 }
 0x17e   :  { %v8503_v1 = vpop.permute.xlu1 %8502  ;;  %8787 = vrot.lane.b32.xlu0 %v12710_v58, %s10701_s30  ;;  %v8480_v58 = vunpack.i.h.bf16 %v12763_v14  ;;  %v12848_v14 = vpack.i.bf16 %v12814_v34, %v12811_v52 }
 0x17f   :  { %v8505_v63 = vunpack.i.h.bf16 %v8503_v1  ;;  %v8504_v37 = vunpack.i.l.bf16 %v8503_v1  ;;  %v2786_v8 = vsel %vm2769_vm6, %v2721_v2, %v8499_v31 }
 0x180   :  { %8792 = vrot.lane.b32.xlu1 %v12802_v27, %s10701_s30  ;;  %v8508_v25 = vpop.permute.xlu0 %8507  ;;  %v2657_v33 = vsel %vm2639_vm3, %v2592_v12, %v8480_v58 }
 0x181   :  { %v2722_v4 = vsel %vm2704_vm5, %v2657_v33, %v8490_v44  ;;  %v8510_v26 = vunpack.i.h.bf16 %v8508_v25  ;;  %v8509_v21 = vunpack.i.l.bf16 %v8508_v25  ;;  %v2788_v12 = vsel %vm2769_vm6, %v2723_v36, %v8504_v37 }
 0x182   :  { %v8513_v0 = vpop.permute.xlu1 %8512  ;;  %8797 = vrot.lane.b32.xlu0 %v12719_v28, %s10702_s18  ;;  %v2659_v28 = vsel %vm2639_vm3, %v2594_v53, %v8485_v6  ;;  %v2787_v1 = vsel %vm2769_vm6, %v2722_v4, %v8500_v43 }
 0x183   :  { %v2724_v15 = vsel %vm2704_vm5, %v2659_v28, %v8495_v9  ;;  %v8515_v62 = vunpack.i.h.bf16 %v8513_v0  ;;  %v8514_v7 = vunpack.i.l.bf16 %v8513_v0  ;;  %v2851_v53 = vsel %vm2834_vm7, %v2786_v8, %v8509_v21  ;;  %v416_v28 = vld [vmem:[#allocation2 + $0x2d8] sm:$0xff] }
 0x184   :  { %8802 = vrot.lane.b32.xlu1 %v12832_v45, %s10702_s18  ;;  %v8518_v24 = vpop.permute.xlu0 %8517  ;;  %v2789_v35 = vsel %vm2769_vm6, %v2724_v15, %v8505_v63  ;;  %v2852_v58 = vsel %vm2834_vm7, %v2787_v1, %v8510_v26  ;;  %v12904_v1 = vpack.i.bf16 %v12793_v56, %v12781_v13 }
 0x185   :  { %v8520_v50 = vunpack.i.h.bf16 %v8518_v24  ;;  %v8519_v40 = vunpack.i.l.bf16 %v8518_v24  ;;  %v2853_v6 = vsel %vm2834_vm7, %v2788_v12, %v8514_v7  ;;  %v2854_v48 = vsel %vm2834_vm7, %v2789_v35, %v8515_v62 }
 0x186   :  { %v8523_v3 = vpop.permute.xlu1 %8522  ;;  %8807 = vrot.lane.b32.xlu0 %v12779_v54, %s10703_s2  ;;  %v926_v62 = vrot.slane %v416_v28, 1 }
 0x187   :  { %v8525_v20 = vunpack.i.h.bf16 %v8523_v3  ;;  %v8524_v54 = vunpack.i.l.bf16 %v8523_v3  ;;  %v2916_v0 = vsel %vm2899_vm8, %v2851_v53, %v8519_v40  ;;  %v2917_v44 = vsel %vm2899_vm8, %v2852_v58, %v8520_v50  ;;  %v421_v40 = vld [vmem:[#allocation2 + $0x300] sm:$0xff] }
 0x188   :  { %8812 = vrot.lane.b32.xlu1 %v12836_v29, %s10703_s2  ;;  %v8528_v22 = vpop.permute.xlu0 %8527  ;;  %v676_v58 = vrot.slane %v421_v40, 7 }
 0x189   :  { %v8530_v30 = vunpack.i.h.bf16 %v8528_v22  ;;  %v8529_v18 = vunpack.i.l.bf16 %v8528_v22  ;;  %v2918_v9 = vsel %vm2899_vm8, %v2853_v6, %v8524_v54  ;;  %v2919_v11 = vsel %vm2899_vm8, %v2854_v48, %v8525_v20  ;;  %v10645_v22 = vld [vmem:[#allocation2 + $0x2e8] sm:$0xff]  ;;  %v420_v20 = vld [vmem:[#allocation2 + $0x2f8] sm:$0xff]  ;;  %v12918_v6 = vld [vmem:[#allocation2 + $0x310] sm:$0xff] }
 0x18a   :  { %v8533_v59 = vpop.permute.xlu1 %8532  ;;  %8817 = vrot.lane.b32.xlu0 %v12802_v27, %s10704_s19  ;;  %v672_v8 = vrot.slane %v10645_v22, 7  ;;  %v679_v48 = vrot.slane %v12918_v6, 7  ;;  %v928_v13 = vrot.slane %v10645_v22, 1  ;;  %v931_v56 = vrot.slane %v420_v20, 1 }
 0x18b   :  { %v8535_v60 = vunpack.i.h.bf16 %v8533_v59  ;;  %v8534_v25 = vunpack.i.l.bf16 %v8533_v59  ;;  %v2981_v55 = vsel %vm2964_vm9, %v2916_v0, %v8529_v18  ;;  %v2982_v43 = vsel %vm2964_vm9, %v2917_v44, %v8530_v30  ;;  %v10646_v59 = vld [vmem:[#allocation2 + $0x2f0] sm:$0xff] }
 0x18c   :  { %8822 = vrot.lane.b32.xlu1 %v12840_v16, %s10704_s19  ;;  %v8538_v46 = vpop.permute.xlu0 %8537  ;;  %v674_v12 = vrot.slane %v10646_v59, 7  ;;  %v927_v30 = vsel %vm822_vm1, %v924_v10, %v926_v62  ;;  %v16933_v18 = vld [vmem:[#allocation12_spill] sm:$0xff]  ;;  %v16934_v44 = vld [vmem:[#allocation13_spill] sm:$0xff]  ;;  %v12962_v40 = vpack.i.bf16 %v10646_v59, %v10645_v22 }
 0x18d   :  { %v8540_v33 = vunpack.i.h.bf16 %v8538_v46  ;;  %v8539_v17 = vunpack.i.l.bf16 %v8538_v46  ;;  %v2983_v2 = vsel %vm2964_vm9, %v2918_v9, %v8534_v25  ;;  %v2984_v4 = vsel %vm2964_vm9, %v2919_v11, %v8535_v60  ;;  %v12915_v60 = vld [vmem:[#allocation2 + $0x308] sm:$0xff] }
 0x18e   :  { %v8543_v24 = vpop.permute.xlu1 %8542  ;;  %8827 = vrot.lane.b32.xlu0 %v12802_v27, %s10698_s24  ;;  %v417_v27 = vld [vmem:[#allocation2 + $0x2e0] sm:$0xff]  ;;  %v8089_v53 = vunpack.i.l.bf16 %v16933_v18  ;;  %v677_v25 = vrot.slane %v12915_v60, 7  ;;  %v8095_v46 = vunpack.i.h.bf16 %v16934_v44  ;;  %v8094_v9 = vunpack.i.l.bf16 %v16934_v44 }
 0x18f   :  { %v8545_v31 = vunpack.i.h.bf16 %v8543_v24  ;;  %v8544_v3 = vunpack.i.l.bf16 %v8543_v24  ;;  %v3046_v63 = vsel %vm3029_vm10, %v2981_v55, %v8539_v17  ;;  %v3047_v37 = vsel %vm3029_vm10, %v2982_v43, %v8540_v33  ;;  %v16935_v43 = vld [vmem:[#allocation38_spill] sm:$0xff] }
 0x190   :  { %8832 = vrot.lane.b32.xlu1 %v12840_v16, %s10698_s24  ;;  %v12892_v26 = vpop.permute.xlu0 %8547  ;;  %v3102_v21 = vpack.c.bf16 %v3047_v37, %v3046_v63  ;;  %v671_v54 = vrot.slane %v417_v27, 7  ;;  %v12937_v24 = vsel %vm565_vm2, %v676_v58, %v677_v25  ;;  %v12940_v28 = vsel %vm565_vm2, %v677_v25, %v679_v48  ;;  %v16937_v37 = vld [vmem:[#allocation40_spill] sm:$0xff] }
 0x191   :  { %v3048_v36 = vsel %vm3029_vm10, %v2983_v2, %v8544_v3  ;;  %v3049_v15 = vsel %vm3029_vm10, %v2984_v4, %v8545_v31  ;;  %v2595_v31 = vsel %vm51_vm0, %v16935_v43, %v8089_v53  ;;  %v16936_v4 = vld [vmem:[#allocation39_spill] sm:$0xff]  ;;  %v8549_v27 = vunpack.i.l.bf16 %v12892_v26 }
 0x192   :  { %v12894_v7 = vpop.permute.xlu1 %8552  ;;  %v3103_v50 = vpack.c.bf16 %v3049_v15, %v3048_v36  ;;  %8837 = vrot.lane.b32.xlu0 %v12832_v45, %s10699_s23  ;;  %7854 = vmatprep.mubr.msk.bf16.mxu0 %vm3153_vm11, %v3102_v21  ;;  %v925_v45 = vsel %vm822_vm1, %v923_v38, %v924_v10  ;;  %v929_v38 = vrot.slane %v10646_v59, 1  ;;  %v8090_v10 = vunpack.i.h.bf16 %v16933_v18  ;;  %v16938_v15 = vld [vmem:[#allocation41_spill] sm:$0xff] }
 0x193   :  { %v12928_v11 = vpack.i.bf16 %v927_v30, %v925_v45  ;;  %v12931_v17 = vsel %vm565_vm2, %v671_v54, %v672_v8  ;;  %v2597_v36 = vsel %vm51_vm0, %v16937_v37, %v8094_v9  ;;  %v2598_v21 = vsel %vm51_vm0, %v16938_v15, %v8095_v46 }
 0x194   :  { %8842 = vrot.lane.b32.xlu1 %v12848_v14, %s10699_s23  ;;  %7855 = vmatmul.mubr.msk.bf16.gmra.mrb[16].mxu0 %vm3153_vm11, %v3103_v50  ;;  %v8558_v35 = vpop.permute.xlu0 %8557  ;;  %v930_v3 = vsel %vm822_vm1, %v928_v13, %v929_v38  ;;  %v932_v2 = vsel %vm822_vm1, %v929_v38, %v931_v56  ;;  %v2596_v63 = vsel %vm51_vm0, %v16936_v4, %v8090_v10  ;;  %v8554_v20 = vunpack.i.l.bf16 %v12894_v7 }
 0x195   :  { %v8560_v45 = vunpack.i.h.bf16 %v8558_v35  ;;  %v8559_v30 = vunpack.i.l.bf16 %v8558_v35  ;;  %v933_v58 = vrot.slane %v12915_v60, 1  ;;  %v934_v35 = vrot.slane %v12918_v6, 1 }
 0x196   :  { %v8563_v0 = vpop.permute.xlu1 %8562  ;;  %8847 = vrot.lane.b32.xlu0 %v12836_v29, %s10700_s27  ;;  %v12934_v29 = vsel %vm565_vm2, %v672_v8, %v674_v12  ;;  %v8555_v8 = vunpack.i.h.bf16 %v12894_v7  ;;  %v12966_v12 = vpack.i.bf16 %v932_v2, %v930_v3  ;;  %v2660_v7 = vsel %vm2639_vm3, %v2595_v31, %v8549_v27 }
 0x197   :  { %v12958_v62 = vpack.i.bf16 %v12934_v29, %v12931_v17  ;;  %v8565_v18 = vunpack.i.h.bf16 %v8563_v0  ;;  %v8564_v53 = vunpack.i.l.bf16 %v8563_v0  ;;  %v2662_v25 = vsel %vm2639_vm3, %v2597_v36, %v8554_v20 }
 0x198   :  { %8852 = vrot.lane.b32.xlu1 %v12904_v1, %s10700_s27  ;;  %v8568_v33 = vpop.permute.xlu0 %8567  ;;  %v2725_v38 = vsel %vm2704_vm5, %v2660_v7, %v8559_v30 }
 0x199   :  { %v8570_v48 = vunpack.i.h.bf16 %v8568_v33  ;;  %v8569_v0 = vunpack.i.l.bf16 %v8568_v33  ;;  %v2727_v46 = vsel %vm2704_vm5, %v2662_v25, %v8564_v53 }
 0x19a   :  { %v8573_v55 = vpop.permute.xlu1 %8572  ;;  %8857 = vrot.lane.b32.xlu0 %v12840_v16, %s10701_s30  ;;  %v8550_v16 = vunpack.i.h.bf16 %v12892_v26  ;;  %v12974_v26 = vpack.i.bf16 %v12940_v28, %v12937_v24 }
 0x19b   :  { %v8575_v10 = vunpack.i.h.bf16 %v8573_v55  ;;  %v8574_v44 = vunpack.i.l.bf16 %v8573_v55  ;;  %v2790_v37 = vsel %vm2769_vm6, %v2725_v38, %v8569_v0 }
 0x19c   :  { %8862 = vrot.lane.b32.xlu1 %v12928_v11, %s10701_s30  ;;  %v8578_v50 = vpop.permute.xlu0 %8577  ;;  %v2661_v22 = vsel %vm2639_vm3, %v2596_v63, %v8550_v16 }
 0x19d   :  { %v2726_v56 = vsel %vm2704_vm5, %v2661_v22, %v8560_v45  ;;  %v8580_v43 = vunpack.i.h.bf16 %v8578_v50  ;;  %v8579_v31 = vunpack.i.l.bf16 %v8578_v50 }
 0x19e   :  { %v8583_v54 = vpop.permute.xlu1 %8582  ;;  %8867 = vrot.lane.b32.xlu0 %v12848_v14, %s10702_s18  ;;  %v2663_v14 = vsel %vm2639_vm3, %v2598_v21, %v8555_v8  ;;  %v2791_v55 = vsel %vm2769_vm6, %v2726_v56, %v8570_v48  ;;  %v2792_v21 = vsel %vm2769_vm6, %v2727_v46, %v8574_v44 }
 0x19f   :  { %v2728_v9 = vsel %vm2704_vm5, %v2663_v14, %v8565_v18  ;;  %v8585_v33 = vunpack.i.h.bf16 %v8583_v54  ;;  %v8584_v3 = vunpack.i.l.bf16 %v8583_v54  ;;  %v2855_v8 = vsel %vm2834_vm7, %v2790_v37, %v8579_v31 }
 0x1a0   :  { %8872 = vrot.lane.b32.xlu1 %v12958_v62, %s10702_s18  ;;  %v8588_v59 = vpop.permute.xlu0 %8587  ;;  %v2793_v16 = vsel %vm2769_vm6, %v2728_v9, %v8575_v10  ;;  %v2856_v20 = vsel %vm2834_vm7, %v2791_v55, %v8580_v43 }
 0x1a1   :  { %v8590_v2 = vunpack.i.h.bf16 %v8588_v59  ;;  %v8589_v4 = vunpack.i.l.bf16 %v8588_v59  ;;  %v2857_v30 = vsel %vm2834_vm7, %v2792_v21, %v8584_v3  ;;  %v2858_v18 = vsel %vm2834_vm7, %v2793_v16, %v8585_v33  ;;  %v425_v33 = vld [vmem:[#allocation2 + $0x320] sm:$0xff]  ;;  %v428_v21 = vld [vmem:[#allocation2 + $0x338] sm:$0xff]  ;;  %v258_v16 = vld [vmem:[%s16803_s0 + $0x1f0] sm:$0xff] }
 0x1a2   :  { %v8593_v13 = vpop.permute.xlu1 %8592  ;;  %8877 = vrot.lane.b32.xlu0 %v12904_v1, %s10703_s2  ;;  %323 = vst.msk [vmem:[#allocation2 + $0x448] sm:$0xff] %vm51_vm0, %v258_v16 }
 0x1a3   :  { %v8595_v36 = vunpack.i.h.bf16 %v8593_v13  ;;  %v8594_v1 = vunpack.i.l.bf16 %v8593_v13  ;;  %v2920_v53 = vsel %vm2899_vm8, %v2855_v8, %v8589_v4  ;;  %v2921_v22 = vsel %vm2899_vm8, %v2856_v20, %v8590_v2  ;;  %v424_v13 = vld [vmem:[#allocation2 + $0x318] sm:$0xff]  ;;  %v10650_v8 = vld [vmem:[#allocation2 + $0x330] sm:$0xff] }
 0x1a4   :  { %8882 = vrot.lane.b32.xlu1 %v12962_v40, %s10703_s2  ;;  %v8598_v63 = vpop.permute.xlu0 %8597  ;;  %v684_v20 = vrot.slane %v10650_v8, 7 }
 0x1a5   :  { %v8600_v27 = vunpack.i.h.bf16 %v8598_v63  ;;  %v8599_v50 = vunpack.i.l.bf16 %v8598_v63  ;;  %v2922_v59 = vsel %vm2899_vm8, %v2857_v30, %v8594_v1  ;;  %v2923_v14 = vsel %vm2899_vm8, %v2858_v18, %v8595_v36  ;;  %v429_v36 = vld [vmem:[#allocation2 + $0x340] sm:$0xff] }
 0x1a6   :  { %v8603_v15 = vpop.permute.xlu1 %8602  ;;  %8887 = vrot.lane.b32.xlu0 %v12928_v11, %s10704_s19  ;;  %v681_v1 = vrot.slane %v425_v33, 7  ;;  %v16939_v18 = vld [vmem:[#allocation14_spill] sm:$0xff] }
 0x1a7   :  { %v8605_v54 = vunpack.i.h.bf16 %v8603_v15  ;;  %v8604_v45 = vunpack.i.l.bf16 %v8603_v15  ;;  %v2985_v38 = vsel %vm2964_vm9, %v2920_v53, %v8599_v50  ;;  %v2986_v56 = vsel %vm2964_vm9, %v2921_v22, %v8600_v27  ;;  %v10649_v27 = vld [vmem:[#allocation2 + $0x328] sm:$0xff] }
 0x1a8   :  { %8892 = vrot.lane.b32.xlu1 %v12966_v12, %s10704_s19  ;;  %v8608_v7 = vpop.permute.xlu0 %8607  ;;  %v13030_v15 = vpack.i.bf16 %v12918_v6, %v12915_v60  ;;  %v682_v50 = vrot.slane %v10649_v27, 7  ;;  %v8100_v53 = vunpack.i.h.bf16 %v16939_v18  ;;  %v686_v22 = vrot.slane %v429_v36, 7 }
 0x1a9   :  { %v8610_v25 = vunpack.i.h.bf16 %v8608_v7  ;;  %v8609_v48 = vunpack.i.l.bf16 %v8608_v7  ;;  %v2987_v46 = vsel %vm2964_vm9, %v2922_v59, %v8604_v45  ;;  %v2988_v9 = vsel %vm2964_vm9, %v2923_v14, %v8605_v54  ;;  %v13051_v7 = vld [vmem:[#allocation2 + $0x348] sm:$0xff]  ;;  %v13054_v14 = vld [vmem:[#allocation2 + $0x350] sm:$0xff] }
 0x1aa   :  { %v8613_v0 = vpop.permute.xlu1 %8612  ;;  %8897 = vrot.lane.b32.xlu0 %v12928_v11, %s10698_s24  ;;  %v936_v11 = vrot.slane %v424_v13, 1  ;;  %v935_v45 = vsel %vm822_vm1, %v933_v58, %v934_v35  ;;  %v687_v59 = vrot.slane %v13051_v7, 7  ;;  %v689_v60 = vrot.slane %v13054_v14, 7 }
 0x1ab   :  { %v8615_v10 = vunpack.i.h.bf16 %v8613_v0  ;;  %v8614_v44 = vunpack.i.l.bf16 %v8613_v0  ;;  %v3050_v43 = vsel %vm3029_vm10, %v2985_v38, %v8609_v48  ;;  %v3051_v31 = vsel %vm3029_vm10, %v2986_v56, %v8610_v25  ;;  %v16940_v0 = vld [vmem:[#allocation15_spill] sm:$0xff] }
 0x1ac   :  { %8902 = vrot.lane.b32.xlu1 %v12966_v12, %s10698_s24  ;;  %v13018_v4 = vpop.permute.xlu0 %8617  ;;  %v3104_v63 = vpack.c.bf16 %v3051_v31, %v3050_v43  ;;  %v937_v30 = vsel %vm822_vm1, %v934_v35, %v936_v11  ;;  %v938_v6 = vrot.slane %v10649_v27, 1  ;;  %v939_v35 = vrot.slane %v10650_v8, 1  ;;  %v16941_v31 = vld [vmem:[#allocation42_spill] sm:$0xff] }
 0x1ad   :  { %v3052_v3 = vsel %vm3029_vm10, %v2987_v46, %v8614_v44  ;;  %v3053_v2 = vsel %vm3029_vm10, %v2988_v9, %v8615_v10  ;;  %v941_v25 = vrot.slane %v428_v21, 1  ;;  %v8099_v48 = vunpack.i.l.bf16 %v16939_v18 }
 0x1ae   :  { %v13020_v37 = vpop.permute.xlu1 %8622  ;;  %v3105_v55 = vpack.c.bf16 %v3053_v2, %v3052_v3  ;;  %8907 = vrot.lane.b32.xlu0 %v12958_v62, %s10699_s23  ;;  %7858 = vmatprep.mubr.msk.bf16.mxu0 %vm3153_vm11, %v3104_v63  ;;  %v259_v62 = vld [vmem:[%s16803_s0 + $0x1f8] sm:$0xff]  ;;  %v8105_v13 = vunpack.i.h.bf16 %v16940_v0  ;;  %v8104_v38 = vunpack.i.l.bf16 %v16940_v0  ;;  %v13064_v56 = vpack.i.bf16 %v937_v30, %v935_v45  ;;  %v16942_v63 = vld [vmem:[#allocation43_spill] sm:$0xff] }
 0x1af   :  { %324 = vst.msk [vmem:[#allocation2 + $0x450] sm:$0xff] %vm51_vm0, %v259_v62  ;;  %v13067_v44 = vsel %vm565_vm2, %v681_v1, %v682_v50  ;;  %v13073_v46 = vsel %vm565_vm2, %v686_v22, %v687_v59  ;;  %v13076_v9 = vsel %vm565_vm2, %v687_v59, %v689_v60  ;;  %v2600_v33 = vsel %vm51_vm0, %v16941_v31, %v8100_v53 }
 0x1b0   :  { %8912 = vrot.lane.b32.xlu1 %v12974_v26, %s10699_s23  ;;  %7859 = vmatmul.mubr.msk.bf16.gmra.mrb[20].mxu0 %vm3153_vm11, %v3105_v55  ;;  %v13038_v54 = vpop.permute.xlu0 %8627  ;;  %v940_v3 = vsel %vm822_vm1, %v938_v6, %v939_v35  ;;  %v942_v2 = vsel %vm822_vm1, %v939_v35, %v941_v25  ;;  %v2599_v11 = vsel %vm51_vm0, %v16942_v63, %v8099_v48  ;;  %v8619_v21 = vunpack.i.l.bf16 %v13018_v4 }
 0x1b1   :  { %v2602_v55 = vsel %vm51_vm0, %v12355_v23, %v8105_v13  ;;  %v2601_v36 = vsel %vm51_vm0, %v12348_v47, %v8104_v38  ;;  %v13098_v62 = vpack.i.bf16 %v10650_v8, %v10649_v27  ;;  %v8624_v23 = vunpack.i.l.bf16 %v13020_v37 }
 0x1b2   :  { %v8633_v58 = vpop.permute.xlu1 %8632  ;;  %8917 = vrot.lane.b32.xlu0 %v12962_v40, %s10700_s27  ;;  %v13070_v40 = vsel %vm565_vm2, %v682_v50, %v684_v20  ;;  %v8625_v50 = vunpack.i.h.bf16 %v13020_v37  ;;  %v13102_v47 = vpack.i.bf16 %v942_v2, %v940_v3  ;;  %v8630_v45 = vunpack.i.h.bf16 %v13038_v54 }
 0x1b3   :  { %v13094_v1 = vpack.i.bf16 %v13070_v40, %v13067_v44  ;;  %v8629_v30 = vunpack.i.l.bf16 %v13038_v54  ;;  %v8635_v18 = vunpack.i.h.bf16 %v8633_v58  ;;  %v8634_v53 = vunpack.i.l.bf16 %v8633_v58 }
 0x1b4   :  { %8922 = vrot.lane.b32.xlu1 %v13030_v15, %s10700_s27  ;;  %v8638_v10 = vpop.permute.xlu0 %8637  ;;  %v2664_v27 = vsel %vm2639_vm3, %v2599_v11, %v8619_v21  ;;  %v943_v22 = vrot.slane %v13051_v7, 1  ;;  %v944_v54 = vrot.slane %v13054_v14, 1  ;;  %v2666_v59 = vsel %vm2639_vm3, %v2601_v36, %v8624_v23 }
 0x1b5   :  { %v8640_v60 = vunpack.i.h.bf16 %v8638_v10  ;;  %v8639_v58 = vunpack.i.l.bf16 %v8638_v10  ;;  %v2729_v35 = vsel %vm2704_vm5, %v2664_v27, %v8629_v30  ;;  %v2731_v13 = vsel %vm2704_vm5, %v2666_v59, %v8634_v53 }
 0x1b6   :  { %v8643_v43 = vpop.permute.xlu1 %8642  ;;  %8927 = vrot.lane.b32.xlu0 %v12966_v12, %s10701_s30  ;;  %v8620_v12 = vunpack.i.h.bf16 %v13018_v4  ;;  %v13112_v4 = vpack.i.bf16 %v13076_v9, %v13073_v46 }
 0x1b7   :  { %v8645_v48 = vunpack.i.h.bf16 %v8643_v43  ;;  %v8644_v0 = vunpack.i.l.bf16 %v8643_v43 }
 0x1b8   :  { %8932 = vrot.lane.b32.xlu1 %v13064_v56, %s10701_s30  ;;  %v8648_v16 = vpop.permute.xlu0 %8647  ;;  %v2665_v37 = vsel %vm2639_vm3, %v2600_v33, %v8620_v12 }
 0x1b9   :  { %v2730_v25 = vsel %vm2704_vm5, %v2665_v37, %v8630_v45  ;;  %v8650_v31 = vunpack.i.h.bf16 %v8648_v16  ;;  %v8649_v33 = vunpack.i.l.bf16 %v8648_v16  ;;  %v2796_v21 = vsel %vm2769_vm6, %v2731_v13, %v8644_v0 }
 0x1ba   :  { %v8653_v20 = vpop.permute.xlu1 %8652  ;;  %8937 = vrot.lane.b32.xlu0 %v12974_v26, %s10702_s18  ;;  %v2667_v26 = vsel %vm2639_vm3, %v2602_v55, %v8625_v50  ;;  %v2794_v55 = vsel %vm2769_vm6, %v2729_v35, %v8639_v58  ;;  %v2795_v43 = vsel %vm2769_vm6, %v2730_v25, %v8640_v60  ;;  %v432_v25 = vld [vmem:[#allocation2 + $0x358] sm:$0xff] }
 0x1bb   :  { %v2732_v38 = vsel %vm2704_vm5, %v2667_v26, %v8635_v18  ;;  %v8655_v10 = vunpack.i.h.bf16 %v8653_v20  ;;  %v8654_v3 = vunpack.i.l.bf16 %v8653_v20  ;;  %v2859_v20 = vsel %vm2834_vm7, %v2794_v55, %v8649_v33 }
 0x1bc   :  { %8942 = vrot.lane.b32.xlu1 %v13094_v1, %s10702_s18  ;;  %v8658_v8 = vpop.permute.xlu0 %8657  ;;  %v2797_v50 = vsel %vm2769_vm6, %v2732_v38, %v8645_v48  ;;  %v2860_v45 = vsel %vm2834_vm7, %v2795_v43, %v8650_v31 }
 0x1bd   :  { %v8660_v2 = vunpack.i.h.bf16 %v8658_v8  ;;  %v8659_v63 = vunpack.i.l.bf16 %v8658_v8  ;;  %v2861_v53 = vsel %vm2834_vm7, %v2796_v21, %v8654_v3  ;;  %v2862_v37 = vsel %vm2834_vm7, %v2797_v50, %v8655_v10 }
 0x1be   :  { %v8663_v6 = vpop.permute.xlu1 %8662  ;;  %8947 = vrot.lane.b32.xlu0 %v13030_v15, %s10703_s2  ;;  %v13168_v50 = vpack.i.bf16 %v13054_v14, %v13051_v7 }
 0x1bf   :  { %v8665_v36 = vunpack.i.h.bf16 %v8663_v6  ;;  %v8664_v15 = vunpack.i.l.bf16 %v8663_v6  ;;  %v2924_v27 = vsel %vm2899_vm8, %v2859_v20, %v8659_v63  ;;  %v2925_v8 = vsel %vm2899_vm8, %v2860_v45, %v8660_v2  ;;  %v433_v2 = vld [vmem:[#allocation2 + $0x360] sm:$0xff]  ;;  %v10654_v45 = vld [vmem:[#allocation2 + $0x370] sm:$0xff] }
 0x1c0   :  { %8952 = vrot.lane.b32.xlu1 %v13098_v62, %s10703_s2  ;;  %v8668_v11 = vpop.permute.xlu0 %8667  ;;  %v691_v21 = vrot.slane %v433_v2, 7 }
 0x1c1   :  { %v8670_v16 = vunpack.i.h.bf16 %v8668_v11  ;;  %v8669_v23 = vunpack.i.l.bf16 %v8668_v11  ;;  %v2926_v59 = vsel %vm2899_vm8, %v2861_v53, %v8664_v15  ;;  %v2927_v60 = vsel %vm2899_vm8, %v2862_v37, %v8665_v36  ;;  %v16943_v37 = vld [vmem:[#allocation16_spill] sm:$0xff] }
 0x1c2   :  { %v8673_v12 = vpop.permute.xlu1 %8672  ;;  %8957 = vrot.lane.b32.xlu0 %v13064_v56, %s10704_s19 }
 0x1c3   :  { %v8675_v30 = vunpack.i.h.bf16 %v8673_v12  ;;  %v8674_v18 = vunpack.i.l.bf16 %v8673_v12  ;;  %v2989_v48 = vsel %vm2964_vm9, %v2924_v27, %v8669_v23  ;;  %v2990_v0 = vsel %vm2964_vm9, %v2925_v8, %v8670_v16  ;;  %v437_v12 = vld [vmem:[#allocation2 + $0x380] sm:$0xff]  ;;  %v436_v16 = vld [vmem:[#allocation2 + $0x378] sm:$0xff]  ;;  %v10653_v23 = vld [vmem:[#allocation2 + $0x368] sm:$0xff] }
 0x1c4   :  { %8962 = vrot.lane.b32.xlu1 %v13102_v47, %s10704_s19  ;;  %v8678_v26 = vpop.permute.xlu0 %8677  ;;  %v692_v20 = vrot.slane %v10653_v23, 7  ;;  %v8110_v27 = vunpack.i.h.bf16 %v16943_v37  ;;  %v13181_v8 = vld [vmem:[#allocation2 + $0x240] sm:$0xff]  ;;  %v948_v14 = vrot.slane %v10653_v23, 1 }
 0x1c5   :  { %v8680_v58 = vunpack.i.h.bf16 %v8678_v26  ;;  %v8679_v6 = vunpack.i.l.bf16 %v8678_v26  ;;  %v2991_v31 = vsel %vm2964_vm9, %v2926_v59, %v8674_v18  ;;  %v2992_v33 = vsel %vm2964_vm9, %v2927_v60, %v8675_v30  ;;  %v13183_v59 = vld [vmem:[#allocation2 + $0x388] sm:$0xff] }
 0x1c6   :  { %v8683_v35 = vpop.permute.xlu1 %8682  ;;  %8967 = vrot.lane.b32.xlu0 %v13064_v56, %s10698_s24  ;;  %v946_v56 = vrot.slane %v432_v25, 1  ;;  %v694_v30 = vrot.slane %v10654_v45, 7  ;;  %v696_v26 = vrot.slane %v437_v12, 7  ;;  %v697_v60 = vrot.slane %v13183_v59, 7 }
 0x1c7   :  { %v8685_v13 = vunpack.i.h.bf16 %v8683_v35  ;;  %v8684_v38 = vunpack.i.l.bf16 %v8683_v35  ;;  %v3054_v10 = vsel %vm3029_vm10, %v2989_v48, %v8679_v6  ;;  %v3055_v3 = vsel %vm3029_vm10, %v2990_v0, %v8680_v58  ;;  %v13186_v58 = vld [vmem:[#allocation2 + $0x390] sm:$0xff] }
 0x1c8   :  { %8972 = vrot.lane.b32.xlu1 %v13102_v47, %s10698_s24  ;;  %v13156_v55 = vpop.permute.xlu0 %8687  ;;  %v3106_v43 = vpack.c.bf16 %v3055_v3, %v3054_v10  ;;  %v947_v53 = vsel %vm822_vm1, %v944_v54, %v946_v56  ;;  %v699_v6 = vrot.slane %v13186_v58, 7  ;;  %v951_v35 = vrot.slane %v436_v16, 1  ;;  %v16944_v48 = vld [vmem:[#allocation17_spill] sm:$0xff] }
 0x1c9   :  { %v3056_v63 = vsel %vm3029_vm10, %v2991_v31, %v8684_v38  ;;  %v3057_v11 = vsel %vm3029_vm10, %v2992_v33, %v8685_v13  ;;  %v8109_v25 = vunpack.i.l.bf16 %v16943_v37  ;;  %v8115_v0 = vunpack.i.h.bf16 %v16944_v48 }
 0x1ca   :  { %v13158_v36 = vpop.permute.xlu1 %8692  ;;  %v3107_v15 = vpack.c.bf16 %v3057_v11, %v3056_v63  ;;  %8977 = vrot.lane.b32.xlu0 %v13094_v1, %s10699_s23  ;;  %7862 = vmatprep.mubr.msk.bf16.mxu0 %vm3153_vm11, %v3106_v43  ;;  %v945_v1 = vsel %vm822_vm1, %v943_v22, %v944_v54  ;;  %v13191_v22 = vld [vmem:[#allocation2 + $0x3a0] sm:$0xff]  ;;  %v949_v54 = vrot.slane %v10654_v45, 1  ;;  %v8114_v13 = vunpack.i.l.bf16 %v16944_v48  ;;  %v13216_v11 = vld [vmem:[#allocation2 + $0x3a8] sm:$0xff] }
 0x1cb   :  { %v13200_v38 = vpack.i.bf16 %v947_v53, %v945_v1  ;;  %v646_v31 = vrot.slane %v13181_v8, 7  ;;  %v13204_v33 = vsel %vm565_vm2, %v691_v21, %v692_v20  ;;  %v13210_v3 = vsel %vm565_vm2, %v696_v26, %v697_v60 }
 0x1cc   :  { %8982 = vrot.lane.b32.xlu1 %v13112_v4, %s10699_s23  ;;  %7863 = vmatmul.mubr.msk.bf16.gmra.mrb[24].mxu0 %vm3153_vm11, %v3107_v15  ;;  %v13170_v18 = vpop.permute.xlu0 %8697  ;;  %v13213_v2 = vsel %vm565_vm2, %v697_v60, %v699_v6  ;;  %v701_v63 = vrot.slane %v13191_v22, 7  ;;  %v702_v43 = vrot.slane %v13216_v11, 7  ;;  %v2604_v15 = vsel %vm51_vm0, %v12373_v32, %v8110_v27 }
 0x1cd   :  { %v950_v12 = vsel %vm822_vm1, %v948_v14, %v949_v54  ;;  %v952_v21 = vsel %vm822_vm1, %v949_v54, %v951_v35  ;;  %v2603_v16 = vsel %vm51_vm0, %v12366_v42, %v8109_v25  ;;  %v8689_v1 = vunpack.i.l.bf16 %v13156_v55 }
 0x1ce   :  { %v13189_v7 = vpop.permute.xlu1 %8702  ;;  %8987 = vrot.lane.b32.xlu0 %v13098_v62, %s10700_s27  ;;  %v13207_v62 = vsel %vm565_vm2, %v692_v20, %v694_v30  ;;  %v2606_v20 = vsel %vm51_vm0, %v12497_v5, %v8115_v0  ;;  %v2605_v30 = vsel %vm51_vm0, %v12521_v61, %v8114_v13  ;;  %v13239_v37 = vpack.i.bf16 %v10654_v45, %v10653_v23 }
 0x1cf   :  { %v13235_v32 = vpack.i.bf16 %v13207_v62, %v13204_v33  ;;  %v8695_v42 = vunpack.i.h.bf16 %v13158_v36  ;;  %v8694_v5 = vunpack.i.l.bf16 %v13158_v36  ;;  %v13243_v61 = vpack.i.bf16 %v952_v21, %v950_v12 }
 0x1d0   :  { %8992 = vrot.lane.b32.xlu1 %v13168_v50, %s10700_s27  ;;  %v8708_v10 = vpop.permute.xlu0 %8707  ;;  %v8700_v26 = vunpack.i.h.bf16 %v13170_v18  ;;  %v8699_v60 = vunpack.i.l.bf16 %v13170_v18  ;;  %v8705_v6 = vunpack.i.h.bf16 %v13189_v7  ;;  %v13255_v36 = vpack.i.bf16 %v13213_v2, %v13210_v3 }
 0x1d1   :  { %v2668_v45 = vsel %vm2639_vm3, %v2603_v16, %v8689_v1  ;;  %v953_v18 = vrot.slane %v13183_v59, 1  ;;  %v2671_v54 = vsel %vm2639_vm3, %v2606_v20, %v8695_v42  ;;  %v8710_v35 = vunpack.i.h.bf16 %v8708_v10 }
 0x1d2   :  { %v8713_v56 = vpop.permute.xlu1 %8712  ;;  %8997 = vrot.lane.b32.xlu0 %v13102_v47, %s10701_s30  ;;  %v8690_v47 = vunpack.i.h.bf16 %v13156_v55  ;;  %v8704_v55 = vunpack.i.l.bf16 %v13189_v7  ;;  %v2670_v7 = vsel %vm2639_vm3, %v2605_v30, %v8694_v5  ;;  %v8709_v25 = vunpack.i.l.bf16 %v8708_v10 }
 0x1d3   :  { %v2733_v0 = vsel %vm2704_vm5, %v2668_v45, %v8699_v60  ;;  %v8715_v12 = vunpack.i.h.bf16 %v8713_v56  ;;  %v2736_v16 = vsel %vm2704_vm5, %v2671_v54, %v8705_v6  ;;  %v13323_v8 = vpack.i.bf16 %v13186_v58, %v13183_v59 }
 0x1d4   :  { %9002 = vrot.lane.b32.xlu1 %v13200_v38, %s10701_s30  ;;  %v8718_v53 = vpop.permute.xlu0 %8717  ;;  %v2669_v23 = vsel %vm2639_vm3, %v2604_v15, %v8690_v47  ;;  %v8714_v15 = vunpack.i.l.bf16 %v8713_v56  ;;  %v2735_v21 = vsel %vm2704_vm5, %v2670_v7, %v8704_v55  ;;  %v958_v59 = vrot.slane %v13216_v11, 1 }
 0x1d5   :  { %v2734_v13 = vsel %vm2704_vm5, %v2669_v23, %v8700_v26  ;;  %v8720_v47 = vunpack.i.h.bf16 %v8718_v53  ;;  %v8719_v20 = vunpack.i.l.bf16 %v8718_v53  ;;  %v2798_v26 = vsel %vm2769_vm6, %v2733_v0, %v8709_v25 }
 0x1d6   :  { %v8723_v27 = vpop.permute.xlu1 %8722  ;;  %9007 = vrot.lane.b32.xlu0 %v13112_v4, %s10702_s18  ;;  %v954_v4 = vrot.slane %v13186_v58, 1  ;;  %v2799_v56 = vsel %vm2769_vm6, %v2734_v13, %v8710_v35  ;;  %v2800_v55 = vsel %vm2769_vm6, %v2735_v21, %v8714_v15  ;;  %v2801_v6 = vsel %vm2769_vm6, %v2736_v16, %v8715_v12 }
 0x1d7   :  { %v8725_v10 = vunpack.i.h.bf16 %v8723_v27  ;;  %v8724_v30 = vunpack.i.l.bf16 %v8723_v27  ;;  %v2863_v27 = vsel %vm2834_vm7, %v2798_v26, %v8719_v20  ;;  %v440_v20 = vld [vmem:[#allocation2 + $0x398] sm:$0xff] }
 0x1d8   :  { %9012 = vrot.lane.b32.xlu1 %v13235_v32, %s10702_s18  ;;  %v8728_v14 = vpop.permute.xlu0 %8727 }
 0x1d9   :  { %v8730_v1 = vunpack.i.h.bf16 %v8728_v14  ;;  %v8729_v42 = vunpack.i.l.bf16 %v8728_v14  ;;  %v2864_v14 = vsel %vm2834_vm7, %v2799_v56, %v8720_v47  ;;  %v2865_v35 = vsel %vm2834_vm7, %v2800_v55, %v8724_v30 }
 0x1da   :  { %v8733_v48 = vpop.permute.xlu1 %8732  ;;  %9017 = vrot.lane.b32.xlu0 %v13168_v50, %s10703_s2  ;;  %v2866_v25 = vsel %vm2834_vm7, %v2801_v6, %v8725_v10 }
 0x1db   :  { %v8735_v60 = vunpack.i.h.bf16 %v8733_v48  ;;  %v8734_v50 = vunpack.i.l.bf16 %v8733_v48  ;;  %v2928_v48 = vsel %vm2899_vm8, %v2863_v27, %v8729_v42  ;;  %v2929_v0 = vsel %vm2899_vm8, %v2864_v14, %v8730_v1  ;;  %v16945_v14 = vld [vmem:[#allocation7_spill] sm:$0xff] }
 0x1dc   :  { %9022 = vrot.lane.b32.xlu1 %v13239_v37, %s10703_s2  ;;  %v8738_v5 = vpop.permute.xlu0 %8737 }
 0x1dd   :  { %v8740_v53 = vunpack.i.h.bf16 %v8738_v5  ;;  %v8739_v45 = vunpack.i.l.bf16 %v8738_v5  ;;  %v2930_v12 = vsel %vm2899_vm8, %v2865_v35, %v8734_v50  ;;  %v2931_v15 = vsel %vm2899_vm8, %v2866_v25, %v8735_v60  ;;  %v445_v50 = vld [vmem:[#allocation2 + $0x3c0] sm:$0xff]  ;;  %v10658_v25 = vld [vmem:[#allocation2 + $0x3b0] sm:$0xff] }
 0x1de   :  { %v8743_v23 = vpop.permute.xlu1 %8742  ;;  %9027 = vrot.lane.b32.xlu0 %v13200_v38, %s10704_s19  ;;  %v13316_v35 = vsel %vm565_vm2, %v701_v63, %v702_v43  ;;  %v959_v58 = vrot.slane %v10658_v25, 1 }
 0x1df   :  { %v8745_v54 = vunpack.i.h.bf16 %v8743_v23  ;;  %v8744_v7 = vunpack.i.l.bf16 %v8743_v23  ;;  %v2993_v5 = vsel %vm2964_vm9, %v2928_v48, %v8739_v45  ;;  %v2994_v26 = vsel %vm2964_vm9, %v2929_v0, %v8740_v53 }
 0x1e0   :  { %9032 = vrot.lane.b32.xlu1 %v13243_v61, %s10704_s19  ;;  %v8748_v13 = vpop.permute.xlu0 %8747  ;;  %v704_v48 = vrot.slane %v10658_v25, 7  ;;  %v706_v0 = vrot.slane %v445_v50, 7 }
 0x1e1   :  { %v8750_v21 = vunpack.i.h.bf16 %v8748_v13  ;;  %v8749_v16 = vunpack.i.l.bf16 %v8748_v13  ;;  %v2995_v10 = vsel %vm2964_vm9, %v2930_v12, %v8744_v7  ;;  %v2996_v1 = vsel %vm2964_vm9, %v2931_v15, %v8745_v54  ;;  %v13328_v13 = vld [vmem:[#allocation2 + $0x3d0] sm:$0xff]  ;;  %v13331_v12 = vld [vmem:[#allocation2 + $0x3e0] sm:$0xff] }
 0x1e2   :  { %v8753_v47 = vpop.permute.xlu1 %8752  ;;  %9037 = vrot.lane.b32.xlu0 %v13200_v38, %s10698_s24  ;;  %v956_v38 = vrot.slane %v440_v20, 1  ;;  %v16946_v54 = vrot.slane %v16945_v14, 7  ;;  %v709_v63 = vrot.slane %v13328_v13, 7  ;;  %v16951_v14 = vld [vmem:[#allocation8_spill] sm:$0xff] }
 0x1e3   :  { %v8755_v30 = vunpack.i.h.bf16 %v8753_v47  ;;  %v8754_v56 = vunpack.i.l.bf16 %v8753_v47  ;;  %v3058_v42 = vsel %vm3029_vm10, %v2993_v5, %v8749_v16  ;;  %v3059_v60 = vsel %vm3029_vm10, %v2994_v26, %v8750_v21  ;;  %v16947_v47 = vld [vmem:[#allocation18_spill] sm:$0xff]  ;;  %v16948_v26 = vld [vmem:[#allocation19_spill] sm:$0xff] }
 0x1e4   :  { %9042 = vrot.lane.b32.xlu1 %v13243_v61, %s10698_s24  ;;  %v13299_v6 = vpop.permute.xlu0 %8757  ;;  %v3108_v53 = vpack.c.bf16 %v3059_v60, %v3058_v42  ;;  %v648_v7 = vsel %vm565_vm2, %v646_v31, %v16946_v54  ;;  %v444_v31 = vld [vmem:[#allocation2 + $0x3b8] sm:$0xff]  ;;  %v955_v21 = vsel %vm822_vm1, %v953_v18, %v954_v4  ;;  %v957_v16 = vsel %vm822_vm1, %v954_v4, %v956_v38  ;;  %v13360_v60 = vld [vmem:[#allocation2 + $0x3e8] sm:$0xff] }
 0x1e5   :  { %v3060_v23 = vsel %vm3029_vm10, %v2995_v10, %v8754_v56  ;;  %v3061_v55 = vsel %vm3029_vm10, %v2996_v1, %v8755_v30  ;;  %v8120_v20 = vunpack.i.h.bf16 %v16947_v47  ;;  %v8119_v5 = vunpack.i.l.bf16 %v16947_v47  ;;  %v13347_v10 = vld [vmem:[#allocation2 + $0x400] sm:$0xff] }
 0x1e6   :  { %v13301_v45 = vpop.permute.xlu1 %8762  ;;  %v3109_v27 = vpack.c.bf16 %v3061_v55, %v3060_v23  ;;  %9047 = vrot.lane.b32.xlu0 %v13235_v32, %s10699_s23  ;;  %7866 = vmatprep.mubr.msk.bf16.mxu0 %vm3153_vm11, %v3108_v53  ;;  %v13325_v32 = vld [vmem:[#allocation2 + $0x3c8] sm:$0xff]  ;;  %v8125_v30 = vunpack.i.h.bf16 %v16948_v26  ;;  %v8124_v56 = vunpack.i.l.bf16 %v16948_v26  ;;  %v961_v18 = vrot.slane %v444_v31, 1  ;;  %v13373_v53 = vld [vmem:[#allocation2 + $0x3f0] sm:$0xff] }
 0x1e7   :  { %v707_v22 = vrot.slane %v13325_v32, 7  ;;  %v13357_v4 = vsel %vm565_vm2, %v702_v43, %v704_v48  ;;  %v13365_v23 = vpack.i.bf16 %v957_v16, %v955_v21  ;;  %v2608_v54 = vsel %vm51_vm0, %v16951_v14, %v8120_v20 }
 0x1e8   :  { %9052 = vrot.lane.b32.xlu1 %v13255_v36, %s10699_s23  ;;  %7867 = vmatmul.mubr.msk.bf16.gmra.mrb[28].mxu0 %vm3153_vm11, %v3109_v27  ;;  %v13333_v15 = vpop.permute.xlu0 %8767  ;;  %v2607_v48 = vsel %vm51_vm0, %v648_v7, %v8119_v5  ;;  %v2610_v31 = vsel %vm51_vm0, %v12673_v51, %v8125_v30  ;;  %v2609_v21 = vsel %vm51_vm0, %v12678_v57, %v8124_v56  ;;  %v8760_v20 = vunpack.i.h.bf16 %v13299_v6  ;;  %v13404_v30 = vld [vmem:[#allocation2 + $0x3d8] sm:$0xff] }
 0x1e9   :  { %v13371_v55 = vsel %vm565_vm2, %v707_v22, %v709_v63  ;;  %v960_v16 = vsel %vm822_vm1, %v958_v59, %v959_v58  ;;  %v962_v47 = vsel %vm822_vm1, %v959_v58, %v961_v18  ;;  %v13395_v51 = vpack.i.bf16 %v13357_v4, %v13316_v35 }
 0x1ea   :  { %v13349_v1 = vpop.permute.xlu1 %8772  ;;  %9057 = vrot.lane.b32.xlu0 %v13239_v37, %s10700_s27  ;;  %v13368_v37 = vsel %vm565_vm2, %v706_v0, %v707_v22  ;;  %16950 = vst [vmem:[#allocation10_spill] sm:$0xff] %v13371_v55  ;;  %v13382_v0 = vld [vmem:[#allocation2 + $0x408] sm:$0xff]  ;;  %v13398_v7 = vpack.i.bf16 %v10658_v25, %v13216_v11  ;;  %v8759_v57 = vunpack.i.l.bf16 %v13299_v6  ;;  %v8764_v5 = vunpack.i.l.bf16 %v13301_v45 }
 0x1eb   :  { %16949 = vst [vmem:[#allocation25_spill] sm:$0xff] %v13368_v37  ;;  %v8770_v56 = vunpack.i.h.bf16 %v13333_v15  ;;  %v8769_v59 = vunpack.i.l.bf16 %v13333_v15  ;;  %v13408_v18 = vpack.i.bf16 %v962_v47, %v960_v16  ;;  %v8774_v11 = vunpack.i.l.bf16 %v13349_v1 }
 0x1ec   :  { %9062 = vrot.lane.b32.xlu1 %v13323_v8, %s10700_s27  ;;  %v8778_v27 = vpop.permute.xlu0 %8777  ;;  %v13415_v6 = vpack.i.bf16 %v13371_v55, %v13368_v37  ;;  %v2673_v16 = vsel %vm2639_vm3, %v2608_v54, %v8760_v20  ;;  %v2672_v47 = vsel %vm2639_vm3, %v2607_v48, %v8759_v57  ;;  %v2674_v38 = vsel %vm2639_vm3, %v2609_v21, %v8764_v5 }
 0x1ed   :  { %v2738_v43 = vsel %vm2704_vm5, %v2673_v16, %v8770_v56  ;;  %v8780_v42 = vunpack.i.h.bf16 %v8778_v27  ;;  %v8779_v50 = vunpack.i.l.bf16 %v8778_v27  ;;  %v2739_v15 = vsel %vm2704_vm5, %v2674_v38, %v8774_v11 }
 0x1ee   :  { %v8783_v63 = vpop.permute.xlu1 %8782  ;;  %9067 = vrot.lane.b32.xlu0 %v13243_v61, %s10701_s30  ;;  %v8765_v61 = vunpack.i.h.bf16 %v13301_v45  ;;  %v8775_v45 = vunpack.i.h.bf16 %v13349_v1  ;;  %v2737_v1 = vsel %vm2704_vm5, %v2672_v47, %v8769_v59 }
 0x1ef   :  { %v8785_v37 = vunpack.i.h.bf16 %v8783_v63  ;;  %v8784_v14 = vunpack.i.l.bf16 %v8783_v63  ;;  %v2802_v38 = vsel %vm2769_vm6, %v2737_v1, %v8779_v50  ;;  %v2803_v63 = vsel %vm2769_vm6, %v2738_v43, %v8780_v42 }
 0x1f0   :  { %9072 = vrot.lane.b32.xlu1 %v13365_v23, %s10701_s30  ;;  %v8788_v26 = vpop.permute.xlu0 %8787 }
 0x1f1   :  { %v8789_v55 = vunpack.i.l.bf16 %v8788_v26  ;;  %v8790_v48 = vunpack.i.h.bf16 %v8788_v26  ;;  %v2804_v11 = vsel %vm2769_vm6, %v2739_v15, %v8784_v14 }
 0x1f2   :  { %v8793_v58 = vpop.permute.xlu1 %8792  ;;  %9077 = vrot.lane.b32.xlu0 %v13255_v36, %s10702_s18  ;;  %v2675_v36 = vsel %vm2639_vm3, %v2610_v31, %v8765_v61 }
 0x1f3   :  { %v2740_v54 = vsel %vm2704_vm5, %v2675_v36, %v8775_v45  ;;  %v8795_v31 = vunpack.i.h.bf16 %v8793_v58  ;;  %v8794_v21 = vunpack.i.l.bf16 %v8793_v58  ;;  %v2867_v58 = vsel %vm2834_vm7, %v2802_v38, %v8789_v55 }
 0x1f4   :  { %9082 = vrot.lane.b32.xlu1 %v13395_v51, %s10702_s18  ;;  %v8798_v22 = vpop.permute.xlu0 %8797  ;;  %v2805_v26 = vsel %vm2769_vm6, %v2740_v54, %v8785_v37  ;;  %v13450_v37 = vld [vmem:[%s16806_s3] ss:$0 sm:$0xff] }
 0x1f5   :  { %v8800_v20 = vunpack.i.h.bf16 %v8798_v22  ;;  %v8799_v57 = vunpack.i.l.bf16 %v8798_v22  ;;  %v2868_v22 = vsel %vm2834_vm7, %v2803_v63, %v8790_v48  ;;  %v2870_v50 = vsel %vm2834_vm7, %v2805_v26, %v8795_v31 }
 0x1f6   :  { %v8803_v25 = vpop.permute.xlu1 %8802  ;;  %9087 = vrot.lane.b32.xlu0 %v13323_v8, %s10703_s2 }
 0x1f7   :  { %v8805_v27 = vunpack.i.h.bf16 %v8803_v25  ;;  %v8804_v61 = vunpack.i.l.bf16 %v8803_v25  ;;  %v2869_v25 = vsel %vm2834_vm7, %v2804_v11, %v8794_v21  ;;  %v2932_v55 = vsel %vm2899_vm8, %v2867_v58, %v8799_v57 }
 0x1f8   :  { %9092 = vrot.lane.b32.xlu1 %v13398_v7, %s10703_s2  ;;  %v8808_v5 = vpop.permute.xlu0 %8807  ;;  %v2933_v43 = vsel %vm2899_vm8, %v2868_v22, %v8800_v20  ;;  %v16952_v22 = vld [vmem:[#allocation21_spill] sm:$0xff] }
 0x1f9   :  { %v8810_v56 = vunpack.i.h.bf16 %v8808_v5  ;;  %v8809_v59 = vunpack.i.l.bf16 %v8808_v5  ;;  %v2934_v15 = vsel %vm2899_vm8, %v2869_v25, %v8804_v61  ;;  %v2935_v14 = vsel %vm2899_vm8, %v2870_v50, %v8805_v27  ;;  %v13474_v50 = vld [vmem:[#allocation2 + $0x410] sm:$0xff] }
 0x1fa   :  { %v8813_v8 = vpop.permute.xlu1 %8812  ;;  %9097 = vrot.lane.b32.xlu0 %v13365_v23, %s10704_s19  ;;  %v8130_v25 = vunpack.i.h.bf16 %v16952_v22 }
 0x1fb   :  { %v8814_v45 = vunpack.i.l.bf16 %v8813_v8  ;;  %v8815_v42 = vunpack.i.h.bf16 %v8813_v8  ;;  %v2997_v47 = vsel %vm2964_vm9, %v2932_v55, %v8809_v59  ;;  %v2998_v36 = vsel %vm2964_vm9, %v2933_v43, %v8810_v56 }
 0x1fc   :  { %9102 = vrot.lane.b32.xlu1 %v13408_v18, %s10704_s19  ;;  %v8818_v16 = vpop.permute.xlu0 %8817 }
 0x1fd   :  { %v8820_v1 = vunpack.i.h.bf16 %v8818_v16  ;;  %v8819_v54 = vunpack.i.l.bf16 %v8818_v16  ;;  %v7840_v31 = vpop.f32.mrb[0].mxu0  ;;  %v2999_v21 = vsel %vm2964_vm9, %v2934_v15, %v8814_v45  ;;  %v3000_v27 = vsel %vm2964_vm9, %v2935_v14, %v8815_v42  ;;  %v452_v14 = vld [vmem:[#allocation2 + $0x3f8] sm:$0xff] }
 0x1fe   :  { %v8823_v48 = vpop.permute.xlu1 %8822  ;;  %v3297_v57 = vadd.f32 %v7840_v31, %v13450_v37  ;;  %9107 = vrot.lane.b32.xlu0 %v13365_v23, %s10698_s24  ;;  %v3288_v20 = vpop.f32.mrb[1].mxu0  ;;  %v719_v42 = vrot.slane %v13474_v50, 7  ;;  %v8129_v16 = vunpack.i.l.bf16 %v16952_v22  ;;  %v13491_v31 = vpack.i.bf16 %v13328_v13, %v13325_v32 }
 0x1ff   :  { %v8825_v5 = vunpack.i.h.bf16 %v8823_v48  ;;  %v8824_v38 = vunpack.i.l.bf16 %v8823_v48  ;;  %v3062_v61 = vsel %vm3029_vm10, %v2997_v47, %v8819_v54  ;;  %v3063_v63 = vsel %vm3029_vm10, %v2998_v36, %v8820_v1  ;;  %v7841_v59 = vpop.f32.mrb[2].mxu0  ;;  %v13484_v1 = vld [vmem:[#allocation2 + $0x420] sm:$0xff] }
 0x200   :  { %v3289_v56 = vadd.f32 %v13450_v37, %v3288_v20  ;;  %9112 = vrot.lane.b32.xlu1 %v13408_v18, %s10698_s24  ;;  %v3545_v26 = vmax.f32 %v3297_v57, 0.0  ;;  %v3300_v23 = vadd.f32 %v7841_v59, %v13450_v37  ;;  %v13471_v58 = vpop.permute.xlu0 %8827  ;;  %v3291_v45 = vpop.f32.mrb[3].mxu0  ;;  %v3110_v36 = vpack.c.bf16 %v3063_v63, %v3062_v61  ;;  %v16957_v59 = vld [vmem:[#allocation22_spill] sm:$0xff] }
 0x201   :  { %v3064_v8 = vsel %vm3029_vm10, %v2999_v21, %v8824_v38  ;;  %v3065_v11 = vsel %vm3029_vm10, %v3000_v27, %v8825_v5  ;;  %v3292_v43 = vadd.f32 %v13450_v37, %v3291_v45  ;;  %v16953_v21 = vrot.slane %v13328_v13, 1 }
 0x202   :  { %v3543_v55 = vmax.f32 %v3289_v56, 0.0  ;;  %v13478_v15 = vpop.permute.xlu1 %8832  ;;  %3754 = vst.msk [vmem:[#allocation3 + $0x48] sm:$0xff] %vm2639_vm3, %v3545_v26  ;;  %v3546_v47 = vmax.f32 %v3300_v23, 0.0  ;;  %9117 = vrot.lane.b32.xlu0 %v13395_v51, %s10699_s23  ;;  %v3111_v48 = vpack.c.bf16 %v3065_v11, %v3064_v8  ;;  %v16954_v5 = vrot.slane %v13325_v32, 1  ;;  %7870 = vmatprep.mubr.msk.bf16.mxu0 %vm3153_vm11, %v3110_v36 }
 0x203   :  { %v3544_v54 = vmax.f32 %v3292_v43, 0.0  ;;  %v16955_v57 = vrot.slane %v13404_v30, 1  ;;  %v16956_v20 = vmov %v16953_v21  ;;  %v968_v61 = vrot.slane %v13360_v60, 1 }
 0x204   :  { %3752 = vst.msk [vmem:[#allocation3 + $0x28] sm:$0xff] %vm2639_vm3, %v3543_v55  ;;  %9122 = vrot.lane.b32.xlu1 %v13415_v6, %s10699_s23  ;;  %v965_v51 = vsel %vm822_vm1, %v16954_v5, %v16953_v21  ;;  %3755 = vst.msk [vmem:[#allocation3 + $0x50] sm:$0xff] %vm2639_vm3, %v3546_v47  ;;  %v8838_v38 = vpop.permute.xlu0 %8837  ;;  %v969_v63 = vrot.slane %v13373_v53, 1  ;;  %v971_v56 = vrot.slane %v452_v14, 1  ;;  %v8135_v32 = vunpack.i.h.bf16 %v16957_v59  ;;  %7871 = vmatmul.mubr.msk.bf16.gmra.mrb[32].mxu0 %vm3153_vm11, %v3111_v48 }
 0x205   :  { %v967_v27 = vsel %vm822_vm1, %v16956_v20, %v16955_v57  ;;  %v8134_v8 = vunpack.i.l.bf16 %v16957_v59  ;;  %3753 = vst.msk [vmem:[#allocation3 + $0x30] sm:$0xff] %vm2639_vm3, %v3544_v54  ;;  %v16958_v30 = vrot.slane %v13360_v60, 7  ;;  %v16959_v13 = vrot.slane %v13331_v12, 7  ;;  %v13540_v54 = vld [vmem:[#allocation2 + $0x428] sm:$0xff] }
 0x206   :  { %v8843_v11 = vpop.permute.xlu1 %8842  ;;  %v16960_v23 = vrot.slane %v13373_v53, 7  ;;  %v721_v55 = vrot.slane %v13484_v1, 7  ;;  %9127 = vrot.lane.b32.xlu0 %v13398_v7, %s10700_s27  ;;  %v16962_v43 = vrot.slane %v13382_v0, 7  ;;  %v16963_v14 = vrot.slane %v13347_v10, 7  ;;  %v461_v1 = vld [vmem:[#allocation2 + $0x440] sm:$0xff] }
 0x207   :  { %v13516_v26 = vsel %vm565_vm2, %v16959_v13, %v16958_v30  ;;  %v16961_v45 = vmov %v16958_v30  ;;  %v722_v48 = vrot.slane %v13540_v54, 7  ;;  %v13545_v7 = vpack.i.bf16 %v967_v27, %v965_v51 }
 0x208   :  { %v13523_v22 = vsel %vm565_vm2, %v16961_v45, %v16960_v23  ;;  %v13533_v12 = vsel %vm565_vm2, %v16963_v14, %v16962_v43  ;;  %v16964_v47 = vmov %v16962_v43  ;;  %9132 = vrot.lane.b32.xlu1 %v13491_v31, %s10700_s27  ;;  %v2612_v10 = vsel %vm51_vm0, %v12684_v49, %v8130_v25  ;;  %v8848_v5 = vpop.permute.xlu0 %8847 }
 0x209   :  { %v13538_v36 = vsel %vm565_vm2, %v16964_v47, %v719_v42  ;;  %v2611_v21 = vsel %vm51_vm0, %v12681_v19, %v8129_v16  ;;  %v970_v57 = vsel %vm822_vm1, %v968_v61, %v969_v63  ;;  %v972_v42 = vsel %vm822_vm1, %v969_v63, %v971_v56 }
 0x20a   :  { %v2614_v20 = vsel %vm51_vm0, %v12808_v41, %v8135_v32  ;;  %v2613_v59 = vsel %vm51_vm0, %v12805_v39, %v8134_v8  ;;  %v8853_v30 = vpop.permute.xlu1 %8852  ;;  %v13559_v51 = vpack.i.bf16 %v13523_v22, %v13516_v26  ;;  %v8830_v49 = vunpack.i.h.bf16 %v13471_v58  ;;  %9137 = vrot.lane.b32.xlu0 %v13408_v18, %s10701_s30 }
 0x20b   :  { %v8829_v19 = vunpack.i.l.bf16 %v13471_v58  ;;  %v13567_v25 = vpack.i.bf16 %v13373_v53, %v13360_v60  ;;  %v8835_v41 = vunpack.i.h.bf16 %v13478_v15  ;;  %v8834_v39 = vunpack.i.l.bf16 %v13478_v15 }
 0x20c   :  { %9142 = vrot.lane.b32.xlu1 %v13545_v7, %s10701_s30  ;;  %v13573_v16 = vpack.i.bf16 %v972_v42, %v970_v57  ;;  %v8858_v27 = vpop.permute.xlu0 %8857  ;;  %v13577_v58 = vpack.i.bf16 %v13538_v36, %v13533_v12  ;;  %v8840_v61 = vunpack.i.h.bf16 %v8838_v38  ;;  %v8839_v18 = vunpack.i.l.bf16 %v8838_v38 }
 0x20d   :  { %v973_v60 = vrot.slane %v13382_v0, 1  ;;  %v974_v53 = vrot.slane %v13474_v50, 1  ;;  %v2677_v56 = vsel %vm2639_vm3, %v2612_v10, %v8830_v49  ;;  %v2676_v15 = vsel %vm2639_vm3, %v2611_v21, %v8829_v19 }
 0x20e   :  { %v8863_v63 = vpop.permute.xlu1 %8862  ;;  %v8845_v32 = vunpack.i.h.bf16 %v8843_v11  ;;  %v8844_v8 = vunpack.i.l.bf16 %v8843_v11  ;;  %9147 = vrot.lane.b32.xlu0 %v13415_v6, %s10702_s18  ;;  %v2679_v13 = vsel %vm2639_vm3, %v2614_v20, %v8835_v41  ;;  %v2678_v23 = vsel %vm2639_vm3, %v2613_v59, %v8834_v39 }
 0x20f   :  { %v8850_v45 = vunpack.i.h.bf16 %v8848_v5  ;;  %v8849_v38 = vunpack.i.l.bf16 %v8848_v5  ;;  %v8855_v43 = vunpack.i.h.bf16 %v8853_v30  ;;  %v8854_v14 = vunpack.i.l.bf16 %v8853_v30 }
 0x210   :  { %9152 = vrot.lane.b32.xlu1 %v13559_v51, %s10702_s18  ;;  %v8860_v47 = vunpack.i.h.bf16 %v8858_v27  ;;  %v8859_v10 = vunpack.i.l.bf16 %v8858_v27  ;;  %v8868_v57 = vpop.permute.xlu0 %8867  ;;  %v2741_v21 = vsel %vm2704_vm5, %v2676_v15, %v8839_v18  ;;  %v2742_v11 = vsel %vm2704_vm5, %v2677_v56, %v8840_v61 }
 0x211   :  { %v8865_v42 = vunpack.i.h.bf16 %v8863_v63  ;;  %v8864_v6 = vunpack.i.l.bf16 %v8863_v63  ;;  %v2743_v20 = vsel %vm2704_vm5, %v2678_v23, %v8844_v8  ;;  %v2744_v59 = vsel %vm2704_vm5, %v2679_v13, %v8845_v32 }
 0x212   :  { %v8873_v49 = vpop.permute.xlu1 %8872  ;;  %v8870_v5 = vunpack.i.h.bf16 %v8868_v57  ;;  %v8869_v19 = vunpack.i.l.bf16 %v8868_v57  ;;  %9157 = vrot.lane.b32.xlu0 %v13491_v31, %s10703_s2  ;;  %v2806_v30 = vsel %vm2769_vm6, %v2741_v21, %v8849_v38  ;;  %v2807_v41 = vsel %vm2769_vm6, %v2742_v11, %v8850_v45 }
 0x213   :  { %v8875_v39 = vunpack.i.h.bf16 %v8873_v49  ;;  %v8874_v27 = vunpack.i.l.bf16 %v8873_v49  ;;  %v2808_v61 = vsel %vm2769_vm6, %v2743_v20, %v8854_v14  ;;  %v2809_v18 = vsel %vm2769_vm6, %v2744_v59, %v8855_v43 }
 0x214   :  { %9162 = vrot.lane.b32.xlu1 %v13567_v25, %s10703_s2  ;;  %v2871_v63 = vsel %vm2834_vm7, %v2806_v30, %v8859_v10  ;;  %v2872_v56 = vsel %vm2834_vm7, %v2807_v41, %v8860_v47  ;;  %v8878_v15 = vpop.permute.xlu0 %8877  ;;  %v2873_v31 = vsel %vm2834_vm7, %v2808_v61, %v8864_v6  ;;  %v2874_v32 = vsel %vm2834_vm7, %v2809_v18, %v8865_v42 }
 0x215   :  { %v8880_v8 = vunpack.i.h.bf16 %v8878_v15  ;;  %v8879_v13 = vunpack.i.l.bf16 %v8878_v15  ;;  %v7844_v45 = vpop.f32.mrb[4].mxu0  ;;  %v2936_v38 = vsel %vm2899_vm8, %v2871_v63, %v8869_v19  ;;  %v2937_v57 = vsel %vm2899_vm8, %v2872_v56, %v8870_v5  ;;  %v456_v63 = vld [vmem:[#allocation2 + $0x418] sm:$0xff] }
 0x216   :  { %v8883_v23 = vpop.permute.xlu1 %8882  ;;  %v3313_v43 = vadd.f32 %v7844_v45, %v13450_v37  ;;  %9167 = vrot.lane.b32.xlu0 %v13545_v7, %s10704_s19  ;;  %v3304_v47 = vpop.f32.mrb[5].mxu0  ;;  %v2938_v10 = vsel %vm2899_vm8, %v2873_v31, %v8874_v27  ;;  %v2939_v21 = vsel %vm2899_vm8, %v2874_v32, %v8875_v39 }
 0x217   :  { %v8884_v14 = vunpack.i.l.bf16 %v8883_v23  ;;  %v8885_v11 = vunpack.i.h.bf16 %v8883_v23  ;;  %v3305_v42 = vadd.f32 %v13450_v37, %v3304_v47  ;;  %v7845_v6 = vpop.f32.mrb[6].mxu0  ;;  %v3001_v49 = vsel %vm2964_vm9, %v2936_v38, %v8879_v13  ;;  %v460_v47 = vld [vmem:[#allocation2 + $0x438] sm:$0xff] }
 0x218   :  { %9172 = vrot.lane.b32.xlu1 %v13573_v16, %s10704_s19  ;;  %v3002_v20 = vsel %vm2964_vm9, %v2937_v57, %v8880_v8  ;;  %v3549_v59 = vmax.f32 %v3313_v43, 0.0  ;;  %v3316_v5 = vadd.f32 %v7845_v6, %v13450_v37  ;;  %v8888_v19 = vpop.permute.xlu0 %8887  ;;  %v3307_v30 = vpop.f32.mrb[7].mxu0  ;;  %v976_v43 = vrot.slane %v456_v63, 1 }
 0x219   :  { %v3547_v41 = vmax.f32 %v3305_v42, 0.0  ;;  %v8890_v27 = vunpack.i.h.bf16 %v8888_v19  ;;  %v8889_v61 = vunpack.i.l.bf16 %v8888_v19  ;;  %v3308_v39 = vadd.f32 %v13450_v37, %v3307_v30  ;;  %v10666_v42 = vld [vmem:[#allocation2 + $0x430] sm:$0xff] }
 0x21a   :  { %v8893_v18 = vpop.permute.xlu1 %8892  ;;  %v3003_v56 = vsel %vm2964_vm9, %v2938_v10, %v8884_v14  ;;  %3758 = vst.msk [vmem:[#allocation3 + $0x88] sm:$0xff] %vm2639_vm3, %v3549_v59  ;;  %v3550_v15 = vmax.f32 %v3316_v5, 0.0  ;;  %9177 = vrot.lane.b32.xlu0 %v13545_v7, %s10698_s24  ;;  %v3004_v8 = vsel %vm2964_vm9, %v2939_v21, %v8885_v11  ;;  %v16965_v10 = vld [vmem:[#allocation23_spill] sm:$0xff]  ;;  %v13640_v11 = vsel %vm565_vm2, %v721_v55, %v722_v48  ;;  %v16966_v5 = vld [vmem:[#allocation24_spill] sm:$0xff] }
 0x21b   :  { %v8895_v31 = vunpack.i.h.bf16 %v8893_v18  ;;  %v8894_v32 = vunpack.i.l.bf16 %v8893_v18  ;;  %3756 = vst.msk [vmem:[#allocation3 + $0x68] sm:$0xff] %vm2639_vm3, %v3547_v41  ;;  %v3066_v13 = vsel %vm3029_vm10, %v3001_v49, %v8889_v61  ;;  %v3067_v23 = vsel %vm3029_vm10, %v3002_v20, %v8890_v27  ;;  %v13651_v55 = vld [vmem:[#allocation2 + $0x448] sm:$0xff]  ;;  %v13653_v41 = vld [vmem:[#allocation2 + $0x450] sm:$0xff]  ;;  %v16967_v18 = vld [vmem:[#allocation26_spill] sm:$0xff] }
 0x21c   :  { %v3548_v45 = vmax.f32 %v3308_v39, 0.0  ;;  %9182 = vrot.lane.b32.xlu1 %v13573_v16, %s10698_s24  ;;  %3759 = vst.msk [vmem:[#allocation3 + $0x90] sm:$0xff] %vm2639_vm3, %v3550_v15  ;;  %v13632_v14 = vpop.permute.xlu0 %8897  ;;  %v3112_v7 = vpack.c.bf16 %v3067_v23, %v3066_v13  ;;  %v8140_v21 = vunpack.i.h.bf16 %v16965_v10  ;;  %v724_v6 = vrot.slane %v10666_v42, 7 }
 0x21d   :  { %v3068_v38 = vsel %vm3029_vm10, %v3003_v56, %v8894_v32  ;;  %v3069_v57 = vsel %vm3029_vm10, %v3004_v8, %v8895_v31  ;;  %v8139_v59 = vunpack.i.l.bf16 %v16965_v10  ;;  %v8145_v19 = vunpack.i.h.bf16 %v16966_v5 }
 0x21e   :  { %3757 = vst.msk [vmem:[#allocation3 + $0x70] sm:$0xff] %vm2639_vm3, %v3548_v45  ;;  %v13643_v49 = vpop.permute.xlu1 %8902  ;;  %v3113_v20 = vpack.c.bf16 %v3069_v57, %v3068_v38  ;;  %v8144_v30 = vunpack.i.l.bf16 %v16966_v5  ;;  %9187 = vrot.lane.b32.xlu0 %v13559_v51, %s10699_s23  ;;  %7874 = vmatprep.mubr.msk.bf16.mxu0 %vm3153_vm11, %v3112_v7  ;;  %v13660_v27 = vpack.i.bf16 %v13474_v50, %v13382_v0  ;;  %v978_v61 = vrot.slane %v13540_v54, 1 }
 0x21f   :  { %v979_v39 = vrot.slane %v10666_v42, 1  ;;  %v981_v51 = vrot.slane %v460_v47, 1  ;;  %v8150_v63 = vunpack.i.h.bf16 %v16967_v18  ;;  %v8149_v56 = vunpack.i.l.bf16 %v16967_v18 }
 0x220   :  { %9192 = vrot.lane.b32.xlu1 %v13577_v58, %s10699_s23  ;;  %7875 = vmatmul.mubr.msk.bf16.gmra.mrb[36].mxu0 %vm3153_vm11, %v3113_v20  ;;  %v8908_v15 = vpop.permute.xlu0 %8907  ;;  %v975_v31 = vsel %vm822_vm1, %v973_v60, %v974_v53  ;;  %v977_v32 = vsel %vm822_vm1, %v974_v53, %v976_v43  ;;  %v13676_v8 = vsel %vm565_vm2, %v722_v48, %v724_v6  ;;  %v994_v23 = vrot.slane %v461_v1, 7 }
 0x221   :  { %v995_v45 = vrot.slane %v13651_v55, 7  ;;  %v997_v38 = vrot.slane %v13653_v41, 7  ;;  %v2616_v0 = vsel %vm51_vm0, %v12814_v34, %v8140_v21  ;;  %v2615_v60 = vsel %vm51_vm0, %v12811_v52, %v8139_v59 }
 0x222   :  { %v8913_v13 = vpop.permute.xlu1 %8912  ;;  %v2618_v50 = vsel %vm51_vm0, %v12934_v29, %v8145_v19  ;;  %9197 = vrot.lane.b32.xlu0 %v13567_v25, %s10700_s27  ;;  %v2617_v48 = vsel %vm51_vm0, %v12931_v17, %v8144_v30  ;;  %v13692_v53 = vpack.i.bf16 %v977_v32, %v975_v31  ;;  %v980_v57 = vsel %vm822_vm1, %v978_v61, %v979_v39  ;;  %v16968_v25 = vld [vmem:[#allocation27_spill] sm:$0xff] }
 0x223   :  { %v982_v34 = vsel %vm822_vm1, %v979_v39, %v981_v51  ;;  %v13698_v52 = vsel %vm51_vm0, %v12940_v28, %v8150_v63  ;;  %v13702_v29 = vsel %vm51_vm0, %v12937_v24, %v8149_v56  ;;  %v8155_v7 = vunpack.i.h.bf16 %v16968_v25 }
 0x224   :  { %9202 = vrot.lane.b32.xlu1 %v13660_v27, %s10700_s27  ;;  %v8154_v17 = vunpack.i.l.bf16 %v16968_v25  ;;  %v8918_v43 = vpop.permute.xlu0 %8917  ;;  %v13708_v10 = vpack.i.bf16 %v13676_v8, %v13640_v11  ;;  %v996_v21 = vsel %vm565_vm2, %v994_v23, %v995_v45  ;;  %v998_v6 = vsel %vm565_vm2, %v995_v45, %v997_v38 }
 0x225   :  { %v13715_v24 = vpack.i.bf16 %v10666_v42, %v13540_v54  ;;  %v13717_v28 = vpack.i.bf16 %v982_v34, %v980_v57  ;;  %v8900_v20 = vunpack.i.h.bf16 %v13632_v14  ;;  %v8899_v59 = vunpack.i.l.bf16 %v13632_v14 }
 0x226   :  { %v8923_v47 = vpop.permute.xlu1 %8922  ;;  %9207 = vrot.lane.b32.xlu0 %v13573_v16, %s10701_s30  ;;  %v8905_v5 = vunpack.i.h.bf16 %v13643_v49  ;;  %v8904_v19 = vunpack.i.l.bf16 %v13643_v49  ;;  %v13725_v1 = vpack.i.bf16 %v998_v6, %v996_v21  ;;  %v8910_v16 = vunpack.i.h.bf16 %v8908_v15 }
 0x227   :  { %v8909_v61 = vunpack.i.l.bf16 %v8908_v15  ;;  %v8915_v54 = vunpack.i.h.bf16 %v8913_v13  ;;  %v8914_v42 = vunpack.i.l.bf16 %v8913_v13  ;;  %v8920_v51 = vunpack.i.h.bf16 %v8918_v43 }
 0x228   :  { %9212 = vrot.lane.b32.xlu1 %v13692_v53, %s10701_s30  ;;  %v8928_v30 = vpop.permute.xlu0 %8927  ;;  %v8919_v18 = vunpack.i.l.bf16 %v8918_v43  ;;  %v8925_v63 = vunpack.i.h.bf16 %v8923_v47  ;;  %v8924_v56 = vunpack.i.l.bf16 %v8923_v47  ;;  %v2681_v14 = vsel %vm2639_vm3, %v2616_v0, %v8900_v20 }
 0x229   :  { %v8929_v31 = vunpack.i.l.bf16 %v8928_v30  ;;  %v1006_v49 = vrot.slane %v13651_v55, 1  ;;  %v1007_v15 = vrot.slane %v13653_v41, 1  ;;  %v2680_v32 = vsel %vm2639_vm3, %v2615_v60, %v8899_v59 }
 0x22a   :  { %v8933_v39 = vpop.permute.xlu1 %8932  ;;  %9217 = vrot.lane.b32.xlu0 %v13577_v58, %s10702_s18  ;;  %v2683_v13 = vsel %vm2639_vm3, %v2618_v50, %v8905_v5  ;;  %v2682_v23 = vsel %vm2639_vm3, %v2617_v48, %v8904_v19  ;;  %v8930_v45 = vunpack.i.h.bf16 %v8928_v30  ;;  %v2745_v58 = vsel %vm2704_vm5, %v2680_v32, %v8909_v61 }
 0x22b   :  { %v2746_v0 = vsel %vm2704_vm5, %v2681_v14, %v8910_v16  ;;  %v2747_v57 = vsel %vm2704_vm5, %v2682_v23, %v8914_v42  ;;  %v2748_v34 = vsel %vm2704_vm5, %v2683_v13, %v8915_v54  ;;  %v2810_v47 = vsel %vm2769_vm6, %v2745_v58, %v8919_v18 }
 0x22c   :  { %9222 = vrot.lane.b32.xlu1 %v13708_v10, %s10702_s18  ;;  %v8938_v38 = vpop.permute.xlu0 %8937  ;;  %v2811_v21 = vsel %vm2769_vm6, %v2746_v0, %v8920_v51  ;;  %v2812_v60 = vsel %vm2769_vm6, %v2747_v57, %v8924_v56  ;;  %v2813_v50 = vsel %vm2769_vm6, %v2748_v34, %v8925_v63  ;;  %v2875_v6 = vsel %vm2834_vm7, %v2810_v47, %v8929_v31 }
 0x22d   :  { %v8935_v20 = vunpack.i.h.bf16 %v8933_v39  ;;  %v8934_v59 = vunpack.i.l.bf16 %v8933_v39  ;;  %v2876_v30 = vsel %vm2834_vm7, %v2811_v21, %v8930_v45  ;;  %v8940_v16 = vunpack.i.h.bf16 %v8938_v38 }
 0x22e   :  { %v8943_v43 = vpop.permute.xlu1 %8942  ;;  %9227 = vrot.lane.b32.xlu0 %v13660_v27, %s10703_s2  ;;  %v8939_v61 = vunpack.i.l.bf16 %v8938_v38 }
 0x22f   :  { %v7848_v48 = vpop.f32.mrb[8].mxu0  ;;  %v8945_v27 = vunpack.i.h.bf16 %v8943_v43  ;;  %v8944_v18 = vunpack.i.l.bf16 %v8943_v43  ;;  %v2877_v45 = vsel %vm2834_vm7, %v2812_v60, %v8934_v59  ;;  %v2878_v57 = vsel %vm2834_vm7, %v2813_v50, %v8935_v20 }
 0x230   :  { %v3329_v5 = vadd.f32 %v7848_v48, %v13450_v37  ;;  %9232 = vrot.lane.b32.xlu1 %v13715_v24, %s10703_s2  ;;  %v3320_v19 = vpop.f32.mrb[9].mxu0  ;;  %v8948_v42 = vpop.permute.xlu0 %8947  ;;  %v2940_v34 = vsel %vm2899_vm8, %v2875_v6, %v8939_v61  ;;  %v2941_v43 = vsel %vm2899_vm8, %v2876_v30, %v8940_v16  ;;  %v465_v16 = vld [vmem:[#allocation2 + $0x460] sm:$0xff]  ;;  %v13773_v61 = vld [vmem:[#allocation2 + $0x468] sm:$0xff] }
 0x231   :  { %v3321_v54 = vadd.f32 %v13450_v37, %v3320_v19  ;;  %v7849_v51 = vpop.f32.mrb[10].mxu0  ;;  %v8950_v32 = vunpack.i.h.bf16 %v8948_v42  ;;  %v8949_v13 = vunpack.i.l.bf16 %v8948_v42  ;;  %v2942_v60 = vsel %vm2899_vm8, %v2877_v45, %v8944_v18  ;;  %v13775_v42 = vld [vmem:[#allocation2 + $0x470] sm:$0xff]  ;;  %v3819_v45 = vld [vmem:[#allocation3 + $0x18] sm:$0xff] }
 0x232   :  { %v3553_v63 = vmax.f32 %v3329_v5, 0.0  ;;  %v3332_v56 = vadd.f32 %v7849_v51, %v13450_v37  ;;  %v8953_v39 = vpop.permute.xlu1 %8952  ;;  %v3323_v14 = vpop.f32.mrb[11].mxu0  ;;  %9237 = vrot.lane.b32.xlu0 %v13692_v53, %s10704_s19  ;;  %v2943_v48 = vsel %vm2899_vm8, %v2878_v57, %v8945_v27  ;;  %v1023_v57 = vrot.slane %v13773_v61, 7 }
 0x233   :  { %v3551_v31 = vmax.f32 %v3321_v54, 0.0  ;;  %v3324_v23 = vadd.f32 %v13450_v37, %v3323_v14  ;;  %v8955_v58 = vunpack.i.h.bf16 %v8953_v39  ;;  %v8954_v0 = vunpack.i.l.bf16 %v8953_v39  ;;  %v464_v54 = vld [vmem:[#allocation2 + $0x458] sm:$0xff] }
 0x234   :  { %3762 = vst.msk [vmem:[#allocation3 + $0xc8] sm:$0xff] %vm2639_vm3, %v3553_v63  ;;  %v3554_v38 = vmax.f32 %v3332_v56, 0.0  ;;  %9242 = vrot.lane.b32.xlu1 %v13717_v28, %s10704_s19  ;;  %v8958_v21 = vpop.permute.xlu0 %8957  ;;  %v3005_v50 = vsel %vm2964_vm9, %v2940_v34, %v8949_v13  ;;  %v3006_v6 = vsel %vm2964_vm9, %v2941_v43, %v8950_v32  ;;  %v468_v56 = vld [vmem:[#allocation2 + $0x478] sm:$0xff]  ;;  %v1009_v32 = vrot.slane %v464_v54, 1  ;;  %v13787_v13 = vld [vmem:[#allocation3 + $0x8] sm:$0xff] }
 0x235   :  { %3760 = vst.msk [vmem:[#allocation3 + $0xa8] sm:$0xff] %vm2639_vm3, %v3551_v31  ;;  %v3552_v47 = vmax.f32 %v3324_v23, 0.0  ;;  %v8960_v59 = vunpack.i.h.bf16 %v8958_v21  ;;  %v8959_v5 = vunpack.i.l.bf16 %v8958_v21  ;;  %v3007_v51 = vsel %vm2964_vm9, %v2942_v60, %v8954_v0  ;;  %v13789_v23 = vld [vmem:[#allocation3 + $0x10] sm:$0xff]  ;;  %v13800_v60 = vld [vmem:[#allocation3 + $0x20] sm:$0xff]  ;;  %v3823_v54 = vld [vmem:[#allocation3 + $0x38] sm:$0xff] }
 0x236   :  { %3763 = vst.msk [vmem:[#allocation3 + $0xd0] sm:$0xff] %vm2639_vm3, %v3554_v38  ;;  %v8963_v19 = vpop.permute.xlu1 %8962  ;;  %9247 = vrot.lane.b32.xlu0 %v13692_v53, %s10698_s24  ;;  %v3008_v27 = vsel %vm2964_vm9, %v2943_v48, %v8955_v58  ;;  %v1022_v0 = vrot.slane %v465_v16, 7  ;;  %v1025_v34 = vrot.slane %v13775_v42, 7  ;;  %v1034_v43 = vrot.slane %v13773_v61, 1  ;;  %v13802_v48 = vld [vmem:[#allocation3 + $0x40] sm:$0xff] }
 0x237   :  { %3761 = vst.msk [vmem:[#allocation3 + $0xb0] sm:$0xff] %vm2639_vm3, %v3552_v47  ;;  %v8965_v20 = vunpack.i.h.bf16 %v8963_v19  ;;  %v8964_v30 = vunpack.i.l.bf16 %v8963_v19  ;;  %v3070_v18 = vsel %vm3029_vm10, %v3005_v50, %v8959_v5  ;;  %v3071_v63 = vsel %vm3029_vm10, %v3006_v6, %v8960_v59 }
 0x238   :  { %9252 = vrot.lane.b32.xlu1 %v13717_v28, %s10698_s24  ;;  %v13785_v14 = vpop.permute.xlu0 %8967  ;;  %v3114_v31 = vpack.c.bf16 %v3071_v63, %v3070_v18  ;;  %v1035_v47 = vrot.slane %v13775_v42, 1  ;;  %v1037_v21 = vrot.slane %v468_v56, 1  ;;  %v13809_v59 = vpack.i.bf16 %v13653_v41, %v13651_v55 }
 0x239   :  { %v3072_v39 = vsel %vm3029_vm10, %v3007_v51, %v8964_v30  ;;  %v3073_v53 = vsel %vm3029_vm10, %v3008_v27, %v8965_v20  ;;  %v4312_v5 = vrot.slane %v13787_v13, 1  ;;  %v4315_v19 = vrot.slane %v3819_v45, 1  ;;  %v13851_v27 = vld [vmem:[#allocation3 + $0x30] sm:$0xff] }
 0x23a   :  { %v13791_v38 = vpop.permute.xlu1 %8972  ;;  %v3115_v58 = vpack.c.bf16 %v3073_v53, %v3072_v39  ;;  %9257 = vrot.lane.b32.xlu0 %v13708_v10, %s10699_s23  ;;  %7878 = vmatprep.mubr.msk.bf16.mxu0 %vm3153_vm11, %v3114_v31  ;;  %v4313_v10 = vrot.slane %v13789_v23, 1  ;;  %v2622_v50 = vsel %vm51_vm0, %v13070_v40, %v8155_v7  ;;  %v2621_v6 = vsel %vm51_vm0, %v13067_v44, %v8154_v17  ;;  %v13861_v53 = vld [vmem:[#allocation3 + $0x50] sm:$0xff] }
 0x23b   :  { %v1008_v30 = vsel %vm822_vm1, %v1006_v49, %v1007_v15  ;;  %v1010_v16 = vsel %vm822_vm1, %v1007_v15, %v1009_v32  ;;  %v1024_v40 = vsel %vm565_vm2, %v1022_v0, %v1023_v57  ;;  %v1026_v25 = vsel %vm565_vm2, %v1023_v57, %v1025_v34  ;;  %v13849_v15 = vld [vmem:[#allocation3 + $0x28] sm:$0xff] }
 0x23c   :  { %9262 = vrot.lane.b32.xlu1 %v13725_v1, %s10699_s23  ;;  %7879 = vmatmul.mubr.msk.bf16.gmra.mrb[40].mxu0 %vm3153_vm11, %v3115_v58  ;;  %v13821_v20 = vpop.permute.xlu0 %8977  ;;  %v13840_v55 = vsel %vm822_vm1, %v1034_v43, %v1035_v47  ;;  %v13843_v41 = vsel %vm822_vm1, %v1035_v47, %v1037_v21  ;;  %v4320_v17 = vrot.slane %v3823_v54, 1  ;;  %v13847_v49 = vpack.i.bf16 %v1010_v16, %v1008_v30 }
 0x23d   :  { %v13854_v18 = vsel %vm822_vm1, %v4312_v5, %v4313_v10  ;;  %v9291_v56 = vpack.i.bf16 %v1026_v25, %v1024_v40  ;;  %v9301_v39 = vpack.i.bf16 %v13775_v42, %v13773_v61  ;;  %v4059_v45 = vrot.slane %v13789_v23, 7 }
 0x23e   :  { %v13831_v51 = vpop.permute.xlu1 %8982  ;;  %9267 = vrot.lane.b32.xlu0 %v13715_v24, %s10700_s27  ;;  %v13857_v24 = vsel %vm822_vm1, %v4313_v10, %v4315_v19  ;;  %v4057_v0 = vrot.slane %v13787_v13, 7  ;;  %v4317_v61 = vrot.slane %v13849_v15, 1  ;;  %v4318_v42 = vrot.slane %v13851_v27, 1 }
 0x23f   :  { %v8969_v43 = vunpack.i.l.bf16 %v13785_v14  ;;  %v13881_v47 = vpack.i.bf16 %v13851_v27, %v13849_v15  ;;  %v8970_v10 = vunpack.i.h.bf16 %v13785_v14  ;;  %v8975_v5 = vunpack.i.h.bf16 %v13791_v38 }
 0x240   :  { %9272 = vrot.lane.b32.xlu1 %v13809_v59, %s10700_s27  ;;  %v8988_v63 = vpop.permute.xlu0 %8987  ;;  %v8974_v19 = vunpack.i.l.bf16 %v13791_v38  ;;  %v8979_v54 = vunpack.i.l.bf16 %v13821_v20  ;;  %v8980_v16 = vunpack.i.h.bf16 %v13821_v20  ;;  %v8985_v40 = vunpack.i.h.bf16 %v13831_v51 }
 0x241   :  { %v8984_v25 = vunpack.i.l.bf16 %v13831_v51  ;;  %v8989_v7 = vunpack.i.l.bf16 %v8988_v63  ;;  %v8990_v57 = vunpack.i.h.bf16 %v8988_v63  ;;  %v13895_v14 = vsel %vm822_vm1, %v4317_v61, %v4318_v42 }
 0x242   :  { %v8993_v31 = vpop.permute.xlu1 %8992  ;;  %9277 = vrot.lane.b32.xlu0 %v13717_v28, %s10701_s30  ;;  %v2684_v38 = vsel %vm2639_vm3, %v13702_v29, %v8969_v43  ;;  %v13901_v51 = vsel %vm822_vm1, %v4318_v42, %v4320_v17  ;;  %v2685_v63 = vsel %vm2639_vm3, %v13698_v52, %v8970_v10 }
 0x243   :  { %v8995_v34 = vunpack.i.h.bf16 %v8993_v31  ;;  %v8994_v21 = vunpack.i.l.bf16 %v8993_v31  ;;  %v2687_v31 = vsel %vm2639_vm3, %v2622_v50, %v8975_v5  ;;  %v2749_v61 = vsel %vm2704_vm5, %v2684_v38, %v8979_v54 }
 0x244   :  { %9282 = vrot.lane.b32.xlu1 %v13847_v49, %s10701_s30  ;;  %v8998_v30 = vpop.permute.xlu0 %8997  ;;  %v2750_v32 = vsel %vm2704_vm5, %v2685_v63, %v8980_v16  ;;  %v2752_v43 = vsel %vm2704_vm5, %v2687_v31, %v8985_v40 }
 0x245   :  { %v9000_v28 = vunpack.i.h.bf16 %v8998_v30  ;;  %v8999_v20 = vunpack.i.l.bf16 %v8998_v30  ;;  %v2815_v42 = vsel %vm2769_vm6, %v2750_v32, %v8990_v57  ;;  %v2817_v50 = vsel %vm2769_vm6, %v2752_v43, %v8995_v34 }
 0x246   :  { %v9003_v44 = vpop.permute.xlu1 %9002  ;;  %9287 = vrot.lane.b32.xlu0 %v13725_v1, %s10702_s18  ;;  %v2686_v1 = vsel %vm2639_vm3, %v2621_v6, %v8974_v19  ;;  %v16969_v43 = vpack.i.bf16 %v13843_v41, %v13840_v55  ;;  %v3825_v41 = vld [vmem:[#allocation3 + $0x48] sm:$0xff] }
 0x247   :  { %v2751_v29 = vsel %vm2704_vm5, %v2686_v1, %v8984_v25  ;;  %v9005_v10 = vunpack.i.h.bf16 %v9003_v44  ;;  %v2880_v19 = vsel %vm2834_vm7, %v2815_v42, %v9000_v28  ;;  %v9004_v54 = vunpack.i.l.bf16 %v9003_v44 }
 0x248   :  { %9292 = vrot.lane.b32.xlu1 %v9291_v56, %s10702_s18  ;;  %v9008_v58 = vpop.permute.xlu0 %9007  ;;  %v2814_v56 = vsel %vm2769_vm6, %v2749_v61, %v8989_v7  ;;  %v2816_v52 = vsel %vm2769_vm6, %v2751_v29, %v8994_v21 }
 0x249   :  { %v2879_v5 = vsel %vm2834_vm7, %v2814_v56, %v8999_v20  ;;  %v9010_v32 = vunpack.i.h.bf16 %v9008_v58  ;;  %v9009_v57 = vunpack.i.l.bf16 %v9008_v58  ;;  %v2881_v1 = vsel %vm2834_vm7, %v2816_v52, %v9004_v54 }
 0x24a   :  { %v9013_v17 = vpop.permute.xlu1 %9012  ;;  %9297 = vrot.lane.b32.xlu0 %v13809_v59, %s10703_s2  ;;  %v13925_v59 = vsel %vm565_vm2, %v4057_v0, %v4059_v45  ;;  %v2882_v56 = vsel %vm2834_vm7, %v2817_v50, %v9005_v10 }
 0x24b   :  { %v7852_v6 = vpop.f32.mrb[12].mxu0  ;;  %v9015_v40 = vunpack.i.h.bf16 %v9013_v17  ;;  %v9014_v25 = vunpack.i.l.bf16 %v9013_v17  ;;  %v2944_v17 = vsel %vm2899_vm8, %v2879_v5, %v9009_v57 }
 0x24c   :  { %v3345_v30 = vadd.f32 %v7852_v6, %v13450_v37  ;;  %9302 = vrot.lane.b32.xlu1 %v9301_v39, %s10703_s2  ;;  %v3336_v7 = vpop.f32.mrb[13].mxu0  ;;  %v9018_v34 = vpop.permute.xlu0 %9017 }
 0x24d   :  { %v3337_v21 = vadd.f32 %v13450_v37, %v3336_v7  ;;  %v7853_v16 = vpop.f32.mrb[14].mxu0  ;;  %v9020_v63 = vunpack.i.h.bf16 %v9018_v34  ;;  %v9019_v31 = vunpack.i.l.bf16 %v9018_v34  ;;  %v2946_v52 = vsel %vm2899_vm8, %v2881_v1, %v9014_v25 }
 0x24e   :  { %v3557_v28 = vmax.f32 %v3345_v30, 0.0  ;;  %v3348_v44 = vadd.f32 %v7853_v16, %v13450_v37  ;;  %v9023_v38 = vpop.permute.xlu1 %9022  ;;  %v3339_v20 = vpop.f32.mrb[15].mxu0  ;;  %9307 = vrot.lane.b32.xlu0 %v13847_v49, %s10704_s19  ;;  %v2947_v6 = vsel %vm2899_vm8, %v2882_v56, %v9015_v40  ;;  %v16970_v7 = vpack.i.bf16 %v13789_v23, %v13787_v13 }
 0x24f   :  { %v3555_v39 = vmax.f32 %v3337_v21, 0.0  ;;  %v3340_v58 = vadd.f32 %v13450_v37, %v3339_v20  ;;  %v9025_v61 = vunpack.i.h.bf16 %v9023_v38  ;;  %v9024_v29 = vunpack.i.l.bf16 %v9023_v38  ;;  %v16971_v38 = vld [vmem:[#allocation30_spill] sm:$0xff] }
 0x250   :  { %3766 = vst.msk [vmem:[#allocation3 + $0x108] sm:$0xff] %vm2639_vm3, %v3557_v28  ;;  %v3558_v45 = vmax.f32 %v3348_v44, 0.0  ;;  %9312 = vrot.lane.b32.xlu1 %v16969_v43, %s10704_s19  ;;  %v2945_v37 = vsel %vm2899_vm8, %v2880_v19, %v9010_v32  ;;  %v9028_v42 = vpop.permute.xlu0 %9027  ;;  %v3009_v50 = vsel %vm2964_vm9, %v2944_v17, %v9019_v31  ;;  %v4067_v23 = vrot.slane %v3825_v41, 7  ;;  %v3827_v44 = vld [vmem:[#allocation3 + $0x58] sm:$0xff]  ;;  %v16974_v43 = vld [vmem:[#allocation31_spill] sm:$0xff] }
 0x251   :  { %3764 = vst.msk [vmem:[#allocation3 + $0xe8] sm:$0xff] %vm2639_vm3, %v3555_v39  ;;  %v3556_v49 = vmax.f32 %v3340_v58, 0.0  ;;  %v9030_v54 = vunpack.i.h.bf16 %v9028_v42  ;;  %v9029_v30 = vunpack.i.l.bf16 %v9028_v42  ;;  %v3010_v10 = vsel %vm2964_vm9, %v2945_v37, %v9020_v63 }
 0x252   :  { %3767 = vst.msk [vmem:[#allocation3 + $0x110] sm:$0xff] %vm2639_vm3, %v3558_v45  ;;  %v9033_v55 = vpop.permute.xlu1 %9032  ;;  %9317 = vrot.lane.b32.xlu0 %v16970_v7, %s10698_s24  ;;  %v3011_v32 = vsel %vm2964_vm9, %v2946_v52, %v9024_v29  ;;  %v3012_v57 = vsel %vm2964_vm9, %v2947_v6, %v9025_v61  ;;  %v8160_v20 = vunpack.i.h.bf16 %v16971_v38  ;;  %v13966_v31 = vpack.i.bf16 %v13901_v51, %v13895_v14  ;;  %v13975_v61 = vld [vmem:[#allocation3 + $0x70] sm:$0xff]  ;;  %v3828_v52 = vld [vmem:[#allocation3 + $0x60] sm:$0xff]  ;;  %v3829_v6 = vld [vmem:[#allocation3 + $0x68] sm:$0xff] }
 0x253   :  { %3765 = vst.msk [vmem:[#allocation3 + $0xf0] sm:$0xff] %vm2639_vm3, %v3556_v49  ;;  %v9035_v5 = vunpack.i.h.bf16 %v9033_v55  ;;  %v9034_v19 = vunpack.i.l.bf16 %v9033_v55  ;;  %v3074_v21 = vsel %vm3029_vm10, %v3009_v50, %v9029_v30  ;;  %v3075_v34 = vsel %vm3029_vm10, %v3010_v10, %v9030_v54 }
 0x254   :  { %9322 = vrot.lane.b32.xlu1 %v13881_v47, %s10698_s24  ;;  %v13959_v25 = vpop.permute.xlu0 %9037  ;;  %v3116_v28 = vpack.c.bf16 %v3075_v34, %v3074_v21  ;;  %v16972_v58 = vrot.slane %v13851_v27, 7  ;;  %v16973_v1 = vrot.slane %v13849_v15, 7  ;;  %v8159_v29 = vunpack.i.l.bf16 %v16971_v38  ;;  %v3831_v15 = vld [vmem:[#allocation3 + $0x78] sm:$0xff] }
 0x255   :  { %v3076_v16 = vsel %vm3029_vm10, %v3011_v32, %v9034_v19  ;;  %v3077_v40 = vsel %vm3029_vm10, %v3012_v57, %v9035_v5  ;;  %v8165_v56 = vunpack.i.h.bf16 %v16974_v43  ;;  %v16975_v17 = vpack.i.bf16 %v13857_v24, %v13854_v18 }
 0x256   :  { %v13962_v39 = vpop.permute.xlu1 %9042  ;;  %v3117_v63 = vpack.c.bf16 %v3077_v40, %v3076_v16  ;;  %v13973_v45 = vsel %vm565_vm2, %v16973_v1, %v16972_v58  ;;  %7882 = vmatprep.mubr.msk.bf16.mxu0 %vm3153_vm11, %v3116_v28  ;;  %v16976_v27 = vrot.slane %v13861_v53, 7  ;;  %v8164_v51 = vunpack.i.l.bf16 %v16974_v43 }
 0x257   :  { %9327 = vrot.lane.b32.xlu0 %v16975_v17, %s10700_s27  ;;  %v16977_v37 = vmov %v16973_v1  ;;  %v16978_v49 = vrot.slane %v13800_v60, 7  ;;  %v4323_v24 = vrot.slane %v13861_v53, 1  ;;  %v4325_v42 = vrot.slane %v3827_v44, 1 }
 0x258   :  { %v13987_v14 = vsel %vm565_vm2, %v4067_v23, %v16976_v27  ;;  %7883 = vmatmul.mubr.msk.bf16.gmra.mrb[44].mxu0 %vm3153_vm11, %v3117_v63  ;;  %9332 = vrot.lane.b32.xlu1 %v13966_v31, %s10700_s27  ;;  %v14001_v54 = vpop.permute.xlu0 %9047  ;;  %v16979_v55 = vrot.slane %v13802_v48, 7  ;;  %v4074_v60 = vrot.slane %v13975_v61, 7  ;;  %v2624_v10 = vsel %vm51_vm0, %v13076_v9, %v8160_v20 }
 0x259   :  { %v13998_v18 = vsel %vm565_vm2, %v16978_v49, %v16977_v37  ;;  %v4322_v7 = vrot.slane %v3825_v41, 1  ;;  %v2623_v32 = vsel %vm51_vm0, %v13073_v46, %v8159_v29  ;;  %v2626_v48 = vsel %vm51_vm0, %v13207_v62, %v8165_v56 }
 0x25a   :  { %v9336_v30 = vpack.i.bf16 %v13973_v45, %v13998_v18  ;;  %v14008_v50 = vsel %vm565_vm2, %v16979_v55, %v4067_v23  ;;  %v14013_v5 = vpop.permute.xlu1 %9052  ;;  %v4071_v57 = vrot.slane %v3828_v52, 7  ;;  %v4072_v21 = vrot.slane %v3829_v6, 7 }
 0x25b   :  { %v14017_v19 = vpack.i.bf16 %v13987_v14, %v14008_v50  ;;  %v2625_v9 = vsel %vm51_vm0, %v13204_v33, %v8164_v51  ;;  %v4324_v34 = vsel %vm822_vm1, %v4322_v7, %v4323_v24  ;;  %v4326_v16 = vsel %vm822_vm1, %v4323_v24, %v4325_v42  ;;  %v10599_v33 = vld [vmem:[%s16807_s4] sm:$0xff]  }
 0x25c   :  { %9337 = vrot.lane.b32.xlu0 %v9336_v30, %s10702_s18  ;;  %v4330_v40 = vrot.slane %v3831_v15, 1  ;;  %v9058_v28 = vpop.permute.xlu0 %9057  ;;  %v14031_v46 = vpack.i.bf16 %v13861_v53, %v3825_v41  ;;  %v14034_v62 = vsel %vm565_vm2, %v4072_v21, %v4074_v60  ;;  %v4328_v23 = vrot.slane %v13975_v61, 1  ;;  %7902 = vmatprep.subr.bf16.mxu1 %v10599_v33 }
 0x25d   :  { %9342 = vrot.lane.b32.xlu1 %v14017_v19, %s10702_s18  ;;  %v14042_v38 = vpack.i.bf16 %v4326_v16, %v4324_v34  ;;  %v14045_v20 = vsel %vm565_vm2, %v4071_v57, %v4072_v21  ;;  %v4327_v53 = vrot.slane %v3829_v6, 1  ;;  %v9040_v41 = vunpack.i.h.bf16 %v13959_v25  ;;  %7903 = vmatpush3.bf16.msra.mxu1 %v10599_v33 }
 0x25e   :  { %v9063_v44 = vpop.permute.xlu1 %9062  ;;  %v9039_v63 = vunpack.i.l.bf16 %v13959_v25  ;;  %v14053_v58 = vpack.i.bf16 %v14034_v62, %v14045_v20  ;;  %v14056_v1 = vpack.i.bf16 %v13975_v61, %v3829_v6  ;;  %v9044_v29 = vunpack.i.l.bf16 %v13962_v39  ;;  %v10600_v25 = vld [vmem:[%s16807_s4 + $0x8] sm:$0xff]   ;;  %v10601_v6 = vld [vmem:[%s16807_s4 + $0x10] sm:$0xff]  }
 0x25f   :  { %v9049_v43 = vunpack.i.l.bf16 %v14001_v54  ;;  %v14062_v17 = vsel %vm822_vm1, %v4327_v53, %v4328_v23  ;;  %v9050_v27 = vunpack.i.h.bf16 %v14001_v54  ;;  %v9055_v61 = vunpack.i.h.bf16 %v14013_v5  ;;  %7904 = vmatprep.subr.bf16.mxu1 %v10600_v25 }
 0x260   :  { %9347 = vrot.lane.b32.xlu0 %v13881_v47, %s10704_s19  ;;  %v9045_v47 = vunpack.i.h.bf16 %v13962_v39  ;;  %v9068_v56 = vpop.permute.xlu0 %9067  ;;  %v9054_v51 = vunpack.i.l.bf16 %v14013_v5  ;;  %v9059_v37 = vunpack.i.l.bf16 %v9058_v28  ;;  %v9060_v39 = vunpack.i.h.bf16 %v9058_v28 }
 0x261   :  { %9352 = vrot.lane.b32.xlu1 %v14031_v46, %s10704_s19  ;;  %v9065_v24 = vunpack.i.h.bf16 %v9063_v44  ;;  %v9064_v42 = vunpack.i.l.bf16 %v9063_v44  ;;  %v14073_v52 = vsel %vm822_vm1, %v4328_v23, %v4330_v40  ;;  %v2689_v54 = vsel %vm2639_vm3, %v2624_v10, %v9040_v41  ;;  %7905 = vmatpush3.bf16.msra.mxu1 %v10600_v25  ;;  %v10602_v44 = vld [vmem:[%s16807_s4 + $0x18] sm:$0xff]  }
 0x262   :  { %v9073_v49 = vpop.permute.xlu1 %9072  ;;  %v2688_v30 = vsel %vm2639_vm3, %v2623_v32, %v9039_v63  ;;  %v9070_v55 = vunpack.i.h.bf16 %v9068_v56  ;;  %v9069_v60 = vunpack.i.l.bf16 %v9068_v56  ;;  %v2691_v15 = vsel %vm2639_vm3, %v2626_v48, %v9045_v47  ;;  %7906 = vmatprep.subr.bf16.mxu1 %v10601_v6  ;;  %v14102_v63 = vld [vmem:[%s16806_s3] ss:$0 sm:$0xff] }
 0x263   :  { %v2753_v5 = vsel %vm2704_vm5, %v2688_v30, %v9049_v43  ;;  %v9074_v7 = vunpack.i.l.bf16 %v9073_v49  ;;  %v2754_v21 = vsel %vm2704_vm5, %v2689_v54, %v9050_v27  ;;  %v2756_v10 = vsel %vm2704_vm5, %v2691_v15, %v9055_v61  ;;  %v10603_v15 = vld [vmem:[%s16807_s4 + $0x20] ss:$0 sps:$4 sm:$0xff]   ;;  %s10708_s4 = smov 64  }
 0x264   :  { %9357 = vrot.lane.b32.xlu0 %v13966_v31, %s10705_s21  ;;  %v2690_v31 = vsel %vm2639_vm3, %v2625_v9, %v9044_v29  ;;  %v9078_v57 = vpop.permute.xlu0 %9077  ;;  %v2818_v32 = vsel %vm2769_vm6, %v2753_v5, %v9059_v37  ;;  %v2819_v40 = vsel %vm2769_vm6, %v2754_v21, %v9060_v39  ;;  %v2821_v9 = vsel %vm2769_vm6, %v2756_v10, %v9065_v24 }
 0x265   :  { %9362 = vrot.lane.b32.xlu1 %v14042_v38, %s10705_s21  ;;  %v2755_v34 = vsel %vm2704_vm5, %v2690_v31, %v9054_v51  ;;  %v9075_v28 = vunpack.i.h.bf16 %v9073_v49  ;;  %v2883_v33 = vsel %vm2834_vm7, %v2818_v32, %v9069_v60  ;;  %v2884_v53 = vsel %vm2834_vm7, %v2819_v40, %v9070_v55  ;;  %7907 = vmatpush3.bf16.msra.mxu1 %v10601_v6 }
 0x266   :  { %v9083_v16 = vpop.permute.xlu1 %9082  ;;  %v2820_v48 = vsel %vm2769_vm6, %v2755_v34, %v9064_v42  ;;  %v9079_v41 = vunpack.i.l.bf16 %v9078_v57  ;;  %v9080_v43 = vunpack.i.h.bf16 %v9078_v57  ;;  %7908 = vmatprep.subr.bf16.mxu1 %v10602_v44 }
 0x267   :  { %v7856_v23 = vpop.f32.mrb[16].mxu0  ;;  %v9084_v56 = vunpack.i.l.bf16 %v9083_v16  ;;  %v9085_v51 = vunpack.i.h.bf16 %v9083_v16  ;;  %v2886_v54 = vsel %vm2834_vm7, %v2821_v9, %v9075_v28 }
 0x268   :  { %9367 = vrot.lane.b32.xlu0 %v14017_v19, %s10706_s26  ;;  %v3361_v47 = vadd.f32 %v14102_v63, %v7856_v23  ;;  %v3352_v29 = vpop.f32.mrb[17].mxu0  ;;  %v2885_v19 = vsel %vm2834_vm7, %v2820_v48, %v9074_v7  ;;  %v9088_v27 = vpop.permute.xlu0 %9087  ;;  %v2948_v31 = vsel %vm2899_vm8, %v2883_v33, %v9079_v41  ;;  %v2949_v57 = vsel %vm2899_vm8, %v2884_v53, %v9080_v43 }
 0x269   :  { %9372 = vrot.lane.b32.xlu1 %v14053_v58, %s10706_s26  ;;  %v3353_v25 = vadd.f32 %v14102_v63, %v3352_v29  ;;  %v7857_v61 = vpop.f32.mrb[18].mxu0  ;;  %v9089_v49 = vunpack.i.l.bf16 %v9088_v27  ;;  %v9090_v55 = vunpack.i.h.bf16 %v9088_v27  ;;  %v2950_v21 = vsel %vm2899_vm8, %v2885_v19, %v9084_v56  ;;  %7909 = vmatpush3.bf16.msra.mxu1 %v10602_v44  ;;  %v3834_v19 = vld [vmem:[#allocation3 + $0x90] sm:$0xff] }
 0x26a   :  { %v3561_v37 = vmax.f32 %v3361_v47, 0.0  ;;  %v3364_v39 = vadd.f32 %v14102_v63, %v7857_v61  ;;  %v9093_v24 = vpop.permute.xlu1 %9092  ;;  %v3355_v42 = vpop.f32.mrb[19].mxu0  ;;  %v2951_v32 = vsel %vm2899_vm8, %v2886_v54, %v9085_v51  ;;  %8015 = vmatprep.subr.msk.bf16.mxu1 %vm6752_vm12, %v10603_v15  ;;  %v6754_v53 = vsel %vm6752_vm12, %v10603_v15, 0  ;;  %v3835_v51 = vld [vmem:[#allocation3 + $0x98] sm:$0xff] }
 0x26b   :  { %v3559_v30 = vmax.f32 %v3353_v25, 0.0  ;;  %v3356_v60 = vadd.f32 %v14102_v63, %v3355_v42  ;;  %v9095_v5 = vunpack.i.h.bf16 %v9093_v24  ;;  %v9094_v7 = vunpack.i.l.bf16 %v9093_v24  ;;  %v3833_v24 = vld [vmem:[#allocation3 + $0x88] sm:$0xff] }
 0x26c   :  { %9377 = vrot.lane.b32.xlu0 %v14031_v46, %s10707_s17  ;;  %3770 = vst.msk [vmem:[#allocation3 + $0x148] sm:$0xff] %vm2639_vm3, %v3561_v37  ;;  %v3562_v6 = vmax.f32 %v3364_v39, 0.0  ;;  %v9098_v10 = vpop.permute.xlu0 %9097  ;;  %v3013_v16 = vsel %vm2964_vm9, %v2948_v31, %v9089_v49  ;;  %v3014_v28 = vsel %vm2964_vm9, %v2949_v57, %v9090_v55  ;;  %v14143_v61 = vpack.i.bf16 %v14073_v52, %v14062_v17  ;;  %v3832_v39 = vld [vmem:[#allocation3 + $0x80] sm:$0xff]  ;;  %v14159_v57 = vld [vmem:[#allocation3 + $0xa8] sm:$0xff] }
 0x26d   :  { %9382 = vrot.lane.b32.xlu1 %v14056_v1, %s10707_s17  ;;  %3768 = vst.msk [vmem:[#allocation3 + $0x128] sm:$0xff] %vm2639_vm3, %v3559_v30  ;;  %v3560_v34 = vmax.f32 %v3356_v60, 0.0  ;;  %v9100_v40 = vunpack.i.h.bf16 %v9098_v10  ;;  %v9099_v48 = vunpack.i.l.bf16 %v9098_v10  ;;  %v3015_v41 = vsel %vm2964_vm9, %v2950_v21, %v9094_v7  ;;  %7911 = vmatpush3.bf16.msra.mxu1 %v6754_v53  ;;  %v16981_v30 = vld [vmem:[#allocation33_spill] sm:$0xff]  ;;  %v3836_v7 = vld [vmem:[#allocation3 + $0xa0] sm:$0xff] }
 0x26e   :  { %3771 = vst.msk [vmem:[#allocation3 + $0x150] sm:$0xff] %vm2639_vm3, %v3562_v6  ;;  %v9103_v9 = vpop.permute.xlu1 %9102  ;;  %v3016_v47 = vsel %vm2964_vm9, %v2951_v32, %v9095_v5  ;;  %v8175_v55 = vunpack.i.h.bf16 %v16981_v30  ;;  %v4079_v17 = vrot.slane %v3834_v19, 7  ;;  %v4333_v52 = vrot.slane %v3834_v19, 1  ;;  %v14162_v32 = vld [vmem:[#allocation3 + $0xb0] sm:$0xff] }
 0x26f   :  { %3769 = vst.msk [vmem:[#allocation3 + $0x130] sm:$0xff] %vm2639_vm3, %v3560_v34  ;;  %v9105_v23 = vunpack.i.h.bf16 %v9103_v9  ;;  %v9104_v33 = vunpack.i.l.bf16 %v9103_v9  ;;  %v3078_v29 = vsel %vm3029_vm10, %v3013_v16, %v9099_v48  ;;  %v3079_v44 = vsel %vm3029_vm10, %v3014_v28, %v9100_v40  ;;  %v14175_v28 = vld [vmem:[#allocation3 + $0xb8] sm:$0xff] }
 0x270   :  { %9387 = vrot.lane.b32.xlu0 %v14042_v38, %s10708_s4  ;;  %v14139_v25 = vpop.permute.xlu0 %9107  ;;  %v3118_v27 = vpack.c.bf16 %v3079_v44, %v3078_v29  ;;  %v4335_v60 = vrot.slane %v3835_v51, 1  ;;  %v8174_v15 = vunpack.i.l.bf16 %v16981_v30  ;;  %v4076_v6 = vrot.slane %v3832_v39, 7 }
 0x271   :  { %9392 = vrot.lane.b32.xlu1 %v14031_v46, %s10698_s24  ;;  %v3080_v43 = vsel %vm3029_vm10, %v3015_v41, %v9104_v33  ;;  %v3081_v56 = vsel %vm3029_vm10, %v3016_v47, %v9105_v23  ;;  %v16980_v46 = vld [vmem:[#allocation32_spill] sm:$0xff]  ;;  %v4077_v5 = vrot.slane %v3833_v24, 7  ;;  %v16982_v21 = vmov 0.0  }
 0x272   :  { %v14145_v37 = vpop.permute.xlu1 %9112  ;;  %v3119_v49 = vpack.c.bf16 %v3081_v56, %v3080_v43  ;;  %v8170_v42 = vunpack.i.h.bf16 %v16980_v46  ;;  %v8169_v54 = vunpack.i.l.bf16 %v16980_v46  ;;  %7886 = vmatprep.mubr.msk.bf16.mxu0 %vm3153_vm11, %v3118_v27  ;;  %7990 = vmatprep.subr.bf16.mxu1 %v16982_v21  ;;  %v4332_v10 = vrot.slane %v3833_v24, 1 }
 0x273   :  { %v2630_v48 = vsel %vm51_vm0, %v13357_v4, %v8175_v55  ;;  %v14173_v9 = vsel %vm565_vm2, %v4077_v5, %v4079_v17  ;;  %v4081_v33 = vrot.slane %v3836_v7, 7  ;;  %v2629_v4 = vsel %vm51_vm0, %v13316_v35, %v8174_v15 }
 0x274   :  { %9397 = vrot.lane.b32.xlu0 %v14143_v61, %s10708_s4  ;;  %7887 = vmatmul.mubr.msk.bf16.gmra.mrb[48].mxu0 %vm3153_vm11, %v3119_v49  ;;  %v14157_v31 = vpop.permute.xlu0 %9117  ;;  %v2628_v16 = vsel %vm51_vm0, %v13213_v2, %v8170_v42  ;;  %v2627_v40 = vsel %vm51_vm0, %v13210_v3, %v8169_v54  ;;  %v4334_v23 = vsel %vm822_vm1, %v4332_v10, %v4333_v52  ;;  %v4082_v3 = vrot.slane %v14159_v57, 7 }
 0x275   :  { %9402 = vrot.lane.b32.xlu1 %v14056_v1, %s10698_s24  ;;  %v4336_v2 = vsel %vm822_vm1, %v4333_v52, %v4335_v60  ;;  %v4084_v41 = vrot.slane %v14162_v32, 7  ;;  %v14192_v44 = vpack.i.bf16 %v3834_v19, %v3833_v24  ;;  %v4340_v43 = vrot.slane %v14175_v28, 1  ;;  %v3843_v28 = vld [vmem:[#allocation3 + $0xd8] sm:$0xff] }
 0x276   :  { %v9123_v34 = vpop.permute.xlu1 %9122  ;;  %v14197_v56 = vpack.i.bf16 %v4336_v2, %v4334_v23  ;;  %v9110_v35 = vunpack.i.h.bf16 %v14139_v25  ;;  %v14203_v27 = vsel %vm565_vm2, %v4081_v33, %v4082_v3  ;;  %v14207_v51 = vpack.i.bf16 %v14162_v32, %v14159_v57 }
 0x277   :  { %v4337_v19 = vrot.slane %v14159_v57, 1  ;;  %v9109_v49 = vunpack.i.l.bf16 %v14139_v25  ;;  %v9114_v39 = vunpack.i.l.bf16 %v14145_v37  ;;  %v14214_v46 = vsel %vm565_vm2, %v4082_v3, %v4084_v41  ;;  %v3840_v57 = vld [vmem:[#allocation3 + $0xc0] sm:$0xff] }
 0x278   :  { %9407 = vrot.lane.b32.xlu0 %v14042_v38, %s10700_s27  ;;  %v9128_v53 = vpop.permute.xlu0 %9127  ;;  %v14185_v38 = vsel %vm565_vm2, %v4076_v6, %v4077_v5  ;;  %v9120_v42 = vunpack.i.h.bf16 %v14157_v31  ;;  %v9119_v54 = vunpack.i.l.bf16 %v14157_v31  ;;  %v9125_v30 = vunpack.i.h.bf16 %v9123_v34 }
 0x279   :  { %9412 = vrot.lane.b32.xlu1 %v14143_v61, %s10700_s27  ;;  %v14190_v29 = vpack.i.bf16 %v14173_v9, %v14185_v38  ;;  %v9124_v55 = vunpack.i.l.bf16 %v9123_v34  ;;  %v9130_v52 = vunpack.i.h.bf16 %v9128_v53  ;;  %v9129_v60 = vunpack.i.l.bf16 %v9128_v53 }
 0x27a   :  { %v9133_v47 = vpop.permute.xlu1 %9132  ;;  %v2693_v25 = vsel %vm2639_vm3, %v2628_v16, %v9110_v35  ;;  %v14225_v5 = vpack.i.bf16 %v14214_v46, %v14203_v27  ;;  %v4338_v31 = vrot.slane %v14162_v32, 1  ;;  %v2692_v7 = vsel %vm2639_vm3, %v2627_v40, %v9109_v49 }
 0x27b   :  { %v9135_v15 = vunpack.i.h.bf16 %v9133_v47  ;;  %v9134_v6 = vunpack.i.l.bf16 %v9133_v47  ;;  %v2694_v10 = vsel %vm2639_vm3, %v2629_v4, %v9114_v39  ;;  %v2757_v16 = vsel %vm2704_vm5, %v2692_v7, %v9119_v54 }
 0x27c   :  { %9417 = vrot.lane.b32.xlu0 %v14053_v58, %s10702_s18  ;;  %v9115_v58 = vunpack.i.h.bf16 %v14145_v37  ;;  %v9138_v24 = vpop.permute.xlu0 %9137  ;;  %v2758_v2 = vsel %vm2704_vm5, %v2693_v25, %v9120_v42  ;;  %v2759_v33 = vsel %vm2704_vm5, %v2694_v10, %v9124_v55  ;;  %v2822_v41 = vsel %vm2769_vm6, %v2757_v16, %v9129_v60 }
 0x27d   :  { %9422 = vrot.lane.b32.xlu1 %v14190_v29, %s10702_s18  ;;  %v9139_v37 = vunpack.i.l.bf16 %v9138_v24  ;;  %v9140_v23 = vunpack.i.h.bf16 %v9138_v24  ;;  %v2823_v47 = vsel %vm2769_vm6, %v2758_v2, %v9130_v52  ;;  %v2824_v40 = vsel %vm2769_vm6, %v2759_v33, %v9134_v6 }
 0x27e   :  { %v9143_v17 = vpop.permute.xlu1 %9142  ;;  %v2695_v34 = vsel %vm2639_vm3, %v2630_v48, %v9115_v58 }
 0x27f   :  { %v2760_v3 = vsel %vm2704_vm5, %v2695_v34, %v9125_v30  ;;  %v2887_v35 = vsel %vm2834_vm7, %v2822_v41, %v9139_v37  ;;  %v9145_v49 = vunpack.i.h.bf16 %v9143_v17  ;;  %v9144_v58 = vunpack.i.l.bf16 %v9143_v17 }
 0x280   :  { %9427 = vrot.lane.b32.xlu0 %v14056_v1, %s10704_s19  ;;  %v9148_v1 = vpop.permute.xlu0 %9147  ;;  %v2825_v48 = vsel %vm2769_vm6, %v2760_v3, %v9135_v15  ;;  %v2888_v42 = vsel %vm2834_vm7, %v2823_v47, %v9140_v23 }
 0x281   :  { %9432 = vrot.lane.b32.xlu1 %v14192_v44, %s10704_s19  ;;  %v9150_v54 = vunpack.i.h.bf16 %v9148_v1  ;;  %v9149_v30 = vunpack.i.l.bf16 %v9148_v1  ;;  %v2889_v23 = vsel %vm2834_vm7, %v2824_v40, %v9144_v58  ;;  %v2890_v3 = vsel %vm2834_vm7, %v2825_v48, %v9145_v49 }
 0x282   :  { %v9153_v53 = vpop.permute.xlu1 %9152 }
 0x283   :  { %v7860_v4 = vpop.f32.mrb[20].mxu0  ;;  %v9155_v15 = vunpack.i.h.bf16 %v9153_v53  ;;  %v2953_v41 = vsel %vm2899_vm8, %v2888_v42, %v9150_v54 }
 0x284   :  { %9437 = vrot.lane.b32.xlu0 %v14143_v61, %s10705_s21  ;;  %v3377_v39 = vadd.f32 %v14102_v63, %v7860_v4  ;;  %v3368_v24 = vpop.f32.mrb[21].mxu0  ;;  %v9158_v52 = vpop.permute.xlu0 %9157  ;;  %v9154_v61 = vunpack.i.l.bf16 %v9153_v53  ;;  %v2952_v53 = vsel %vm2899_vm8, %v2887_v35, %v9149_v30 }
 0x285   :  { %9442 = vrot.lane.b32.xlu1 %v14197_v56, %s10705_s21  ;;  %v3369_v55 = vadd.f32 %v14102_v63, %v3368_v24  ;;  %v7861_v60 = vpop.f32.mrb[22].mxu0  ;;  %v9160_v34 = vunpack.i.h.bf16 %v9158_v52  ;;  %v9159_v10 = vunpack.i.l.bf16 %v9158_v52  ;;  %v2955_v4 = vsel %vm2899_vm8, %v2890_v3, %v9155_v15  ;;  %v3844_v3 = vld [vmem:[#allocation3 + $0xe0] sm:$0xff] }
 0x286   :  { %v3565_v6 = vmax.f32 %v3377_v39, 0.0  ;;  %v3380_v25 = vadd.f32 %v14102_v63, %v7861_v60  ;;  %v9163_v17 = vpop.permute.xlu1 %9162  ;;  %v3371_v37 = vpop.f32.mrb[23].mxu0  ;;  %v2954_v40 = vsel %vm2899_vm8, %v2889_v23, %v9154_v61 }
 0x287   :  { %v3563_v7 = vmax.f32 %v3369_v55, 0.0  ;;  %v3372_v16 = vadd.f32 %v14102_v63, %v3371_v37  ;;  %v9165_v2 = vunpack.i.h.bf16 %v9163_v17  ;;  %v9164_v33 = vunpack.i.l.bf16 %v9163_v17 }
 0x288   :  { %9447 = vrot.lane.b32.xlu0 %v14190_v29, %s10706_s26  ;;  %3774 = vst.msk [vmem:[#allocation3 + $0x188] sm:$0xff] %vm2639_vm3, %v3565_v6  ;;  %v3566_v1 = vmax.f32 %v3380_v25, 0.0  ;;  %v9168_v29 = vpop.permute.xlu0 %9167  ;;  %v3017_v55 = vsel %vm2964_vm9, %v2952_v53, %v9159_v10  ;;  %v3018_v48 = vsel %vm2964_vm9, %v2953_v41, %v9160_v34  ;;  %v3842_v25 = vld [vmem:[#allocation3 + $0xd0] sm:$0xff]  ;;  %v4341_v34 = vsel %vm822_vm1, %v4338_v31, %v4340_v43  ;;  %v16983_v10 = vld [vmem:[#allocation34_spill] sm:$0xff]  ;;  %v14301_v53 = vld [vmem:[#allocation3 + $0xe8] sm:$0xff] }
 0x289   :  { %9452 = vrot.lane.b32.xlu1 %v14225_v5, %s10706_s26  ;;  %3772 = vst.msk [vmem:[#allocation3 + $0x168] sm:$0xff] %vm2639_vm3, %v3563_v7  ;;  %v3564_v47 = vmax.f32 %v3372_v16, 0.0  ;;  %v9170_v58 = vunpack.i.h.bf16 %v9168_v29  ;;  %v9169_v39 = vunpack.i.l.bf16 %v9168_v29  ;;  %v3019_v42 = vsel %vm2964_vm9, %v2954_v40, %v9164_v33  ;;  %v3841_v33 = vld [vmem:[#allocation3 + $0xc8] sm:$0xff]  ;;  %v14303_v40 = vld [vmem:[#allocation3 + $0xf0] sm:$0xff] }
 0x28a   :  { %3775 = vst.msk [vmem:[#allocation3 + $0x190] sm:$0xff] %vm2639_vm3, %v3566_v1  ;;  %v9173_v24 = vpop.permute.xlu1 %9172  ;;  %v3020_v54 = vsel %vm2964_vm9, %v2955_v4, %v9165_v2  ;;  %v4339_v7 = vsel %vm822_vm1, %v4337_v19, %v4338_v31  ;;  %v8180_v16 = vunpack.i.h.bf16 %v16983_v10  ;;  %v8179_v23 = vunpack.i.l.bf16 %v16983_v10  ;;  %v16984_v1 = vld [vmem:[#allocation35_spill] sm:$0xff]  ;;  %v16985_v4 = vld [vmem:[#allocation10_spill] sm:$0xff] }
 0x28b   :  { %3773 = vst.msk [vmem:[#allocation3 + $0x170] sm:$0xff] %vm2639_vm3, %v3564_v47  ;;  %v9175_v35 = vunpack.i.h.bf16 %v9173_v24  ;;  %v9174_v49 = vunpack.i.l.bf16 %v9173_v24  ;;  %v3082_v30 = vsel %vm3029_vm10, %v3017_v55, %v9169_v39  ;;  %v3083_v52 = vsel %vm3029_vm10, %v3018_v48, %v9170_v58  ;;  %v16986_v39 = vld [vmem:[#allocation25_spill] sm:$0xff] }
 0x28c   :  { %9457 = vrot.lane.b32.xlu0 %v14192_v44, %s10707_s17  ;;  %v14275_v61 = vpop.permute.xlu0 %9177  ;;  %v3120_v6 = vpack.c.bf16 %v3083_v52, %v3082_v30  ;;  %v8185_v2 = vunpack.i.h.bf16 %v16984_v1  ;;  %v4089_v32 = vrot.slane %v3842_v25, 7  ;;  %v8184_v43 = vunpack.i.l.bf16 %v16984_v1 }
 0x28d   :  { %9462 = vrot.lane.b32.xlu1 %v14207_v51, %s10707_s17  ;;  %v3084_v60 = vsel %vm3029_vm10, %v3019_v42, %v9174_v49  ;;  %v3085_v15 = vsel %vm3029_vm10, %v3020_v54, %v9175_v35  ;;  %v14299_v31 = vpack.i.bf16 %v4341_v34, %v4339_v7  ;;  %v4086_v47 = vrot.slane %v3840_v57, 7 }
 0x28e   :  { %v14277_v17 = vpop.permute.xlu1 %9182  ;;  %v3121_v37 = vpack.c.bf16 %v3085_v15, %v3084_v60  ;;  %7890 = vmatprep.mubr.msk.bf16.mxu0 %vm3153_vm11, %v3120_v6  ;;  %v4087_v29 = vrot.slane %v3841_v33, 7  ;;  %v2632_v58 = vsel %vm51_vm0, %v16985_v4, %v8180_v16  ;;  %v2634_v24 = vsel %vm51_vm0, %v13523_v22, %v8185_v2 }
 0x28f   :  { %v4345_v55 = vrot.slane %v3843_v28, 1  ;;  %v4343_v35 = vrot.slane %v3842_v25, 1  ;;  %v4091_v49 = vrot.slane %v3844_v3, 7  ;;  %v4092_v42 = vrot.slane %v14301_v53, 7 }
 0x290   :  { %9467 = vrot.lane.b32.xlu0 %v14197_v56, %s10708_s4  ;;  %7891 = vmatmul.mubr.msk.bf16.gmra.mrb[52].mxu0 %vm3153_vm11, %v3121_v37  ;;  %v9188_v19 = vpop.permute.xlu0 %9187  ;;  %v14316_v48 = vsel %vm565_vm2, %v4087_v29, %v4089_v32  ;;  %v2633_v54 = vsel %vm51_vm0, %v13516_v26, %v8184_v43  ;;  %v4342_v52 = vrot.slane %v3841_v33, 1  ;;  %v4094_v22 = vrot.slane %v14303_v40, 7 }
 0x291   :  { %9472 = vrot.lane.b32.xlu1 %v14192_v44, %s10698_s24  ;;  %v2631_v44 = vsel %vm51_vm0, %v16986_v39, %v8179_v23  ;;  %v14323_v15 = vsel %vm565_vm2, %v4086_v47, %v4087_v29  ;;  %v14331_v37 = vpack.i.bf16 %v3842_v25, %v3841_v33  ;;  %v9180_v7 = vunpack.i.h.bf16 %v14275_v61 }
 0x292   :  { %v9193_v41 = vpop.permute.xlu1 %9192  ;;  %v14329_v6 = vpack.i.bf16 %v14316_v48, %v14323_v15  ;;  %v4344_v26 = vsel %vm822_vm1, %v4342_v52, %v4343_v35  ;;  %v4346_v34 = vsel %vm822_vm1, %v4343_v35, %v4345_v55  ;;  %v14339_v10 = vsel %vm565_vm2, %v4091_v49, %v4092_v42 }
 0x293   :  { %v9185_v16 = vunpack.i.h.bf16 %v14277_v17  ;;  %v9184_v23 = vunpack.i.l.bf16 %v14277_v17  ;;  %v14345_v1 = vsel %vm565_vm2, %v4092_v42, %v4094_v22  ;;  %v9190_v2 = vunpack.i.h.bf16 %v9188_v19 }
 0x294   :  { %9477 = vrot.lane.b32.xlu0 %v14299_v31, %s10708_s4  ;;  %v9198_v30 = vpop.permute.xlu0 %9197  ;;  %v9189_v57 = vunpack.i.l.bf16 %v9188_v19  ;;  %v9195_v33 = vunpack.i.h.bf16 %v9193_v41  ;;  %v9194_v32 = vunpack.i.l.bf16 %v9193_v41  ;;  %v14352_v17 = vpack.i.bf16 %v4346_v34, %v4344_v26 }
 0x295   :  { %9482 = vrot.lane.b32.xlu1 %v14207_v51, %s10698_s24  ;;  %v9200_v43 = vunpack.i.h.bf16 %v9198_v30  ;;  %v9199_v3 = vunpack.i.l.bf16 %v9198_v30  ;;  %v14356_v19 = vpack.i.bf16 %v14345_v1, %v14339_v10  ;;  %v2699_v39 = vsel %vm2639_vm3, %v2634_v24, %v9185_v16 }
 0x296   :  { %v9203_v60 = vpop.permute.xlu1 %9202  ;;  %v2698_v55 = vsel %vm2639_vm3, %v2633_v54, %v9184_v23  ;;  %v2764_v30 = vsel %vm2704_vm5, %v2699_v39, %v9195_v33 }
 0x297   :  { %v9205_v47 = vunpack.i.h.bf16 %v9203_v60  ;;  %v9204_v29 = vunpack.i.l.bf16 %v9203_v60  ;;  %v2763_v42 = vsel %vm2704_vm5, %v2698_v55, %v9194_v32 }
 0x298   :  { %9487 = vrot.lane.b32.xlu0 %v14197_v56, %s10700_s27  ;;  %v9179_v56 = vunpack.i.l.bf16 %v14275_v61  ;;  %v9208_v25 = vpop.permute.xlu0 %9207  ;;  %v2697_v61 = vsel %vm2639_vm3, %v2632_v58, %v9180_v7 }
 0x299   :  { %9492 = vrot.lane.b32.xlu1 %v14299_v31, %s10700_s27  ;;  %v9209_v4 = vunpack.i.l.bf16 %v9208_v25  ;;  %v9210_v35 = vunpack.i.h.bf16 %v9208_v25  ;;  %v2762_v49 = vsel %vm2704_vm5, %v2697_v61, %v9190_v2  ;;  %v2829_v24 = vsel %vm2769_vm6, %v2764_v30, %v9205_v47 }
 0x29a   :  { %v9213_v28 = vpop.permute.xlu1 %9212  ;;  %v2696_v41 = vsel %vm2639_vm3, %v2631_v44, %v9179_v56  ;;  %v2827_v60 = vsel %vm2769_vm6, %v2762_v49, %v9200_v43  ;;  %v2828_v44 = vsel %vm2769_vm6, %v2763_v42, %v9204_v29 }
 0x29b   :  { %v2761_v58 = vsel %vm2704_vm5, %v2696_v41, %v9189_v57  ;;  %v9215_v26 = vunpack.i.h.bf16 %v9213_v28  ;;  %v9214_v34 = vunpack.i.l.bf16 %v9213_v28  ;;  %v2892_v23 = vsel %vm2834_vm7, %v2827_v60, %v9210_v35 }
 0x29c   :  { %9497 = vrot.lane.b32.xlu0 %v14225_v5, %s10702_s18  ;;  %v9218_v5 = vpop.permute.xlu0 %9217  ;;  %v2826_v22 = vsel %vm2769_vm6, %v2761_v58, %v9199_v3 }
 0x29d   :  { %9502 = vrot.lane.b32.xlu1 %v14329_v6, %s10702_s18  ;;  %v2891_v7 = vsel %vm2834_vm7, %v2826_v22, %v9209_v4  ;;  %v9220_v25 = vunpack.i.h.bf16 %v9218_v5  ;;  %v9219_v2 = vunpack.i.l.bf16 %v9218_v5  ;;  %v2893_v55 = vsel %vm2834_vm7, %v2828_v44, %v9214_v34 }
 0x29e   :  { %v9223_v52 = vpop.permute.xlu1 %9222  ;;  %v2894_v49 = vsel %vm2834_vm7, %v2829_v24, %v9215_v26 }
 0x29f   :  { %v7864_v54 = vpop.f32.mrb[24].mxu0  ;;  %v9225_v43 = vunpack.i.h.bf16 %v9223_v52  ;;  %v2956_v42 = vsel %vm2899_vm8, %v2891_v7, %v9219_v2  ;;  %v2957_v30 = vsel %vm2899_vm8, %v2892_v23, %v9220_v25 }
 0x2a0   :  { %9507 = vrot.lane.b32.xlu0 %v14207_v51, %s10704_s19  ;;  %v3393_v56 = vadd.f32 %v14102_v63, %v7864_v54  ;;  %v3384_v16 = vpop.f32.mrb[25].mxu0  ;;  %v9228_v33 = vpop.permute.xlu0 %9227  ;;  %v9224_v51 = vunpack.i.l.bf16 %v9223_v52 }
 0x2a1   :  { %9512 = vrot.lane.b32.xlu1 %v14331_v37, %s10704_s19  ;;  %v3385_v57 = vadd.f32 %v14102_v63, %v3384_v16  ;;  %v7865_v32 = vpop.f32.mrb[26].mxu0  ;;  %v9230_v4 = vunpack.i.h.bf16 %v9228_v33  ;;  %v9229_v41 = vunpack.i.l.bf16 %v9228_v33  ;;  %v2959_v60 = vsel %vm2899_vm8, %v2894_v49, %v9225_v43  ;;  %v3847_v16 = vld [vmem:[#allocation3 + $0xf8] sm:$0xff] }
 0x2a2   :  { %v3569_v3 = vmax.f32 %v3393_v56, 0.0  ;;  %v3396_v47 = vadd.f32 %v14102_v63, %v7865_v32  ;;  %v9233_v28 = vpop.permute.xlu1 %9232  ;;  %v3387_v29 = vpop.f32.mrb[27].mxu0  ;;  %v2958_v22 = vsel %vm2899_vm8, %v2893_v55, %v9224_v51 }
 0x2a3   :  { %v3567_v61 = vmax.f32 %v3385_v57, 0.0  ;;  %v3388_v39 = vadd.f32 %v14102_v63, %v3387_v29  ;;  %v9235_v5 = vunpack.i.h.bf16 %v9233_v28  ;;  %v9234_v58 = vunpack.i.l.bf16 %v9233_v28 }
 0x2a4   :  { %9517 = vrot.lane.b32.xlu0 %v14299_v31, %s10705_s21  ;;  %3778 = vst.msk [vmem:[#allocation3 + $0x1c8] sm:$0xff] %vm2639_vm3, %v3569_v3  ;;  %v3570_v35 = vmax.f32 %v3396_v47, 0.0  ;;  %v9238_v31 = vpop.permute.xlu0 %9237  ;;  %v3021_v56 = vsel %vm2964_vm9, %v2956_v42, %v9229_v41  ;;  %v3022_v24 = vsel %vm2964_vm9, %v2957_v30, %v9230_v4  ;;  %v14411_v28 = vpack.i.bf16 %v14303_v40, %v14301_v53  ;;  %v3848_v4 = vld [vmem:[#allocation3 + $0x100] sm:$0xff]  ;;  %v3849_v41 = vld [vmem:[#allocation3 + $0x108] sm:$0xff] }
 0x2a5   :  { %9522 = vrot.lane.b32.xlu1 %v14352_v17, %s10705_s21  ;;  %3776 = vst.msk [vmem:[#allocation3 + $0x1a8] sm:$0xff] %vm2639_vm3, %v3567_v61  ;;  %v3568_v52 = vmax.f32 %v3388_v39, 0.0  ;;  %v9240_v44 = vunpack.i.h.bf16 %v9238_v31  ;;  %v9239_v54 = vunpack.i.l.bf16 %v9238_v31  ;;  %v3023_v23 = vsel %vm2964_vm9, %v2958_v22, %v9234_v58  ;;  %v16987_v39 = vld [vmem:[#allocation36_spill] sm:$0xff]  ;;  %v3851_v22 = vld [vmem:[#allocation3 + $0x118] sm:$0xff] }
 0x2a6   :  { %3779 = vst.msk [vmem:[#allocation3 + $0x1d0] sm:$0xff] %vm2639_vm3, %v3570_v35  ;;  %v9243_v34 = vpop.permute.xlu1 %9242  ;;  %v3024_v25 = vsel %vm2964_vm9, %v2959_v60, %v9235_v5  ;;  %v4348_v29 = vrot.slane %v14303_v40, 1  ;;  %v4350_v61 = vrot.slane %v3847_v16, 1  ;;  %v8190_v55 = vunpack.i.h.bf16 %v16987_v39  ;;  %v16988_v5 = vld [vmem:[#allocation37_spill] sm:$0xff]  ;;  %v14425_v60 = vld [vmem:[#allocation3 + $0x120] sm:$0xff] }
 0x2a7   :  { %3777 = vst.msk [vmem:[#allocation3 + $0x1b0] sm:$0xff] %vm2639_vm3, %v3568_v52  ;;  %v9245_v7 = vunpack.i.h.bf16 %v9243_v34  ;;  %v9244_v26 = vunpack.i.l.bf16 %v9243_v34  ;;  %v3086_v2 = vsel %vm3029_vm10, %v3021_v56, %v9239_v54  ;;  %v3087_v57 = vsel %vm3029_vm10, %v3022_v24, %v9240_v44 }
 0x2a8   :  { %9527 = vrot.lane.b32.xlu0 %v14329_v6, %s10706_s26  ;;  %v14405_v43 = vpop.permute.xlu0 %9247  ;;  %v3122_v51 = vpack.c.bf16 %v3087_v57, %v3086_v2  ;;  %v3850_v6 = vld [vmem:[#allocation3 + $0x110] sm:$0xff]  ;;  %v8189_v35 = vunpack.i.l.bf16 %v16987_v39  ;;  %v8195_v58 = vunpack.i.h.bf16 %v16988_v5  ;;  %v8194_v49 = vunpack.i.l.bf16 %v16988_v5 }
 0x2a9   :  { %9532 = vrot.lane.b32.xlu1 %v14356_v19, %s10706_s26  ;;  %v3088_v33 = vsel %vm3029_vm10, %v3023_v23, %v9244_v26  ;;  %v3089_v32 = vsel %vm3029_vm10, %v3024_v25, %v9245_v7  ;;  %v4347_v40 = vrot.slane %v14301_v53, 1  ;;  %v4099_v42 = vrot.slane %v3850_v6, 7  ;;  %v14450_v2 = vld [vmem:[#allocation3 + $0x130] sm:$0xff] }
 0x2aa   :  { %v14407_v3 = vpop.permute.xlu1 %9252  ;;  %v3123_v47 = vpack.c.bf16 %v3089_v32, %v3088_v33  ;;  %7894 = vmatprep.mubr.msk.bf16.mxu0 %vm3153_vm11, %v3122_v51  ;;  %v4096_v52 = vrot.slane %v3848_v4, 7  ;;  %v4097_v31 = vrot.slane %v3849_v41, 7  ;;  %v4351_v34 = vsel %vm822_vm1, %v4348_v29, %v4350_v61  ;;  %v14452_v33 = vld [vmem:[#allocation3 + $0x128] sm:$0xff] }
 0x2ab   :  { %v4349_v54 = vsel %vm822_vm1, %v4347_v40, %v4348_v29  ;;  %v2636_v56 = vsel %vm51_vm0, %v13538_v36, %v8190_v55  ;;  %v2635_v24 = vsel %vm51_vm0, %v13533_v12, %v8189_v35  ;;  %v2638_v53 = vsel %vm51_vm0, %v13676_v8, %v8195_v58 }
 0x2ac   :  { %9537 = vrot.lane.b32.xlu0 %v14331_v37, %s10707_s17  ;;  %7895 = vmatmul.mubr.msk.bf16.gmra.mrb[56].mxu0 %vm3153_vm11, %v3123_v47  ;;  %v9258_v30 = vpop.permute.xlu0 %9257  ;;  %v2637_v7 = vsel %vm51_vm0, %v13640_v11, %v8194_v49  ;;  %v14442_v26 = vsel %vm565_vm2, %v4097_v31, %v4099_v42  ;;  %v4353_v16 = vrot.slane %v3850_v6, 1  ;;  %v4355_v36 = vrot.slane %v3851_v22, 1 }
 0x2ad   :  { %9542 = vrot.lane.b32.xlu1 %v14411_v28, %s10707_s17  ;;  %v4101_v23 = vrot.slane %v14425_v60, 7  ;;  %v14445_v25 = vpack.i.bf16 %v4351_v34, %v4349_v54  ;;  %v14448_v8 = vsel %vm565_vm2, %v4096_v52, %v4097_v31  ;;  %v4352_v11 = vrot.slane %v3849_v41, 1  ;;  %v3858_v60 = vld [vmem:[#allocation3 + $0x150] sm:$0xff] }
 0x2ae   :  { %v9263_v44 = vpop.permute.xlu1 %9262  ;;  %v14460_v32 = vpack.i.bf16 %v3850_v6, %v3849_v41  ;;  %v9250_v51 = vunpack.i.h.bf16 %v14405_v43  ;;  %v4356_v29 = vsel %vm822_vm1, %v4353_v16, %v4355_v36  ;;  %v4104_v61 = vrot.slane %v14450_v2, 7 }
 0x2af   :  { %v4354_v47 = vsel %vm822_vm1, %v4352_v11, %v4353_v16  ;;  %v9249_v4 = vunpack.i.l.bf16 %v14405_v43  ;;  %v9255_v39 = vunpack.i.h.bf16 %v14407_v3  ;;  %v9254_v55 = vunpack.i.l.bf16 %v14407_v3 }
 0x2b0   :  { %9547 = vrot.lane.b32.xlu0 %v14352_v17, %s10708_s4  ;;  %v9268_v12 = vpop.permute.xlu0 %9267  ;;  %v4102_v6 = vrot.slane %v14452_v33, 7  ;;  %v9260_v41 = vunpack.i.h.bf16 %v9258_v30  ;;  %v9259_v5 = vunpack.i.l.bf16 %v9258_v30  ;;  %v9265_v58 = vunpack.i.h.bf16 %v9263_v44 }
 0x2b1   :  { %9552 = vrot.lane.b32.xlu1 %v14331_v37, %s10698_s24  ;;  %v14458_v37 = vpack.i.bf16 %v14442_v26, %v14448_v8  ;;  %v9264_v49 = vunpack.i.l.bf16 %v9263_v44  ;;  %v9270_v42 = vunpack.i.h.bf16 %v9268_v12  ;;  %v9269_v52 = vunpack.i.l.bf16 %v9268_v12 }
 0x2b2   :  { %v9273_v57 = vpop.permute.xlu1 %9272  ;;  %v2701_v43 = vsel %vm2639_vm3, %v2636_v56, %v9250_v51  ;;  %v14477_v3 = vpack.i.bf16 %v4356_v29, %v4354_v47  ;;  %v14482_v30 = vsel %vm565_vm2, %v4102_v6, %v4104_v61  ;;  %v2700_v44 = vsel %vm2639_vm3, %v2635_v24, %v9249_v4 }
 0x2b3   :  { %v9275_v31 = vunpack.i.h.bf16 %v9273_v57  ;;  %v9274_v22 = vunpack.i.l.bf16 %v9273_v57  ;;  %v2703_v34 = vsel %vm2639_vm3, %v2638_v53, %v9255_v39  ;;  %v2702_v16 = vsel %vm2639_vm3, %v2637_v7, %v9254_v55 }
 0x2b4   :  { %9557 = vrot.lane.b32.xlu0 %v14445_v25, %s10708_s4  ;;  %v9278_v35 = vpop.permute.xlu0 %9277  ;;  %v2765_v56 = vsel %vm2704_vm5, %v2700_v44, %v9259_v5  ;;  %v2766_v12 = vsel %vm2704_vm5, %v2701_v43, %v9260_v41  ;;  %v2767_v11 = vsel %vm2704_vm5, %v2702_v16, %v9264_v49  ;;  %v2768_v57 = vsel %vm2704_vm5, %v2703_v34, %v9265_v58 }
 0x2b5   :  { %9562 = vrot.lane.b32.xlu1 %v14411_v28, %s10698_s24  ;;  %v9279_v54 = vunpack.i.l.bf16 %v9278_v35  ;;  %v2830_v47 = vsel %vm2769_vm6, %v2765_v56, %v9269_v52  ;;  %v2831_v29 = vsel %vm2769_vm6, %v2766_v12, %v9270_v42  ;;  %v2832_v24 = vsel %vm2769_vm6, %v2767_v11, %v9274_v22 }
 0x2b6   :  { %v9283_v40 = vpop.permute.xlu1 %9282  ;;  %v2833_v53 = vsel %vm2769_vm6, %v2768_v57, %v9275_v31  ;;  %vm6515_vm0 = vcmask 523264   ;;  %vm7588_vm5 = vcmask 91176  }
 0x2b7   :  { %v2895_v61 = vsel %vm2834_vm7, %v2830_v47, %v9279_v54  ;;  %v9285_v4 = vunpack.i.h.bf16 %v9283_v40  ;;  %v9284_v39 = vunpack.i.l.bf16 %v9283_v40 }
 0x2b8   :  { %9567 = vrot.lane.b32.xlu0 %v14352_v17, %s10700_s27  ;;  %v9280_v17 = vunpack.i.h.bf16 %v9278_v35  ;;  %v9288_v36 = vpop.permute.xlu0 %9287 }
 0x2b9   :  { %9572 = vrot.lane.b32.xlu1 %v14445_v25, %s10700_s27  ;;  %v9290_v5 = vunpack.i.h.bf16 %v9288_v36  ;;  %v9289_v58 = vunpack.i.l.bf16 %v9288_v36  ;;  %v2898_v57 = vsel %vm2834_vm7, %v2833_v53, %v9285_v4 }
 0x2ba   :  { %v9293_v51 = vpop.permute.xlu1 %9292  ;;  %v2896_v41 = vsel %vm2834_vm7, %v2831_v29, %v9280_v17  ;;  %v2897_v17 = vsel %vm2834_vm7, %v2832_v24, %v9284_v39  ;;  %vm7599_vm7 = vcmask 50176  }
 0x2bb   :  { %v7868_v7 = vpop.f32.mrb[28].mxu0  ;;  %v9295_v31 = vunpack.i.h.bf16 %v9293_v51  ;;  %v2961_v47 = vsel %vm2899_vm8, %v2896_v41, %v9290_v5 }
 0x2bc   :  { %9577 = vrot.lane.b32.xlu0 %v14356_v19, %s10702_s18  ;;  %v3409_v55 = vadd.f32 %v14102_v63, %v7868_v7  ;;  %v3400_v35 = vpop.f32.mrb[29].mxu0  ;;  %v9298_v42 = vpop.permute.xlu0 %9297  ;;  %v9294_v19 = vunpack.i.l.bf16 %v9293_v51  ;;  %v2960_v51 = vsel %vm2899_vm8, %v2895_v61, %v9289_v58 }
 0x2bd   :  { %9582 = vrot.lane.b32.xlu1 %v14458_v37, %s10702_s18  ;;  %v3401_v49 = vadd.f32 %v14102_v63, %v3400_v35  ;;  %v7869_v52 = vpop.f32.mrb[30].mxu0  ;;  %v9300_v34 = vunpack.i.h.bf16 %v9298_v42  ;;  %v9299_v16 = vunpack.i.l.bf16 %v9298_v42  ;;  %v2963_v24 = vsel %vm2899_vm8, %v2898_v57, %v9295_v31  ;;  %v3859_v57 = vld [vmem:[#allocation3 + $0x158] sm:$0xff] }
 0x2be   :  { %v3573_v22 = vmax.f32 %v3409_v55, 0.0  ;;  %v3412_v43 = vadd.f32 %v14102_v63, %v7869_v52  ;;  %v9303_v40 = vpop.permute.xlu1 %9302  ;;  %v3403_v54 = vpop.f32.mrb[31].mxu0  ;;  %v2962_v29 = vsel %vm2899_vm8, %v2897_v17, %v9294_v19  ;;  %v3857_v17 = vld [vmem:[#allocation3 + $0x148] sm:$0xff] }
 0x2bf   :  { %v3571_v44 = vmax.f32 %v3401_v49, 0.0  ;;  %v3404_v56 = vadd.f32 %v14102_v63, %v3403_v54  ;;  %v9305_v12 = vunpack.i.h.bf16 %v9303_v40  ;;  %v9304_v11 = vunpack.i.l.bf16 %v9303_v40  ;;  %v3855_v54 = vld [vmem:[#allocation3 + $0x138] sm:$0xff] }
 0x2c0   :  { %9587 = vrot.lane.b32.xlu0 %v14411_v28, %s10704_s19  ;;  %3782 = vst.msk [vmem:[#allocation3 + $0x208] sm:$0xff] %vm2639_vm3, %v3573_v22  ;;  %v3574_v36 = vmax.f32 %v3412_v43, 0.0  ;;  %v9308_v28 = vpop.permute.xlu0 %9307  ;;  %v3025_v35 = vsel %vm2964_vm9, %v2960_v51, %v9299_v16  ;;  %v3026_v53 = vsel %vm2964_vm9, %v2961_v47, %v9300_v34  ;;  %v14558_v34 = vpack.i.bf16 %v14450_v2, %v14452_v33 }
 0x2c1   :  { %9592 = vrot.lane.b32.xlu1 %v14460_v32, %s10704_s19  ;;  %3780 = vst.msk [vmem:[#allocation3 + $0x1e8] sm:$0xff] %vm2639_vm3, %v3571_v44  ;;  %v3572_v63 = vmax.f32 %v3404_v56, 0.0  ;;  %v9310_v7 = vunpack.i.h.bf16 %v9308_v28  ;;  %v9309_v39 = vunpack.i.l.bf16 %v9308_v28  ;;  %v3027_v41 = vsel %vm2964_vm9, %v2962_v29, %v9304_v11  ;;  %v3860_v28 = vld [vmem:[#allocation3 + $0x160] sm:$0xff] }
 0x2c2   :  { %3783 = vst.msk [vmem:[#allocation3 + $0x210] sm:$0xff] %vm2639_vm3, %v3574_v36  ;;  %v9313_v55 = vpop.permute.xlu1 %9312  ;;  %v3028_v5 = vsel %vm2964_vm9, %v2963_v24, %v9305_v12  ;;  %v4358_v16 = vrot.slane %v14450_v2, 1  ;;  %v4360_v56 = vrot.slane %v3855_v54, 1  ;;  %v4109_v36 = vrot.slane %v3858_v60, 7 }
 0x2c3   :  { %3781 = vst.msk [vmem:[#allocation3 + $0x1f0] sm:$0xff] %vm2639_vm3, %v3572_v63  ;;  %v9315_v61 = vunpack.i.h.bf16 %v9313_v55  ;;  %v9314_v4 = vunpack.i.l.bf16 %v9313_v55  ;;  %v3090_v58 = vsel %vm3029_vm10, %v3025_v35, %v9309_v39  ;;  %v3091_v49 = vsel %vm3029_vm10, %v3026_v53, %v9310_v7 }
 0x2c4   :  { %9597 = vrot.lane.b32.xlu0 %v14445_v25, %s10705_s21  ;;  %v14531_v31 = vpop.permute.xlu0 %9317  ;;  %v3124_v19 = vpack.c.bf16 %v3091_v49, %v3090_v58  ;;  %v14538_v25 = vsel %vm565_vm2, %v4101_v23, %v4102_v6  ;;  %v3816_v23 = vld [vmem:[#allocation3] sm:$0xff]  ;;  %v4357_v11 = vrot.slane %v14452_v33, 1  ;;  %v4107_v63 = vrot.slane %v3857_v17, 7  ;;  %v14591_v58 = vld [vmem:[#allocation3 + $0x170] sm:$0xff] }
 0x2c5   :  { %9602 = vrot.lane.b32.xlu1 %v14477_v3, %s10705_s21  ;;  %v3092_v42 = vsel %vm3029_vm10, %v3027_v41, %v9314_v4  ;;  %v3093_v52 = vsel %vm3029_vm10, %v3028_v5, %v9315_v61  ;;  %v14544_v40 = vpack.i.bf16 %v14482_v30, %v14538_v25  ;;  %v4056_v12 = vrot.slane %v3816_v23, 7  ;;  %v14589_v5 = vld [vmem:[#allocation3 + $0x168] sm:$0xff] }
 0x2c6   :  { %v14540_v22 = vpop.permute.xlu1 %9322  ;;  %v3125_v43 = vpack.c.bf16 %v3093_v52, %v3092_v42  ;;  %7898 = vmatprep.mubr.msk.bf16.mxu0 %vm3153_vm11, %v3124_v19  ;;  %v4359_v29 = vsel %vm822_vm1, %v4357_v11, %v4358_v16  ;;  %v4361_v24 = vsel %vm822_vm1, %v4358_v16, %v4360_v56  ;;  %v14575_v7 = vsel %vm565_vm2, %v4107_v63, %v4109_v36 }
 0x2c7   :  { %v4363_v39 = vrot.slane %v3858_v60, 1  ;;  %v4365_v33 = vrot.slane %v3859_v57, 1  ;;  %v4058_v55 = vsel %vm565_vm2, %v4056_v12, %v4057_v0  ;;  %v4111_v35 = vrot.slane %v3860_v28, 7 }
 0x2c8   :  { %9607 = vrot.lane.b32.xlu0 %v14458_v37, %s10706_s26  ;;  %7899 = vmatmul.mubr.msk.bf16.gmra.mrb[60].mxu0 %vm3153_vm11, %v3125_v43  ;;  %v3856_v37 = vld [vmem:[#allocation3 + $0x140] sm:$0xff]  ;;  %v14584_v61 = vpack.i.bf16 %v4361_v24, %v4359_v29  ;;  %v4362_v41 = vrot.slane %v3857_v17, 1  ;;  %v14601_v0 = vpack.i.bf16 %v3858_v60, %v3857_v17  ;;  %v9320_v52 = vunpack.i.h.bf16 %v14531_v31 }
 0x2c9   :  { %9612 = vrot.lane.b32.xlu1 %v14544_v40, %s10706_s26  ;;  %v14552_v6 = vpop.permute.xlu0 %9327  ;;  %v4106_v47 = vrot.slane %v3856_v37, 7  ;;  %v4366_v42 = vsel %vm822_vm1, %v4363_v39, %v4365_v33  ;;  %v9319_v19 = vunpack.i.l.bf16 %v14531_v31  ;;  %v4112_v43 = vrot.slane %v14589_v5, 7 }
 0x2ca   :  { %v14554_v44 = vpop.permute.xlu1 %9332  ;;  %v4114_v54 = vrot.slane %v14591_v58, 7  ;;  %v9325_v23 = vunpack.i.h.bf16 %v14540_v22  ;;  %v9324_v60 = vunpack.i.l.bf16 %v14540_v22  ;;  %v9330_v16 = vunpack.i.h.bf16 %v14552_v6 }
 0x2cb   :  { %v14587_v4 = vsel %vm565_vm2, %v4106_v47, %v4107_v63  ;;  %v9329_v56 = vunpack.i.l.bf16 %v14552_v6  ;;  %v9335_v17 = vunpack.i.h.bf16 %v14554_v44  ;;  %v9334_v31 = vunpack.i.l.bf16 %v14554_v44 }
 0x2cc   :  { %9617 = vrot.lane.b32.xlu0 %v14460_v32, %s10707_s17  ;;  %v14597_v13 = vpack.i.bf16 %v14575_v7, %v14587_v4  ;;  %v6065_v44 = vsel %vm2639_vm3, %v13925_v59, %v9320_v52  ;;  %v6064_v47 = vsel %vm2639_vm3, %v4058_v55, %v9319_v19  ;;  %v14638_v63 = vsel %vm565_vm2, %v4112_v43, %v4114_v54 }
 0x2cd   :  { %9622 = vrot.lane.b32.xlu1 %v14558_v34, %s10707_s17  ;;  %v6067_v28 = vsel %vm2639_vm3, %v13973_v45, %v9325_v23  ;;  %v6128_v59 = vsel %vm2769_vm6, %v6064_v47, %v9329_v56  ;;  %vm7632_vm9 = vcmask 0  }
 0x2ce   :  { %v14566_v51 = vpop.permute.xlu0 %9337  ;;  %v6131_v33 = vsel %vm2769_vm6, %v6067_v28, %v9335_v17 }
 0x2cf   :  { %v14568_v2 = vpop.permute.xlu1 %9342  ;;  %v9340_v36 = vunpack.i.h.bf16 %v14566_v51  ;;  %v9339_v11 = vunpack.i.l.bf16 %v14566_v51  ;;  %v14635_v51 = vsel %vm565_vm2, %v4111_v35, %v4112_v43 }
 0x2d0   :  { %9627 = vrot.lane.b32.xlu0 %v14477_v3, %s10708_s4  ;;  %v9345_v57 = vunpack.i.h.bf16 %v14568_v2  ;;  %v9344_v22 = vunpack.i.l.bf16 %v14568_v2  ;;  %v6129_v2 = vsel %vm2769_vm6, %v6065_v44, %v9330_v16 }
 0x2d1   :  { %9632 = vrot.lane.b32.xlu1 %v14460_v32, %s10698_s24  ;;  %v4364_v32 = vsel %vm822_vm1, %v4362_v41, %v4363_v39  ;;  %v6193_v55 = vsel %vm2899_vm8, %v6129_v2, %v9340_v36 }
 0x2d2   :  { %v14582_v53 = vpop.permute.xlu0 %9347  ;;  %v14627_v6 = vpack.i.bf16 %v4366_v42, %v4364_v32  ;;  %v6192_v32 = vsel %vm2899_vm8, %v6128_v59, %v9339_v11  ;;  %v6195_v52 = vsel %vm2899_vm8, %v6131_v33, %v9345_v57 }
 0x2d3   :  { %v14593_v49 = vpop.permute.xlu1 %9352  ;;  %v9350_v54 = vunpack.i.h.bf16 %v14582_v53  ;;  %v9349_v23 = vunpack.i.l.bf16 %v14582_v53 }
 0x2d4   :  { %9637 = vrot.lane.b32.xlu0 %v14584_v61, %s10708_s4  ;;  %v9355_v57 = vunpack.i.h.bf16 %v14593_v49 }
 0x2d5   :  { %9642 = vrot.lane.b32.xlu1 %v14558_v34, %s10698_s24 }
 0x2d6   :  { %v14615_v37 = vpop.permute.xlu0 %9357 }
 0x2d7   :  { %v14620_v12 = vpop.permute.xlu1 %9362  ;;  %v7872_v29 = vpop.f32.mrb[32].mxu0  ;;  %v9360_v17 = vunpack.i.h.bf16 %v14615_v37 }
 0x2d8   :  { %9647 = vrot.lane.b32.xlu0 %v14477_v3, %s10700_s27  ;;  %v6066_v3 = vsel %vm2639_vm3, %v13998_v18, %v9324_v60  ;;  %v14652_v18 = vld [vmem:[%s16806_s3] ss:$0 sm:$0xff]  ;;  %v3416_v35 = vpop.f32.mrb[33].mxu0  ;;  %v9364_v33 = vunpack.i.l.bf16 %v14620_v12 }
 0x2d9   :  { %9652 = vrot.lane.b32.xlu1 %v14584_v61, %s10700_s27  ;;  %v6130_v39 = vsel %vm2769_vm6, %v6066_v3, %v9334_v31  ;;  %v3425_v45 = vadd.f32 %v14652_v18, %v7872_v29  ;;  %v3417_v19 = vadd.f32 %v14652_v18, %v3416_v35  ;;  %v7873_v43 = vpop.f32.mrb[34].mxu0  ;;  %v9359_v31 = vunpack.i.l.bf16 %v14615_v37 }
 0x2da   :  { %v9368_v24 = vpop.permute.xlu0 %9367  ;;  %v6194_v42 = vsel %vm2899_vm8, %v6130_v39, %v9344_v22  ;;  %v3428_v16 = vadd.f32 %v14652_v18, %v7873_v43  ;;  %v3419_v56 = vpop.f32.mrb[35].mxu0  ;;  %v9354_v3 = vunpack.i.l.bf16 %v14593_v49  ;;  %v6256_v37 = vsel %vm3029_vm10, %v6192_v32, %v9349_v23 }
 0x2db   :  { %v14655_v41 = vpop.permute.xlu1 %9372  ;;  %v3577_v60 = vmax.f32 %v3425_v45, 0.0  ;;  %v3575_v36 = vmax.f32 %v3417_v19, 0.0  ;;  %v3420_v11 = vadd.f32 %v14652_v18, %v3419_v56  ;;  %v9370_v22 = vunpack.i.h.bf16 %v9368_v24 }
 0x2dc   :  { %9657 = vrot.lane.b32.xlu0 %v14544_v40, %s10702_s18  ;;  %v3578_v53 = vmax.f32 %v3428_v16, 0.0  ;;  %v9369_v44 = vunpack.i.l.bf16 %v9368_v24  ;;  %v6257_v29 = vsel %vm3029_vm10, %v6193_v55, %v9350_v54  ;;  %v9365_v39 = vunpack.i.h.bf16 %v14620_v12 }
 0x2dd   :  { %9662 = vrot.lane.b32.xlu1 %v14597_v13, %s10702_s18  ;;  %3786 = vst.msk [vmem:[#allocation3 + $0x288] sm:$0xff] %vm2639_vm3, %v3577_v60  ;;  %3784 = vst.msk [vmem:[#allocation3 + $0x268] sm:$0xff] %vm2639_vm3, %v3575_v36  ;;  %v3576_v28 = vmax.f32 %v3420_v11, 0.0  ;;  %v6321_v49 = vsel %vm6320_vm13, %v6256_v37, %v9359_v31  ;;  %v6322_v24 = vsel %vm6320_vm13, %v6257_v29, %v9360_v17  ;;  %v9374_v45 = vunpack.i.l.bf16 %v14655_v41 }
 0x2de   :  { %v9378_v40 = vpop.permute.xlu0 %9377  ;;  %3787 = vst.msk [vmem:[#allocation3 + $0x290] sm:$0xff] %vm2639_vm3, %v3578_v53  ;;  %v6386_v12 = vsel %vm6385_vm14, %v6321_v49, %v9369_v44  ;;  %v6387_v43 = vsel %vm6385_vm14, %v6322_v24, %v9370_v22  ;;  %v6259_v56 = vsel %vm3029_vm10, %v6195_v52, %v9355_v57  ;;  %v14707_v53 = vpack.i.bf16 %v14638_v63, %v14635_v51 }
 0x2df   :  { %v9383_v47 = vpop.permute.xlu1 %9382  ;;  %v9380_v59 = vunpack.i.h.bf16 %v9378_v40  ;;  %v9379_v2 = vunpack.i.l.bf16 %v9378_v40  ;;  %3785 = vst.msk [vmem:[#allocation3 + $0x270] sm:$0xff] %vm2639_vm3, %v3576_v28  ;;  %v6324_v11 = vsel %vm6320_vm13, %v6259_v56, %v9365_v39  ;;  %v3863_v28 = vld [vmem:[#allocation3 + $0x178] sm:$0xff]  ;;  %v3866_v39 = vld [vmem:[#allocation3 + $0x190] sm:$0xff]  ;;  %v14728_v49 = vpack.i.bf16 %v14591_v58, %v14589_v5 }
 0x2e0   :  { %9667 = vrot.lane.b32.xlu0 %v14558_v34, %s10704_s19  ;;  %v9375_v34 = vunpack.i.h.bf16 %v14655_v41  ;;  %v9385_v54 = vunpack.i.h.bf16 %v9383_v47  ;;  %v9384_v23 = vunpack.i.l.bf16 %v9383_v47  ;;  %v6258_v41 = vsel %vm3029_vm10, %v6194_v42, %v9354_v3 }
 0x2e1   :  { %9672 = vrot.lane.b32.xlu1 %v14601_v0, %s10704_s19  ;;  %v6451_v60 = vsel %vm6450_vm15, %v6386_v12, %v9379_v2  ;;  %v6452_v16 = vsel %vm6450_vm15, %v6387_v43, %v9380_v59  ;;  %v6323_v36 = vsel %vm6320_vm13, %v6258_v41, %v9364_v33  ;;  %v4370_v24 = vrot.slane %v3863_v28, 1 }
 0x2e2   :  { %v9388_v55 = vpop.permute.xlu0 %9387  ;;  %v6388_v42 = vsel %vm6385_vm14, %v6323_v36, %v9374_v45  ;;  %v6389_v52 = vsel %vm6385_vm14, %v6324_v11, %v9375_v34  ;;  %v3864_v34 = vld [vmem:[#allocation3 + $0x180] sm:$0xff]  ;;  %v3867_v45 = vld [vmem:[#allocation3 + $0x198] sm:$0xff] }
 0x2e3   :  { %v9390_v35 = vunpack.i.h.bf16 %v9388_v55  ;;  %v9389_v32 = vunpack.i.l.bf16 %v9388_v55  ;;  %v14689_v19 = vpop.permute.xlu1 %9392  ;;  %v6453_v47 = vsel %vm6450_vm15, %v6388_v42, %v9384_v23  ;;  %v6454_v3 = vsel %vm6450_vm15, %v6389_v52, %v9385_v54  ;;  %v3865_v55 = vld [vmem:[#allocation3 + $0x188] sm:$0xff]  ;;  %v3868_v23 = vld [vmem:[#allocation3 + $0x1a0] sm:$0xff] }
 0x2e4   :  { %9677 = vrot.lane.b32.xlu0 %v14584_v61, %s10705_s21  ;;  %v4116_v43 = vrot.slane %v3864_v34, 7  ;;  %v4373_v54 = vrot.slane %v3866_v39, 1  ;;  %v4117_v56 = vrot.slane %v3865_v55, 7  ;;  %v14756_v42 = vld [vmem:[#allocation3 + $0x1a8] sm:$0xff] }
 0x2e5   :  { %9682 = vrot.lane.b32.xlu1 %v14627_v6, %s10705_s21  ;;  %v6516_v17 = vsel %vm6515_vm0, %v6451_v60, %v9389_v32  ;;  %v6517_v31 = vsel %vm6515_vm0, %v6452_v16, %v9390_v35  ;;  %v4367_v35 = vrot.slane %v14589_v5, 1  ;;  %v4119_v32 = vrot.slane %v3866_v39, 7 }
 0x2e6   :  { %v9398_v61 = vpop.permute.xlu0 %9397  ;;  %v6580_v40 = vpack.c.bf16 %v6517_v31, %v6516_v17  ;;  %v4372_v17 = vrot.slane %v3865_v55, 1  ;;  %v4121_v31 = vrot.slane %v3868_v23, 7 }
 0x2e7   :  { %v9400_v57 = vunpack.i.h.bf16 %v9398_v61  ;;  %v9399_v22 = vunpack.i.l.bf16 %v9398_v61  ;;  %v14711_v44 = vpop.permute.xlu1 %9402  ;;  %v14748_v5 = vsel %vm565_vm2, %v4117_v56, %v4119_v32 }
 0x2e8   :  { %9687 = vrot.lane.b32.xlu0 %v14597_v13, %s10706_s26  ;;  %7912 = vmatprep.mubr.msk.bf16.mxu1 %vm6655_vm4, %v6580_v40  ;;  %v4368_v13 = vrot.slane %v14591_v58, 1  ;;  %v4375_v58 = vrot.slane %v3867_v45, 1  ;;  %v4374_v61 = vsel %vm822_vm1, %v4372_v17, %v4373_v54  ;;  %v9404_v32 = vunpack.i.l.bf16 %v14711_v44 }
 0x2e9   :  { %v6519_v59 = vsel %vm6515_vm0, %v6454_v3, %v9400_v57  ;;  %v6518_v2 = vsel %vm6515_vm0, %v6453_v47, %v9399_v22  ;;  %9692 = vrot.lane.b32.xlu1 %v14707_v53, %s10706_s26  ;;  %v14761_v57 = vsel %vm565_vm2, %v4116_v43, %v4117_v56  ;;  %v14771_v3 = vpack.i.bf16 %v3866_v39, %v3865_v55 }
 0x2ea   :  { %v14722_v37 = vpop.permute.xlu0 %9407  ;;  %v6581_v29 = vpack.c.bf16 %v6519_v59, %v6518_v2  ;;  %v4369_v16 = vsel %vm822_vm1, %v4367_v35, %v4368_v13  ;;  %v4371_v41 = vsel %vm822_vm1, %v4368_v13, %v4370_v24  ;;  %v4376_v40 = vsel %vm822_vm1, %v4373_v54, %v4375_v58 }
 0x2eb   :  { %v14724_v33 = vpop.permute.xlu1 %9412  ;;  %v14752_v11 = vpack.i.bf16 %v4371_v41, %v4369_v16  ;;  %v14769_v47 = vpack.i.bf16 %v14748_v5, %v14761_v57  ;;  %v14776_v2 = vpack.i.bf16 %v4376_v40, %v4374_v61  ;;  %v9395_v13 = vunpack.i.h.bf16 %v14689_v19 }
 0x2ec   :  { %9697 = vrot.lane.b32.xlu0 %v14601_v0, %s10707_s17  ;;  %7913 = vmatmul.mubr.msk.bf16.vlgmr.msra.gmra.mrb[0].mxu1 %vm6655_vm4, %v6581_v29  ;;  %v4122_v29 = vrot.slane %v14756_v42, 7  ;;  %v9394_v24 = vunpack.i.l.bf16 %v14689_v19  ;;  %v9405_v55 = vunpack.i.h.bf16 %v14711_v44  ;;  %v9410_v16 = vunpack.i.h.bf16 %v14722_v37 }
 0x2ed   :  { %9702 = vrot.lane.b32.xlu1 %v14728_v49, %s10707_s17  ;;  %v9409_v19 = vunpack.i.l.bf16 %v14722_v37  ;;  %v9415_v17 = vunpack.i.h.bf16 %v14724_v33  ;;  %v9414_v44 = vunpack.i.l.bf16 %v14724_v33  ;;  %v6069_v33 = vsel %vm2639_vm3, %v13987_v14, %v9395_v13 }
 0x2ee   :  { %v14737_v12 = vpop.permute.xlu0 %9417  ;;  %v14801_v40 = vsel %vm565_vm2, %v4121_v31, %v4122_v29 }
 0x2ef   :  { %v14739_v60 = vpop.permute.xlu1 %9422  ;;  %v9420_v37 = vunpack.i.h.bf16 %v14737_v12 }
 0x2f0   :  { %9707 = vrot.lane.b32.xlu0 %v14627_v6, %s10708_s4  ;;  %v9425_v31 = vunpack.i.h.bf16 %v14739_v60 }
 0x2f1   :  { %9712 = vrot.lane.b32.xlu1 %v14601_v0, %s10698_s24  ;;  %v14763_v0 = vld [vmem:[#allocation3 + $0x1b0] sm:$0xff] }
 0x2f2   :  { %v14750_v36 = vpop.permute.xlu0 %9427  ;;  %v4124_v39 = vrot.slane %v14763_v0, 7 }
 0x2f3   :  { %v14758_v52 = vpop.permute.xlu1 %9432  ;;  %v7876_v22 = vpop.f32.mrb[36].mxu0  ;;  %v9430_v13 = vunpack.i.h.bf16 %v14750_v36 }
 0x2f4   :  { %9717 = vrot.lane.b32.xlu0 %v14752_v11, %s10708_s4  ;;  %v3441_v28 = vadd.f32 %v14652_v18, %v7876_v22  ;;  %v3432_v59 = vpop.f32.mrb[37].mxu0  ;;  %v9419_v22 = vunpack.i.l.bf16 %v14737_v12 }
 0x2f5   :  { %9722 = vrot.lane.b32.xlu1 %v14728_v49, %s10698_s24  ;;  %v3433_v34 = vadd.f32 %v14652_v18, %v3432_v59  ;;  %v7877_v45 = vpop.f32.mrb[38].mxu0  ;;  %v14807_v59 = vsel %vm565_vm2, %v4122_v29, %v4124_v39  ;;  %v6070_v29 = vsel %vm2639_vm3, %v14045_v20, %v9404_v32  ;;  %v6133_v39 = vsel %vm2769_vm6, %v6069_v33, %v9410_v16 }
 0x2f6   :  { %v14782_v35 = vpop.permute.xlu0 %9437  ;;  %v3581_v43 = vmax.f32 %v3441_v28, 0.0  ;;  %v3444_v54 = vadd.f32 %v14652_v18, %v7877_v45  ;;  %v3435_v58 = vpop.f32.mrb[39].mxu0  ;;  %v9424_v45 = vunpack.i.l.bf16 %v14739_v60 }
 0x2f7   :  { %v14788_v23 = vpop.permute.xlu1 %9442  ;;  %v3579_v41 = vmax.f32 %v3433_v34, 0.0  ;;  %v3436_v56 = vadd.f32 %v14652_v18, %v3435_v58  ;;  %v6068_v34 = vsel %vm2639_vm3, %v14008_v50, %v9394_v24  ;;  %v6134_v50 = vsel %vm2769_vm6, %v6070_v29, %v9414_v44 }
 0x2f8   :  { %9727 = vrot.lane.b32.xlu0 %v14627_v6, %s10700_s27  ;;  %3790 = vst.msk [vmem:[#allocation3 + $0x2c8] sm:$0xff] %vm2639_vm3, %v3581_v43  ;;  %v3582_v61 = vmax.f32 %v3444_v54, 0.0  ;;  %v6071_v43 = vsel %vm2639_vm3, %v14034_v62, %v9405_v55  ;;  %v6132_v14 = vsel %vm2769_vm6, %v6068_v34, %v9409_v19  ;;  %v9429_v62 = vunpack.i.l.bf16 %v14750_v36 }
 0x2f9   :  { %9732 = vrot.lane.b32.xlu1 %v14752_v11, %s10700_s27  ;;  %3788 = vst.msk [vmem:[#allocation3 + $0x2a8] sm:$0xff] %vm2639_vm3, %v3579_v41  ;;  %v3580_v6 = vmax.f32 %v3436_v56, 0.0  ;;  %v6135_v60 = vsel %vm2769_vm6, %v6071_v43, %v9415_v17  ;;  %v6196_v20 = vsel %vm2899_vm8, %v6132_v14, %v9419_v22  ;;  %v6197_v24 = vsel %vm2899_vm8, %v6133_v39, %v9420_v37 }
 0x2fa   :  { %v9448_v28 = vpop.permute.xlu0 %9447  ;;  %3791 = vst.msk [vmem:[#allocation3 + $0x2d0] sm:$0xff] %vm2639_vm3, %v3582_v61  ;;  %v9440_v55 = vunpack.i.h.bf16 %v14782_v35  ;;  %v9439_v32 = vunpack.i.l.bf16 %v14782_v35  ;;  %v6198_v54 = vsel %vm2899_vm8, %v6134_v50, %v9424_v45  ;;  %v6199_v58 = vsel %vm2899_vm8, %v6135_v60, %v9425_v31 }
 0x2fb   :  { %v9453_v12 = vpop.permute.xlu1 %9452  ;;  %3789 = vst.msk [vmem:[#allocation3 + $0x2b0] sm:$0xff] %vm2639_vm3, %v3580_v6  ;;  %v9450_v16 = vunpack.i.h.bf16 %v9448_v28  ;;  %v9449_v19 = vunpack.i.l.bf16 %v9448_v28  ;;  %v9435_v36 = vunpack.i.h.bf16 %v14758_v52  ;;  %v9434_v56 = vunpack.i.l.bf16 %v14758_v52 }
 0x2fc   :  { %9737 = vrot.lane.b32.xlu0 %v14707_v53, %s10702_s18  ;;  %v6260_v61 = vsel %vm3029_vm10, %v6196_v20, %v9429_v62  ;;  %v6261_v35 = vsel %vm3029_vm10, %v6197_v24, %v9430_v13  ;;  %v9445_v37 = vunpack.i.h.bf16 %v14788_v23  ;;  %v9444_v22 = vunpack.i.l.bf16 %v14788_v23 }
 0x2fd   :  { %9742 = vrot.lane.b32.xlu1 %v14769_v47, %s10702_s18  ;;  %v6325_v6 = vsel %vm6320_vm13, %v6260_v61, %v9439_v32  ;;  %v6326_v52 = vsel %vm6320_vm13, %v6261_v35, %v9440_v55  ;;  %v9455_v28 = vunpack.i.h.bf16 %v9453_v12  ;;  %v9454_v33 = vunpack.i.l.bf16 %v9453_v12 }
 0x2fe   :  { %v9458_v53 = vpop.permute.xlu0 %9457  ;;  %v6391_v31 = vsel %vm6385_vm14, %v6326_v52, %v9450_v16  ;;  %v6262_v12 = vsel %vm3029_vm10, %v6198_v54, %v9434_v56  ;;  %v6263_v60 = vsel %vm3029_vm10, %v6199_v58, %v9435_v36  ;;  %v3871_v56 = vld [vmem:[#allocation3 + $0x1b8] sm:$0xff]  ;;  %v3872_v52 = vld [vmem:[#allocation3 + $0x1c0] sm:$0xff] }
 0x2ff   :  { %v9463_v41 = vpop.permute.xlu1 %9462  ;;  %v9460_v17 = vunpack.i.h.bf16 %v9458_v53  ;;  %v9459_v44 = vunpack.i.l.bf16 %v9458_v53  ;;  %v6327_v20 = vsel %vm6320_vm13, %v6262_v12, %v9444_v22  ;;  %v6328_v24 = vsel %vm6320_vm13, %v6263_v60, %v9445_v37 }
 0x300   :  { %9747 = vrot.lane.b32.xlu0 %v14728_v49, %s10704_s19  ;;  %v6390_v49 = vsel %vm6385_vm14, %v6325_v6, %v9449_v19  ;;  %v9465_v14 = vunpack.i.h.bf16 %v9463_v41  ;;  %v9464_v50 = vunpack.i.l.bf16 %v9463_v41  ;;  %v6392_v53 = vsel %vm6385_vm14, %v6327_v20, %v9454_v33  ;;  %v3873_v33 = vld [vmem:[#allocation3 + $0x1c8] sm:$0xff] }
 0x301   :  { %9752 = vrot.lane.b32.xlu1 %v14771_v3, %s10704_s19  ;;  %v6455_v23 = vsel %vm6450_vm15, %v6390_v49, %v9459_v44  ;;  %v6456_v39 = vsel %vm6450_vm15, %v6391_v31, %v9460_v17  ;;  %v6393_v54 = vsel %vm6385_vm14, %v6328_v24, %v9455_v28  ;;  %v14888_v22 = vpack.i.bf16 %v14763_v0, %v14756_v42  ;;  %v3874_v28 = vld [vmem:[#allocation3 + $0x1d0] sm:$0xff]  ;;  %v3875_v49 = vld [vmem:[#allocation3 + $0x1d8] sm:$0xff] }
 0x302   :  { %v9468_v34 = vpop.permute.xlu0 %9467  ;;  %v6457_v41 = vsel %vm6450_vm15, %v6392_v53, %v9464_v50  ;;  %v6458_v36 = vsel %vm6450_vm15, %v6393_v54, %v9465_v14  ;;  %v4380_v6 = vrot.slane %v3871_v56, 1  ;;  %v4127_v50 = vrot.slane %v3873_v33, 7 }
 0x303   :  { %v9470_v45 = vunpack.i.h.bf16 %v9468_v34  ;;  %v9469_v43 = vunpack.i.l.bf16 %v9468_v34  ;;  %v14851_v29 = vpop.permute.xlu1 %9472  ;;  %v4377_v34 = vrot.slane %v14756_v42, 1  ;;  %v4385_v60 = vrot.slane %v3875_v49, 1 }
 0x304   :  { %9757 = vrot.lane.b32.xlu0 %v14752_v11, %s10705_s21  ;;  %v14867_v11 = vpack.i.bf16 %v14807_v59, %v14801_v40 }
 0x305   :  { %v6520_v13 = vsel %vm6515_vm0, %v6455_v23, %v9469_v43  ;;  %v6521_v62 = vsel %vm6515_vm0, %v6456_v39, %v9470_v45  ;;  %9762 = vrot.lane.b32.xlu1 %v14776_v2, %s10705_s21  ;;  %v4126_v45 = vrot.slane %v3872_v52, 7  ;;  %v4129_v43 = vrot.slane %v3874_v28, 7 }
 0x306   :  { %v9478_v55 = vpop.permute.xlu0 %9477  ;;  %v6582_v32 = vpack.c.bf16 %v6521_v62, %v6520_v13  ;;  %v4383_v62 = vrot.slane %v3874_v28, 1 }
 0x307   :  { %v9480_v58 = vunpack.i.h.bf16 %v9478_v55  ;;  %v9479_v16 = vunpack.i.l.bf16 %v9478_v55  ;;  %v14871_v19 = vpop.permute.xlu1 %9482  ;;  %v14914_v54 = vsel %vm565_vm2, %v4127_v50, %v4129_v43 }
 0x308   :  { %9767 = vrot.lane.b32.xlu0 %v14769_v47, %s10706_s26  ;;  %7916 = vmatprep.mubr.msk.bf16.mxu1 %vm6655_vm4, %v6582_v32  ;;  %v4378_v47 = vrot.slane %v14763_v0, 1  ;;  %v3876_v0 = vld [vmem:[#allocation3 + $0x1e0] sm:$0xff]  ;;  %v4386_v43 = vsel %vm822_vm1, %v4383_v62, %v4385_v60 }
 0x309   :  { %v6523_v17 = vsel %vm6515_vm0, %v6458_v36, %v9480_v58  ;;  %v6522_v44 = vsel %vm6515_vm0, %v6457_v41, %v9479_v16  ;;  %9772 = vrot.lane.b32.xlu1 %v14867_v11, %s10706_s26  ;;  %v4131_v20 = vrot.slane %v3876_v0, 7  ;;  %v4382_v58 = vrot.slane %v3873_v33, 1 }
 0x30a   :  { %v14882_v61 = vpop.permute.xlu0 %9487  ;;  %v6583_v35 = vpack.c.bf16 %v6523_v17, %v6522_v44  ;;  %v4379_v39 = vsel %vm822_vm1, %v4377_v34, %v4378_v47  ;;  %v4381_v14 = vsel %vm822_vm1, %v4378_v47, %v4380_v6  ;;  %v14922_v17 = vld [vmem:[#allocation3 + $0x1e8] sm:$0xff]  ;;  %v14924_v44 = vld [vmem:[#allocation3 + $0x1f0] sm:$0xff] }
 0x30b   :  { %v14884_v37 = vpop.permute.xlu1 %9492  ;;  %v14911_v53 = vpack.i.bf16 %v4381_v14, %v4379_v39  ;;  %v4384_v34 = vsel %vm822_vm1, %v4382_v58, %v4383_v62  ;;  %v4132_v0 = vrot.slane %v14922_v17, 7  ;;  %v4134_v39 = vrot.slane %v14924_v44, 7 }
 0x30c   :  { %9777 = vrot.lane.b32.xlu0 %v14771_v3, %s10707_s17  ;;  %7917 = vmatmul.mubr.msk.bf16.gmra.mrb[4].mxu1 %vm6655_vm4, %v6583_v35  ;;  %v9475_v14 = vunpack.i.h.bf16 %v14851_v29  ;;  %v9490_v60 = vunpack.i.h.bf16 %v14882_v61  ;;  %v9489_v62 = vunpack.i.l.bf16 %v14882_v61 }
 0x30d   :  { %9782 = vrot.lane.b32.xlu1 %v14888_v22, %s10707_s17  ;;  %v14964_v61 = vsel %vm565_vm2, %v4131_v20, %v4132_v0 }
 0x30e   :  { %v14897_v31 = vpop.permute.xlu0 %9497 }
 0x30f   :  { %v14899_v23 = vpop.permute.xlu1 %9502  ;;  %v7880_v12 = vpop.f32.mrb[40].mxu0 }
 0x310   :  { %9787 = vrot.lane.b32.xlu0 %v14776_v2, %s10708_s4  ;;  %v3457_v42 = vadd.f32 %v14652_v18, %v7880_v12  ;;  %v3448_v13 = vpop.f32.mrb[41].mxu0 }
 0x311   :  { %9792 = vrot.lane.b32.xlu1 %v14771_v3, %s10698_s24  ;;  %v3449_v24 = vadd.f32 %v14652_v18, %v3448_v13  ;;  %v7881_v55 = vpop.f32.mrb[42].mxu0  ;;  %v14920_v3 = vsel %vm565_vm2, %v4126_v45, %v4127_v50  ;;  %v9474_v50 = vunpack.i.l.bf16 %v14851_v29  ;;  %v9485_v13 = vunpack.i.h.bf16 %v14871_v19 }
 0x312   :  { %v14909_v32 = vpop.permute.xlu0 %9507  ;;  %v3585_v16 = vmax.f32 %v3457_v42, 0.0  ;;  %v3460_v41 = vadd.f32 %v14652_v18, %v7881_v55  ;;  %v3451_v36 = vpop.f32.mrb[43].mxu0  ;;  %v14934_v52 = vpack.i.bf16 %v14914_v54, %v14920_v3  ;;  %v14946_v42 = vpack.i.bf16 %v3874_v28, %v3873_v33 }
 0x313   :  { %v14917_v56 = vpop.permute.xlu1 %9512  ;;  %v3583_v35 = vmax.f32 %v3449_v24, 0.0  ;;  %v3452_v47 = vadd.f32 %v14652_v18, %v3451_v36  ;;  %v9484_v24 = vunpack.i.l.bf16 %v14871_v19  ;;  %v9495_v29 = vunpack.i.h.bf16 %v14884_v37 }
 0x314   :  { %9797 = vrot.lane.b32.xlu0 %v14911_v53, %s10708_s4  ;;  %3794 = vst.msk [vmem:[#allocation3 + $0x308] sm:$0xff] %vm2639_vm3, %v3585_v16  ;;  %v3586_v6 = vmax.f32 %v3460_v41, 0.0  ;;  %v9494_v55 = vunpack.i.l.bf16 %v14884_v37  ;;  %v14959_v28 = vpack.i.bf16 %v4386_v43, %v4384_v34  ;;  %v9500_v19 = vunpack.i.h.bf16 %v14897_v31 }
 0x315   :  { %9802 = vrot.lane.b32.xlu1 %v14888_v22, %s10698_s24  ;;  %3792 = vst.msk [vmem:[#allocation3 + $0x2e8] sm:$0xff] %vm2639_vm3, %v3583_v35  ;;  %v3584_v49 = vmax.f32 %v3452_v47, 0.0  ;;  %v9499_v33 = vunpack.i.l.bf16 %v14897_v31  ;;  %v14967_v16 = vsel %vm565_vm2, %v4132_v0, %v4134_v39  ;;  %v6072_v37 = vsel %vm2639_vm3, %v14185_v38, %v9474_v50 }
 0x316   :  { %v9518_v45 = vpop.permute.xlu0 %9517  ;;  %3795 = vst.msk [vmem:[#allocation3 + $0x310] sm:$0xff] %vm2639_vm3, %v3586_v6  ;;  %v9505_v41 = vunpack.i.h.bf16 %v14899_v23  ;;  %v9504_v36 = vunpack.i.l.bf16 %v14899_v23  ;;  %v6075_v31 = vsel %vm2639_vm3, %v14214_v46, %v9485_v13  ;;  %v6074_v20 = vsel %vm2639_vm3, %v14203_v27, %v9484_v24 }
 0x317   :  { %v14944_v12 = vpop.permute.xlu1 %9522  ;;  %3793 = vst.msk [vmem:[#allocation3 + $0x2f0] sm:$0xff] %vm2639_vm3, %v3584_v49  ;;  %v6136_v6 = vsel %vm2769_vm6, %v6072_v37, %v9489_v62  ;;  %v6139_v38 = vsel %vm2769_vm6, %v6075_v31, %v9495_v29  ;;  %v9510_v23 = vunpack.i.h.bf16 %v14909_v32  ;;  %v9509_v34 = vunpack.i.l.bf16 %v14909_v32 }
 0x318   :  { %9807 = vrot.lane.b32.xlu0 %v14776_v2, %s10700_s27  ;;  %v6073_v2 = vsel %vm2639_vm3, %v14173_v9, %v9475_v14  ;;  %v6138_v9 = vsel %vm2769_vm6, %v6074_v20, %v9494_v55  ;;  %v6200_v27 = vsel %vm2899_vm8, %v6136_v6, %v9499_v33  ;;  %v9520_v49 = vunpack.i.h.bf16 %v9518_v45 }
 0x319   :  { %9812 = vrot.lane.b32.xlu1 %v14911_v53, %s10700_s27  ;;  %v6137_v47 = vsel %vm2769_vm6, %v6073_v2, %v9490_v60  ;;  %v9519_v43 = vunpack.i.l.bf16 %v9518_v45  ;;  %v6203_v39 = vsel %vm2899_vm8, %v6139_v38, %v9505_v41  ;;  %v9515_v24 = vunpack.i.h.bf16 %v14917_v56 }
 0x31a   :  { %v9528_v58 = vpop.permute.xlu0 %9527  ;;  %v6201_v46 = vsel %vm2899_vm8, %v6137_v47, %v9500_v19  ;;  %v9514_v32 = vunpack.i.l.bf16 %v14917_v56  ;;  %v6264_v29 = vsel %vm3029_vm10, %v6200_v27, %v9509_v34  ;;  %v9525_v55 = vunpack.i.h.bf16 %v14944_v12 }
 0x31b   :  { %v9533_v35 = vpop.permute.xlu1 %9532  ;;  %v9530_v14 = vunpack.i.h.bf16 %v9528_v58  ;;  %v9529_v50 = vunpack.i.l.bf16 %v9528_v58  ;;  %v6265_v45 = vsel %vm3029_vm10, %v6201_v46, %v9510_v23  ;;  %v9524_v19 = vunpack.i.l.bf16 %v14944_v12 }
 0x31c   :  { %9817 = vrot.lane.b32.xlu0 %v14867_v11, %s10702_s18  ;;  %v6202_v11 = vsel %vm2899_vm8, %v6138_v9, %v9504_v36  ;;  %v6329_v33 = vsel %vm6320_vm13, %v6264_v29, %v9519_v43  ;;  %v6330_v56 = vsel %vm6320_vm13, %v6265_v45, %v9520_v49  ;;  %v9535_v58 = vunpack.i.h.bf16 %v9533_v35 }
 0x31d   :  { %9822 = vrot.lane.b32.xlu1 %v14934_v52, %s10702_s18  ;;  %v9534_v2 = vunpack.i.l.bf16 %v9533_v35  ;;  %v6395_v41 = vsel %vm6385_vm14, %v6330_v56, %v9530_v14  ;;  %v6266_v35 = vsel %vm3029_vm10, %v6202_v11, %v9514_v32  ;;  %v6267_v38 = vsel %vm3029_vm10, %v6203_v39, %v9515_v24  ;;  %v3879_v32 = vld [vmem:[#allocation3 + $0x1f8] sm:$0xff]  ;;  %v3882_v56 = vld [vmem:[#allocation3 + $0x210] sm:$0xff] }
 0x31e   :  { %v9538_v0 = vpop.permute.xlu0 %9537  ;;  %v6331_v27 = vsel %vm6320_vm13, %v6266_v35, %v9524_v19  ;;  %v6332_v46 = vsel %vm6320_vm13, %v6267_v38, %v9525_v55  ;;  %v15044_v19 = vpack.i.bf16 %v14924_v44, %v14922_v17 }
 0x31f   :  { %v9543_v13 = vpop.permute.xlu1 %9542  ;;  %v9540_v60 = vunpack.i.h.bf16 %v9538_v0  ;;  %v9539_v62 = vunpack.i.l.bf16 %v9538_v0  ;;  %v6396_v0 = vsel %vm6385_vm14, %v6331_v27, %v9534_v2  ;;  %v6397_v11 = vsel %vm6385_vm14, %v6332_v46, %v9535_v58 }
 0x320   :  { %9827 = vrot.lane.b32.xlu0 %v14888_v22, %s10704_s19  ;;  %v6394_v22 = vsel %vm6385_vm14, %v6329_v33, %v9529_v50  ;;  %v9545_v6 = vunpack.i.h.bf16 %v9543_v13  ;;  %v9544_v9 = vunpack.i.l.bf16 %v9543_v13  ;;  %v4390_v33 = vrot.slane %v3879_v32, 1 }
 0x321   :  { %9832 = vrot.lane.b32.xlu1 %v14946_v42, %s10704_s19  ;;  %v6459_v12 = vsel %vm6450_vm15, %v6394_v22, %v9539_v62  ;;  %v6460_v47 = vsel %vm6450_vm15, %v6395_v41, %v9540_v60  ;;  %v4387_v22 = vrot.slane %v14922_v17, 1  ;;  %v3880_v41 = vld [vmem:[#allocation3 + $0x200] sm:$0xff] }
 0x322   :  { %v9548_v37 = vpop.permute.xlu0 %9547  ;;  %v6461_v13 = vsel %vm6450_vm15, %v6396_v0, %v9544_v9  ;;  %v6462_v24 = vsel %vm6450_vm15, %v6397_v11, %v9545_v6  ;;  %v3883_v6 = vld [vmem:[#allocation3 + $0x218] sm:$0xff]  ;;  %v3884_v11 = vld [vmem:[#allocation3 + $0x220] sm:$0xff] }
 0x323   :  { %v9550_v36 = vunpack.i.h.bf16 %v9548_v37  ;;  %v9549_v31 = vunpack.i.l.bf16 %v9548_v37  ;;  %v15007_v20 = vpop.permute.xlu1 %9552  ;;  %v15057_v9 = vld [vmem:[#allocation3 + $0x278] sm:$0xff] }
 0x324   :  { %9837 = vrot.lane.b32.xlu0 %v14911_v53, %s10705_s21  ;;  %v15023_v53 = vpack.i.bf16 %v14967_v16, %v14964_v61  ;;  %v4400_v32 = vrot.slane %v15057_v9, 1 }
 0x325   :  { %v6524_v23 = vsel %vm6515_vm0, %v6459_v12, %v9549_v31  ;;  %v6525_v34 = vsel %vm6515_vm0, %v6460_v47, %v9550_v36  ;;  %9842 = vrot.lane.b32.xlu1 %v14959_v28, %s10705_s21  ;;  %v3881_v36 = vld [vmem:[#allocation3 + $0x208] sm:$0xff]  ;;  %v4481_v47 = vrot.slane %v3882_v56, 7 }
 0x326   :  { %v9558_v49 = vpop.permute.xlu0 %9557  ;;  %v6584_v43 = vpack.c.bf16 %v6525_v34, %v6524_v23  ;;  %v4479_v0 = vrot.slane %v3881_v36, 7 }
 0x327   :  { %v9560_v39 = vunpack.i.h.bf16 %v9558_v49  ;;  %v9559_v14 = vunpack.i.l.bf16 %v9558_v49  ;;  %v15027_v50 = vpop.permute.xlu1 %9562 }
 0x328   :  { %9847 = vrot.lane.b32.xlu0 %v14934_v52, %s10706_s26  ;;  %7920 = vmatprep.mubr.msk.bf16.mxu1 %vm6655_vm4, %v6584_v43  ;;  %v4388_v52 = vrot.slane %v14924_v44, 1  ;;  %v4478_v43 = vrot.slane %v3880_v41, 7 }
 0x329   :  { %v6527_v60 = vsel %vm6515_vm0, %v6462_v24, %v9560_v39  ;;  %v6526_v62 = vsel %vm6515_vm0, %v6461_v13, %v9559_v14  ;;  %9852 = vrot.lane.b32.xlu1 %v15023_v53, %s10706_s26  ;;  %v15067_v39 = vld [vmem:[#allocation3 + $0x228] sm:$0xff]  ;;  %v15069_v14 = vld [vmem:[#allocation3 + $0x230] sm:$0xff]  ;;  %v4493_v24 = vrot.slane %v3883_v6, 1 }
 0x32a   :  { %v15038_v29 = vpop.permute.xlu0 %9567  ;;  %v6585_v45 = vpack.c.bf16 %v6527_v60, %v6526_v62  ;;  %v4389_v27 = vsel %vm822_vm1, %v4387_v22, %v4388_v52  ;;  %v4391_v17 = vsel %vm822_vm1, %v4388_v52, %v4390_v33  ;;  %v4491_v52 = vrot.slane %v3882_v56, 1 }
 0x32b   :  { %v15040_v55 = vpop.permute.xlu1 %9572  ;;  %v7884_v58 = vpop.f32.mrb[44].mxu0  ;;  %v15078_v62 = vpack.i.bf16 %v4391_v17, %v4389_v27  ;;  %v4490_v22 = vrot.slane %v3881_v36, 1 }
 0x32c   :  { %9857 = vrot.lane.b32.xlu0 %v14946_v42, %s10707_s17  ;;  %7921 = vmatmul.mubr.msk.bf16.gmra.mrb[8].mxu1 %vm6655_vm4, %v6585_v45  ;;  %v3473_v2 = vadd.f32 %v14652_v18, %v7884_v58  ;;  %v3464_v37 = vpop.f32.mrb[45].mxu0  ;;  %v4482_v45 = vsel %vm565_vm2, %v4479_v0, %v4481_v47  ;;  %v4506_v58 = vrot.slane %v3884_v11, 7  ;;  %v4494_v6 = vsel %vm822_vm1, %v4491_v52, %v4493_v24 }
 0x32d   :  { %9862 = vrot.lane.b32.xlu1 %v15044_v19, %s10707_s17  ;;  %v3465_v44 = vadd.f32 %v14652_v18, %v3464_v37  ;;  %v7885_v31 = vpop.f32.mrb[46].mxu0  ;;  %v4480_v37 = vsel %vm565_vm2, %v4478_v43, %v4479_v0  ;;  %v4492_v47 = vsel %vm822_vm1, %v4490_v22, %v4491_v52  ;;  %v9574_v43 = vunpack.i.l.bf16 %v15040_v55 }
 0x32e   :  { %v15055_v12 = vpop.permute.xlu0 %9577  ;;  %v3589_v35 = vmax.f32 %v3473_v2, 0.0  ;;  %v3476_v38 = vadd.f32 %v14652_v18, %v7885_v31  ;;  %v3467_v23 = vpop.f32.mrb[47].mxu0  ;;  %v4509_v2 = vrot.slane %v15069_v14, 7  ;;  %v15092_v41 = vpack.i.bf16 %v4482_v45, %v4480_v37 }
 0x32f   :  { %v15060_v34 = vpop.permute.xlu1 %9582  ;;  %v3587_v46 = vmax.f32 %v3465_v44, 0.0  ;;  %v3468_v49 = vadd.f32 %v14652_v18, %v3467_v23  ;;  %v15094_v44 = vpack.i.bf16 %v3882_v56, %v3881_v36  ;;  %v9565_v56 = vunpack.i.h.bf16 %v15027_v50 }
 0x330   :  { %9867 = vrot.lane.b32.xlu0 %v14959_v28, %s10708_s4  ;;  %3798 = vst.msk [vmem:[#allocation3 + $0x348] sm:$0xff] %vm2639_vm3, %v3589_v35  ;;  %v3590_v13 = vmax.f32 %v3476_v38, 0.0  ;;  %v9555_v35 = vunpack.i.h.bf16 %v15007_v20  ;;  %v9554_v38 = vunpack.i.l.bf16 %v15007_v20  ;;  %v9564_v36 = vunpack.i.l.bf16 %v15027_v50 }
 0x331   :  { %9872 = vrot.lane.b32.xlu1 %v14946_v42, %s10698_s24  ;;  %3796 = vst.msk [vmem:[#allocation3 + $0x328] sm:$0xff] %vm2639_vm3, %v3587_v46  ;;  %v3588_v18 = vmax.f32 %v3468_v49, 0.0  ;;  %v4507_v42 = vrot.slane %v15067_v39, 7  ;;  %v9570_v46 = vunpack.i.h.bf16 %v15038_v29  ;;  %v9569_v49 = vunpack.i.l.bf16 %v15038_v29 }
 0x332   :  { %v15076_v60 = vpop.permute.xlu0 %9587  ;;  %3799 = vst.msk [vmem:[#allocation3 + $0x350] sm:$0xff] %vm2639_vm3, %v3590_v13  ;;  %v9575_v20 = vunpack.i.h.bf16 %v15040_v55  ;;  %v15118_v0 = vpack.i.bf16 %v4494_v6, %v4492_v47  ;;  %v9580_v11 = vunpack.i.h.bf16 %v15055_v12  ;;  %v9579_v50 = vunpack.i.l.bf16 %v15055_v12 }
 0x333   :  { %v15082_v33 = vpop.permute.xlu1 %9592  ;;  %3797 = vst.msk [vmem:[#allocation3 + $0x330] sm:$0xff] %vm2639_vm3, %v3588_v18  ;;  %v15103_v27 = vsel %vm565_vm2, %v4506_v58, %v4507_v42  ;;  %v15106_v17 = vsel %vm565_vm2, %v4507_v42, %v4509_v2  ;;  %v6077_v24 = vsel %vm2639_vm3, %v14316_v48, %v9555_v35  ;;  %v6076_v55 = vsel %vm2639_vm3, %v14323_v15, %v9554_v38 }
 0x334   :  { %9877 = vrot.lane.b32.xlu0 %v15078_v62, %s10708_s4  ;;  %v9931_v29 = vpack.i.bf16 %v15106_v17, %v15103_v27  ;;  %v9585_v18 = vunpack.i.h.bf16 %v15060_v34  ;;  %v9584_v45 = vunpack.i.l.bf16 %v15060_v34  ;;  %v6079_v12 = vsel %vm2639_vm3, %v14345_v1, %v9565_v56 }
 0x335   :  { %9882 = vrot.lane.b32.xlu1 %v15044_v19, %s10698_s24  ;;  %v6078_v58 = vsel %vm2639_vm3, %v14339_v10, %v9564_v36  ;;  %v6141_v42 = vsel %vm2769_vm6, %v6077_v24, %v9570_v46  ;;  %v6140_v2 = vsel %vm2769_vm6, %v6076_v55, %v9569_v49  ;;  %v6143_v15 = vsel %vm2769_vm6, %v6079_v12, %v9575_v20 }
 0x336   :  { %v9598_v31 = vpop.permute.xlu0 %9597  ;;  %v6142_v48 = vsel %vm2769_vm6, %v6078_v58, %v9574_v43  ;;  %v9590_v34 = vunpack.i.h.bf16 %v15076_v60  ;;  %v9589_v37 = vunpack.i.l.bf16 %v15076_v60  ;;  %v6204_v10 = vsel %vm2899_vm8, %v6140_v2, %v9579_v50 }
 0x337   :  { %v15100_v23 = vpop.permute.xlu1 %9602  ;;  %v6205_v1 = vsel %vm2899_vm8, %v6141_v42, %v9580_v11  ;;  %v9600_v22 = vunpack.i.h.bf16 %v9598_v31  ;;  %v9599_v47 = vunpack.i.l.bf16 %v9598_v31  ;;  %v6207_v35 = vsel %vm2899_vm8, %v6143_v15, %v9585_v18 }
 0x338   :  { %9887 = vrot.lane.b32.xlu0 %v14959_v28, %s10700_s27  ;;  %v9941_v28 = vpack.i.bf16 %v15069_v14, %v15067_v39  ;;  %v9595_v46 = vunpack.i.h.bf16 %v15082_v33  ;;  %v9594_v60 = vunpack.i.l.bf16 %v15082_v33  ;;  %v6268_v43 = vsel %vm3029_vm10, %v6204_v10, %v9589_v37 }
 0x339   :  { %9892 = vrot.lane.b32.xlu1 %v15078_v62, %s10700_s27  ;;  %v6269_v31 = vsel %vm3029_vm10, %v6205_v1, %v9590_v34  ;;  %v9605_v11 = vunpack.i.h.bf16 %v15100_v23  ;;  %v9604_v50 = vunpack.i.l.bf16 %v15100_v23  ;;  %v15176_v1 = vld [vmem:[#allocation3 + $0x250] sm:$0xff] }
 0x33a   :  { %v9608_v13 = vpop.permute.xlu0 %9607  ;;  %v6334_v33 = vsel %vm6320_vm13, %v6269_v31, %v9600_v22  ;;  %v6271_v34 = vsel %vm3029_vm10, %v6207_v35, %v9595_v46  ;;  %v15190_v31 = vld [vmem:[#allocation3 + $0x248] sm:$0xff] }
 0x33b   :  { %v9613_v52 = vpop.permute.xlu1 %9612  ;;  %v9610_v38 = vunpack.i.h.bf16 %v9608_v13  ;;  %v9609_v56 = vunpack.i.l.bf16 %v9608_v13  ;;  %v6333_v13 = vsel %vm6320_vm13, %v6268_v43, %v9599_v47  ;;  %v6336_v47 = vsel %vm6320_vm13, %v6271_v34, %v9605_v11 }
 0x33c   :  { %9897 = vrot.lane.b32.xlu0 %v15023_v53, %s10702_s18  ;;  %v6206_v53 = vsel %vm2899_vm8, %v6142_v48, %v9584_v45  ;;  %v9615_v24 = vunpack.i.h.bf16 %v9613_v52  ;;  %v9614_v55 = vunpack.i.l.bf16 %v9613_v52  ;;  %v4518_v11 = vrot.slane %v15067_v39, 1 }
 0x33d   :  { %9902 = vrot.lane.b32.xlu1 %v15092_v41, %s10702_s18  ;;  %v6399_v45 = vsel %vm6385_vm14, %v6334_v33, %v9610_v38  ;;  %v6270_v52 = vsel %vm3029_vm10, %v6206_v53, %v9594_v60  ;;  %v3887_v53 = vld [vmem:[#allocation3 + $0x238] sm:$0xff]  ;;  %v9951_v27 = vpack.i.bf16 %v15176_v1, %v15190_v31  ;;  %v4392_v17 = vrot.slane %v15190_v31, 1 }
 0x33e   :  { %v9618_v6 = vpop.permute.xlu0 %9617  ;;  %v6335_v22 = vsel %vm6320_vm13, %v6270_v52, %v9604_v50  ;;  %v4519_v50 = vrot.slane %v15069_v14, 1 }
 0x33f   :  { %v9623_v36 = vpop.permute.xlu1 %9622  ;;  %v9620_v49 = vunpack.i.h.bf16 %v9618_v6  ;;  %v9619_v20 = vunpack.i.l.bf16 %v9618_v6  ;;  %v6400_v35 = vsel %vm6385_vm14, %v6335_v22, %v9614_v55 }
 0x340   :  { %9907 = vrot.lane.b32.xlu0 %v15044_v19, %s10704_s19  ;;  %v6398_v19 = vsel %vm6385_vm14, %v6333_v13, %v9609_v56  ;;  %v9625_v48 = vunpack.i.h.bf16 %v9623_v36  ;;  %v9624_v15 = vunpack.i.l.bf16 %v9623_v36  ;;  %v6401_v56 = vsel %vm6385_vm14, %v6336_v47, %v9615_v24  ;;  %v15199_v24 = vld [vmem:[%s16806_s3] ss:$0 sm:$0xff] }
 0x341   :  { %9912 = vrot.lane.b32.xlu1 %v15094_v44, %s10704_s19  ;;  %v6463_v23 = vsel %vm6450_vm15, %v6398_v19, %v9619_v20  ;;  %v6464_v2 = vsel %vm6450_vm15, %v6399_v45, %v9620_v49  ;;  %v3891_v19 = vld [vmem:[#allocation3 + $0x258] sm:$0xff] }
 0x342   :  { %v9628_v18 = vpop.permute.xlu0 %9627  ;;  %v6465_v49 = vsel %vm6450_vm15, %v6400_v35, %v9624_v15  ;;  %v6466_v20 = vsel %vm6450_vm15, %v6401_v56, %v9625_v48  ;;  %v4137_v48 = vrot.slane %v15190_v31, 7  ;;  %v3894_v15 = vld [vmem:[#allocation3 + $0x270] sm:$0xff]  ;;  %v3892_v35 = vld [vmem:[#allocation3 + $0x260] sm:$0xff] }
 0x343   :  { %v9630_v12 = vunpack.i.h.bf16 %v9628_v18  ;;  %v9629_v58 = vunpack.i.l.bf16 %v9628_v18  ;;  %v15164_v42 = vpop.permute.xlu1 %9632  ;;  %v4521_v18 = vrot.slane %v3887_v53, 1  ;;  %v4395_v53 = vrot.slane %v3891_v19, 1  ;;  %v3896_v56 = vld [vmem:[#allocation3 + $0x280] sm:$0xff] }
 0x344   :  { %9917 = vrot.lane.b32.xlu0 %v15078_v62, %s10705_s21  ;;  %v4139_v62 = vrot.slane %v15176_v1, 7 }
 0x345   :  { %v6528_v37 = vsel %vm6515_vm0, %v6463_v23, %v9629_v58  ;;  %v6529_v10 = vsel %vm6515_vm0, %v6464_v2, %v9630_v12  ;;  %9922 = vrot.lane.b32.xlu1 %v15118_v0, %s10705_s21  ;;  %v4393_v2 = vrot.slane %v15176_v1, 1 }
 0x346   :  { %v9638_v6 = vpop.permute.xlu0 %9637  ;;  %v6586_v38 = vpack.c.bf16 %v6529_v10, %v6528_v37 }
 0x347   :  { %v9640_v36 = vunpack.i.h.bf16 %v9638_v6  ;;  %v9639_v46 = vunpack.i.l.bf16 %v9638_v6  ;;  %v15183_v60 = vpop.permute.xlu1 %9642  ;;  %v7888_v43 = vpop.f32.mrb[48].mxu0  ;;  %v4520_v6 = vsel %vm822_vm1, %v4518_v11, %v4519_v50 }
 0x348   :  { %9927 = vrot.lane.b32.xlu0 %v15092_v41, %s10706_s26  ;;  %7924 = vmatprep.mubr.msk.bf16.mxu1 %vm6655_vm4, %v6586_v38  ;;  %v3489_v55 = vadd.f32 %v15199_v24, %v7888_v43  ;;  %v3480_v41 = vpop.f32.mrb[49].mxu0  ;;  %v3893_v38 = vld [vmem:[#allocation3 + $0x268] sm:$0xff] }
 0x349   :  { %v6531_v13 = vsel %vm6515_vm0, %v6466_v20, %v9640_v36  ;;  %v6530_v33 = vsel %vm6515_vm0, %v6465_v49, %v9639_v46  ;;  %9932 = vrot.lane.b32.xlu1 %v9931_v29, %s10706_s26  ;;  %v3481_v45 = vadd.f32 %v15199_v24, %v3480_v41  ;;  %v7889_v12 = vpop.f32.mrb[50].mxu0  ;;  %v15217_v29 = vld [vmem:[#allocation3 + $0x290] sm:$0xff]  ;;  %v4522_v36 = vsel %vm822_vm1, %v4519_v50, %v4521_v18  ;;  %v3897_v49 = vld [vmem:[#allocation3 + $0x288] sm:$0xff]  ;;  %v3900_v41 = vld [vmem:[#allocation3 + $0x2a0] sm:$0xff] }
 0x34a   :  { %v15207_v58 = vpop.permute.xlu0 %9647  ;;  %v6587_v23 = vpack.c.bf16 %v6531_v13, %v6530_v33  ;;  %v3593_v52 = vmax.f32 %v3489_v55, 0.0  ;;  %v3492_v34 = vadd.f32 %v15199_v24, %v7889_v12  ;;  %v3483_v37 = vpop.f32.mrb[51].mxu0  ;;  %v4398_v46 = vrot.slane %v3894_v15, 1  ;;  %v3899_v13 = vld [vmem:[#allocation3 + $0x298] sm:$0xff]  ;;  %v15242_v18 = vld [vmem:[#allocation3 + $0x2b0] sm:$0xff] }
 0x34b   :  { %v15212_v10 = vpop.permute.xlu1 %9652  ;;  %v3591_v22 = vmax.f32 %v3481_v45, 0.0  ;;  %v3484_v47 = vadd.f32 %v15199_v24, %v3483_v37  ;;  %v4149_v11 = vrot.slane %v15217_v29, 7  ;;  %v15237_v33 = vsel %vm565_vm2, %v4137_v48, %v4139_v62 }
 0x34c   :  { %9937 = vrot.lane.b32.xlu0 %v15094_v44, %s10707_s17  ;;  %7925 = vmatmul.mubr.msk.bf16.gmra.mrb[12].mxu1 %vm6655_vm4, %v6587_v23  ;;  %3802 = vst.msk [vmem:[#allocation3 + $0x388] sm:$0xff] %vm2639_vm3, %v3593_v52  ;;  %v3594_v1 = vmax.f32 %v3492_v34, 0.0  ;;  %v4144_v44 = vrot.slane %v3894_v15, 7  ;;  %v4397_v14 = vrot.slane %v3893_v38, 1  ;;  %v4142_v50 = vrot.slane %v3893_v38, 7 }
 0x34d   :  { %9942 = vrot.lane.b32.xlu1 %v9941_v28, %s10707_s17  ;;  %3800 = vst.msk [vmem:[#allocation3 + $0x368] sm:$0xff] %vm2639_vm3, %v3591_v22  ;;  %v3592_v20 = vmax.f32 %v3484_v47, 0.0  ;;  %v4141_v28 = vrot.slane %v3892_v35, 7  ;;  %v4146_v55 = vrot.slane %v3896_v56, 7  ;;  %v9956_v19 = vpack.i.bf16 %v4522_v36, %v4520_v6 }
 0x34e   :  { %v15231_v43 = vpop.permute.xlu0 %9657  ;;  %3803 = vst.msk [vmem:[#allocation3 + $0x390] sm:$0xff] %vm2639_vm3, %v3594_v1  ;;  %v4394_v62 = vsel %vm822_vm1, %v4392_v17, %v4393_v2  ;;  %v4396_v45 = vsel %vm822_vm1, %v4393_v2, %v4395_v53  ;;  %v4147_v12 = vrot.slane %v3897_v49, 7  ;;  %v4399_v23 = vsel %vm822_vm1, %v4397_v14, %v4398_v46 }
 0x34f   :  { %v15240_v39 = vpop.permute.xlu1 %9662  ;;  %3801 = vst.msk [vmem:[#allocation3 + $0x370] sm:$0xff] %vm2639_vm3, %v3592_v20  ;;  %v4401_v52 = vsel %vm822_vm1, %v4398_v46, %v4400_v32  ;;  %v15255_v34 = vsel %vm565_vm2, %v4142_v50, %v4144_v44  ;;  %v4403_v37 = vrot.slane %v15217_v29, 1  ;;  %v4405_v17 = vrot.slane %v3899_v13, 1 }
 0x350   :  { %9947 = vrot.lane.b32.xlu0 %v15118_v0, %s10708_s4  ;;  %v15258_v0 = vld [vmem:[#allocation3 + $0x2a8] sm:$0xff]  ;;  %v15263_v2 = vsel %vm565_vm2, %v4147_v12, %v4149_v11  ;;  %v4154_v47 = vrot.slane %v15242_v18, 7  ;;  %v15268_v9 = vpack.i.bf16 %v3894_v15, %v3893_v38  ;;  %v9966_v32 = vpack.i.bf16 %v4396_v45, %v4394_v62 }
 0x351   :  { %9952 = vrot.lane.b32.xlu1 %v9951_v27, %s10698_s24  ;;  %v4151_v27 = vrot.slane %v3900_v41, 7  ;;  %v15271_v53 = vsel %vm565_vm2, %v4141_v28, %v4142_v50  ;;  %v4402_v35 = vrot.slane %v3897_v49, 1  ;;  %v15274_v56 = vpack.i.bf16 %v4401_v52, %v4399_v23 }
 0x352   :  { %v15260_v22 = vpop.permute.xlu0 %9667  ;;  %v9976_v1 = vpack.i.bf16 %v15255_v34, %v15271_v53  ;;  %v15279_v36 = vsel %vm565_vm2, %v4146_v55, %v4147_v12  ;;  %v4152_v46 = vrot.slane %v15258_v0, 7  ;;  %v9635_v15 = vunpack.i.h.bf16 %v15164_v42 }
 0x353   :  { %v15266_v6 = vpop.permute.xlu1 %9672  ;;  %v15287_v38 = vpack.i.bf16 %v15263_v2, %v15279_v36  ;;  %v4404_v44 = vsel %vm822_vm1, %v4402_v35, %v4403_v37  ;;  %v9634_v20 = vunpack.i.l.bf16 %v15164_v42  ;;  %v9645_v11 = vunpack.i.h.bf16 %v15183_v60 }
 0x354   :  { %9957 = vrot.lane.b32.xlu0 %v9956_v19, %s10708_s4  ;;  %v4406_v14 = vsel %vm822_vm1, %v4403_v37, %v4405_v17  ;;  %v15294_v28 = vsel %vm565_vm2, %v4152_v46, %v4154_v47  ;;  %v9644_v50 = vunpack.i.l.bf16 %v15183_v60  ;;  %v9650_v55 = vunpack.i.h.bf16 %v15207_v58 }
 0x355   :  { %9962 = vrot.lane.b32.xlu1 %v15268_v9, %s10698_s24  ;;  %v15301_v19 = vpack.i.bf16 %v15217_v29, %v3897_v49  ;;  %v9649_v62 = vunpack.i.l.bf16 %v15207_v58  ;;  %v9654_v42 = vunpack.i.l.bf16 %v15212_v10  ;;  %v15307_v45 = vsel %vm565_vm2, %v4151_v27, %v4152_v46 }
 0x356   :  { %v9678_v13 = vpop.permute.xlu0 %9677  ;;  %v6081_v12 = vsel %vm2639_vm3, %v14442_v26, %v9635_v15  ;;  %v9655_v60 = vunpack.i.h.bf16 %v15212_v10  ;;  %v15314_v23 = vpack.i.bf16 %v4406_v14, %v4404_v44  ;;  %v15318_v58 = vpack.i.bf16 %v15294_v28, %v15307_v45 }
 0x357   :  { %v15298_v41 = vpop.permute.xlu1 %9682  ;;  %v6080_v29 = vsel %vm2639_vm3, %v14448_v8, %v9634_v20  ;;  %v6083_v49 = vsel %vm2639_vm3, %v14482_v30, %v9645_v11  ;;  %v9660_v52 = vunpack.i.h.bf16 %v15231_v43  ;;  %v9659_v26 = vunpack.i.l.bf16 %v15231_v43 }
 0x358   :  { %9967 = vrot.lane.b32.xlu0 %v9966_v32, %s10700_s27  ;;  %v6082_v37 = vsel %vm2639_vm3, %v14538_v25, %v9644_v50  ;;  %v6145_v17 = vsel %vm2769_vm6, %v6081_v12, %v9650_v55  ;;  %v9665_v27 = vunpack.i.h.bf16 %v15240_v39  ;;  %v9664_v47 = vunpack.i.l.bf16 %v15240_v39 }
 0x359   :  { %9972 = vrot.lane.b32.xlu1 %v15274_v56, %s10700_s27  ;;  %v6144_v8 = vsel %vm2769_vm6, %v6080_v29, %v9649_v62  ;;  %v6146_v35 = vsel %vm2769_vm6, %v6082_v37, %v9654_v42  ;;  %v9670_v30 = vunpack.i.h.bf16 %v15260_v22  ;;  %v9669_v46 = vunpack.i.l.bf16 %v15260_v22 }
 0x35a   :  { %v9688_v10 = vpop.permute.xlu0 %9687  ;;  %v6147_v43 = vsel %vm2769_vm6, %v6083_v49, %v9655_v60  ;;  %v9675_v25 = vunpack.i.h.bf16 %v15266_v6  ;;  %v9674_v15 = vunpack.i.l.bf16 %v15266_v6  ;;  %v9679_v44 = vunpack.i.l.bf16 %v9678_v13 }
 0x35b   :  { %v9693_v32 = vpop.permute.xlu1 %9692  ;;  %v6208_v39 = vsel %vm2899_vm8, %v6144_v8, %v9659_v26  ;;  %v6209_v20 = vsel %vm2899_vm8, %v6145_v17, %v9660_v52  ;;  %v9680_v11 = vunpack.i.h.bf16 %v9678_v13  ;;  %v9684_v14 = vunpack.i.l.bf16 %v15298_v41 }
 0x35c   :  { %9977 = vrot.lane.b32.xlu0 %v9976_v1, %s10702_s18  ;;  %v6210_v1 = vsel %vm2899_vm8, %v6146_v35, %v9664_v47  ;;  %v6211_v50 = vsel %vm2899_vm8, %v6147_v43, %v9665_v27  ;;  %v9690_v55 = vunpack.i.h.bf16 %v9688_v10  ;;  %v9689_v62 = vunpack.i.l.bf16 %v9688_v10 }
 0x35d   :  { %9982 = vrot.lane.b32.xlu1 %v15287_v38, %s10702_s18  ;;  %v6272_v6 = vsel %vm3029_vm10, %v6208_v39, %v9669_v46  ;;  %v6273_v12 = vsel %vm3029_vm10, %v6209_v20, %v9670_v30  ;;  %v6274_v13 = vsel %vm3029_vm10, %v6210_v1, %v9674_v15  ;;  %v6275_v49 = vsel %vm3029_vm10, %v6211_v50, %v9675_v25 }
 0x35e   :  { %v9698_v22 = vpop.permute.xlu0 %9697  ;;  %v6337_v52 = vsel %vm6320_vm13, %v6272_v6, %v9679_v44  ;;  %v9685_v26 = vunpack.i.h.bf16 %v15298_v41  ;;  %v6338_v10 = vsel %vm6320_vm13, %v6273_v12, %v9680_v11  ;;  %v6339_v37 = vsel %vm6320_vm13, %v6274_v13, %v9684_v14 }
 0x35f   :  { %v9703_v42 = vpop.permute.xlu1 %9702  ;;  %v9700_v60 = vunpack.i.h.bf16 %v9698_v22  ;;  %v9699_v29 = vunpack.i.l.bf16 %v9698_v22  ;;  %v9695_v17 = vunpack.i.h.bf16 %v9693_v32  ;;  %v9694_v27 = vunpack.i.l.bf16 %v9693_v32 }
 0x360   :  { %9987 = vrot.lane.b32.xlu0 %v15268_v9, %s10704_s19  ;;  %v6402_v9 = vsel %vm6385_vm14, %v6337_v52, %v9689_v62  ;;  %v6403_v8 = vsel %vm6385_vm14, %v6338_v10, %v9690_v55  ;;  %v9705_v25 = vunpack.i.h.bf16 %v9703_v42  ;;  %v9704_v15 = vunpack.i.l.bf16 %v9703_v42 }
 0x361   :  { %9992 = vrot.lane.b32.xlu1 %v15301_v19, %s10704_s19  ;;  %v6467_v41 = vsel %vm6450_vm15, %v6402_v9, %v9699_v29  ;;  %v6468_v43 = vsel %vm6450_vm15, %v6403_v8, %v9700_v60  ;;  %v6340_v32 = vsel %vm6320_vm13, %v6275_v49, %v9685_v26  ;;  %v6404_v22 = vsel %vm6385_vm14, %v6339_v37, %v9694_v27  ;;  %v3903_v37 = vld [vmem:[#allocation3 + $0x2b8] sm:$0xff] }
 0x362   :  { %v9708_v47 = vpop.permute.xlu0 %9707  ;;  %v6405_v1 = vsel %vm6385_vm14, %v6340_v32, %v9695_v17  ;;  %v6469_v49 = vsel %vm6450_vm15, %v6404_v22, %v9704_v15  ;;  %v3905_v15 = vld [vmem:[#allocation3 + $0x2c8] sm:$0xff]  ;;  %v4407_v32 = vrot.slane %v15258_v0, 1  ;;  %v3908_v22 = vld [vmem:[#allocation3 + $0x2e0] sm:$0xff] }
 0x363   :  { %v9710_v35 = vunpack.i.h.bf16 %v9708_v47  ;;  %v9709_v30 = vunpack.i.l.bf16 %v9708_v47  ;;  %v15360_v46 = vpop.permute.xlu1 %9712  ;;  %v7892_v44 = vpop.f32.mrb[52].mxu0  ;;  %v6470_v52 = vsel %vm6450_vm15, %v6405_v1, %v9705_v25  ;;  %v3904_v25 = vld [vmem:[#allocation3 + $0x2c0] sm:$0xff]  ;;  %v15409_v1 = vld [vmem:[#allocation3 + $0x2f0] sm:$0xff] }
 0x364   :  { %9997 = vrot.lane.b32.xlu0 %v15274_v56, %s10705_s21  ;;  %v3505_v11 = vadd.f32 %v15199_v24, %v7892_v44  ;;  %v3496_v14 = vpop.f32.mrb[53].mxu0  ;;  %v3906_v44 = vld [vmem:[#allocation3 + $0x2d0] sm:$0xff] }
 0x365   :  { %v6532_v39 = vsel %vm6515_vm0, %v6467_v41, %v9709_v30  ;;  %v6533_v20 = vsel %vm6515_vm0, %v6468_v43, %v9710_v35  ;;  %10002 = vrot.lane.b32.xlu1 %v15314_v23, %s10705_s21  ;;  %v3497_v50 = vadd.f32 %v15199_v24, %v3496_v14  ;;  %v7893_v55 = vpop.f32.mrb[54].mxu0  ;;  %v15397_v30 = vpack.i.bf16 %v15242_v18, %v15258_v0 }
 0x366   :  { %v9718_v56 = vpop.permute.xlu0 %9717  ;;  %v6588_v62 = vpack.c.bf16 %v6533_v20, %v6532_v39  ;;  %v3597_v42 = vmax.f32 %v3505_v11, 0.0  ;;  %v3508_v6 = vadd.f32 %v15199_v24, %v7893_v55  ;;  %v3499_v29 = vpop.f32.mrb[55].mxu0  ;;  %v4408_v41 = vrot.slane %v15242_v18, 1  ;;  %v3907_v39 = vld [vmem:[#allocation3 + $0x2d8] sm:$0xff] }
 0x367   :  { %v9720_v12 = vunpack.i.h.bf16 %v9718_v56  ;;  %v9719_v60 = vunpack.i.l.bf16 %v9718_v56  ;;  %v15376_v13 = vpop.permute.xlu1 %9722  ;;  %v3595_v26 = vmax.f32 %v3497_v50, 0.0  ;;  %v3500_v10 = vadd.f32 %v15199_v24, %v3499_v29 }
 0x368   :  { %10007 = vrot.lane.b32.xlu0 %v15287_v38, %s10706_s26  ;;  %7928 = vmatprep.mubr.msk.bf16.mxu1 %vm6655_vm4, %v6588_v62  ;;  %3806 = vst.msk [vmem:[#allocation3 + $0x3c8] sm:$0xff] %vm2639_vm3, %v3597_v42  ;;  %v3598_v17 = vmax.f32 %v3508_v6, 0.0  ;;  %v4410_v43 = vrot.slane %v3903_v37, 1  ;;  %v4156_v18 = vrot.slane %v3904_v25, 7  ;;  %v4157_v11 = vrot.slane %v3905_v15, 7  ;;  %v15417_v42 = vld [vmem:[#allocation3 + $0x2e8] sm:$0xff] }
 0x369   :  { %v6535_v27 = vsel %vm6515_vm0, %v6470_v52, %v9720_v12  ;;  %v6534_v47 = vsel %vm6515_vm0, %v6469_v49, %v9719_v60  ;;  %10012 = vrot.lane.b32.xlu1 %v15318_v58, %s10706_s26  ;;  %3804 = vst.msk [vmem:[#allocation3 + $0x3a8] sm:$0xff] %vm2639_vm3, %v3595_v26  ;;  %v3596_v9 = vmax.f32 %v3500_v10, 0.0  ;;  %v4159_v14 = vrot.slane %v3906_v44, 7 }
 0x36a   :  { %v15390_v8 = vpop.permute.xlu0 %9727  ;;  %v6589_v35 = vpack.c.bf16 %v6535_v27, %v6534_v47  ;;  %3807 = vst.msk [vmem:[#allocation3 + $0x3d0] sm:$0xff] %vm2639_vm3, %v3598_v17  ;;  %v4409_v55 = vsel %vm822_vm1, %v4407_v32, %v4408_v41  ;;  %v4411_v56 = vsel %vm822_vm1, %v4408_v41, %v4410_v43  ;;  %v4413_v62 = vrot.slane %v3906_v44, 1 }
 0x36b   :  { %v15393_v38 = vpop.permute.xlu1 %9732  ;;  %3805 = vst.msk [vmem:[#allocation3 + $0x3b0] sm:$0xff] %vm2639_vm3, %v3596_v9  ;;  %v4415_v0 = vrot.slane %v3907_v39, 1  ;;  %v4161_v6 = vrot.slane %v3908_v22, 7  ;;  %v4164_v12 = vrot.slane %v15409_v1, 7  ;;  %v15422_v29 = vpack.i.bf16 %v4411_v56, %v4409_v55 }
 0x36c   :  { %10017 = vrot.lane.b32.xlu0 %v15301_v19, %s10707_s17  ;;  %7929 = vmatmul.mubr.msk.bf16.gmra.mrb[16].mxu1 %vm6655_vm4, %v6589_v35  ;;  %v15425_v49 = vsel %vm565_vm2, %v4156_v18, %v4157_v11  ;;  %v15428_v52 = vsel %vm565_vm2, %v4157_v11, %v4159_v14  ;;  %v4412_v26 = vrot.slane %v3905_v15, 1  ;;  %v4162_v37 = vrot.slane %v15417_v42, 7 }
 0x36d   :  { %10022 = vrot.lane.b32.xlu1 %v15397_v30, %s10707_s17  ;;  %v9715_v17 = vunpack.i.h.bf16 %v15360_v46  ;;  %v4416_v27 = vsel %vm822_vm1, %v4413_v62, %v4415_v0  ;;  %v9714_v47 = vunpack.i.l.bf16 %v15360_v46  ;;  %v15443_v9 = vpack.i.bf16 %v15428_v52, %v15425_v49 }
 0x36e   :  { %v15407_v20 = vpop.permute.xlu0 %9737  ;;  %v15445_v35 = vpack.i.bf16 %v3906_v44, %v3905_v15  ;;  %v15448_v41 = vsel %vm565_vm2, %v4162_v37, %v4164_v12  ;;  %v9725_v43 = vunpack.i.h.bf16 %v15376_v13  ;;  %v9724_v25 = vunpack.i.l.bf16 %v15376_v13 }
 0x36f   :  { %v15411_v50 = vpop.permute.xlu1 %9742  ;;  %v9730_v39 = vunpack.i.h.bf16 %v15390_v8  ;;  %v9729_v46 = vunpack.i.l.bf16 %v15390_v8  ;;  %v15459_v14 = vsel %vm565_vm2, %v4161_v6, %v4162_v37  ;;  %v6085_v15 = vsel %vm2639_vm3, %v14575_v7, %v9715_v17 }
 0x370   :  { %10027 = vrot.lane.b32.xlu0 %v15314_v23, %s10708_s4  ;;  %v9735_v44 = vunpack.i.h.bf16 %v15393_v38  ;;  %v9734_v22 = vunpack.i.l.bf16 %v15393_v38  ;;  %v15469_v13 = vpack.i.bf16 %v15448_v41, %v15459_v14  ;;  %v6084_v8 = vsel %vm2639_vm3, %v14587_v4, %v9714_v47 }
 0x371   :  { %10032 = vrot.lane.b32.xlu1 %v15301_v19, %s10698_s24  ;;  %v4414_v19 = vsel %vm822_vm1, %v4412_v26, %v4413_v62  ;;  %v9740_v55 = vunpack.i.h.bf16 %v15407_v20  ;;  %v9739_v56 = vunpack.i.l.bf16 %v15407_v20  ;;  %v9744_v7 = vunpack.i.l.bf16 %v15411_v50 }
 0x372   :  { %v9748_v60 = vpop.permute.xlu0 %9747  ;;  %v15456_v11 = vpack.i.bf16 %v4416_v27, %v4414_v19  ;;  %v6087_v38 = vsel %vm2639_vm3, %v14638_v63, %v9725_v43  ;;  %v9745_v62 = vunpack.i.h.bf16 %v15411_v50  ;;  %v6149_v4 = vsel %vm2769_vm6, %v6085_v15, %v9730_v39 }
 0x373   :  { %v15430_v10 = vpop.permute.xlu1 %9752  ;;  %v9749_v0 = vunpack.i.l.bf16 %v9748_v60  ;;  %v6148_v12 = vsel %vm2769_vm6, %v6084_v8, %v9729_v46  ;;  %v9750_v20 = vunpack.i.h.bf16 %v9748_v60  ;;  %v6151_v63 = vsel %vm2769_vm6, %v6087_v38, %v9735_v44 }
 0x374   :  { %10037 = vrot.lane.b32.xlu0 %v15422_v29, %s10708_s4  ;;  %v9754_v26 = vunpack.i.l.bf16 %v15430_v10  ;;  %v6213_v50 = vsel %vm2899_vm8, %v6149_v4, %v9740_v55  ;;  %v6215_v43 = vsel %vm2899_vm8, %v6151_v63, %v9745_v62  ;;  %v9755_v39 = vunpack.i.h.bf16 %v15430_v10 }
 0x375   :  { %10042 = vrot.lane.b32.xlu1 %v15397_v30, %s10698_s24 }
 0x376   :  { %v9758_v32 = vpop.permute.xlu0 %9757 }
 0x377   :  { %v15454_v18 = vpop.permute.xlu1 %9762  ;;  %v9760_v19 = vunpack.i.h.bf16 %v9758_v32  ;;  %v9759_v27 = vunpack.i.l.bf16 %v9758_v32 }
 0x378   :  { %10047 = vrot.lane.b32.xlu0 %v15314_v23, %s10700_s27  ;;  %v6086_v23 = vsel %vm2639_vm3, %v14635_v51, %v9724_v25  ;;  %v6212_v51 = vsel %vm2899_vm8, %v6148_v12, %v9739_v56  ;;  %v9765_v44 = vunpack.i.h.bf16 %v15454_v18 }
 0x379   :  { %10052 = vrot.lane.b32.xlu1 %v15422_v29, %s10700_s27  ;;  %v6150_v17 = vsel %vm2769_vm6, %v6086_v23, %v9734_v22  ;;  %v6276_v25 = vsel %vm3029_vm10, %v6212_v51, %v9749_v0  ;;  %v9764_v22 = vunpack.i.l.bf16 %v15454_v18 }
 0x37a   :  { %v9768_v6 = vpop.permute.xlu0 %9767  ;;  %v6214_v47 = vsel %vm2899_vm8, %v6150_v17, %v9744_v7  ;;  %v6341_v55 = vsel %vm6320_vm13, %v6276_v25, %v9759_v27 }
 0x37b   :  { %v15486_v37 = vpop.permute.xlu1 %9772  ;;  %v9769_v60 = vunpack.i.l.bf16 %v9768_v6  ;;  %v9770_v32 = vunpack.i.h.bf16 %v9768_v6  ;;  %v6278_v15 = vsel %vm3029_vm10, %v6214_v47, %v9754_v26 }
 0x37c   :  { %10057 = vrot.lane.b32.xlu0 %v15318_v58, %s10702_s18  ;;  %v6277_v58 = vsel %vm3029_vm10, %v6213_v50, %v9750_v20  ;;  %v9775_v62 = vunpack.i.h.bf16 %v15486_v37  ;;  %v9774_v0 = vunpack.i.l.bf16 %v15486_v37 }
 0x37d   :  { %10062 = vrot.lane.b32.xlu1 %v15443_v9, %s10702_s18  ;;  %v6342_v56 = vsel %vm6320_vm13, %v6277_v58, %v9760_v19  ;;  %v6406_v10 = vsel %vm6385_vm14, %v6341_v55, %v9769_v60 }
 0x37e   :  { %v9778_v46 = vpop.permute.xlu0 %9777  ;;  %v6407_v4 = vsel %vm6385_vm14, %v6342_v56, %v9770_v32  ;;  %v6343_v56 = vsel %vm6320_vm13, %v6278_v15, %v9764_v22 }
 0x37f   :  { %v9783_v8 = vpop.permute.xlu1 %9782  ;;  %v9780_v7 = vunpack.i.h.bf16 %v9778_v46  ;;  %v9779_v38 = vunpack.i.l.bf16 %v9778_v46  ;;  %v7896_v23 = vpop.f32.mrb[56].mxu0  ;;  %v6279_v46 = vsel %vm3029_vm10, %v6215_v43, %v9755_v39  ;;  %v6408_v43 = vsel %vm6385_vm14, %v6343_v56, %v9774_v0 }
 0x380   :  { %10067 = vrot.lane.b32.xlu0 %v15397_v30, %s10704_s19  ;;  %v3521_v6 = vadd.f32 %v15199_v24, %v7896_v23  ;;  %v3512_v18 = vpop.f32.mrb[57].mxu0  ;;  %v9785_v12 = vunpack.i.h.bf16 %v9783_v8  ;;  %v9784_v20 = vunpack.i.l.bf16 %v9783_v8 }
 0x381   :  { %10072 = vrot.lane.b32.xlu1 %v15445_v35, %s10704_s19  ;;  %v3513_v26 = vadd.f32 %v15199_v24, %v3512_v18  ;;  %v7897_v17 = vpop.f32.mrb[58].mxu0  ;;  %v6471_v47 = vsel %vm6450_vm15, %v6406_v10, %v9779_v38  ;;  %v6472_v60 = vsel %vm6450_vm15, %v6407_v4, %v9780_v7  ;;  %v6344_v7 = vsel %vm6320_vm13, %v6279_v46, %v9765_v44  ;;  %v3911_v44 = vld [vmem:[#allocation3 + $0x2f8] sm:$0xff] }
 0x382   :  { %v9788_v30 = vpop.permute.xlu0 %9787  ;;  %v3601_v63 = vmax.f32 %v3521_v6, 0.0  ;;  %v3524_v19 = vadd.f32 %v15199_v24, %v7897_v17  ;;  %v3515_v37 = vpop.f32.mrb[59].mxu0  ;;  %v6409_v39 = vsel %vm6385_vm14, %v6344_v7, %v9775_v62  ;;  %v6473_v4 = vsel %vm6450_vm15, %v6408_v43, %v9784_v20  ;;  %v15577_v43 = vld [vmem:[#allocation3 + $0x328] sm:$0xff] }
 0x383   :  { %v9790_v27 = vunpack.i.h.bf16 %v9788_v30  ;;  %v9789_v51 = vunpack.i.l.bf16 %v9788_v30  ;;  %v15517_v50 = vpop.permute.xlu1 %9792  ;;  %v3599_v25 = vmax.f32 %v3513_v26, 0.0  ;;  %v3516_v32 = vadd.f32 %v15199_v24, %v3515_v37  ;;  %v3914_v26 = vld [vmem:[#allocation3 + $0x310] sm:$0xff] }
 0x384   :  { %10077 = vrot.lane.b32.xlu0 %v15422_v29, %s10705_s21  ;;  %3810 = vst.msk [vmem:[#allocation3 + $0x408] sm:$0xff] %vm2639_vm3, %v3601_v63  ;;  %v3602_v58 = vmax.f32 %v3524_v19, 0.0  ;;  %v6474_v15 = vsel %vm6450_vm15, %v6409_v39, %v9785_v12  ;;  %v15554_v17 = vpack.i.bf16 %v15409_v1, %v15417_v42  ;;  %v4420_v30 = vrot.slane %v3911_v44, 1  ;;  %v3912_v63 = vld [vmem:[#allocation3 + $0x300] sm:$0xff]  ;;  %v3913_v19 = vld [vmem:[#allocation3 + $0x308] sm:$0xff]  ;;  %v15579_v39 = vld [vmem:[#allocation3 + $0x330] sm:$0xff] }
 0x385   :  { %v6536_v8 = vsel %vm6515_vm0, %v6471_v47, %v9789_v51  ;;  %v6537_v55 = vsel %vm6515_vm0, %v6472_v60, %v9790_v27  ;;  %10082 = vrot.lane.b32.xlu1 %v15456_v11, %s10705_s21  ;;  %3808 = vst.msk [vmem:[#allocation3 + $0x3e8] sm:$0xff] %vm2639_vm3, %v3599_v25  ;;  %v3600_v38 = vmax.f32 %v3516_v32, 0.0  ;;  %v3915_v27 = vld [vmem:[#allocation3 + $0x318] sm:$0xff]  ;;  %v4417_v51 = vrot.slane %v15417_v42, 1 }
 0x386   :  { %v9798_v29 = vpop.permute.xlu0 %9797  ;;  %v6590_v23 = vpack.c.bf16 %v6537_v55, %v6536_v8  ;;  %3811 = vst.msk [vmem:[#allocation3 + $0x410] sm:$0xff] %vm2639_vm3, %v3602_v58  ;;  %v4169_v37 = vrot.slane %v3914_v26, 7  ;;  %v4166_v60 = vrot.slane %v3912_v63, 7  ;;  %v4167_v25 = vrot.slane %v3913_v19, 7 }
 0x387   :  { %v9800_v10 = vunpack.i.h.bf16 %v9798_v29  ;;  %v9799_v6 = vunpack.i.l.bf16 %v9798_v29  ;;  %v15536_v18 = vpop.permute.xlu1 %9802  ;;  %3809 = vst.msk [vmem:[#allocation3 + $0x3f0] sm:$0xff] %vm2639_vm3, %v3600_v38  ;;  %v4425_v32 = vrot.slane %v3915_v27, 1  ;;  %v4423_v55 = vrot.slane %v3914_v26, 1 }
 0x388   :  { %10087 = vrot.lane.b32.xlu0 %v15443_v9, %s10706_s26  ;;  %7932 = vmatprep.mubr.msk.bf16.mxu1 %vm6655_vm4, %v6590_v23  ;;  %v4418_v9 = vrot.slane %v15409_v1, 1  ;;  %v3916_v1 = vld [vmem:[#allocation3 + $0x320] sm:$0xff]  ;;  %v15570_v42 = vsel %vm565_vm2, %v4167_v25, %v4169_v37  ;;  %v4422_v56 = vrot.slane %v3913_v19, 1  ;;  %v15575_v23 = vsel %vm565_vm2, %v4166_v60, %v4167_v25 }
 0x389   :  { %v6539_v22 = vsel %vm6515_vm0, %v6474_v15, %v9800_v10  ;;  %v6538_v62 = vsel %vm6515_vm0, %v6473_v4, %v9799_v6  ;;  %10092 = vrot.lane.b32.xlu1 %v15469_v13, %s10706_s26  ;;  %v4171_v7 = vrot.slane %v3916_v1, 7  ;;  %v15589_v4 = vpack.i.bf16 %v15570_v42, %v15575_v23 }
 0x38a   :  { %v15548_v0 = vpop.permute.xlu0 %9807  ;;  %v6591_v20 = vpack.c.bf16 %v6539_v22, %v6538_v62  ;;  %v4419_v58 = vsel %vm822_vm1, %v4417_v51, %v4418_v9  ;;  %v4421_v8 = vsel %vm822_vm1, %v4418_v9, %v4420_v30  ;;  %v4424_v6 = vsel %vm822_vm1, %v4422_v56, %v4423_v55 }
 0x38b   :  { %v15550_v12 = vpop.permute.xlu1 %9812  ;;  %v15572_v29 = vpack.i.bf16 %v4421_v8, %v4419_v58  ;;  %v15591_v15 = vpack.i.bf16 %v3914_v26, %v3913_v19  ;;  %v9795_v44 = vunpack.i.h.bf16 %v15517_v50  ;;  %v9794_v22 = vunpack.i.l.bf16 %v15517_v50 }
 0x38c   :  { %10097 = vrot.lane.b32.xlu0 %v15445_v35, %s10707_s17  ;;  %7933 = vmatmul.mubr.msk.bf16.gmra.mrb[20].mxu1 %vm6655_vm4, %v6591_v20  ;;  %v4172_v62 = vrot.slane %v15577_v43, 7  ;;  %v4174_v20 = vrot.slane %v15579_v39, 7  ;;  %v9805_v9 = vunpack.i.h.bf16 %v15536_v18  ;;  %v9804_v30 = vunpack.i.l.bf16 %v15536_v18 }
 0x38d   :  { %10102 = vrot.lane.b32.xlu1 %v15554_v17, %s10707_s17  ;;  %v9810_v26 = vunpack.i.h.bf16 %v15548_v0  ;;  %v9809_v19 = vunpack.i.l.bf16 %v15548_v0  ;;  %v9815_v50 = vunpack.i.h.bf16 %v15550_v12  ;;  %v9814_v51 = vunpack.i.l.bf16 %v15550_v12 }
 0x38e   :  { %v9818_v47 = vpop.permute.xlu0 %9817  ;;  %v6089_v18 = vsel %vm2639_vm3, %v14748_v5, %v9795_v44  ;;  %v6088_v58 = vsel %vm2639_vm3, %v14761_v57, %v9794_v22  ;;  %v15620_v0 = vsel %vm565_vm2, %v4171_v7, %v4172_v62  ;;  %v15623_v12 = vsel %vm565_vm2, %v4172_v62, %v4174_v20 }
 0x38f   :  { %v9823_v46 = vpop.permute.xlu1 %9822  ;;  %v9820_v60 = vunpack.i.h.bf16 %v9818_v47  ;;  %v9819_v25 = vunpack.i.l.bf16 %v9818_v47  ;;  %v6091_v47 = vsel %vm2639_vm3, %v14807_v59, %v9805_v9  ;;  %v6153_v57 = vsel %vm2769_vm6, %v6089_v18, %v9810_v26 }
 0x390   :  { %10107 = vrot.lane.b32.xlu0 %v15456_v11, %s10708_s4  ;;  %v9824_v1 = vunpack.i.l.bf16 %v9823_v46  ;;  %v6155_v7 = vsel %vm2769_vm6, %v6091_v47, %v9815_v50 }
 0x391   :  { %10112 = vrot.lane.b32.xlu1 %v15445_v35, %s10698_s24  ;;  %v4426_v35 = vsel %vm822_vm1, %v4423_v55, %v4425_v32  ;;  %v9825_v32 = vunpack.i.h.bf16 %v9823_v46  ;;  %v6152_v55 = vsel %vm2769_vm6, %v6088_v58, %v9809_v19  ;;  %v6217_v59 = vsel %vm2899_vm8, %v6153_v57, %v9820_v60 }
 0x392   :  { %v9828_v38 = vpop.permute.xlu0 %9827  ;;  %v15603_v27 = vpack.i.bf16 %v4426_v35, %v4424_v6  ;;  %v6216_v35 = vsel %vm2899_vm8, %v6152_v55, %v9819_v25 }
 0x393   :  { %v15581_v10 = vpop.permute.xlu1 %9832  ;;  %v9830_v46 = vunpack.i.h.bf16 %v9828_v38  ;;  %v9829_v5 = vunpack.i.l.bf16 %v9828_v38 }
 0x394   :  { %10117 = vrot.lane.b32.xlu0 %v15572_v29, %s10708_s4  ;;  %v9835_v22 = vunpack.i.h.bf16 %v15581_v10  ;;  %v9834_v62 = vunpack.i.l.bf16 %v15581_v10 }
 0x395   :  { %10122 = vrot.lane.b32.xlu1 %v15554_v17, %s10698_s24  ;;  %v6280_v26 = vsel %vm3029_vm10, %v6216_v35, %v9829_v5  ;;  %v6281_v19 = vsel %vm3029_vm10, %v6217_v59, %v9830_v46 }
 0x396   :  { %v15601_v63 = vpop.permute.xlu0 %9837 }
 0x397   :  { %v15609_v37 = vpop.permute.xlu1 %9842  ;;  %v9839_v20 = vunpack.i.l.bf16 %v15601_v63  ;;  %v9840_v50 = vunpack.i.h.bf16 %v15601_v63 }
 0x398   :  { %10127 = vrot.lane.b32.xlu0 %v15456_v11, %s10700_s27  ;;  %v6090_v11 = vsel %vm2639_vm3, %v14801_v40, %v9804_v30  ;;  %v6219_v40 = vsel %vm2899_vm8, %v6155_v7, %v9825_v32  ;;  %v9845_v46 = vunpack.i.h.bf16 %v15609_v37  ;;  %v9844_v55 = vunpack.i.l.bf16 %v15609_v37 }
 0x399   :  { %10132 = vrot.lane.b32.xlu1 %v15572_v29, %s10700_s27  ;;  %v6154_v56 = vsel %vm2769_vm6, %v6090_v11, %v9814_v51  ;;  %v6345_v63 = vsel %vm6320_vm13, %v6280_v26, %v9839_v20 }
 0x39a   :  { %v9848_v8 = vpop.permute.xlu0 %9847  ;;  %v6218_v44 = vsel %vm2899_vm8, %v6154_v56, %v9824_v1  ;;  %v6346_v56 = vsel %vm6320_vm13, %v6281_v19, %v9840_v50 }
 0x39b   :  { %v15633_v6 = vpop.permute.xlu1 %9852  ;;  %v7900_v38 = vpop.f32.mrb[60].mxu0  ;;  %v9850_v25 = vunpack.i.h.bf16 %v9848_v8  ;;  %v9849_v10 = vunpack.i.l.bf16 %v9848_v8  ;;  %v6282_v50 = vsel %vm3029_vm10, %v6218_v44, %v9834_v62 }
 0x39c   :  { %10137 = vrot.lane.b32.xlu0 %v15469_v13, %s10702_s18  ;;  %v3537_v9 = vadd.f32 %v15199_v24, %v7900_v38  ;;  %v3528_v30 = vpop.f32.mrb[61].mxu0  ;;  %v9855_v7 = vunpack.i.h.bf16 %v15633_v6 }
 0x39d   :  { %10142 = vrot.lane.b32.xlu1 %v15589_v4, %s10702_s18  ;;  %v3529_v13 = vadd.f32 %v15199_v24, %v3528_v30  ;;  %v7901_v51 = vpop.f32.mrb[62].mxu0  ;;  %v6410_v59 = vsel %vm6385_vm14, %v6345_v63, %v9849_v10  ;;  %v6411_v37 = vsel %vm6385_vm14, %v6346_v56, %v9850_v25  ;;  %v6347_v25 = vsel %vm6320_vm13, %v6282_v50, %v9844_v55  ;;  %v3920_v55 = vld [vmem:[#allocation3 + $0x340] sm:$0xff] }
 0x39e   :  { %v9858_v60 = vpop.permute.xlu0 %9857  ;;  %v3605_v32 = vmax.f32 %v3537_v9, 0.0  ;;  %v3540_v1 = vadd.f32 %v15199_v24, %v7901_v51  ;;  %v3531_v18 = vpop.f32.mrb[63].mxu0 }
 0x39f   :  { %v9863_v58 = vpop.permute.xlu1 %9862  ;;  %v3603_v47 = vmax.f32 %v3529_v13, 0.0  ;;  %v9860_v11 = vunpack.i.h.bf16 %v9858_v60  ;;  %v9859_v57 = vunpack.i.l.bf16 %v9858_v60  ;;  %v3532_v5 = vadd.f32 %v15199_v24, %v3531_v18 }
 0x3a0   :  { %10147 = vrot.lane.b32.xlu0 %v15554_v17, %s10704_s19  ;;  %3814 = vst.msk [vmem:[#allocation3 + $0x448] sm:$0xff] %vm2639_vm3, %v3605_v32  ;;  %v3606_v8 = vmax.f32 %v3540_v1, 0.0  ;;  %v9854_v24 = vunpack.i.l.bf16 %v15633_v6  ;;  %v9865_v6 = vunpack.i.h.bf16 %v9863_v58  ;;  %v9864_v19 = vunpack.i.l.bf16 %v9863_v58 }
 0x3a1   :  { %10152 = vrot.lane.b32.xlu1 %v15591_v15, %s10704_s19  ;;  %3812 = vst.msk [vmem:[#allocation3 + $0x428] sm:$0xff] %vm2639_vm3, %v3603_v47  ;;  %v3604_v17 = vmax.f32 %v3532_v5, 0.0  ;;  %v6475_v30 = vsel %vm6450_vm15, %v6410_v59, %v9859_v57  ;;  %v6476_v26 = vsel %vm6450_vm15, %v6411_v37, %v9860_v11  ;;  %v6283_v13 = vsel %vm3029_vm10, %v6219_v40, %v9835_v22  ;;  %v3919_v11 = vld [vmem:[#allocation3 + $0x338] sm:$0xff] }
 0x3a2   :  { %v9868_v35 = vpop.permute.xlu0 %9867  ;;  %3815 = vst.msk [vmem:[#allocation3 + $0x450] sm:$0xff] %vm2639_vm3, %v3606_v8  ;;  %v6348_v10 = vsel %vm6320_vm13, %v6283_v13, %v9845_v46  ;;  %v6412_v44 = vsel %vm6385_vm14, %v6347_v25, %v9854_v24  ;;  %v3921_v8 = vld [vmem:[#allocation3 + $0x348] sm:$0xff]  ;;  %v4430_v24 = vrot.slane %v3919_v11, 1  ;;  %v4176_v59 = vrot.slane %v3920_v55, 7 }
 0x3a3   :  { %v9870_v38 = vunpack.i.h.bf16 %v9868_v35  ;;  %v9869_v20 = vunpack.i.l.bf16 %v9868_v35  ;;  %v15668_v9 = vpop.permute.xlu1 %9872  ;;  %3813 = vst.msk [vmem:[#allocation3 + $0x430] sm:$0xff] %vm2639_vm3, %v3604_v17  ;;  %v6413_v40 = vsel %vm6385_vm14, %v6348_v10, %v9855_v7  ;;  %v6477_v58 = vsel %vm6450_vm15, %v6412_v44, %v9864_v19  ;;  %v3922_v17 = vld [vmem:[#allocation3 + $0x350] sm:$0xff] }
 0x3a4   :  { %10157 = vrot.lane.b32.xlu0 %v15572_v29, %s10705_s21  ;;  %v15685_v29 = vpack.i.bf16 %v15623_v12, %v15620_v0  ;;  %v6478_v47 = vsel %vm6450_vm15, %v6413_v40, %v9865_v6  ;;  %v4428_v7 = vrot.slane %v15579_v39, 1  ;;  %v4427_v35 = vrot.slane %v15577_v43, 1 }
 0x3a5   :  { %v6540_v51 = vsel %vm6515_vm0, %v6475_v30, %v9869_v20  ;;  %v6541_v60 = vsel %vm6515_vm0, %v6476_v26, %v9870_v38  ;;  %10162 = vrot.lane.b32.xlu1 %v15603_v27, %s10705_s21  ;;  %v4177_v37 = vrot.slane %v3921_v8, 7  ;;  %v3923_v38 = vld [vmem:[#allocation3 + $0x358] sm:$0xff]  ;;  %v15715_v20 = vld [vmem:[#allocation3 + $0x370] sm:$0xff]  ;;  %v3924_v26 = vld [vmem:[#allocation3 + $0x360] sm:$0xff]  ;;  %v4433_v13 = vrot.slane %v3922_v17, 1 }
 0x3a6   :  { %v9878_v32 = vpop.permute.xlu0 %9877  ;;  %v6592_v1 = vpack.c.bf16 %v6541_v60, %v6540_v51  ;;  %v4429_v19 = vsel %vm822_vm1, %v4427_v35, %v4428_v7  ;;  %v4431_v50 = vsel %vm822_vm1, %v4428_v7, %v4430_v24  ;;  %v15723_v51 = vld [vmem:[#allocation3 + $0x368] sm:$0xff]  ;;  %v4184_v60 = vrot.slane %v15715_v20, 7 }
 0x3a7   :  { %v9880_v22 = vunpack.i.h.bf16 %v9878_v32  ;;  %v9879_v62 = vunpack.i.l.bf16 %v9878_v32  ;;  %v15689_v18 = vpop.permute.xlu1 %9882  ;;  %v15731_v25 = vsel %vm565_vm2, %v4176_v59, %v4177_v37  ;;  %v4432_v10 = vrot.slane %v3921_v8, 1 }
 0x3a8   :  { %10167 = vrot.lane.b32.xlu0 %v15589_v4, %s10706_s26  ;;  %7936 = vmatprep.mubr.msk.bf16.mxu1 %vm6655_vm4, %v6592_v1  ;;  %v15706_v4 = vpack.i.bf16 %v15579_v39, %v15577_v43  ;;  %v4179_v39 = vrot.slane %v3922_v17, 7  ;;  %v4435_v43 = vrot.slane %v3923_v38, 1  ;;  %v4181_v32 = vrot.slane %v3924_v26, 7 }
 0x3a9   :  { %v6543_v57 = vsel %vm6515_vm0, %v6478_v47, %v9880_v22  ;;  %v6542_v5 = vsel %vm6515_vm0, %v6477_v58, %v9879_v62  ;;  %10172 = vrot.lane.b32.xlu1 %v15685_v29, %s10706_s26  ;;  %v15733_v44 = vpack.i.bf16 %v4431_v50, %v4429_v19  ;;  %v4182_v22 = vrot.slane %v15723_v51, 7 }
 0x3aa   :  { %v15700_v63 = vpop.permute.xlu0 %9887  ;;  %v6593_v46 = vpack.c.bf16 %v6543_v57, %v6542_v5  ;;  %v15736_v40 = vsel %vm565_vm2, %v4177_v37, %v4179_v39  ;;  %v9875_v62 = vunpack.i.h.bf16 %v15668_v9  ;;  %v4434_v47 = vsel %vm822_vm1, %v4432_v10, %v4433_v13 }
 0x3ab   :  { %v15702_v56 = vpop.permute.xlu1 %9892  ;;  %v9885_v11 = vunpack.i.h.bf16 %v15689_v18  ;;  %v4436_v57 = vsel %vm822_vm1, %v4433_v13, %v4435_v43  ;;  %v15747_v5 = vsel %vm565_vm2, %v4182_v22, %v4184_v60  ;;  %v15754_v55 = vpack.i.bf16 %v15736_v40, %v15731_v25 }
 0x3ac   :  { %10177 = vrot.lane.b32.xlu0 %v15591_v15, %s10707_s17  ;;  %7937 = vmatmul.mubr.msk.bf16.gmra.mrb[24].mxu1 %vm6655_vm4, %v6593_v46  ;;  %v9884_v46 = vunpack.i.l.bf16 %v15689_v18  ;;  %v9890_v7 = vunpack.i.h.bf16 %v15700_v63  ;;  %v9889_v24 = vunpack.i.l.bf16 %v15700_v63  ;;  %v15761_v59 = vsel %vm565_vm2, %v4181_v32, %v4182_v22 }
 0x3ad   :  { %10182 = vrot.lane.b32.xlu1 %v15706_v4, %s10707_s17  ;;  %v6093_v18 = vsel %vm2639_vm3, %v14914_v54, %v9875_v62  ;;  %v15765_v38 = vpack.i.bf16 %v4436_v57, %v4434_v47  ;;  %v15769_v39 = vpack.i.bf16 %v15747_v5, %v15761_v59  ;;  %v6095_v63 = vsel %vm2639_vm3, %v14967_v16, %v9885_v11 }
 0x3ae   :  { %v15717_v30 = vpop.permute.xlu0 %9897  ;;  %v9894_v26 = vunpack.i.l.bf16 %v15702_v56  ;;  %v6094_v54 = vsel %vm2639_vm3, %v14964_v61, %v9884_v46 }
 0x3af   :  { %v15719_v6 = vpop.permute.xlu1 %9902  ;;  %v9900_v19 = vunpack.i.h.bf16 %v15717_v30  ;;  %v9899_v50 = vunpack.i.l.bf16 %v15717_v30 }
 0x3b0   :  { %10187 = vrot.lane.b32.xlu0 %v15603_v27, %s10708_s4  ;;  %v9904_v13 = vunpack.i.l.bf16 %v15719_v6  ;;  %v6158_v30 = vsel %vm2769_vm6, %v6094_v54, %v9894_v26 }
 0x3b1   :  { %10192 = vrot.lane.b32.xlu1 %v15591_v15, %s10698_s24  ;;  %v9874_v15 = vunpack.i.l.bf16 %v15668_v9  ;;  %v15756_v9 = vpack.i.bf16 %v3922_v17, %v3921_v8  ;;  %v9895_v17 = vunpack.i.h.bf16 %v15702_v56  ;;  %v9905_v56 = vunpack.i.h.bf16 %v15719_v6 }
 0x3b2   :  { %v9908_v1 = vpop.permute.xlu0 %9907  ;;  %v6222_v57 = vsel %vm2899_vm8, %v6158_v30, %v9904_v13 }
 0x3b3   :  { %v9913_v58 = vpop.permute.xlu1 %9912  ;;  %v6092_v8 = vsel %vm2639_vm3, %v14920_v3, %v9874_v15  ;;  %v6157_v3 = vsel %vm2769_vm6, %v6093_v18, %v9890_v7  ;;  %v9909_v43 = vunpack.i.l.bf16 %v9908_v1  ;;  %v9910_v60 = vunpack.i.h.bf16 %v9908_v1 }
 0x3b4   :  { %10197 = vrot.lane.b32.xlu0 %v15733_v44, %s10708_s4  ;;  %v6156_v16 = vsel %vm2769_vm6, %v6092_v8, %v9889_v24  ;;  %v9915_v10 = vunpack.i.h.bf16 %v9913_v58  ;;  %v9914_v61 = vunpack.i.l.bf16 %v9913_v58  ;;  %v6159_v62 = vsel %vm2769_vm6, %v6095_v63, %v9895_v17 }
 0x3b5   :  { %10202 = vrot.lane.b32.xlu1 %v15706_v4, %s10698_s24  ;;  %v6220_v11 = vsel %vm2899_vm8, %v6156_v16, %v9899_v50  ;;  %v6221_v6 = vsel %vm2899_vm8, %v6157_v3, %v9900_v19  ;;  %v6223_v58 = vsel %vm2899_vm8, %v6159_v62, %v9905_v56 }
 0x3b6   :  { %v9918_v35 = vpop.permute.xlu0 %9917  ;;  %v6284_v46 = vsel %vm3029_vm10, %v6220_v11, %v9909_v43  ;;  %v6285_v18 = vsel %vm3029_vm10, %v6221_v6, %v9910_v60  ;;  %v6286_v8 = vsel %vm3029_vm10, %v6222_v57, %v9914_v61 }
 0x3b7   :  { %v9923_v37 = vpop.permute.xlu1 %9922  ;;  %v9919_v32 = vunpack.i.l.bf16 %v9918_v35  ;;  %v9920_v47 = vunpack.i.h.bf16 %v9918_v35 }
 0x3b8   :  { %10207 = vrot.lane.b32.xlu0 %v15603_v27, %s10700_s27  ;;  %v9924_v15 = vunpack.i.l.bf16 %v9923_v37  ;;  %v9925_v1 = vunpack.i.h.bf16 %v9923_v37  ;;  %v6287_v37 = vsel %vm3029_vm10, %v6223_v58, %v9915_v10 }
 0x3b9   :  { %10212 = vrot.lane.b32.xlu1 %v15733_v44, %s10700_s27  ;;  %v6349_v63 = vsel %vm6320_vm13, %v6284_v46, %v9919_v32  ;;  %v6350_v54 = vsel %vm6320_vm13, %v6285_v18, %v9920_v47 }
 0x3ba   :  { %v9928_v27 = vpop.permute.xlu0 %9927  ;;  %v6351_v19 = vsel %vm6320_vm13, %v6286_v8, %v9924_v15  ;;  %v6352_v16 = vsel %vm6320_vm13, %v6287_v37, %v9925_v1 }
 0x3bb   :  { %v9933_v22 = vpop.permute.xlu1 %9932  ;;  %v9930_v7 = vunpack.i.h.bf16 %v9928_v27  ;;  %v9929_v24 = vunpack.i.l.bf16 %v9928_v27 }
 0x3bc   :  { %10217 = vrot.lane.b32.xlu0 %v15685_v29, %s10702_s18  ;;  %v15803_v29 = vld [vmem:[%s16808_s5] ss:$0 sm:$0xff]  ;;  %v9935_v56 = vunpack.i.h.bf16 %v9933_v22  ;;  %v9934_v32 = vunpack.i.l.bf16 %v9933_v22 }
 0x3bd   :  { %10222 = vrot.lane.b32.xlu1 %v15754_v55, %s10702_s18  ;;  %v6414_v10 = vsel %vm6385_vm14, %v6349_v63, %v9929_v24  ;;  %v6415_v61 = vsel %vm6385_vm14, %v6350_v54, %v9930_v7 }
 0x3be   :  { %v9938_v35 = vpop.permute.xlu0 %9937  ;;  %v6416_v8 = vsel %vm6385_vm14, %v6351_v19, %v9934_v32  ;;  %v6417_v37 = vsel %vm6385_vm14, %v6352_v16, %v9935_v56  ;;  %v3927_v19 = vld [vmem:[#allocation3 + $0x378] sm:$0xff]  ;;  %v3888_v32 = vld [vmem:[#allocation3 + $0x240] sm:$0xff] }
 0x3bf   :  { %v9943_v17 = vpop.permute.xlu1 %9942  ;;  %v7914_v26 = vpop.f32.mrb[0].mxu1  ;;  %v9940_v50 = vunpack.i.h.bf16 %v9938_v35  ;;  %v9939_v13 = vunpack.i.l.bf16 %v9938_v35 }
 0x3c0   :  { %10227 = vrot.lane.b32.xlu0 %v15706_v4, %s10704_s19  ;;  %v6790_v3 = vpop.f32.mrb[1].mxu1  ;;  %v6799_v43 = vadd.f32 %v7914_v26, %v15803_v29  ;;  %v9945_v46 = vunpack.i.h.bf16 %v9943_v17  ;;  %v9944_v24 = vunpack.i.l.bf16 %v9943_v17 }
 0x3c1   :  { %v6791_v27 = vadd.f32 %v15803_v29, %v6790_v3  ;;  %10232 = vrot.lane.b32.xlu1 %v15756_v9, %s10704_s19  ;;  %v7915_v60 = vpop.f32.mrb[2].mxu1  ;;  %v6479_v1 = vsel %vm6450_vm15, %v6414_v10, %v9939_v13  ;;  %v6480_v58 = vsel %vm6450_vm15, %v6415_v61, %v9940_v50 }
 0x3c2   :  { %v6802_v30 = vadd.f32 %v7915_v60, %v15803_v29  ;;  %v9948_v4 = vpop.permute.xlu0 %9947  ;;  %v6793_v62 = vpop.f32.mrb[3].mxu1  ;;  %v7047_v22 = vmax.f32 %v6799_v43, 0.0  ;;  %v6481_v43 = vsel %vm6450_vm15, %v6416_v8, %v9944_v24  ;;  %v3931_v24 = vld [vmem:[#allocation3 + $0x398] sm:$0xff]  ;;  %v3932_v8 = vld [vmem:[#allocation3 + $0x3a0] sm:$0xff] }
 0x3c3   :  { %v7045_v47 = vmax.f32 %v6791_v27, 0.0  ;;  %v9950_v15 = vunpack.i.h.bf16 %v9948_v4  ;;  %v9949_v11 = vunpack.i.l.bf16 %v9948_v4  ;;  %v6794_v6 = vadd.f32 %v15803_v29, %v6793_v62  ;;  %v15822_v57 = vpop.permute.xlu1 %9952  ;;  %v3928_v62 = vld [vmem:[#allocation3 + $0x380] sm:$0xff] }
 0x3c4   :  { %10237 = vrot.lane.b32.xlu0 %v15733_v44, %s10705_s21  ;;  %v7048_v63 = vmax.f32 %v6802_v30, 0.0  ;;  %v6482_v27 = vsel %vm6450_vm15, %v6417_v37, %v9945_v46  ;;  %v7112_v16 = vsel %vm2769_vm6, %v7047_v22, 0.0  ;;  %v4136_v22 = vrot.slane %v3888_v32, 7 }
 0x3c5   :  { %v6544_v7 = vsel %vm6515_vm0, %v6479_v1, %v9949_v11  ;;  %v6545_v35 = vsel %vm6515_vm0, %v6480_v58, %v9950_v15  ;;  %v7046_v18 = vmax.f32 %v6794_v6, 0.0  ;;  %10242 = vrot.lane.b32.xlu1 %v15765_v38, %s10705_s21  ;;  %v7109_v17 = vsel %vm2769_vm6, %v7045_v47, 0.0  ;;  %v3929_v47 = vld [vmem:[#allocation3 + $0x388] sm:$0xff]  ;;  %v3930_v58 = vld [vmem:[#allocation3 + $0x390] sm:$0xff] }
 0x3c6   :  { %v9958_v26 = vpop.permute.xlu0 %9957  ;;  %v6594_v54 = vpack.c.bf16 %v6545_v35, %v6544_v7  ;;  %v15855_v11 = vpack.i.bf16 %v15715_v20, %v15723_v51  ;;  %v4438_v6 = vrot.slane %v15715_v20, 1  ;;  %v4440_v1 = vrot.slane %v3927_v19, 1  ;;  %v15866_v20 = vld [vmem:[#allocation3 + $0x3b0] sm:$0xff] }
 0x3c7   :  { %v7110_v44 = vsel %vm2769_vm6, %v7046_v18, 0.0  ;;  %v9960_v50 = vunpack.i.h.bf16 %v9958_v26  ;;  %v9959_v13 = vunpack.i.l.bf16 %v9958_v26  ;;  %v15836_v3 = vpop.permute.xlu1 %9962  ;;  %v4437_v7 = vrot.slane %v15723_v51, 1 }
 0x3c8   :  { %v7111_v60 = vadd.f32 %v7110_v44, %v7109_v17  ;;  %10247 = vrot.lane.b32.xlu0 %v15754_v55, %s10706_s26  ;;  %7940 = vmatprep.mubr.msk.bf16.mxu1 %vm6655_vm4, %v6594_v54  ;;  %v7114_v55 = vsel %vm2769_vm6, %v7048_v63, 0.0  ;;  %v4186_v35 = vrot.slane %v3928_v62, 7  ;;  %v4187_v18 = vrot.slane %v3929_v47, 7 }
 0x3c9   :  { %v6547_v56 = vsel %vm6515_vm0, %v6482_v27, %v9960_v50  ;;  %v6546_v10 = vsel %vm6515_vm0, %v6481_v43, %v9959_v13  ;;  %10252 = vrot.lane.b32.xlu1 %v15769_v39, %s10706_s26  ;;  %v4189_v63 = vrot.slane %v3930_v58, 7  ;;  %v4439_v54 = vsel %vm822_vm1, %v4437_v7, %v4438_v6  ;;  %v15874_v50 = vld [vmem:[#allocation3 + $0x3a8] sm:$0xff] }
 0x3ca   :  { %v7113_v61 = vadd.f32 %v7112_v16, %v7111_v60  ;;  %v15848_v30 = vpop.permute.xlu0 %9967  ;;  %v6595_v4 = vpack.c.bf16 %v6547_v56, %v6546_v10  ;;  %v4441_v17 = vsel %vm822_vm1, %v4438_v6, %v4440_v1  ;;  %v4445_v44 = vrot.slane %v3931_v24, 1 }
 0x3cb   :  { %v15851_v15 = vpop.permute.xlu1 %9972  ;;  %v4443_v51 = vrot.slane %v3930_v58, 1  ;;  %v4191_v13 = vrot.slane %v3932_v8, 7  ;;  %v4194_v43 = vrot.slane %v15866_v20, 7  ;;  %v4138_v27 = vsel %vm565_vm2, %v4136_v22, %v4137_v48 }
 0x3cc   :  { %10257 = vrot.lane.b32.xlu0 %v15756_v9, %s10707_s17  ;;  %7941 = vmatmul.mubr.msk.bf16.gmra.mrb[28].mxu1 %vm6655_vm4, %v6595_v4  ;;  %v15861_v46 = vadd.f32 %v7114_v55, %v7113_v61  ;;  %v15885_v60 = vsel %vm565_vm2, %v4186_v35, %v4187_v18  ;;  %v4442_v19 = vrot.slane %v3929_v47, 1  ;;  %v15887_v56 = vpack.i.bf16 %v4441_v17, %v4439_v54 }
 0x3cd   :  { %10262 = vrot.lane.b32.xlu1 %v15855_v11, %s10707_s17  ;;  %v15890_v10 = vsel %vm565_vm2, %v4187_v18, %v4189_v63  ;;  %v4192_v61 = vrot.slane %v15874_v50, 7  ;;  %v9955_v32 = vunpack.i.h.bf16 %v15822_v57  ;;  %v9954_v31 = vunpack.i.l.bf16 %v15822_v57 }
 0x3ce   :  { %v15868_v37 = vpop.permute.xlu0 %9977  ;;  %v9965_v4 = vunpack.i.h.bf16 %v15836_v3  ;;  %v4446_v62 = vsel %vm822_vm1, %v4443_v51, %v4445_v44  ;;  %v9964_v6 = vunpack.i.l.bf16 %v15836_v3  ;;  %v15908_v57 = vpack.i.bf16 %v15890_v10, %v15885_v60 }
 0x3cf   :  { %v15870_v26 = vpop.permute.xlu1 %9982  ;;  %v15901_v55 = vsel %vm565_vm2, %v4192_v61, %v4194_v43  ;;  %v15910_v1 = vpack.i.bf16 %v3930_v58, %v3929_v47  ;;  %v9970_v24 = vunpack.i.h.bf16 %v15848_v30  ;;  %v9969_v22 = vunpack.i.l.bf16 %v15848_v30 }
 0x3d0   :  { %10267 = vrot.lane.b32.xlu0 %v15765_v38, %s10708_s4  ;;  %v15915_v35 = vsel %vm565_vm2, %v4191_v13, %v4192_v61  ;;  %v6097_v3 = vsel %vm2639_vm3, %v15237_v33, %v9955_v32  ;;  %v6096_v18 = vsel %vm2639_vm3, %v4138_v27, %v9954_v31  ;;  %v6099_v58 = vsel %vm2639_vm3, %v15255_v34, %v9965_v4 }
 0x3d1   :  { %10272 = vrot.lane.b32.xlu1 %v15756_v9, %s10698_s24  ;;  %v4444_v9 = vsel %vm822_vm1, %v4442_v19, %v4443_v51  ;;  %v15924_v47 = vpack.i.bf16 %v15901_v55, %v15915_v35  ;;  %v9975_v30 = vunpack.i.h.bf16 %v15851_v15  ;;  %v9974_v54 = vunpack.i.l.bf16 %v15851_v15 }
 0x3d2   :  { %v9988_v16 = vpop.permute.xlu0 %9987  ;;  %v15920_v63 = vpack.i.bf16 %v4446_v62, %v4444_v9  ;;  %v9979_v17 = vunpack.i.l.bf16 %v15868_v37  ;;  %v6098_v33 = vsel %vm2639_vm3, %v15271_v53, %v9964_v6  ;;  %v9980_v44 = vunpack.i.h.bf16 %v15868_v37 }
 0x3d3   :  { %v9993_v48 = vpop.permute.xlu1 %9992  ;;  %v9985_v51 = vunpack.i.h.bf16 %v15870_v26  ;;  %v9984_v13 = vunpack.i.l.bf16 %v15870_v26  ;;  %v6161_v34 = vsel %vm2769_vm6, %v6097_v3, %v9970_v24  ;;  %v6160_v15 = vsel %vm2769_vm6, %v6096_v18, %v9969_v22 }
 0x3d4   :  { %10277 = vrot.lane.b32.xlu0 %v15887_v56, %s10708_s4  ;;  %v9990_v43 = vunpack.i.h.bf16 %v9988_v16  ;;  %v9989_v27 = vunpack.i.l.bf16 %v9988_v16  ;;  %v9994_v61 = vunpack.i.l.bf16 %v9993_v48  ;;  %v6162_v37 = vsel %vm2769_vm6, %v6098_v33, %v9974_v54 }
 0x3d5   :  { %10282 = vrot.lane.b32.xlu1 %v15855_v11, %s10698_s24  ;;  %v6163_v4 = vsel %vm2769_vm6, %v6099_v58, %v9975_v30  ;;  %v6224_v26 = vsel %vm2899_vm8, %v6160_v15, %v9979_v17  ;;  %v6225_v62 = vsel %vm2899_vm8, %v6161_v34, %v9980_v44  ;;  %v6226_v16 = vsel %vm2899_vm8, %v6162_v37, %v9984_v13 }
 0x3d6   :  { %v9998_v7 = vpop.permute.xlu0 %9997  ;;  %v6227_v6 = vsel %vm2899_vm8, %v6163_v4, %v9985_v51  ;;  %v6288_v24 = vsel %vm3029_vm10, %v6224_v26, %v9989_v27  ;;  %v6289_v22 = vsel %vm3029_vm10, %v6225_v62, %v9990_v43  ;;  %v6290_v58 = vsel %vm3029_vm10, %v6226_v16, %v9994_v61 }
 0x3d7   :  { %v10003_v8 = vpop.permute.xlu1 %10002  ;;  %v10000_v32 = vunpack.i.h.bf16 %v9998_v7  ;;  %v9999_v53 = vunpack.i.l.bf16 %v9998_v7 }
 0x3d8   :  { %10287 = vrot.lane.b32.xlu0 %v15765_v38, %s10700_s27  ;;  %v9995_v38 = vunpack.i.h.bf16 %v9993_v48  ;;  %v10004_v9 = vunpack.i.l.bf16 %v10003_v8  ;;  %v10005_v48 = vunpack.i.h.bf16 %v10003_v8 }
 0x3d9   :  { %10292 = vrot.lane.b32.xlu1 %v15887_v56, %s10700_s27  ;;  %v6353_v30 = vsel %vm6320_vm13, %v6288_v24, %v9999_v53  ;;  %v6354_v54 = vsel %vm6320_vm13, %v6289_v22, %v10000_v32 }
 0x3da   :  { %v10008_v19 = vpop.permute.xlu0 %10007  ;;  %v6355_v33 = vsel %vm6320_vm13, %v6290_v58, %v10004_v9 }
 0x3db   :  { %v10013_v31 = vpop.permute.xlu1 %10012  ;;  %v10010_v7 = vunpack.i.h.bf16 %v10008_v19  ;;  %v10009_v3 = vunpack.i.l.bf16 %v10008_v19 }
 0x3dc   :  { %10297 = vrot.lane.b32.xlu0 %v15769_v39, %s10702_s18  ;;  %v6291_v39 = vsel %vm3029_vm10, %v6227_v6, %v9995_v38  ;;  %v10015_v43 = vunpack.i.h.bf16 %v10013_v31  ;;  %v10014_v27 = vunpack.i.l.bf16 %v10013_v31 }
 0x3dd   :  { %10302 = vrot.lane.b32.xlu1 %v15908_v57, %s10702_s18  ;;  %v6356_v15 = vsel %vm6320_vm13, %v6291_v39, %v10005_v48  ;;  %v6418_v61 = vsel %vm6385_vm14, %v6353_v30, %v10009_v3  ;;  %v6419_v32 = vsel %vm6385_vm14, %v6354_v54, %v10010_v7 }
 0x3de   :  { %v10018_v18 = vpop.permute.xlu0 %10017  ;;  %v6420_v39 = vsel %vm6385_vm14, %v6355_v33, %v10014_v27  ;;  %v6421_v30 = vsel %vm6385_vm14, %v6356_v15, %v10015_v43  ;;  %v3935_v33 = vld [vmem:[#allocation3 + $0x3b8] sm:$0xff] }
 0x3df   :  { %v10023_v17 = vpop.permute.xlu1 %10022  ;;  %v7918_v8 = vpop.f32.mrb[4].mxu1  ;;  %v10020_v44 = vunpack.i.h.bf16 %v10018_v18  ;;  %v10019_v51 = vunpack.i.l.bf16 %v10018_v18 }
 0x3e0   :  { %v6815_v13 = vadd.f32 %v7918_v8, %v15803_v29  ;;  %10307 = vrot.lane.b32.xlu0 %v15855_v11, %s10704_s19  ;;  %v6806_v34 = vpop.f32.mrb[5].mxu1  ;;  %v10025_v53 = vunpack.i.h.bf16 %v10023_v17  ;;  %v10024_v24 = vunpack.i.l.bf16 %v10023_v17 }
 0x3e1   :  { %v6807_v19 = vadd.f32 %v15803_v29, %v6806_v34  ;;  %10312 = vrot.lane.b32.xlu1 %v15910_v1, %s10704_s19  ;;  %v7919_v38 = vpop.f32.mrb[6].mxu1  ;;  %v6483_v6 = vsel %vm6450_vm15, %v6418_v61, %v10019_v51  ;;  %v6484_v48 = vsel %vm6450_vm15, %v6419_v32, %v10020_v44 }
 0x3e2   :  { %v6818_v37 = vadd.f32 %v7919_v38, %v15803_v29  ;;  %v10028_v4 = vpop.permute.xlu0 %10027  ;;  %v6809_v11 = vpop.f32.mrb[7].mxu1  ;;  %v7051_v22 = vmax.f32 %v6815_v13, 0.0  ;;  %v6486_v38 = vsel %vm6450_vm15, %v6421_v30, %v10025_v53 }
 0x3e3   :  { %v7049_v26 = vmax.f32 %v6807_v19, 0.0  ;;  %v10030_v9 = vunpack.i.h.bf16 %v10028_v4  ;;  %v10029_v62 = vunpack.i.l.bf16 %v10028_v4  ;;  %v6810_v31 = vadd.f32 %v15803_v29, %v6809_v11  ;;  %v15970_v16 = vpop.permute.xlu1 %10032  ;;  %v3937_v4 = vld [vmem:[#allocation3 + $0x3c8] sm:$0xff] }
 0x3e4   :  { %10317 = vrot.lane.b32.xlu0 %v15887_v56, %s10705_s21  ;;  %v7052_v17 = vmax.f32 %v6818_v37, 0.0  ;;  %v6485_v19 = vsel %vm6450_vm15, %v6420_v39, %v10024_v24  ;;  %v3936_v37 = vld [vmem:[#allocation3 + $0x3c0] sm:$0xff] }
 0x3e5   :  { %v7116_v7 = vsel %vm2769_vm6, %v7049_v26, 0.0  ;;  %v6548_v3 = vsel %vm6515_vm0, %v6483_v6, %v10029_v62  ;;  %v6549_v18 = vsel %vm6515_vm0, %v6484_v48, %v10030_v9  ;;  %v7050_v58 = vmax.f32 %v6810_v31, 0.0  ;;  %10322 = vrot.lane.b32.xlu1 %v15920_v63, %s10705_s21  ;;  %v3938_v31 = vld [vmem:[#allocation3 + $0x3d0] sm:$0xff] }
 0x3e6   :  { %v7117_v54 = vadd.f32 %v7116_v7, %v15861_v46  ;;  %v10038_v8 = vpop.permute.xlu0 %10037  ;;  %v6596_v34 = vpack.c.bf16 %v6549_v18, %v6548_v3  ;;  %v7120_v46 = vsel %vm2769_vm6, %v7051_v22, 0.0  ;;  %v16004_v26 = vpack.i.bf16 %v15866_v20, %v15874_v50  ;;  %v3939_v7 = vld [vmem:[#allocation3 + $0x3d8] sm:$0xff]  ;;  %v3940_v3 = vld [vmem:[#allocation3 + $0x3e0] sm:$0xff]  ;;  %v16015_v18 = vld [vmem:[#allocation3 + $0x3f0] sm:$0xff] }
 0x3e7   :  { %v7118_v56 = vsel %vm2769_vm6, %v7050_v58, 0.0  ;;  %v10040_v44 = vunpack.i.h.bf16 %v10038_v8  ;;  %v10039_v51 = vunpack.i.l.bf16 %v10038_v8  ;;  %v15985_v13 = vpop.permute.xlu1 %10042  ;;  %v4448_v9 = vrot.slane %v15866_v20, 1 }
 0x3e8   :  { %v7119_v61 = vadd.f32 %v7118_v56, %v7117_v54  ;;  %10327 = vrot.lane.b32.xlu0 %v15908_v57, %s10706_s26  ;;  %7944 = vmatprep.mubr.msk.bf16.mxu1 %vm6655_vm4, %v6596_v34  ;;  %v7122_v57 = vsel %vm2769_vm6, %v7052_v17, 0.0  ;;  %v4450_v62 = vrot.slane %v3935_v33, 1  ;;  %v4447_v48 = vrot.slane %v15874_v50, 1  ;;  %v16023_v17 = vld [vmem:[#allocation3 + $0x3e8] sm:$0xff] }
 0x3e9   :  { %v6551_v15 = vsel %vm6515_vm0, %v6486_v38, %v10040_v44  ;;  %v6550_v43 = vsel %vm6515_vm0, %v6485_v19, %v10039_v51  ;;  %10332 = vrot.lane.b32.xlu1 %v15924_v47, %s10706_s26  ;;  %v4196_v24 = vrot.slane %v3936_v37, 7  ;;  %v4197_v22 = vrot.slane %v3937_v4, 7 }
 0x3ea   :  { %v7121_v27 = vadd.f32 %v7120_v46, %v7119_v61  ;;  %v15997_v32 = vpop.permute.xlu0 %10047  ;;  %v6597_v53 = vpack.c.bf16 %v6551_v15, %v6550_v43  ;;  %v4199_v58 = vrot.slane %v3938_v31, 7  ;;  %v4449_v30 = vsel %vm822_vm1, %v4447_v48, %v4448_v9 }
 0x3eb   :  { %v16000_v11 = vpop.permute.xlu1 %10052  ;;  %v4451_v54 = vsel %vm822_vm1, %v4448_v9, %v4450_v62  ;;  %v4453_v50 = vrot.slane %v3938_v31, 1  ;;  %v4455_v8 = vrot.slane %v3939_v7, 1  ;;  %v4201_v56 = vrot.slane %v3940_v3, 7 }
 0x3ec   :  { %10337 = vrot.lane.b32.xlu0 %v15910_v1, %s10707_s17  ;;  %7945 = vmatmul.mubr.msk.bf16.gmra.mrb[32].mxu1 %vm6655_vm4, %v6597_v53  ;;  %v16010_v6 = vadd.f32 %v7122_v57, %v7121_v27  ;;  %v4204_v44 = vrot.slane %v16015_v18, 7  ;;  %v16031_v51 = vsel %vm565_vm2, %v4196_v24, %v4197_v22  ;;  %v4452_v34 = vrot.slane %v3937_v4, 1 }
 0x3ed   :  { %10342 = vrot.lane.b32.xlu1 %v16004_v26, %s10707_s17  ;;  %v16033_v38 = vpack.i.bf16 %v4451_v54, %v4449_v30  ;;  %v16036_v61 = vsel %vm565_vm2, %v4197_v22, %v4199_v58  ;;  %v4202_v33 = vrot.slane %v16023_v17, 7  ;;  %v10035_v46 = vunpack.i.h.bf16 %v15970_v16 }
 0x3ee   :  { %v16017_v20 = vpop.permute.xlu0 %10057  ;;  %v10034_v15 = vunpack.i.l.bf16 %v15970_v16  ;;  %v10045_v27 = vunpack.i.h.bf16 %v15985_v13  ;;  %v4456_v53 = vsel %vm822_vm1, %v4453_v50, %v4455_v8  ;;  %v10044_v57 = vunpack.i.l.bf16 %v15985_v13 }
 0x3ef   :  { %v16019_v39 = vpop.permute.xlu1 %10062  ;;  %v16047_v37 = vsel %vm565_vm2, %v4202_v33, %v4204_v44  ;;  %v16054_v16 = vpack.i.bf16 %v16036_v61, %v16031_v51  ;;  %v16056_v9 = vpack.i.bf16 %v3938_v31, %v3937_v4  ;;  %v10050_v62 = vunpack.i.h.bf16 %v15997_v32 }
 0x3f0   :  { %10347 = vrot.lane.b32.xlu0 %v15920_v63, %s10708_s4  ;;  %v10049_v48 = vunpack.i.l.bf16 %v15997_v32  ;;  %v16061_v22 = vsel %vm565_vm2, %v4201_v56, %v4202_v33  ;;  %v6101_v13 = vsel %vm2639_vm3, %v15263_v2, %v10035_v46  ;;  %v6100_v7 = vsel %vm2639_vm3, %v15279_v36, %v10034_v15 }
 0x3f1   :  { %10352 = vrot.lane.b32.xlu1 %v15910_v1, %s10698_s24  ;;  %v4454_v1 = vsel %vm822_vm1, %v4452_v34, %v4453_v50  ;;  %v16071_v4 = vpack.i.bf16 %v16047_v37, %v16061_v22  ;;  %v6103_v32 = vsel %vm2639_vm3, %v15294_v28, %v10045_v27  ;;  %v10055_v31 = vunpack.i.h.bf16 %v16000_v11 }
 0x3f2   :  { %v10068_v19 = vpop.permute.xlu0 %10067  ;;  %v16067_v58 = vpack.i.bf16 %v4456_v53, %v4454_v1  ;;  %v10054_v30 = vunpack.i.l.bf16 %v16000_v11  ;;  %v10059_v54 = vunpack.i.l.bf16 %v16017_v20  ;;  %v6102_v2 = vsel %vm2639_vm3, %v15307_v45, %v10044_v57 }
 0x3f3   :  { %v10073_v43 = vpop.permute.xlu1 %10072  ;;  %v10060_v36 = vunpack.i.h.bf16 %v16017_v20  ;;  %v10065_v50 = vunpack.i.h.bf16 %v16019_v39  ;;  %v10064_v8 = vunpack.i.l.bf16 %v16019_v39  ;;  %v6165_v28 = vsel %vm2769_vm6, %v6101_v13, %v10050_v62 }
 0x3f4   :  { %10357 = vrot.lane.b32.xlu0 %v16033_v38, %s10708_s4  ;;  %v6164_v11 = vsel %vm2769_vm6, %v6100_v7, %v10049_v48  ;;  %v10070_v56 = vunpack.i.h.bf16 %v10068_v19  ;;  %v10069_v44 = vunpack.i.l.bf16 %v10068_v19  ;;  %v10074_v33 = vunpack.i.l.bf16 %v10073_v43 }
 0x3f5   :  { %10362 = vrot.lane.b32.xlu1 %v16004_v26, %s10698_s24  ;;  %v6166_v20 = vsel %vm2769_vm6, %v6102_v2, %v10054_v30  ;;  %v6167_v27 = vsel %vm2769_vm6, %v6103_v32, %v10055_v31  ;;  %v6228_v39 = vsel %vm2899_vm8, %v6164_v11, %v10059_v54  ;;  %v6229_v53 = vsel %vm2899_vm8, %v6165_v28, %v10060_v36 }
 0x3f6   :  { %v10078_v24 = vpop.permute.xlu0 %10077  ;;  %v6230_v19 = vsel %vm2899_vm8, %v6166_v20, %v10064_v8  ;;  %v6231_v57 = vsel %vm2899_vm8, %v6167_v27, %v10065_v50  ;;  %v6292_v62 = vsel %vm3029_vm10, %v6228_v39, %v10069_v44  ;;  %v6293_v48 = vsel %vm3029_vm10, %v6229_v53, %v10070_v56 }
 0x3f7   :  { %v10083_v3 = vpop.permute.xlu1 %10082  ;;  %v10080_v46 = vunpack.i.h.bf16 %v10078_v24  ;;  %v10079_v45 = vunpack.i.l.bf16 %v10078_v24  ;;  %v6294_v32 = vsel %vm3029_vm10, %v6230_v19, %v10074_v33 }
 0x3f8   :  { %10367 = vrot.lane.b32.xlu0 %v15920_v63, %s10700_s27  ;;  %v10075_v63 = vunpack.i.h.bf16 %v10073_v43  ;;  %v10084_v1 = vunpack.i.l.bf16 %v10083_v3  ;;  %v10085_v43 = vunpack.i.h.bf16 %v10083_v3 }
 0x3f9   :  { %10372 = vrot.lane.b32.xlu1 %v16033_v38, %s10700_s27  ;;  %v6357_v31 = vsel %vm6320_vm13, %v6292_v62, %v10079_v45  ;;  %v6358_v30 = vsel %vm6320_vm13, %v6293_v48, %v10080_v46 }
 0x3fa   :  { %v10088_v34 = vpop.permute.xlu0 %10087  ;;  %v6359_v2 = vsel %vm6320_vm13, %v6294_v32, %v10084_v1 }
 0x3fb   :  { %v10093_v15 = vpop.permute.xlu1 %10092  ;;  %v10090_v24 = vunpack.i.h.bf16 %v10088_v34  ;;  %v10089_v13 = vunpack.i.l.bf16 %v10088_v34 }
 0x3fc   :  { %10377 = vrot.lane.b32.xlu0 %v15924_v47, %s10702_s18  ;;  %v6295_v47 = vsel %vm3029_vm10, %v6231_v57, %v10075_v63  ;;  %v10095_v56 = vunpack.i.h.bf16 %v10093_v15  ;;  %v10094_v44 = vunpack.i.l.bf16 %v10093_v15 }
 0x3fd   :  { %10382 = vrot.lane.b32.xlu1 %v16054_v16, %s10702_s18  ;;  %v6360_v11 = vsel %vm6320_vm13, %v6295_v47, %v10085_v43  ;;  %v6422_v33 = vsel %vm6385_vm14, %v6357_v31, %v10089_v13  ;;  %v6423_v46 = vsel %vm6385_vm14, %v6358_v30, %v10090_v24 }
 0x3fe   :  { %v10098_v7 = vpop.permute.xlu0 %10097  ;;  %v6424_v47 = vsel %vm6385_vm14, %v6359_v2, %v10094_v44  ;;  %v6425_v31 = vsel %vm6385_vm14, %v6360_v11, %v10095_v56  ;;  %v3943_v2 = vld [vmem:[#allocation3 + $0x3f8] sm:$0xff] }
 0x3ff   :  { %v10103_v54 = vpop.permute.xlu1 %10102  ;;  %v7922_v3 = vpop.f32.mrb[8].mxu1  ;;  %v10100_v36 = vunpack.i.h.bf16 %v10098_v7  ;;  %v10099_v50 = vunpack.i.l.bf16 %v10098_v7 }
 0x400   :  { %v6831_v8 = vadd.f32 %v7922_v3, %v15803_v29  ;;  %10387 = vrot.lane.b32.xlu0 %v16004_v26, %s10704_s19  ;;  %v6822_v28 = vpop.f32.mrb[9].mxu1  ;;  %v10105_v45 = vunpack.i.h.bf16 %v10103_v54  ;;  %v10104_v62 = vunpack.i.l.bf16 %v10103_v54 }
 0x401   :  { %v6823_v34 = vadd.f32 %v15803_v29, %v6822_v28  ;;  %10392 = vrot.lane.b32.xlu1 %v16056_v9, %s10704_s19  ;;  %v7923_v63 = vpop.f32.mrb[10].mxu1  ;;  %v6487_v57 = vsel %vm6450_vm15, %v6422_v33, %v10099_v50  ;;  %v6488_v43 = vsel %vm6450_vm15, %v6423_v46, %v10100_v36 }
 0x402   :  { %v6834_v20 = vadd.f32 %v7923_v63, %v15803_v29  ;;  %v10108_v27 = vpop.permute.xlu0 %10107  ;;  %v6825_v26 = vpop.f32.mrb[11].mxu1  ;;  %v7055_v48 = vmax.f32 %v6831_v8, 0.0  ;;  %v6490_v63 = vsel %vm6450_vm15, %v6425_v31, %v10105_v45 }
 0x403   :  { %v7053_v39 = vmax.f32 %v6823_v34, 0.0  ;;  %v10110_v1 = vunpack.i.h.bf16 %v10108_v27  ;;  %v10109_v53 = vunpack.i.l.bf16 %v10108_v27  ;;  %v6826_v15 = vadd.f32 %v15803_v29, %v6825_v26  ;;  %v16117_v19 = vpop.permute.xlu1 %10112  ;;  %v3945_v27 = vld [vmem:[#allocation3 + $0x408] sm:$0xff] }
 0x404   :  { %10397 = vrot.lane.b32.xlu0 %v16033_v38, %s10705_s21  ;;  %v7056_v54 = vmax.f32 %v6834_v20, 0.0  ;;  %v6489_v34 = vsel %vm6450_vm15, %v6424_v47, %v10104_v62  ;;  %v3944_v20 = vld [vmem:[#allocation3 + $0x400] sm:$0xff] }
 0x405   :  { %v7124_v24 = vsel %vm2769_vm6, %v7053_v39, 0.0  ;;  %v6552_v13 = vsel %vm6515_vm0, %v6487_v57, %v10109_v53  ;;  %v6553_v7 = vsel %vm6515_vm0, %v6488_v43, %v10110_v1  ;;  %v7054_v32 = vmax.f32 %v6826_v15, 0.0  ;;  %10402 = vrot.lane.b32.xlu1 %v16067_v58, %s10705_s21  ;;  %v3946_v15 = vld [vmem:[#allocation3 + $0x410] sm:$0xff] }
 0x406   :  { %v7125_v30 = vadd.f32 %v7124_v24, %v16010_v6  ;;  %v10118_v3 = vpop.permute.xlu0 %10117  ;;  %v6598_v28 = vpack.c.bf16 %v6553_v7, %v6552_v13  ;;  %v7128_v6 = vsel %vm2769_vm6, %v7055_v48, 0.0  ;;  %v16151_v39 = vpack.i.bf16 %v16015_v18, %v16023_v17  ;;  %v3947_v24 = vld [vmem:[#allocation3 + $0x418] sm:$0xff]  ;;  %v3948_v13 = vld [vmem:[#allocation3 + $0x420] sm:$0xff]  ;;  %v16162_v7 = vld [vmem:[#allocation3 + $0x430] sm:$0xff] }
 0x407   :  { %v7126_v38 = vsel %vm2769_vm6, %v7054_v32, 0.0  ;;  %v10120_v36 = vunpack.i.h.bf16 %v10118_v3  ;;  %v10119_v50 = vunpack.i.l.bf16 %v10118_v3  ;;  %v16132_v8 = vpop.permute.xlu1 %10122  ;;  %v4458_v1 = vrot.slane %v16015_v18, 1 }
 0x408   :  { %v7127_v33 = vadd.f32 %v7126_v38, %v7125_v30  ;;  %10407 = vrot.lane.b32.xlu0 %v16054_v16, %s10706_s26  ;;  %7948 = vmatprep.mubr.msk.bf16.mxu1 %vm6655_vm4, %v6598_v28  ;;  %v7130_v16 = vsel %vm2769_vm6, %v7056_v54, 0.0  ;;  %v4460_v53 = vrot.slane %v3943_v2, 1  ;;  %v4457_v43 = vrot.slane %v16023_v17, 1  ;;  %v16170_v54 = vld [vmem:[#allocation3 + $0x428] sm:$0xff] }
 0x409   :  { %v6555_v11 = vsel %vm6515_vm0, %v6490_v63, %v10120_v36  ;;  %v6554_v56 = vsel %vm6515_vm0, %v6489_v34, %v10119_v50  ;;  %10412 = vrot.lane.b32.xlu1 %v16071_v4, %s10706_s26  ;;  %v4206_v62 = vrot.slane %v3944_v20, 7  ;;  %v4207_v48 = vrot.slane %v3945_v27, 7 }
 0x40a   :  { %v7129_v44 = vadd.f32 %v7128_v6, %v7127_v33  ;;  %v16144_v46 = vpop.permute.xlu0 %10127  ;;  %v6599_v45 = vpack.c.bf16 %v6555_v11, %v6554_v56  ;;  %v4209_v32 = vrot.slane %v3946_v15, 7  ;;  %v4459_v31 = vsel %vm822_vm1, %v4457_v43, %v4458_v1 }
 0x40b   :  { %v16147_v26 = vpop.permute.xlu1 %10132  ;;  %v4461_v30 = vsel %vm822_vm1, %v4458_v1, %v4460_v53  ;;  %v4463_v17 = vrot.slane %v3946_v15, 1  ;;  %v4465_v3 = vrot.slane %v3947_v24, 1  ;;  %v4211_v38 = vrot.slane %v3948_v13, 7 }
 0x40c   :  { %10417 = vrot.lane.b32.xlu0 %v16056_v9, %s10707_s17  ;;  %7949 = vmatmul.mubr.msk.bf16.gmra.mrb[36].mxu1 %vm6655_vm4, %v6599_v45  ;;  %v16157_v57 = vadd.f32 %v7130_v16, %v7129_v44  ;;  %v4214_v36 = vrot.slane %v16162_v7, 7  ;;  %v16178_v50 = vsel %vm565_vm2, %v4206_v62, %v4207_v48  ;;  %v4462_v28 = vrot.slane %v3945_v27, 1 }
 0x40d   :  { %10422 = vrot.lane.b32.xlu1 %v16151_v39, %s10707_s17  ;;  %v16180_v63 = vpack.i.bf16 %v4461_v30, %v4459_v31  ;;  %v16183_v33 = vsel %vm565_vm2, %v4207_v48, %v4209_v32  ;;  %v4212_v2 = vrot.slane %v16170_v54, 7  ;;  %v10115_v6 = vunpack.i.h.bf16 %v16117_v19 }
 0x40e   :  { %v16164_v18 = vpop.permute.xlu0 %10137  ;;  %v10114_v11 = vunpack.i.l.bf16 %v16117_v19  ;;  %v10125_v44 = vunpack.i.h.bf16 %v16132_v8  ;;  %v4466_v45 = vsel %vm822_vm1, %v4463_v17, %v4465_v3  ;;  %v10124_v16 = vunpack.i.l.bf16 %v16132_v8 }
 0x40f   :  { %v16166_v47 = vpop.permute.xlu1 %10142  ;;  %v16194_v20 = vsel %vm565_vm2, %v4212_v2, %v4214_v36  ;;  %v16201_v19 = vpack.i.bf16 %v16183_v33, %v16178_v50  ;;  %v16203_v1 = vpack.i.bf16 %v3946_v15, %v3945_v27  ;;  %v10130_v53 = vunpack.i.h.bf16 %v16144_v46 }
 0x410   :  { %10427 = vrot.lane.b32.xlu0 %v16067_v58, %s10708_s4  ;;  %v10129_v43 = vunpack.i.l.bf16 %v16144_v46  ;;  %v16208_v48 = vsel %vm565_vm2, %v4211_v38, %v4212_v2  ;;  %v6105_v8 = vsel %vm2639_vm3, %v15428_v52, %v10115_v6  ;;  %v6104_v24 = vsel %vm2639_vm3, %v15425_v49, %v10114_v11 }
 0x411   :  { %10432 = vrot.lane.b32.xlu1 %v16056_v9, %s10698_s24  ;;  %v4464_v9 = vsel %vm822_vm1, %v4462_v28, %v4463_v17  ;;  %v16218_v27 = vpack.i.bf16 %v16194_v20, %v16208_v48  ;;  %v6107_v46 = vsel %vm2639_vm3, %v15448_v41, %v10125_v44  ;;  %v10135_v15 = vunpack.i.h.bf16 %v16147_v26 }
 0x412   :  { %v10148_v34 = vpop.permute.xlu0 %10147  ;;  %v16214_v32 = vpack.i.bf16 %v4466_v45, %v4464_v9  ;;  %v10134_v31 = vunpack.i.l.bf16 %v16147_v26  ;;  %v10139_v30 = vunpack.i.l.bf16 %v16164_v18  ;;  %v6106_v49 = vsel %vm2639_vm3, %v15459_v14, %v10124_v16 }
 0x413   :  { %v10153_v56 = vpop.permute.xlu1 %10152  ;;  %v10140_v52 = vunpack.i.h.bf16 %v16164_v18  ;;  %v10145_v17 = vunpack.i.h.bf16 %v16166_v47  ;;  %v10144_v3 = vunpack.i.l.bf16 %v16166_v47  ;;  %v6169_v41 = vsel %vm2769_vm6, %v6105_v8, %v10130_v53 }
 0x414   :  { %10437 = vrot.lane.b32.xlu0 %v16180_v63, %s10708_s4  ;;  %v6168_v26 = vsel %vm2769_vm6, %v6104_v24, %v10129_v43  ;;  %v10150_v38 = vunpack.i.h.bf16 %v10148_v34  ;;  %v10149_v36 = vunpack.i.l.bf16 %v10148_v34  ;;  %v10154_v2 = vunpack.i.l.bf16 %v10153_v56 }
 0x415   :  { %10442 = vrot.lane.b32.xlu1 %v16151_v39, %s10698_s24  ;;  %v6170_v18 = vsel %vm2769_vm6, %v6106_v49, %v10134_v31  ;;  %v6171_v44 = vsel %vm2769_vm6, %v6107_v46, %v10135_v15  ;;  %v6232_v47 = vsel %vm2899_vm8, %v6168_v26, %v10139_v30  ;;  %v6233_v45 = vsel %vm2899_vm8, %v6169_v41, %v10140_v52 }
 0x416   :  { %v10158_v62 = vpop.permute.xlu0 %10157  ;;  %v6234_v34 = vsel %vm2899_vm8, %v6170_v18, %v10144_v3  ;;  %v6235_v16 = vsel %vm2899_vm8, %v6171_v44, %v10145_v17  ;;  %v6296_v53 = vsel %vm3029_vm10, %v6232_v47, %v10149_v36  ;;  %v6297_v43 = vsel %vm3029_vm10, %v6233_v45, %v10150_v38 }
 0x417   :  { %v10163_v13 = vpop.permute.xlu1 %10162  ;;  %v10160_v6 = vunpack.i.h.bf16 %v10158_v62  ;;  %v10159_v14 = vunpack.i.l.bf16 %v10158_v62  ;;  %v6298_v46 = vsel %vm3029_vm10, %v6234_v34, %v10154_v2 }
 0x418   :  { %10447 = vrot.lane.b32.xlu0 %v16067_v58, %s10700_s27  ;;  %v10155_v58 = vunpack.i.h.bf16 %v10153_v56  ;;  %v10164_v9 = vunpack.i.l.bf16 %v10163_v13  ;;  %v10165_v56 = vunpack.i.h.bf16 %v10163_v13 }
 0x419   :  { %10452 = vrot.lane.b32.xlu1 %v16180_v63, %s10700_s27  ;;  %v6361_v15 = vsel %vm6320_vm13, %v6296_v53, %v10159_v14  ;;  %v6362_v31 = vsel %vm6320_vm13, %v6297_v43, %v10160_v6 }
 0x41a   :  { %v10168_v28 = vpop.permute.xlu0 %10167  ;;  %v6363_v49 = vsel %vm6320_vm13, %v6298_v46, %v10164_v9 }
 0x41b   :  { %v10173_v11 = vpop.permute.xlu1 %10172  ;;  %v10170_v62 = vunpack.i.h.bf16 %v10168_v28  ;;  %v10169_v8 = vunpack.i.l.bf16 %v10168_v28 }
 0x41c   :  { %10457 = vrot.lane.b32.xlu0 %v16071_v4, %s10702_s18  ;;  %v6299_v4 = vsel %vm3029_vm10, %v6235_v16, %v10155_v58  ;;  %v10175_v38 = vunpack.i.h.bf16 %v10173_v11  ;;  %v10174_v36 = vunpack.i.l.bf16 %v10173_v11 }
 0x41d   :  { %10462 = vrot.lane.b32.xlu1 %v16201_v19, %s10702_s18  ;;  %v6364_v26 = vsel %vm6320_vm13, %v6299_v4, %v10165_v56  ;;  %v6426_v2 = vsel %vm6385_vm14, %v6361_v15, %v10169_v8  ;;  %v6427_v6 = vsel %vm6385_vm14, %v6362_v31, %v10170_v62 }
 0x41e   :  { %v10178_v24 = vpop.permute.xlu0 %10177  ;;  %v6428_v4 = vsel %vm6385_vm14, %v6363_v49, %v10174_v36  ;;  %v6429_v15 = vsel %vm6385_vm14, %v6364_v26, %v10175_v38  ;;  %v3952_v36 = vld [vmem:[#allocation3 + $0x440] sm:$0xff] }
 0x41f   :  { %v10183_v30 = vpop.permute.xlu1 %10182  ;;  %v7926_v13 = vpop.f32.mrb[12].mxu1  ;;  %v10180_v52 = vunpack.i.h.bf16 %v10178_v24  ;;  %v10179_v17 = vunpack.i.l.bf16 %v10178_v24 }
 0x420   :  { %v6847_v3 = vadd.f32 %v7926_v13, %v15803_v29  ;;  %10467 = vrot.lane.b32.xlu0 %v16151_v39, %s10704_s19  ;;  %v6838_v41 = vpop.f32.mrb[13].mxu1  ;;  %v10185_v14 = vunpack.i.h.bf16 %v10183_v30  ;;  %v16265_v39 = vld [vmem:[%s16808_s5] ss:$0 sm:$0xff]  ;;  %v10184_v53 = vunpack.i.l.bf16 %v10183_v30 }
 0x421   :  { %v6839_v28 = vadd.f32 %v15803_v29, %v6838_v41  ;;  %10472 = vrot.lane.b32.xlu1 %v16203_v1, %s10704_s19  ;;  %v7927_v58 = vpop.f32.mrb[14].mxu1  ;;  %v6491_v16 = vsel %vm6450_vm15, %v6426_v2, %v10179_v17  ;;  %v6492_v56 = vsel %vm6450_vm15, %v6427_v6, %v10180_v52  ;;  %v3951_v52 = vld [vmem:[#allocation3 + $0x438] sm:$0xff] }
 0x422   :  { %v6850_v18 = vadd.f32 %v16265_v39, %v7927_v58  ;;  %v10188_v44 = vpop.permute.xlu0 %10187  ;;  %v6841_v11 = vpop.f32.mrb[15].mxu1  ;;  %v7059_v43 = vmax.f32 %v6847_v3, 0.0  ;;  %v6493_v58 = vsel %vm6450_vm15, %v6428_v4, %v10184_v53  ;;  %v6494_v2 = vsel %vm6450_vm15, %v6429_v15, %v10185_v14 }
 0x423   :  { %v7057_v47 = vmax.f32 %v6839_v28, 0.0  ;;  %v10190_v29 = vunpack.i.h.bf16 %v10188_v44  ;;  %v10189_v9 = vunpack.i.l.bf16 %v10188_v44  ;;  %v6842_v45 = vadd.f32 %v16265_v39, %v6841_v11  ;;  %v16269_v34 = vpop.permute.xlu1 %10192 }
 0x424   :  { %10477 = vrot.lane.b32.xlu0 %v16180_v63, %s10705_s21  ;;  %v7060_v63 = vmax.f32 %v6850_v18, 0.0  ;;  %v4470_v38 = vrot.slane %v3951_v52, 1  ;;  %v3953_v18 = vld [vmem:[#allocation3 + $0x448] sm:$0xff]  ;;  %v4483_v53 = vrot.slane %v3952_v36, 7 }
 0x425   :  { %v7132_v62 = vsel %vm2769_vm6, %v7057_v47, 0.0  ;;  %v6556_v8 = vsel %vm6515_vm0, %v6491_v16, %v10189_v9  ;;  %v6557_v24 = vsel %vm6515_vm0, %v6492_v56, %v10190_v29  ;;  %v7058_v46 = vmax.f32 %v6842_v45, 0.0  ;;  %10482 = vrot.lane.b32.xlu1 %v16214_v32, %s10705_s21  ;;  %v3954_v47 = vld [vmem:[#allocation3 + $0x450] sm:$0xff]  ;;  %v3955_v29 = vld [vmem:[#allocation3 + $0x458] sm:$0xff] }
 0x426   :  { %v7133_v31 = vadd.f32 %v7132_v62, %v16157_v57  ;;  %v6600_v30 = vpack.c.bf16 %v6557_v24, %v6556_v8  ;;  %v10198_v13 = vpop.permute.xlu0 %10197  ;;  %v7136_v57 = vsel %vm2769_vm6, %v7059_v43, 0.0  ;;  %v7138_v9 = vsel %vm2769_vm6, %v7060_v63, 0.0  ;;  %v3956_v8 = vld [vmem:[#allocation3 + $0x460] sm:$0xff]  ;;  %v16312_v24 = vld [vmem:[#allocation3 + $0x468] sm:$0xff] }
 0x427   :  { %v7134_v17 = vsel %vm2769_vm6, %v7058_v46, 0.0  ;;  %v10200_v3 = vunpack.i.h.bf16 %v10198_v13  ;;  %v10199_v41 = vunpack.i.l.bf16 %v10198_v13  ;;  %v16284_v28 = vpop.permute.xlu1 %10202  ;;  %v16304_v16 = vpack.i.bf16 %v16162_v7, %v16170_v54  ;;  %v16314_v46 = vld [vmem:[#allocation3 + $0x470] sm:$0xff] }
 0x428   :  { %v7135_v6 = vadd.f32 %v7134_v17, %v7133_v31  ;;  %10487 = vrot.lane.b32.xlu0 %v16201_v19, %s10706_s26  ;;  %7952 = vmatprep.mubr.msk.bf16.mxu1 %vm6655_vm4, %v6600_v30  ;;  %v4468_v19 = vrot.slane %v16162_v7, 1  ;;  %v4467_v56 = vrot.slane %v16170_v54, 1  ;;  %v4484_v43 = vrot.slane %v3953_v18, 7 }
 0x429   :  { %v6559_v49 = vsel %vm6515_vm0, %v6494_v2, %v10200_v3  ;;  %v6558_v26 = vsel %vm6515_vm0, %v6493_v58, %v10199_v41  ;;  %10492 = vrot.lane.b32.xlu1 %v16218_v27, %s10706_s26  ;;  %v4486_v7 = vrot.slane %v3954_v47, 7  ;;  %v4498_v4 = vrot.slane %v3955_v29, 1 }
 0x42a   :  { %v7137_v44 = vadd.f32 %v7136_v57, %v7135_v6  ;;  %v6601_v14 = vpack.c.bf16 %v6559_v49, %v6558_v26  ;;  %v16296_v11 = vpop.permute.xlu0 %10207  ;;  %v4469_v31 = vsel %vm822_vm1, %v4467_v56, %v4468_v19  ;;  %v4471_v54 = vsel %vm822_vm1, %v4468_v19, %v4470_v38 }
 0x42b   :  { %v16300_v45 = vpop.permute.xlu1 %10212  ;;  %v4496_v30 = vrot.slane %v3954_v47, 1  ;;  %v4511_v52 = vrot.slane %v3956_v8, 7  ;;  %v4512_v63 = vrot.slane %v16312_v24, 7  ;;  %v4514_v17 = vrot.slane %v16314_v46, 7 }
 0x42c   :  { %10497 = vrot.lane.b32.xlu0 %v16203_v1, %s10707_s17  ;;  %7953 = vmatmul.mubr.msk.bf16.gmra.mrb[40].mxu1 %vm6655_vm4, %v6601_v14  ;;  %v16310_v62 = vadd.f32 %v7138_v9, %v7137_v44  ;;  %v4485_v3 = vsel %vm565_vm2, %v4483_v53, %v4484_v43  ;;  %v4495_v41 = vrot.slane %v3953_v18, 1  ;;  %v16331_v58 = vpack.i.bf16 %v4471_v54, %v4469_v31  ;;  %v16351_v9 = vld [vmem:[#allocation3 + $0x478] sm:$0xff] }
 0x42d   :  { %10502 = vrot.lane.b32.xlu1 %v16304_v16, %s10707_s17  ;;  %v4487_v2 = vsel %vm565_vm2, %v4484_v43, %v4486_v7  ;;  %v4499_v49 = vsel %vm822_vm1, %v4496_v30, %v4498_v4  ;;  %v10195_v26 = vunpack.i.h.bf16 %v16269_v34  ;;  %v10194_v38 = vunpack.i.l.bf16 %v16269_v34 }
 0x42e   :  { %v16318_v15 = vpop.permute.xlu0 %10217  ;;  %v4497_v57 = vsel %vm822_vm1, %v4495_v41, %v4496_v30  ;;  %v16339_v44 = vsel %vm565_vm2, %v4511_v52, %v4512_v63  ;;  %v16342_v14 = vsel %vm565_vm2, %v4512_v63, %v4514_v17  ;;  %v16347_v19 = vpack.i.bf16 %v4487_v2, %v4485_v3 }
 0x42f   :  { %v16322_v13 = vpop.permute.xlu1 %10222  ;;  %v16349_v29 = vpack.i.bf16 %v3954_v47, %v3953_v18  ;;  %v10204_v34 = vunpack.i.l.bf16 %v16284_v28  ;;  %v16356_v56 = vpack.i.bf16 %v4499_v49, %v4497_v57  ;;  %v10210_v53 = vunpack.i.h.bf16 %v16296_v11 }
 0x430   :  { %10507 = vrot.lane.b32.xlu0 %v16214_v32, %s10708_s4  ;;  %v10209_v43 = vunpack.i.l.bf16 %v16296_v11  ;;  %v10571_v7 = vpack.i.bf16 %v16342_v14, %v16339_v44  ;;  %v4523_v18 = vrot.slane %v16312_v24, 1  ;;  %v6109_v47 = vsel %vm2639_vm3, %v15570_v42, %v10195_v26 }
 0x431   :  { %10512 = vrot.lane.b32.xlu1 %v16203_v1, %s10698_s24  ;;  %v10205_v1 = vunpack.i.h.bf16 %v16284_v28  ;;  %v6108_v28 = vsel %vm2639_vm3, %v15575_v23, %v10194_v38  ;;  %v4524_v31 = vrot.slane %v16314_v46, 1  ;;  %v4526_v54 = vrot.slane %v16351_v9, 1 }
 0x432   :  { %v10228_v6 = vpop.permute.xlu0 %10227  ;;  %v10215_v30 = vunpack.i.h.bf16 %v16300_v45  ;;  %v10214_v52 = vunpack.i.l.bf16 %v16300_v45  ;;  %v10219_v63 = vunpack.i.l.bf16 %v16318_v15  ;;  %v6110_v42 = vsel %vm2639_vm3, %v15620_v0, %v10204_v34 }
 0x433   :  { %v10233_v36 = vpop.permute.xlu1 %10232  ;;  %v6111_v11 = vsel %vm2639_vm3, %v15623_v12, %v10205_v1  ;;  %v10220_v23 = vunpack.i.h.bf16 %v16318_v15  ;;  %v10225_v17 = vunpack.i.h.bf16 %v16322_v13  ;;  %v10224_v3 = vunpack.i.l.bf16 %v16322_v13 }
 0x434   :  { %10517 = vrot.lane.b32.xlu0 %v16331_v58, %s10708_s4  ;;  %v6173_v12 = vsel %vm2769_vm6, %v6109_v47, %v10210_v53  ;;  %v6172_v45 = vsel %vm2769_vm6, %v6108_v28, %v10209_v43  ;;  %v10230_v41 = vunpack.i.h.bf16 %v10228_v6  ;;  %v10229_v2 = vunpack.i.l.bf16 %v10228_v6 }
 0x435   :  { %10522 = vrot.lane.b32.xlu1 %v16304_v16, %s10698_s24  ;;  %v10234_v49 = vunpack.i.l.bf16 %v10233_v36  ;;  %v6174_v15 = vsel %vm2769_vm6, %v6110_v42, %v10214_v52  ;;  %v6175_v1 = vsel %vm2769_vm6, %v6111_v11, %v10215_v30  ;;  %v6236_v13 = vsel %vm2899_vm8, %v6172_v45, %v10219_v63 }
 0x436   :  { %v10238_v8 = vpop.permute.xlu0 %10237  ;;  %v6237_v53 = vsel %vm2899_vm8, %v6173_v12, %v10220_v23  ;;  %v6238_v6 = vsel %vm2899_vm8, %v6174_v15, %v10224_v3  ;;  %v6239_v43 = vsel %vm2899_vm8, %v6175_v1, %v10225_v17  ;;  %vm7265_vm2 = vcmask 1041409  }
 0x437   :  { %v10243_v4 = vpop.permute.xlu1 %10242  ;;  %v10240_v26 = vunpack.i.h.bf16 %v10238_v8  ;;  %v10239_v0 = vunpack.i.l.bf16 %v10238_v8  ;;  %v6300_v8 = vsel %vm3029_vm10, %v6236_v13, %v10229_v2  ;;  %v6301_v47 = vsel %vm3029_vm10, %v6237_v53, %v10230_v41 }
 0x438   :  { %10527 = vrot.lane.b32.xlu0 %v16214_v32, %s10700_s27  ;;  %v10235_v32 = vunpack.i.h.bf16 %v10233_v36  ;;  %v10244_v34 = vunpack.i.l.bf16 %v10243_v4  ;;  %v10245_v36 = vunpack.i.h.bf16 %v10243_v4  ;;  %v6302_v52 = vsel %vm3029_vm10, %v6238_v6, %v10234_v49 }
 0x439   :  { %10532 = vrot.lane.b32.xlu1 %v16331_v58, %s10700_s27  ;;  %v6365_v63 = vsel %vm6320_vm13, %v6300_v8, %v10239_v0  ;;  %v6366_v42 = vsel %vm6320_vm13, %v6301_v47, %v10240_v26 }
 0x43a   :  { %v10248_v57 = vpop.permute.xlu0 %10247  ;;  %v6367_v17 = vsel %vm6320_vm13, %v6302_v52, %v10244_v34 }
 0x43b   :  { %v10253_v38 = vpop.permute.xlu1 %10252  ;;  %v10250_v28 = vunpack.i.h.bf16 %v10248_v57  ;;  %v10249_v11 = vunpack.i.l.bf16 %v10248_v57 }
 0x43c   :  { %10537 = vrot.lane.b32.xlu0 %v16218_v27, %s10702_s18  ;;  %v6303_v27 = vsel %vm3029_vm10, %v6239_v43, %v10235_v32  ;;  %v10255_v57 = vunpack.i.h.bf16 %v10253_v38  ;;  %v10254_v32 = vunpack.i.l.bf16 %v10253_v38 }
 0x43d   :  { %10542 = vrot.lane.b32.xlu1 %v16347_v19, %s10702_s18  ;;  %v6368_v2 = vsel %vm6320_vm13, %v6303_v27, %v10245_v36  ;;  %v6430_v0 = vsel %vm6385_vm14, %v6365_v63, %v10249_v11  ;;  %v6431_v15 = vsel %vm6385_vm14, %v6366_v42, %v10250_v28 }
 0x43e   :  { %v10258_v30 = vpop.permute.xlu0 %10257  ;;  %v6432_v42 = vsel %vm6385_vm14, %v6367_v17, %v10254_v32 }
 0x43f   :  { %v10263_v23 = vpop.permute.xlu1 %10262  ;;  %v7930_v4 = vpop.f32.mrb[16].mxu1  ;;  %v10260_v3 = vunpack.i.h.bf16 %v10258_v30  ;;  %v10259_v12 = vunpack.i.l.bf16 %v10258_v30 }
 0x440   :  { %v6863_v45 = vadd.f32 %v16265_v39, %v7930_v4  ;;  %10547 = vrot.lane.b32.xlu0 %v16304_v16, %s10704_s19  ;;  %v6854_v41 = vpop.f32.mrb[17].mxu1  ;;  %v10265_v1 = vunpack.i.h.bf16 %v10263_v23  ;;  %v10264_v30 = vunpack.i.l.bf16 %v10263_v23  ;;  %v6433_v4 = vsel %vm6385_vm14, %v6368_v2, %v10255_v57 }
 0x441   :  { %v6855_v49 = vadd.f32 %v16265_v39, %v6854_v41  ;;  %10552 = vrot.lane.b32.xlu1 %v16349_v29, %s10704_s19  ;;  %v7931_v26 = vpop.f32.mrb[18].mxu1  ;;  %v6495_v8 = vsel %vm6450_vm15, %v6430_v0, %v10259_v12  ;;  %v6496_v47 = vsel %vm6450_vm15, %v6431_v15, %v10260_v3  ;;  %v10581_v57 = vpack.i.bf16 %v16314_v46, %v16312_v24 }
 0x442   :  { %v6866_v13 = vadd.f32 %v16265_v39, %v7931_v26  ;;  %v10268_v34 = vpop.permute.xlu0 %10267  ;;  %v6857_v16 = vpop.f32.mrb[19].mxu1  ;;  %v7063_v52 = vmax.f32 %v6863_v45, 0.0  ;;  %v6497_v0 = vsel %vm6450_vm15, %v6432_v42, %v10264_v30  ;;  %v6498_v15 = vsel %vm6450_vm15, %v6433_v4, %v10265_v1 }
 0x443   :  { %v7061_v53 = vmax.f32 %v6855_v49, 0.0  ;;  %v10270_v6 = vunpack.i.h.bf16 %v10268_v34  ;;  %v10269_v43 = vunpack.i.l.bf16 %v10268_v34  ;;  %v6858_v38 = vadd.f32 %v16265_v39, %v6857_v16  ;;  %v10273_v36 = vpop.permute.xlu1 %10272 }
 0x444   :  { %10557 = vrot.lane.b32.xlu0 %v16331_v58, %s10705_s21  ;;  %v7064_v45 = vmax.f32 %v6866_v13, 0.0  ;;  %v4527_v16 = vsel %vm822_vm1, %v4524_v31, %v4526_v54  ;;  %v10275_v9 = vunpack.i.h.bf16 %v10273_v36 }
 0x445   :  { %v7140_v28 = vsel %vm2769_vm6, %v7061_v53, 0.0  ;;  %v6560_v11 = vsel %vm6515_vm0, %v6495_v8, %v10269_v43  ;;  %v6561_v27 = vsel %vm6515_vm0, %v6496_v47, %v10270_v6  ;;  %v7062_v63 = vmax.f32 %v6858_v38, 0.0  ;;  %10562 = vrot.lane.b32.xlu1 %v16356_v56, %s10705_s21 }
 0x446   :  { %v7141_v23 = vadd.f32 %v7140_v28, %v16310_v62  ;;  %v6602_v3 = vpack.c.bf16 %v6561_v27, %v6560_v11  ;;  %v10278_v12 = vpop.permute.xlu0 %10277  ;;  %v7144_v62 = vsel %vm2769_vm6, %v7063_v52, 0.0  ;;  %v7146_v44 = vsel %vm2769_vm6, %v7064_v45, 0.0 }
 0x447   :  { %v7142_v58 = vsel %vm2769_vm6, %v7062_v63, 0.0  ;;  %v10280_v41 = vunpack.i.h.bf16 %v10278_v12  ;;  %v10279_v49 = vunpack.i.l.bf16 %v10278_v12  ;;  %v10283_v26 = vpop.permute.xlu1 %10282  ;;  %v6113_v47 = vsel %vm2639_vm3, %v15736_v40, %v10275_v9 }
 0x448   :  { %v7143_v34 = vadd.f32 %v7142_v58, %v7141_v23  ;;  %10567 = vrot.lane.b32.xlu0 %v16347_v19, %s10706_s26  ;;  %7956 = vmatprep.mubr.msk.bf16.mxu1 %vm6655_vm4, %v6602_v3  ;;  %v4525_v19 = vsel %vm822_vm1, %v4523_v18, %v4524_v31  ;;  %v10274_v31 = vunpack.i.l.bf16 %v10273_v36  ;;  %v10285_v6 = vunpack.i.h.bf16 %v10283_v26 }
 0x449   :  { %v6563_v17 = vsel %vm6515_vm0, %v6498_v15, %v10280_v41  ;;  %v6562_v2 = vsel %vm6515_vm0, %v6497_v0, %v10279_v49  ;;  %10572 = vrot.lane.b32.xlu1 %v10571_v7, %s10706_s26  ;;  %v10591_v24 = vpack.i.bf16 %v4527_v16, %v4525_v19  ;;  %vm10709_vm1 = vmmov 0  }
 0x44a   :  { %v7145_v32 = vadd.f32 %v7144_v62, %v7143_v34  ;;  %v6603_v1 = vpack.c.bf16 %v6563_v17, %v6562_v2  ;;  %v10288_v13 = vpop.permute.xlu0 %10287  ;;  %v6112_v30 = vsel %vm2639_vm3, %v15731_v25, %v10274_v31  ;;  %7978 = vmatprep.mubr.msk.bf16.mxu0 %vm10709_vm1, %v16982_v21 }
 0x44b   :  { %v10293_v14 = vpop.permute.xlu1 %10292  ;;  %v10290_v43 = vunpack.i.h.bf16 %v10288_v13  ;;  %v10289_v38 = vunpack.i.l.bf16 %v10288_v13 }
 0x44c   :  { %10577 = vrot.lane.b32.xlu0 %v16349_v29, %s10707_s17  ;;  %7957 = vmatmul.mubr.msk.bf16.gmra.mrb[44].mxu1 %vm6655_vm4, %v6603_v1  ;;  %v16454_v7 = vadd.f32 %v7146_v44, %v7145_v32  ;;  %v10284_v29 = vunpack.i.l.bf16 %v10283_v26  ;;  %v10295_v28 = vunpack.i.h.bf16 %v10293_v14  ;;  %v10294_v11 = vunpack.i.l.bf16 %v10293_v14 }
 0x44d   :  { %10582 = vrot.lane.b32.xlu1 %v10581_v57, %s10707_s17  ;;  %v6177_v23 = vsel %vm2769_vm6, %v6113_v47, %v10290_v43  ;;  %v6176_v40 = vsel %vm2769_vm6, %v6112_v30, %v10289_v38 }
 0x44e   :  { %v10298_v18 = vpop.permute.xlu0 %10297  ;;  %v6114_v36 = vsel %vm2639_vm3, %v15761_v59, %v10284_v29 }
 0x44f   :  { %v10303_v53 = vpop.permute.xlu1 %10302  ;;  %v10299_v27 = vunpack.i.l.bf16 %v10298_v18  ;;  %v10300_v63 = vunpack.i.h.bf16 %v10298_v18  ;;  %v6178_v26 = vsel %vm2769_vm6, %v6114_v36, %v10294_v11 }
 0x450   :  { %10587 = vrot.lane.b32.xlu0 %v16356_v56, %s10708_s4  ;;  %v6115_v56 = vsel %vm2639_vm3, %v15747_v5, %v10285_v6  ;;  %v10305_v42 = vunpack.i.h.bf16 %v10303_v53  ;;  %v10304_v4 = vunpack.i.l.bf16 %v10303_v53 }
 0x451   :  { %10592 = vrot.lane.b32.xlu1 %v10591_v24, %s10708_s4  ;;  %v6179_v0 = vsel %vm2769_vm6, %v6115_v56, %v10295_v28  ;;  %v6240_v59 = vsel %vm2899_vm8, %v6176_v40, %v10299_v27  ;;  %v6241_v34 = vsel %vm2899_vm8, %v6177_v23, %v10300_v63  ;;  %s10711_s4 = smov [#allocation4]  }
 0x452   :  { %v10308_v46 = vpop.permute.xlu0 %10307  ;;  %v6242_v62 = vsel %vm2899_vm8, %v6178_v26, %v10304_v4  ;;  %v6243_v17 = vsel %vm2899_vm8, %v6179_v0, %v10305_v42  ;;  %s7642_s2 = sshll.u32 %s10711_s4, 4  ;;  %s7643_s2 = int_to_ptr.vmem [resolvable:$true] %s7642_s2 }
 0x453   :  { %v10313_v54 = vpop.permute.xlu1 %10312  ;;  %v10310_v3 = vunpack.i.h.bf16 %v10308_v46  ;;  %v10309_v12 = vunpack.i.l.bf16 %v10308_v46  ;;  %s10672_s20 = scalar_lea.vmem %s7643_s2, 16  ;;  %s10676_s22 = scalar_lea.vmem %s7643_s2, 32 }
 0x454   :  { %v10315_v45 = vunpack.i.h.bf16 %v10313_v54  ;;  %v10314_v58 = vunpack.i.l.bf16 %v10313_v54  ;;  %p10673_p0 = scmp.ne.s32.totalorder %s7643_s2, %s10672_s20  ;;  %p10677_p1 = scmp.lt.s32.totalorder %s7643_s2, %s7643_s2 }
 0x455   :  { %v6304_v57 = vsel %vm3029_vm10, %v6240_v59, %v10309_v12  ;;  %v6305_v32 = vsel %vm3029_vm10, %v6241_v34, %v10310_v3  ;;  %p10678_p2 = scmp.lt.s32.totalorder %s10676_s22, %s10672_s20 }
 0x456   :  { %v10318_v8 = vpop.permute.xlu0 %10317  ;;  %v6306_v16 = vsel %vm3029_vm10, %v6242_v62, %v10314_v58  ;;  %v6307_v44 = vsel %vm3029_vm10, %v6243_v17, %v10315_v45 }
 0x457   :  { %v10323_v52 = vpop.permute.xlu1 %10322  ;;  %v10320_v41 = vunpack.i.h.bf16 %v10318_v8  ;;  %v10319_v5 = vunpack.i.l.bf16 %v10318_v8  ;;  %p10679_p3 = por %p10678_p2, %p10677_p1 }
 0x458   :  { %v10324_v15 = vunpack.i.l.bf16 %v10323_v52  ;;  %v10325_v2 = vunpack.i.h.bf16 %v10323_v52 }
 0x459   :  { %v6369_v14 = vsel %vm6320_vm13, %v6304_v57, %v10319_v5  ;;  %v6370_v24 = vsel %vm6320_vm13, %v6305_v32, %v10320_v41  ;;  %p10680_p4 = pnand %p10679_p3, %p10673_p0 }
 0x45a   :  { %v10328_v25 = vpop.permute.xlu0 %10327  ;;  %v6371_v46 = vsel %vm6320_vm13, %v6306_v16, %v10324_v15  ;;  %v6372_v29 = vsel %vm6320_vm13, %v6307_v44, %v10325_v2 }
 0x45b   :  { %v10333_v49 = vpop.permute.xlu1 %10332  ;;  %v10330_v1 = vunpack.i.h.bf16 %v10328_v25  ;;  %v10329_v13 = vunpack.i.l.bf16 %v10328_v25 }
 0x45c   :  { %v10335_v43 = vunpack.i.h.bf16 %v10333_v49  ;;  %v10334_v38 = vunpack.i.l.bf16 %v10333_v49 }
 0x45d   :  { %v6434_v30 = vsel %vm6385_vm14, %v6369_v14, %v10329_v13  ;;  %v6435_v52 = vsel %vm6385_vm14, %v6370_v24, %v10330_v1 }
 0x45e   :  { %v10338_v19 = vpop.permute.xlu0 %10337  ;;  %v6436_v49 = vsel %vm6385_vm14, %v6371_v46, %v10334_v38  ;;  %v6437_v26 = vsel %vm6385_vm14, %v6372_v29, %v10335_v43 }
 0x45f   :  { %v10343_v18 = vpop.permute.xlu1 %10342  ;;  %v7934_v53 = vpop.f32.mrb[20].mxu1  ;;  %v10340_v9 = vunpack.i.h.bf16 %v10338_v19  ;;  %v10339_v31 = vunpack.i.l.bf16 %v10338_v19 }
 0x460   :  { %v6879_v54 = vadd.f32 %v16265_v39, %v7934_v53  ;;  %v6870_v6 = vpop.f32.mrb[21].mxu1  ;;  %v10345_v56 = vunpack.i.h.bf16 %v10343_v18  ;;  %v10344_v12 = vunpack.i.l.bf16 %v10343_v18 }
 0x461   :  { %v6871_v8 = vadd.f32 %v16265_v39, %v6870_v6  ;;  %v7935_v47 = vpop.f32.mrb[22].mxu1  ;;  %v6499_v40 = vsel %vm6450_vm15, %v6434_v30, %v10339_v31  ;;  %v6500_v3 = vsel %vm6450_vm15, %v6435_v52, %v10340_v9 }
 0x462   :  { %v6882_v28 = vadd.f32 %v16265_v39, %v7935_v47  ;;  %v10348_v11 = vpop.permute.xlu0 %10347  ;;  %v6873_v27 = vpop.f32.mrb[23].mxu1  ;;  %v7067_v25 = vmax.f32 %v6879_v54, 0.0  ;;  %v6501_v32 = vsel %vm6450_vm15, %v6436_v49, %v10344_v12  ;;  %v6502_v1 = vsel %vm6450_vm15, %v6437_v26, %v10345_v56 }
 0x463   :  { %v7065_v36 = vmax.f32 %v6871_v8, 0.0  ;;  %v10350_v63 = vunpack.i.h.bf16 %v10348_v11  ;;  %v10349_v42 = vunpack.i.l.bf16 %v10348_v11  ;;  %v6874_v4 = vadd.f32 %v16265_v39, %v6873_v27  ;;  %v10353_v23 = vpop.permute.xlu1 %10352 }
 0x464   :  { %v7068_v34 = vmax.f32 %v6882_v28, 0.0  ;;  %v7152_v19 = vsel %vm2769_vm6, %v7067_v25, 0.0  ;;  %v10355_v6 = vunpack.i.h.bf16 %v10353_v23  ;;  %v10354_v29 = vunpack.i.l.bf16 %v10353_v23 }
 0x465   :  { %v7148_v45 = vsel %vm2769_vm6, %v7065_v36, 0.0  ;;  %v6564_v58 = vsel %vm6515_vm0, %v6499_v40, %v10349_v42  ;;  %v6565_v41 = vsel %vm6515_vm0, %v6500_v3, %v10350_v63  ;;  %v7066_v5 = vmax.f32 %v6874_v4, 0.0 }
 0x466   :  { %v7149_v0 = vadd.f32 %v7148_v45, %v16454_v7  ;;  %v6604_v59 = vpack.c.bf16 %v6565_v41, %v6564_v58  ;;  %v10358_v15 = vpop.permute.xlu0 %10357  ;;  %v7154_v18 = vsel %vm2769_vm6, %v7068_v34, 0.0  ;;  %v6117_v56 = vsel %vm2639_vm3, %v15890_v10, %v10355_v6 }
 0x467   :  { %v7150_v62 = vsel %vm2769_vm6, %v7066_v5, 0.0  ;;  %v10360_v17 = vunpack.i.h.bf16 %v10358_v15  ;;  %v10359_v2 = vunpack.i.l.bf16 %v10358_v15  ;;  %v10363_v57 = vpop.permute.xlu1 %10362  ;;  %v6116_v28 = vsel %vm2639_vm3, %v15885_v60, %v10354_v29 }
 0x468   :  { %v7151_v13 = vadd.f32 %v7150_v62, %v7149_v0  ;;  %7960 = vmatprep.mubr.msk.bf16.mxu1 %vm6655_vm4, %v6604_v59  ;;  %v10365_v38 = vunpack.i.h.bf16 %v10363_v57  ;;  %v10364_v8 = vunpack.i.l.bf16 %v10363_v57 }
 0x469   :  { %v6567_v16 = vsel %vm6515_vm0, %v6502_v1, %v10360_v17  ;;  %v6566_v7 = vsel %vm6515_vm0, %v6501_v32, %v10359_v2 }
 0x46a   :  { %v7153_v44 = vadd.f32 %v7152_v19, %v7151_v13  ;;  %v6605_v14 = vpack.c.bf16 %v6567_v16, %v6566_v7  ;;  %v10368_v24 = vpop.permute.xlu0 %10367  ;;  %v6119_v27 = vsel %vm2639_vm3, %v15901_v55, %v10365_v38  ;;  %v6118_v4 = vsel %vm2639_vm3, %v15915_v35, %v10364_v8 }
 0x46b   :  { %v10373_v53 = vpop.permute.xlu1 %10372  ;;  %v10370_v47 = vunpack.i.h.bf16 %v10368_v24  ;;  %v10369_v30 = vunpack.i.l.bf16 %v10368_v24 }
 0x46c   :  { %7961 = vmatmul.mubr.msk.bf16.gmra.mrb[48].mxu1 %vm6655_vm4, %v6605_v14  ;;  %v16507_v46 = vadd.f32 %v7154_v18, %v7153_v44  ;;  %v10375_v36 = vunpack.i.h.bf16 %v10373_v53  ;;  %v10374_v63 = vunpack.i.l.bf16 %v10373_v53 }
 0x46d   :  { %v6181_v12 = vsel %vm2769_vm6, %v6117_v56, %v10370_v47  ;;  %v6180_v10 = vsel %vm2769_vm6, %v6116_v28, %v10369_v30 }
 0x46e   :  { %v10378_v9 = vpop.permute.xlu0 %10377  ;;  %v6182_v26 = vsel %vm2769_vm6, %v6118_v4, %v10374_v63  ;;  %v6183_v0 = vsel %vm2769_vm6, %v6119_v27, %v10375_v36 }
 0x46f   :  { %v10383_v31 = vpop.permute.xlu1 %10382  ;;  %v10379_v42 = vunpack.i.l.bf16 %v10378_v9  ;;  %v10380_v23 = vunpack.i.h.bf16 %v10378_v9 }
 0x470   :  { %v10385_v40 = vunpack.i.h.bf16 %v10383_v31  ;;  %v10384_v3 = vunpack.i.l.bf16 %v10383_v31 }
 0x471   :  { %v6244_v35 = vsel %vm2899_vm8, %v6180_v10, %v10379_v42  ;;  %v6245_v15 = vsel %vm2899_vm8, %v6181_v12, %v10380_v23 }
 0x472   :  { %v10388_v54 = vpop.permute.xlu0 %10387  ;;  %v6246_v34 = vsel %vm2899_vm8, %v6182_v26, %v10384_v3  ;;  %v6247_v62 = vsel %vm2899_vm8, %v6183_v0, %v10385_v40 }
 0x473   :  { %v10393_v43 = vpop.permute.xlu1 %10392  ;;  %v10390_v25 = vunpack.i.h.bf16 %v10388_v54  ;;  %v10389_v45 = vunpack.i.l.bf16 %v10388_v54 }
 0x474   :  { %v10395_v58 = vunpack.i.h.bf16 %v10393_v43  ;;  %v10394_v41 = vunpack.i.l.bf16 %v10393_v43 }
 0x475   :  { %v6308_v2 = vsel %vm3029_vm10, %v6244_v35, %v10389_v45  ;;  %v6309_v57 = vsel %vm3029_vm10, %v6245_v15, %v10390_v25 }
 0x476   :  { %v10398_v52 = vpop.permute.xlu0 %10397  ;;  %v6310_v19 = vsel %vm3029_vm10, %v6246_v34, %v10394_v41  ;;  %v6311_v16 = vsel %vm3029_vm10, %v6247_v62, %v10395_v58 }
 0x477   :  { %v10403_v11 = vpop.permute.xlu1 %10402  ;;  %v10400_v5 = vunpack.i.h.bf16 %v10398_v52  ;;  %v10399_v55 = vunpack.i.l.bf16 %v10398_v52 }
 0x478   :  { %v10404_v59 = vunpack.i.l.bf16 %v10403_v11  ;;  %v10405_v17 = vunpack.i.h.bf16 %v10403_v11 }
 0x479   :  { %v6373_v7 = vsel %vm6320_vm13, %v6308_v2, %v10399_v55  ;;  %v6374_v44 = vsel %vm6320_vm13, %v6309_v57, %v10400_v5 }
 0x47a   :  { %v10408_v60 = vpop.permute.xlu0 %10407  ;;  %v6375_v18 = vsel %vm6320_vm13, %v6310_v19, %v10404_v59  ;;  %v6376_v6 = vsel %vm6320_vm13, %v6311_v16, %v10405_v17 }
 0x47b   :  { %v10413_v49 = vpop.permute.xlu1 %10412  ;;  %v10410_v32 = vunpack.i.h.bf16 %v10408_v60  ;;  %v10409_v1 = vunpack.i.l.bf16 %v10408_v60 }
 0x47c   :  { %v10415_v29 = vunpack.i.h.bf16 %v10413_v49  ;;  %v10414_v43 = vunpack.i.l.bf16 %v10413_v49 }
 0x47d   :  { %v6438_v47 = vsel %vm6385_vm14, %v6373_v7, %v10409_v1  ;;  %v6439_v30 = vsel %vm6385_vm14, %v6374_v44, %v10410_v32 }
 0x47e   :  { %v10418_v13 = vpop.permute.xlu0 %10417  ;;  %v6440_v58 = vsel %vm6385_vm14, %v6375_v18, %v10414_v43  ;;  %v6441_v41 = vsel %vm6385_vm14, %v6376_v6, %v10415_v29 }
 0x47f   :  { %v10423_v14 = vpop.permute.xlu1 %10422  ;;  %v7938_v24 = vpop.f32.mrb[24].mxu1  ;;  %v10420_v53 = vunpack.i.h.bf16 %v10418_v13  ;;  %v10419_v9 = vunpack.i.l.bf16 %v10418_v13 }
 0x480   :  { %v6895_v31 = vadd.f32 %v16265_v39, %v7938_v24  ;;  %v6886_v54 = vpop.f32.mrb[25].mxu1  ;;  %v10425_v52 = vunpack.i.h.bf16 %v10423_v14  ;;  %v10424_v3 = vunpack.i.l.bf16 %v10423_v14 }
 0x481   :  { %v6887_v38 = vadd.f32 %v16265_v39, %v6886_v54  ;;  %v7939_v8 = vpop.f32.mrb[26].mxu1  ;;  %v6503_v23 = vsel %vm6450_vm15, %v6438_v47, %v10419_v9  ;;  %v6504_v40 = vsel %vm6450_vm15, %v6439_v30, %v10420_v53 }
 0x482   :  { %v6898_v56 = vadd.f32 %v16265_v39, %v7939_v8  ;;  %v10428_v28 = vpop.permute.xlu0 %10427  ;;  %v6889_v11 = vpop.f32.mrb[27].mxu1  ;;  %v7071_v12 = vmax.f32 %v6895_v31, 0.0  ;;  %v6505_v34 = vsel %vm6450_vm15, %v6440_v58, %v10424_v3  ;;  %v6506_v62 = vsel %vm6450_vm15, %v6441_v41, %v10425_v52 }
 0x483   :  { %v7069_v27 = vmax.f32 %v6887_v38, 0.0  ;;  %v10430_v36 = vunpack.i.h.bf16 %v10428_v28  ;;  %v10429_v63 = vunpack.i.l.bf16 %v10428_v28  ;;  %v6890_v42 = vadd.f32 %v16265_v39, %v6889_v11  ;;  %v10433_v4 = vpop.permute.xlu1 %10432 }
 0x484   :  { %v7072_v26 = vmax.f32 %v6898_v56, 0.0  ;;  %v7160_v2 = vsel %vm2769_vm6, %v7071_v12, 0.0  ;;  %v10435_v18 = vunpack.i.h.bf16 %v10433_v4  ;;  %v10434_v53 = vunpack.i.l.bf16 %v10433_v4 }
 0x485   :  { %v7156_v10 = vsel %vm2769_vm6, %v7069_v27, 0.0  ;;  %v6568_v25 = vsel %vm6515_vm0, %v6503_v23, %v10429_v63  ;;  %v6569_v45 = vsel %vm6515_vm0, %v6504_v40, %v10430_v36  ;;  %v7070_v60 = vmax.f32 %v6890_v42, 0.0 }
 0x486   :  { %v7157_v5 = vadd.f32 %v7156_v10, %v16507_v46  ;;  %v6606_v55 = vpack.c.bf16 %v6569_v45, %v6568_v25  ;;  %v10438_v49 = vpop.permute.xlu0 %10437  ;;  %v7162_v19 = vsel %vm2769_vm6, %v7072_v26, 0.0  ;;  %v6121_v38 = vsel %vm2639_vm3, %v16036_v61, %v10435_v18 }
 0x487   :  { %v7158_v0 = vsel %vm2769_vm6, %v7070_v60, 0.0  ;;  %v10440_v35 = vunpack.i.h.bf16 %v10438_v49  ;;  %v10439_v59 = vunpack.i.l.bf16 %v10438_v49  ;;  %v10443_v15 = vpop.permute.xlu1 %10442  ;;  %v6120_v8 = vsel %vm2639_vm3, %v16031_v51, %v10434_v53 }
 0x488   :  { %v7159_v17 = vadd.f32 %v7158_v0, %v7157_v5  ;;  %7964 = vmatprep.mubr.msk.bf16.mxu1 %vm6655_vm4, %v6606_v55  ;;  %v10445_v31 = vunpack.i.h.bf16 %v10443_v15  ;;  %v10444_v54 = vunpack.i.l.bf16 %v10443_v15 }
 0x489   :  { %v6571_v57 = vsel %vm6515_vm0, %v6506_v62, %v10440_v35  ;;  %v6570_v46 = vsel %vm6515_vm0, %v6505_v34, %v10439_v59 }
 0x48a   :  { %v7161_v32 = vadd.f32 %v7160_v2, %v7159_v17  ;;  %v6607_v1 = vpack.c.bf16 %v6571_v57, %v6570_v46  ;;  %v10448_v13 = vpop.permute.xlu0 %10447  ;;  %v6123_v30 = vsel %vm2639_vm3, %v16047_v37, %v10445_v31  ;;  %v6122_v11 = vsel %vm2639_vm3, %v16061_v22, %v10444_v54 }
 0x48b   :  { %v10453_v16 = vpop.permute.xlu1 %10452  ;;  %v10450_v6 = vunpack.i.h.bf16 %v10448_v13  ;;  %v10449_v29 = vunpack.i.l.bf16 %v10448_v13 }
 0x48c   :  { %7965 = vmatmul.mubr.msk.bf16.gmra.mrb[52].mxu1 %vm6655_vm4, %v6607_v1  ;;  %v16556_v7 = vadd.f32 %v7162_v19, %v7161_v32  ;;  %v10455_v52 = vunpack.i.h.bf16 %v10453_v16  ;;  %v10454_v56 = vunpack.i.l.bf16 %v10453_v16 }
 0x48d   :  { %v6185_v42 = vsel %vm2769_vm6, %v6121_v38, %v10450_v6  ;;  %v6184_v61 = vsel %vm2769_vm6, %v6120_v8, %v10449_v29 }
 0x48e   :  { %v10458_v44 = vpop.permute.xlu0 %10457  ;;  %v6186_v25 = vsel %vm2769_vm6, %v6122_v11, %v10454_v56  ;;  %v6187_v45 = vsel %vm2769_vm6, %v6123_v30, %v10455_v52 }
 0x48f   :  { %v10463_v14 = vpop.permute.xlu1 %10462  ;;  %v10459_v28 = vunpack.i.l.bf16 %v10458_v44  ;;  %v10460_v27 = vunpack.i.h.bf16 %v10458_v44 }
 0x490   :  { %v10465_v36 = vunpack.i.h.bf16 %v10463_v14  ;;  %v10464_v63 = vunpack.i.l.bf16 %v10463_v14 }
 0x491   :  { %v6248_v22 = vsel %vm2899_vm8, %v6184_v61, %v10459_v28  ;;  %v6249_v58 = vsel %vm2899_vm8, %v6185_v42, %v10460_v27 }
 0x492   :  { %v10468_v24 = vpop.permute.xlu0 %10467  ;;  %v6250_v41 = vsel %vm2899_vm8, %v6186_v25, %v10464_v63  ;;  %v6251_v5 = vsel %vm2899_vm8, %v6187_v45, %v10465_v36 }
 0x493   :  { %v10473_v9 = vpop.permute.xlu1 %10472  ;;  %v10470_v4 = vunpack.i.h.bf16 %v10468_v24  ;;  %v10469_v23 = vunpack.i.l.bf16 %v10468_v24 }
 0x494   :  { %v10475_v40 = vunpack.i.h.bf16 %v10473_v9  ;;  %v10474_v3 = vunpack.i.l.bf16 %v10473_v9 }
 0x495   :  { %v6312_v49 = vsel %vm3029_vm10, %v6248_v22, %v10469_v23  ;;  %v6313_v26 = vsel %vm3029_vm10, %v6249_v58, %v10470_v4 }
 0x496   :  { %v10478_v43 = vpop.permute.xlu0 %10477  ;;  %v6314_v15 = vsel %vm3029_vm10, %v6250_v41, %v10474_v3  ;;  %v6315_v34 = vsel %vm3029_vm10, %v6251_v5, %v10475_v40 }
 0x497   :  { %v10483_v47 = vpop.permute.xlu1 %10482  ;;  %v10480_v12 = vunpack.i.h.bf16 %v10478_v43  ;;  %v10479_v37 = vunpack.i.l.bf16 %v10478_v43 }
 0x498   :  { %v10484_v60 = vunpack.i.l.bf16 %v10483_v47  ;;  %v10485_v55 = vunpack.i.h.bf16 %v10483_v47 }
 0x499   :  { %v6377_v62 = vsel %vm6320_vm13, %v6312_v49, %v10479_v37  ;;  %v6378_v17 = vsel %vm6320_vm13, %v6313_v26, %v10480_v12 }
 0x49a   :  { %v10488_v51 = vpop.permute.xlu0 %10487  ;;  %v6379_v46 = vsel %vm6320_vm13, %v6314_v15, %v10484_v60  ;;  %v6380_v16 = vsel %vm6320_vm13, %v6315_v34, %v10485_v55 }
 0x49b   :  { %v10493_v10 = vpop.permute.xlu1 %10492  ;;  %v10490_v0 = vunpack.i.h.bf16 %v10488_v51  ;;  %v10489_v35 = vunpack.i.l.bf16 %v10488_v51 }
 0x49c   :  { %v10495_v44 = vunpack.i.h.bf16 %v10493_v10  ;;  %v10494_v14 = vunpack.i.l.bf16 %v10493_v10 }
 0x49d   :  { %v6442_v53 = vsel %vm6385_vm14, %v6377_v62, %v10489_v35  ;;  %v6443_v9 = vsel %vm6385_vm14, %v6378_v17, %v10490_v0 }
 0x49e   :  { %v10498_v59 = vpop.permute.xlu0 %10497  ;;  %v6444_v61 = vsel %vm6385_vm14, %v6379_v46, %v10494_v14  ;;  %v6445_v4 = vsel %vm6385_vm14, %v6380_v16, %v10495_v44 }
 0x49f   :  { %v10503_v2 = vpop.permute.xlu1 %10502  ;;  %v7942_v57 = vpop.f32.mrb[28].mxu1  ;;  %v10500_v32 = vunpack.i.h.bf16 %v10498_v59  ;;  %v10499_v1 = vunpack.i.l.bf16 %v10498_v59 }
 0x4a0   :  { %v6911_v13 = vadd.f32 %v16265_v39, %v7942_v57  ;;  %v6902_v19 = vpop.f32.mrb[29].mxu1  ;;  %v10505_v31 = vunpack.i.h.bf16 %v10503_v2  ;;  %v10504_v28 = vunpack.i.l.bf16 %v10503_v2 }
 0x4a1   :  { %v6903_v24 = vadd.f32 %v16265_v39, %v6902_v19  ;;  %v7943_v18 = vpop.f32.mrb[30].mxu1  ;;  %v6507_v52 = vsel %vm6450_vm15, %v6442_v53, %v10499_v1  ;;  %v6508_v56 = vsel %vm6450_vm15, %v6443_v9, %v10500_v32 }
 0x4a2   :  { %v6914_v54 = vadd.f32 %v16265_v39, %v7943_v18  ;;  %v10508_v6 = vpop.permute.xlu0 %10507  ;;  %v6905_v29 = vpop.f32.mrb[31].mxu1  ;;  %v7075_v11 = vmax.f32 %v6911_v13, 0.0  ;;  %v6509_v25 = vsel %vm6450_vm15, %v6444_v61, %v10504_v28  ;;  %v6510_v45 = vsel %vm6450_vm15, %v6445_v4, %v10505_v31 }
 0x4a3   :  { %v7073_v43 = vmax.f32 %v6903_v24, 0.0  ;;  %v10510_v38 = vunpack.i.h.bf16 %v10508_v6  ;;  %v10509_v8 = vunpack.i.l.bf16 %v10508_v6  ;;  %v6906_v47 = vadd.f32 %v16265_v39, %v6905_v29  ;;  %v10513_v30 = vpop.permute.xlu1 %10512 }
 0x4a4   :  { %v7076_v40 = vmax.f32 %v6914_v54, 0.0  ;;  %v7168_v60 = vsel %vm2769_vm6, %v7075_v11, 0.0  ;;  %v10515_v15 = vunpack.i.h.bf16 %v10513_v30  ;;  %v10514_v62 = vunpack.i.l.bf16 %v10513_v30 }
 0x4a5   :  { %v7164_v27 = vsel %vm2769_vm6, %v7073_v43, 0.0  ;;  %v6572_v36 = vsel %vm6515_vm0, %v6507_v52, %v10509_v8  ;;  %v6573_v63 = vsel %vm6515_vm0, %v6508_v56, %v10510_v38  ;;  %v7074_v42 = vmax.f32 %v6906_v47, 0.0 }
 0x4a6   :  { %v7165_v39 = vadd.f32 %v7164_v27, %v16556_v7  ;;  %v6608_v23 = vpack.c.bf16 %v6573_v63, %v6572_v36  ;;  %v10518_v51 = vpop.permute.xlu0 %10517  ;;  %v7170_v49 = vsel %vm2769_vm6, %v7076_v40, 0.0  ;;  %v6125_v13 = vsel %vm2639_vm3, %v16183_v33, %v10515_v15 }
 0x4a7   :  { %v7166_v3 = vsel %vm2769_vm6, %v7074_v42, 0.0  ;;  %v10520_v12 = vunpack.i.h.bf16 %v10518_v51  ;;  %v10519_v37 = vunpack.i.l.bf16 %v10518_v51  ;;  %v10523_v10 = vpop.permute.xlu1 %10522  ;;  %v6124_v44 = vsel %vm2639_vm3, %v16178_v50, %v10514_v62 }
 0x4a8   :  { %v7167_v22 = vadd.f32 %v7166_v3, %v7165_v39  ;;  %7968 = vmatprep.mubr.msk.bf16.mxu1 %vm6655_vm4, %v6608_v23  ;;  %v10525_v17 = vunpack.i.h.bf16 %v10523_v10  ;;  %v10524_v57 = vunpack.i.l.bf16 %v10523_v10 }
 0x4a9   :  { %v6575_v58 = vsel %vm6515_vm0, %v6510_v45, %v10520_v12  ;;  %v6574_v7 = vsel %vm6515_vm0, %v6509_v25, %v10519_v37 }
 0x4aa   :  { %v7169_v41 = vadd.f32 %v7168_v60, %v7167_v22  ;;  %v6609_v5 = vpack.c.bf16 %v6575_v58, %v6574_v7  ;;  %v10528_v55 = vpop.permute.xlu0 %10527  ;;  %v6127_v14 = vsel %vm2639_vm3, %v16194_v20, %v10525_v17  ;;  %v6126_v9 = vsel %vm2639_vm3, %v16208_v48, %v10524_v57 }
 0x4ab   :  { %v10533_v26 = vpop.permute.xlu1 %10532  ;;  %v10530_v46 = vunpack.i.h.bf16 %v10528_v55  ;;  %v10529_v32 = vunpack.i.l.bf16 %v10528_v55  ;;  %vm7552_vm3 = vcmask 91136  }
 0x4ac   :  { %v16604_v0 = vadd.f32 %v7170_v49, %v7169_v41  ;;  %7969 = vmatmul.mubr.msk.bf16.gmra.mrb[56].mxu1 %vm6655_vm4, %v6609_v5  ;;  %v10534_v1 = vunpack.i.l.bf16 %v10533_v26  ;;  %v10535_v19 = vunpack.i.h.bf16 %v10533_v26 }
 0x4ad   :  { %v6189_v31 = vsel %vm2769_vm6, %v6125_v13, %v10530_v46  ;;  %v6188_v33 = vsel %vm2769_vm6, %v6124_v44, %v10529_v32 }
 0x4ae   :  { %v10538_v35 = vpop.permute.xlu0 %10537  ;;  %v6190_v29 = vsel %vm2769_vm6, %v6126_v9, %v10534_v1  ;;  %v6191_v50 = vsel %vm2769_vm6, %v6127_v14, %v10535_v19 }
 0x4af   :  { %v10543_v59 = vpop.permute.xlu1 %10542  ;;  %v10540_v24 = vunpack.i.h.bf16 %v10538_v35  ;;  %v10539_v18 = vunpack.i.l.bf16 %v10538_v35 }
 0x4b0   :  { %v10545_v54 = vunpack.i.h.bf16 %v10543_v59  ;;  %v10544_v6 = vunpack.i.l.bf16 %v10543_v59  ;;  %v16637_v59 = vld [vmem:[%s16808_s5] ss:$0 sm:$0xff] }
 0x4b1   :  { %v6252_v52 = vsel %vm2899_vm8, %v6188_v33, %v10539_v18  ;;  %v6253_v48 = vsel %vm2899_vm8, %v6189_v31, %v10540_v24 }
 0x4b2   :  { %v10548_v34 = vpop.permute.xlu0 %10547  ;;  %v6254_v27 = vsel %vm2899_vm8, %v6190_v29, %v10544_v6  ;;  %v6255_v36 = vsel %vm2899_vm8, %v6191_v50, %v10545_v54  ;;  %v10604_v50 = vld [vmem:[%s16809_s6] sm:$0xff]   ;;  %vm7573_vm8 = vcmask 1024  }
 0x4b3   :  { %v10553_v2 = vpop.permute.xlu1 %10552  ;;  %v10550_v43 = vunpack.i.h.bf16 %v10548_v34  ;;  %v10549_v38 = vunpack.i.l.bf16 %v10548_v34  ;;  %7977 = vmatpush3.bf16.msra.mxu0 %v10604_v50 }
 0x4b4   :  { %v10555_v8 = vunpack.i.h.bf16 %v10553_v2  ;;  %v10554_v20 = vunpack.i.l.bf16 %v10553_v2  ;;  %7982 = vmatprep.subr.bf16.mxu0 %v16982_v21 }
 0x4b5   :  { %v6316_v61 = vsel %vm3029_vm10, %v6252_v52, %v10549_v38  ;;  %v6317_v4 = vsel %vm3029_vm10, %v6253_v48, %v10550_v43 }
 0x4b6   :  { %v10558_v16 = vpop.permute.xlu0 %10557  ;;  %v6318_v51 = vsel %vm3029_vm10, %v6254_v27, %v10554_v20  ;;  %v6319_v40 = vsel %vm3029_vm10, %v6255_v36, %v10555_v8 }
 0x4b7   :  { %v10563_v53 = vpop.permute.xlu1 %10562  ;;  %v10559_v47 = vunpack.i.l.bf16 %v10558_v16  ;;  %v10560_v56 = vunpack.i.h.bf16 %v10558_v16 }
 0x4b8   :  { %v10564_v28 = vunpack.i.l.bf16 %v10563_v53  ;;  %v10565_v63 = vunpack.i.h.bf16 %v10563_v53 }
 0x4b9   :  { %v6381_v3 = vsel %vm6320_vm13, %v6316_v61, %v10559_v47  ;;  %v6382_v10 = vsel %vm6320_vm13, %v6317_v4, %v10560_v56 }
 0x4ba   :  { %v10568_v30 = vpop.permute.xlu0 %10567  ;;  %v6383_v25 = vsel %vm6320_vm13, %v6318_v51, %v10564_v28  ;;  %v6384_v7 = vsel %vm6320_vm13, %v6319_v40, %v10565_v63 }
 0x4bb   :  { %v10573_v11 = vpop.permute.xlu1 %10572  ;;  %v10569_v42 = vunpack.i.l.bf16 %v10568_v30  ;;  %v10570_v39 = vunpack.i.h.bf16 %v10568_v30 }
 0x4bc   :  { %v10574_v23 = vunpack.i.l.bf16 %v10573_v11  ;;  %v10575_v12 = vunpack.i.h.bf16 %v10573_v11 }
 0x4bd   :  { %v6446_v41 = vsel %vm6385_vm14, %v6381_v3, %v10569_v42  ;;  %v6447_v26 = vsel %vm6385_vm14, %v6382_v10, %v10570_v39 }
 0x4be   :  { %v10578_v37 = vpop.permute.xlu0 %10577  ;;  %v6448_v35 = vsel %vm6385_vm14, %v6383_v25, %v10574_v23  ;;  %v6449_v17 = vsel %vm6385_vm14, %v6384_v7, %v10575_v12 }
 0x4bf   :  { %v10580_v45 = vunpack.i.h.bf16 %v10578_v37  ;;  %v10579_v22 = vunpack.i.l.bf16 %v10578_v37  ;;  %v10583_v60 = vpop.permute.xlu1 %10582  ;;  %v7946_v58 = vpop.f32.mrb[32].mxu1 }
 0x4c0   :  { %v10585_v5 = vunpack.i.h.bf16 %v10583_v60  ;;  %v10584_v55 = vunpack.i.l.bf16 %v10583_v60  ;;  %v6918_v49 = vpop.f32.mrb[33].mxu1  ;;  %v6927_v15 = vadd.f32 %v16637_v59, %v7946_v58 }
 0x4c1   :  { %v6919_v34 = vadd.f32 %v16637_v59, %v6918_v49  ;;  %v7947_v62 = vpop.f32.mrb[34].mxu1  ;;  %v6511_v2 = vsel %vm6450_vm15, %v6446_v41, %v10579_v22  ;;  %v6512_v57 = vsel %vm6450_vm15, %v6447_v26, %v10580_v45 }
 0x4c2   :  { %v6930_v46 = vadd.f32 %v16637_v59, %v7947_v62  ;;  %v10588_v32 = vpop.permute.xlu0 %10587  ;;  %v6921_v1 = vpop.f32.mrb[35].mxu1  ;;  %v6513_v24 = vsel %vm6450_vm15, %v6448_v35, %v10584_v55  ;;  %v6514_v18 = vsel %vm6450_vm15, %v6449_v17, %v10585_v5  ;;  %v7079_v31 = vmax.f32 %v6927_v15, 0.0 }
 0x4c3   :  { %v7077_v13 = vmax.f32 %v6919_v34, 0.0  ;;  %v10590_v19 = vunpack.i.h.bf16 %v10588_v32  ;;  %v10589_v16 = vunpack.i.l.bf16 %v10588_v32  ;;  %v6922_v44 = vadd.f32 %v16637_v59, %v6921_v1  ;;  %v10593_v14 = vpop.permute.xlu1 %10592 }
 0x4c4   :  { %v10595_v53 = vunpack.i.h.bf16 %v10593_v14  ;;  %v10594_v9 = vunpack.i.l.bf16 %v10593_v14  ;;  %v7080_v20 = vmax.f32 %v6930_v46, 0.0  ;;  %v7181_v48 = vsel %vm2769_vm6, %v7079_v31, 0.0 }
 0x4c5   :  { %v6576_v54 = vsel %vm6515_vm0, %v6511_v2, %v10589_v16  ;;  %v6577_v6 = vsel %vm6515_vm0, %v6512_v57, %v10590_v19  ;;  %v7078_v33 = vmax.f32 %v6922_v44, 0.0  ;;  %v7178_v8 = vsel %vm2769_vm6, %v7077_v13, 0.0 }
 0x4c6   :  { %v6610_v29 = vpack.c.bf16 %v6577_v6, %v6576_v54  ;;  %v6578_v43 = vsel %vm6515_vm0, %v6513_v24, %v10594_v9  ;;  %v6579_v38 = vsel %vm6515_vm0, %v6514_v18, %v10595_v53  ;;  %v7183_v28 = vsel %vm2769_vm6, %v7080_v20, 0.0 }
 0x4c7   :  { %v7179_v47 = vsel %vm2769_vm6, %v7078_v33, 0.0  ;;  %v6611_v30 = vpack.c.bf16 %v6579_v38, %v6578_v43 }
 0x4c8   :  { %v7180_v52 = vadd.f32 %v7179_v47, %v7178_v8  ;;  %7972 = vmatprep.mubr.msk.bf16.mxu1 %vm6655_vm4, %v6610_v29 }
 0x4c9   :  { %7973 = vmatmul.mubr.msk.bf16.gmra.mrb[60].mxu1 %vm6655_vm4, %v6611_v30 }
 0x4ca   :  { %v7182_v56 = vadd.f32 %v7181_v48, %v7180_v52  ;;  %7998 = vmatprep.mubr.msk.bf16.mxu1 %vm10709_vm1, %v16982_v21 }
 0x4cc   :  { %v7184_v11 = vadd.f32 %v7183_v28, %v7182_v56 }
 0x4df   :  { %v7950_v27 = vpop.f32.mrb[36].mxu1 }
 0x4e0   :  { %v6934_v36 = vpop.f32.mrb[37].mxu1  ;;  %v6943_v63 = vadd.f32 %v16637_v59, %v7950_v27 }
 0x4e1   :  { %v6935_v42 = vadd.f32 %v16637_v59, %v6934_v36  ;;  %v7951_v61 = vpop.f32.mrb[38].mxu1 }
 0x4e2   :  { %v6937_v4 = vpop.f32.mrb[39].mxu1  ;;  %v6946_v23 = vadd.f32 %v16637_v59, %v7951_v61  ;;  %v7083_v40 = vmax.f32 %v6943_v63, 0.0 }
 0x4e3   :  { %v7081_v39 = vmax.f32 %v6935_v42, 0.0  ;;  %v6938_v51 = vadd.f32 %v16637_v59, %v6937_v4 }
 0x4e4   :  { %v7084_v10 = vmax.f32 %v6946_v23, 0.0  ;;  %v7189_v22 = vsel %vm2769_vm6, %v7083_v40, 0.0 }
 0x4e5   :  { %v7185_v3 = vsel %vm2769_vm6, %v7081_v39, 0.0  ;;  %v7082_v12 = vmax.f32 %v6938_v51, 0.0 }
 0x4e6   :  { %v7186_v37 = vadd.f32 %v7185_v3, %v7184_v11  ;;  %v7191_v58 = vsel %vm2769_vm6, %v7084_v10, 0.0 }
 0x4e7   :  { %v7187_v25 = vsel %vm2769_vm6, %v7082_v12, 0.0 }
 0x4e8   :  { %v7188_v45 = vadd.f32 %v7187_v25, %v7186_v37 }
 0x4ea   :  { %v7190_v60 = vadd.f32 %v7189_v22, %v7188_v45 }
 0x4ec   :  { %v7192_v7 = vadd.f32 %v7191_v58, %v7190_v60 }
 0x4ff   :  { %v7954_v41 = vpop.f32.mrb[40].mxu1 }
 0x500   :  { %v6950_v5 = vpop.f32.mrb[41].mxu1  ;;  %v6959_v55 = vadd.f32 %v16637_v59, %v7954_v41 }
 0x501   :  { %v6951_v49 = vadd.f32 %v16637_v59, %v6950_v5  ;;  %v7955_v26 = vpop.f32.mrb[42].mxu1 }
 0x502   :  { %v6953_v35 = vpop.f32.mrb[43].mxu1  ;;  %v6962_v34 = vadd.f32 %v16637_v59, %v7955_v26  ;;  %v7087_v17 = vmax.f32 %v6959_v55, 0.0 }
 0x503   :  { %v7085_v15 = vmax.f32 %v6951_v49, 0.0  ;;  %v6954_v62 = vadd.f32 %v16637_v59, %v6953_v35 }
 0x504   :  { %v7088_v32 = vmax.f32 %v6962_v34, 0.0  ;;  %v7197_v19 = vsel %vm2769_vm6, %v7087_v17, 0.0 }
 0x505   :  { %v7193_v2 = vsel %vm2769_vm6, %v7085_v15, 0.0  ;;  %v7086_v57 = vmax.f32 %v6954_v62, 0.0 }
 0x506   :  { %v7194_v46 = vadd.f32 %v7193_v2, %v7192_v7  ;;  %v7199_v44 = vsel %vm2769_vm6, %v7088_v32, 0.0 }
 0x507   :  { %v7195_v1 = vsel %vm2769_vm6, %v7086_v57, 0.0 }
 0x508   :  { %v7196_v13 = vadd.f32 %v7195_v1, %v7194_v46 }
 0x50a   :  { %v7198_v16 = vadd.f32 %v7197_v19, %v7196_v13 }
 0x50c   :  { %v7200_v14 = vadd.f32 %v7199_v44, %v7198_v16 }
 0x51f   :  { %v7958_v24 = vpop.f32.mrb[44].mxu1 }
 0x520   :  { %v6966_v18 = vpop.f32.mrb[45].mxu1  ;;  %v6975_v53 = vadd.f32 %v16637_v59, %v7958_v24 }
 0x521   :  { %v6967_v9 = vadd.f32 %v16637_v59, %v6966_v18  ;;  %v7959_v31 = vpop.f32.mrb[46].mxu1 }
 0x522   :  { %v6969_v54 = vpop.f32.mrb[47].mxu1  ;;  %v6978_v33 = vadd.f32 %v16637_v59, %v7959_v31  ;;  %v7091_v43 = vmax.f32 %v6975_v53, 0.0 }
 0x523   :  { %v7089_v6 = vmax.f32 %v6967_v9, 0.0  ;;  %v6970_v29 = vadd.f32 %v16637_v59, %v6969_v54 }
 0x524   :  { %v7092_v20 = vmax.f32 %v6978_v33, 0.0  ;;  %v7205_v52 = vsel %vm2769_vm6, %v7091_v43, 0.0 }
 0x525   :  { %v7201_v38 = vsel %vm2769_vm6, %v7089_v6, 0.0  ;;  %v7090_v50 = vmax.f32 %v6970_v29, 0.0 }
 0x526   :  { %v7202_v8 = vadd.f32 %v7201_v38, %v7200_v14  ;;  %v7207_v56 = vsel %vm2769_vm6, %v7092_v20, 0.0 }
 0x527   :  { %v7203_v47 = vsel %vm2769_vm6, %v7090_v50, 0.0 }
 0x528   :  { %v7204_v30 = vadd.f32 %v7203_v47, %v7202_v8 }
 0x52a   :  { %v7206_v48 = vadd.f32 %v7205_v52, %v7204_v30 }
 0x52c   :  { %v7208_v28 = vadd.f32 %v7207_v56, %v7206_v48 }
 0x53f   :  { %v7962_v11 = vpop.f32.mrb[48].mxu1 }
 0x540   :  { %v6982_v27 = vpop.f32.mrb[49].mxu1  ;;  %v6991_v36 = vadd.f32 %v16637_v59, %v7962_v11 }
 0x541   :  { %v6983_v63 = vadd.f32 %v16637_v59, %v6982_v27  ;;  %v7963_v42 = vpop.f32.mrb[50].mxu1 }
 0x542   :  { %v6985_v61 = vpop.f32.mrb[51].mxu1  ;;  %v6994_v39 = vadd.f32 %v16637_v59, %v7963_v42  ;;  %v7095_v51 = vmax.f32 %v6991_v36, 0.0 }
 0x543   :  { %v7093_v4 = vmax.f32 %v6983_v63, 0.0  ;;  %v6986_v23 = vadd.f32 %v16637_v59, %v6985_v61 }
 0x544   :  { %v7096_v37 = vmax.f32 %v6994_v39, 0.0  ;;  %v7213_v45 = vsel %vm2769_vm6, %v7095_v51, 0.0 }
 0x545   :  { %v7209_v40 = vsel %vm2769_vm6, %v7093_v4, 0.0  ;;  %v7094_v3 = vmax.f32 %v6986_v23, 0.0 }
 0x546   :  { %v7210_v12 = vadd.f32 %v7209_v40, %v7208_v28  ;;  %v7215_v60 = vsel %vm2769_vm6, %v7096_v37, 0.0  ;;  %v7172_v28 = vrot.slane %v16604_v0, 4 }
 0x547   :  { %v7211_v10 = vsel %vm2769_vm6, %v7094_v3, 0.0 }
 0x548   :  { %v7212_v25 = vadd.f32 %v7211_v10, %v7210_v12  ;;  %v7173_v61 = vadd.f32 %v7172_v28, %v16604_v0  ;;  %v10613_v28 = vld [vmem:[%s16815_s12 + $0x10] sm:$0xff]  }
 0x54a   :  { %v7214_v22 = vadd.f32 %v7213_v45, %v7212_v25  ;;  %v7174_v37 = vrot.slane %v7173_v61, 2 }
 0x54c   :  { %v7216_v58 = vadd.f32 %v7215_v60, %v7214_v22 }
 0x55f   :  { %v7966_v7 = vpop.f32.mrb[52].mxu1 }
 0x560   :  { %v6998_v41 = vpop.f32.mrb[53].mxu1  ;;  %v7007_v5 = vadd.f32 %v16637_v59, %v7966_v7 }
 0x561   :  { %v6999_v55 = vadd.f32 %v16637_v59, %v6998_v41  ;;  %v7967_v49 = vpop.f32.mrb[54].mxu1 }
 0x562   :  { %v7001_v26 = vpop.f32.mrb[55].mxu1  ;;  %v7010_v15 = vadd.f32 %v16637_v59, %v7967_v49  ;;  %v7099_v62 = vmax.f32 %v7007_v5, 0.0 }
 0x563   :  { %v7097_v35 = vmax.f32 %v6999_v55, 0.0  ;;  %v7002_v34 = vadd.f32 %v16637_v59, %v7001_v26 }
 0x564   :  { %v7100_v46 = vmax.f32 %v7010_v15, 0.0  ;;  %v7221_v13 = vsel %vm2769_vm6, %v7099_v62, 0.0 }
 0x565   :  { %v7217_v17 = vsel %vm2769_vm6, %v7097_v35, 0.0  ;;  %v7098_v2 = vmax.f32 %v7002_v34, 0.0 }
 0x566   :  { %v7218_v57 = vadd.f32 %v7217_v17, %v7216_v58  ;;  %v7223_v16 = vsel %vm2769_vm6, %v7100_v46, 0.0  ;;  %v7175_v58 = vadd.f32 %v7174_v37, %v7173_v61 }
 0x567   :  { %v7219_v32 = vsel %vm2769_vm6, %v7098_v2, 0.0 }
 0x568   :  { %v7220_v1 = vadd.f32 %v7219_v32, %v7218_v57  ;;  %v7176_v5 = vrot.slane %v7175_v58, 1 }
 0x56a   :  { %v7222_v19 = vadd.f32 %v7221_v13, %v7220_v1  ;;  %v7177_v49 = vadd.f32 %v7176_v5, %v7175_v58  ;;  %v10605_v13 = vld [vmem:[%s16811_s8] sm:$0xff]  }
 0x56c   :  { %v7224_v44 = vadd.f32 %v7223_v16, %v7222_v19  ;;  %v7248_v15 = vmul.f32 0.00390625, %v7177_v49  ;;  %v10606_v16 = vld [vmem:[%s16811_s8 + $0x8] sm:$0xff]  }
 0x56e   :  { %v7250_v17 = vpack.c.bf16 %v7248_v15, %v7248_v15 }
 0x570   :  { %v7263_v46 = vunpack.c.l.b16 %v7250_v17 }
 0x57f   :  { %v7970_v14 = vpop.f32.mrb[56].mxu1 }
 0x580   :  { %v7014_v24 = vpop.f32.mrb[57].mxu1  ;;  %v7023_v18 = vadd.f32 %v16637_v59, %v7970_v14  ;;  %v10608_v14 = vld [vmem:[%s16813_s10 + $0x8] sm:$0xff]  }
 0x581   :  { %v7015_v53 = vadd.f32 %v16637_v59, %v7014_v24  ;;  %v7971_v9 = vpop.f32.mrb[58].mxu1  ;;  %v10609_v24 = vld [vmem:[%s16813_s10 + $0x10] sm:$0xff]  }
 0x582   :  { %v7017_v31 = vpop.f32.mrb[59].mxu1  ;;  %v7026_v6 = vadd.f32 %v16637_v59, %v7971_v9  ;;  %v7103_v29 = vmax.f32 %v7023_v18, 0.0  ;;  %v10610_v18 = vld [vmem:[%s16813_s10 + $0x18] sm:$0xff]  }
 0x583   :  { %v7101_v54 = vmax.f32 %v7015_v53, 0.0  ;;  %v7018_v33 = vadd.f32 %v16637_v59, %v7017_v31  ;;  %v7726_v53 = vld [vmem:[%s16810_s7] ss:$0 sm:$0xff] }
 0x584   :  { %v7104_v8 = vmax.f32 %v7026_v6, 0.0  ;;  %v7229_v30 = vsel %vm2769_vm6, %v7103_v29, 0.0 }
 0x585   :  { %v7225_v43 = vsel %vm2769_vm6, %v7101_v54, 0.0  ;;  %v7102_v38 = vmax.f32 %v7018_v33, 0.0 }
 0x586   :  { %v7226_v50 = vadd.f32 %v7225_v43, %v7224_v44  ;;  %v7231_v48 = vsel %vm2769_vm6, %v7104_v8, 0.0  ;;  %v10607_v44 = vld [vmem:[%s16813_s10] sm:$0xff]  }
 0x587   :  { %v7227_v20 = vsel %vm2769_vm6, %v7102_v38, 0.0  ;;  %7991 = vmatpush3.bf16.msra.mxu1 %v10607_v44  ;;  %v10611_v43 = vld [vmem:[%s16815_s12] sm:$0xff]   ;;  %v10612_v38 = vld [vmem:[%s16815_s12 + $0x8] sm:$0xff]  }
 0x588   :  { %v7228_v47 = vadd.f32 %v7227_v20, %v7226_v50  ;;  %7992 = vmatprep.subr.bf16.mxu1 %v16982_v21  ;;  %v7729_v50 = vld [vmem:[%s16812_s9] ss:$0 sm:$0xff] }
 0x58a   :  { %v7230_v52 = vadd.f32 %v7229_v30, %v7228_v47 }
 0x58b   :  { %7993 = vmatpush3.bf16.msra.mxu1 %v10608_v14 }
 0x58c   :  { %v7232_v56 = vadd.f32 %v7231_v48, %v7230_v52  ;;  %7994 = vmatprep.subr.bf16.mxu1 %v16982_v21 }
 0x58f   :  { %7995 = vmatpush3.bf16.msra.mxu1 %v10609_v24 }
 0x590   :  { %7996 = vmatprep.subr.bf16.mxu1 %v16982_v21 }
 0x593   :  { %7997 = vmatpush3.bf16.msra.mxu1 %v10610_v18 }
 0x59c   :  { %v7974_v11 = vpop.f32.mrb[60].mxu1 }
 0x59d   :  { %v7030_v27 = vpop.f32.mrb[61].mxu1  ;;  %v7039_v36 = vadd.f32 %v16637_v59, %v7974_v11  ;;  %v10614_v11 = vld [vmem:[%s16815_s12 + $0x18] sm:$0xff]  }
 0x59e   :  { %v7031_v63 = vadd.f32 %v16637_v59, %v7030_v27  ;;  %v7975_v42 = vpop.f32.mrb[62].mxu1  ;;  %v7733_v27 = vld [vmem:[%s16814_s11] ss:$0 sm:$0xff] }
 0x59f   :  { %v7033_v4 = vpop.f32.mrb[63].mxu1  ;;  %v7042_v23 = vadd.f32 %v16637_v59, %v7975_v42  ;;  %v7107_v40 = vmax.f32 %v7039_v36, 0.0 }
 0x5a0   :  { %v7105_v39 = vmax.f32 %v7031_v63, 0.0  ;;  %v7034_v51 = vadd.f32 %v16637_v59, %v7033_v4 }
 0x5a1   :  { %v7108_v25 = vmax.f32 %v7042_v23, 0.0  ;;  %v7237_v60 = vsel %vm2769_vm6, %v7107_v40, 0.0 }
 0x5a2   :  { %v7233_v3 = vsel %vm2769_vm6, %v7105_v39, 0.0  ;;  %v7106_v12 = vmax.f32 %v7034_v51, 0.0  ;;  %v7739_v51 = vld [vmem:[%s16816_s13] ss:$0 sm:$0xff]  ;;  %s10710_s13 = smov 123  }
 0x5a3   :  { %v7234_v10 = vadd.f32 %v7233_v3, %v7232_v56  ;;  %v7239_v7 = vsel %vm2769_vm6, %v7108_v25, 0.0 }
 0x5a4   :  { %v7235_v45 = vsel %vm2769_vm6, %v7106_v12, 0.0 }
 0x5a5   :  { %v7236_v22 = vadd.f32 %v7235_v45, %v7234_v10  ;;  %v7554_v45 = vld [vmem:[%s16804_s1] sm:$0x3] }
 0x5a7   :  { %v7238_v0 = vadd.f32 %v7237_v60, %v7236_v22 }
 0x5a9   :  { %v7240_v41 = vadd.f32 %v7239_v7, %v7238_v0 }
 0x5ab   :  { %v7241_v55 = vrot.slane %v7240_v41, 4 }
 0x5ad   :  { %v7242_v59 = vadd.f32 %v7241_v55, %v7240_v41 }
 0x5af   :  { %v7243_v26 = vrot.slane %v7242_v59, 2 }
 0x5b1   :  { %v7244_v35 = vadd.f32 %v7243_v26, %v7242_v59 }
 0x5b3   :  { %v7245_v34 = vrot.slane %v7244_v35, 1 }
 0x5b5   :  { %v7246_v62 = vadd.f32 %v7245_v34, %v7244_v35 }
 0x5b7   :  { %v7249_v2 = vmul.f32 0.00390625, %v7246_v62 }
 0x5b9   :  { %v7251_v57 = vpack.c.bf16 %v7249_v2, %v7249_v2 }
 0x5bb   :  { %v7264_v32 = vunpack.c.l.b16 %v7251_v57 }
 0x5bd   :  { %v7266_v1 = vsel %vm7265_vm2, %v7264_v32, %v7263_v46 }
 0x5be   :  { %v7267_v19 = vpack.c.b16 %v7266_v1, %v7266_v1 }
 0x5c0   :  { %7979 = vmatmul.mubr.msk.bf16.vlgmr.msra.gmra.mrb[64].mxu0 %vm2769_vm6, %v7267_v19  ;;  %vm7555_vm6 = vcmask 33792  }
 0x5c1   :  { %7983 = vmatpush3.bf16.msra.mxu0 %v10605_v13  ;;  %7986 = vmatprep.mubr.msk.bf16.mxu0 %vm10709_vm1, %v16982_v21 }
 0x5c2   :  { %7984 = vmatprep.subr.bf16.mxu0 %v16982_v21 }
 0x5c5   :  { %7985 = vmatpush3.bf16.msra.mxu0 %v10606_v16 }
 0x5c6   :  { %8002 = vmatprep.subr.bf16.mxu0 %v16982_v21 }
 0x693   :  { %v7311_v9 = vpop.f32.mrb[64].mxu0 }
 0x694   :  { %v7312_v31 = vadd.f32 %v7726_v53, %v7311_v9  ;;  %v7980_v54 = vpop.f32.mrb[65].mxu0 }
 0x695   :  { %v7314_v6 = vpop.f32.mrb[66].mxu0 }
 0x696   :  { %v7317_v33 = vpack.c.bf16 %v7312_v31, %v7312_v31  ;;  %v7981_v29 = vpop.f32.mrb[67].mxu0 }
 0x698   :  { %7987 = vmatmul.mubr.msk.bf16.vlgmr.msra.gmra.mrb[68].mxu0 %vm3029_vm10, %v7317_v33 }
 0x699   :  { %8010 = vmatprep.mubr.msk.bf16.mxu0 %vm10709_vm1, %v16982_v21  ;;  %8003 = vmatpush3.bf16.msra.mxu0 %v10611_v43 }
 0x69a   :  { %8004 = vmatprep.subr.bf16.mxu0 %v16982_v21 }
 0x69d   :  { %8005 = vmatpush3.bf16.msra.mxu0 %v10612_v38 }
 0x69e   :  { %8006 = vmatprep.subr.bf16.mxu0 %v16982_v21 }
 0x6a1   :  { %8007 = vmatpush3.bf16.msra.mxu0 %v10613_v28 }
 0x6a2   :  { %8008 = vmatprep.subr.bf16.mxu0 %v16982_v21 }
 0x6a5   :  { %8009 = vmatpush3.bf16.msra.mxu0 %v10614_v11 }
 0x76b   :  { %v7378_v8 = vpop.f32.mrb[68].mxu0 }
 0x76c   :  { %v7379_v20 = vadd.f32 %v7729_v50, %v7378_v8  ;;  %v7988_v47 = vpop.f32.mrb[69].mxu0 }
 0x76d   :  { %v7381_v30 = vpop.f32.mrb[70].mxu0 }
 0x76e   :  { %v7384_v52 = vmax.f32 %v7379_v20, 0.0  ;;  %v7989_v48 = vpop.f32.mrb[71].mxu0 }
 0x770   :  { %v7385_v56 = vpack.c.bf16 %v7384_v52, %v7384_v52 }
 0x772   :  { %7999 = vmatmul.mubr.msk.bf16.vlgmr.msra.gmra.mrb[64].mxu1 %vm6515_vm0, %v7385_v56 }
 0x845   :  { %v7462_v36 = vpop.f32.mrb[64].mxu1 }
 0x846   :  { %v7463_v63 = vadd.f32 %v7733_v27, %v7462_v36  ;;  %v8000_v42 = vpop.f32.mrb[65].mxu1 }
 0x847   :  { %v7465_v61 = vpop.f32.mrb[66].mxu1 }
 0x848   :  { %v7468_v4 = vmax.f32 %v7463_v63, 0.0  ;;  %v8001_v39 = vpop.f32.mrb[67].mxu1 }
 0x84a   :  { %v7469_v23 = vpack.c.bf16 %v7468_v4, %v7468_v4 }
 0x84c   :  { %8011 = vmatmul.mubr.msk.bf16.vlgmr.msra.gmra.mrb[72].mxu0 %vm6515_vm0, %v7469_v23 }
 0x91f   :  { %v7546_v40 = vpop.f32.mrb[72].mxu0 }
 0x920   :  { %v7547_v21 = vadd.f32 %v7739_v51, %v7546_v40  ;;  %v8012_v3 = vpop.f32.mrb[73].mxu0 }
 0x921   :  { %v7549_v12 = vpop.f32.mrb[74].mxu0 }
 0x922   :  { %7553 = vst.msk [vmem:[%s16817_s14] sm:$0x3] %vm7552_vm3, %v7547_v21  ;;  %v8013_v37 = vpop.f32.mrb[75].mxu0  ;;  %v7589_v10 = vsel %vm7588_vm5, %v7547_v21, -inf  ;;  %v7556_v25 = vsel %vm7555_vm6, %v7547_v21, -inf  ;;  %v7568_v22 = vmul.f32 %v7554_v45, %v7547_v21 }
 0x923   :  { %7590 = vmax.xlane.f32.xlu0 %v7589_v10  ;;  %7557 = vmax.xlane.f32.xlu1 %v7556_v25 }
 0x924   :  { %v7569_v26 = vsel %vm7555_vm6, %v7568_v22, 0.0 }
 0x934   :  { %7607 = vrot.lane.b32.xlu1 %v7568_v22, %s10710_s13 }
 0x9b0   :  { %v7591_v60 = vpop.xlane.xlu0 %7590  ;;  %v7558_v41 = vpop.xlane.xlu1 %7557 }
 0x9b1   :  { %v7592_v58 = vsub.f32 %v7547_v21, %v7591_v60  ;;  %v7559_v5 = vsub.f32 %v7547_v21, %v7558_v41 }
 0x9b3   :  { %v7593_v0 = vmul.f32 1.442695, %v7592_v58  ;;  %v7560_v55 = vmul.f32 1.442695, %v7559_v5 }
 0x9b4   :  { %v7608_v35 = vpop.permute.xlu1 %7607 }
 0x9b5   :  { %10615 = vpow2.f32 %v7593_v0  ;;  %v7610_v15 = vsel %vm7599_vm7, %v7608_v35, 0.0 }
 0x9b6   :  { %10617 = vpow2.f32 %v7560_v55 }
 0x9bf   :  { %v10616_v7 = vpop.eup %10615 }
 0x9c0   :  { %7596 = vrot.lane.b32.xlu0 %v10616_v7, %s10710_s13  ;;  %v10618_v59 = vpop.eup %10617 }
 0x9c1   :  { %v7562_v49 = vsel %vm7555_vm6, %v10618_v59, 0.0 }
 0x9df   :  { %7563 = vadd.xlane.f32.xlu0 %v7562_v49 }
 0x9e3   :  { %7570 = vadd.xlane.f32.xlu0 %v7569_v26 }
 0x9e7   :  { %7611 = vadd.xlane.f32.xlu0 %v7610_v15 }
 0xa32   :  { %v7597_v34 = vpop.permute.xlu0 %7596 }
 0xa33   :  { %v7600_v62 = vsel %vm7599_vm7, %v7597_v34, 0.0 }
 0xa34   :  { %7601 = vadd.xlane.f32.xlu1 %v7600_v62 }
 0xa6c   :  { %v7564_v17 = vpop.xlane.xlu0 %7563 }
 0xa6d   :  { %10619 = vlog2.f32 %v7564_v17 }
 0xa70   :  { %v7571_v32 = vpop.xlane.xlu0 %7570 }
 0xa74   :  { %v7612_v24 = vpop.xlane.xlu0 %7611 }
 0xa77   :  { %v10620_v2 = vpop.eup %10619 }
 0xa78   :  { %v7566_v57 = vmul.f32 0.6931472, %v10620_v2 }
 0xa7a   :  { %v7567_v46 = vadd.f32 %v7566_v57, %v7558_v41 }
 0xa7c   :  { %v7572_v1 = vsub.f32 %v7567_v46, %v7571_v32 }
 0xa7e   :  { %v7574_v13 = vsel %vm7573_vm8, %v7572_v1, 0.0 }
 0xa7f   :  { %7575 = vadd.xlane.f32.xlu1 %v7574_v13 }
 0xac1   :  { %v7602_v19 = vpop.xlane.xlu1 %7601 }
 0xac2   :  { %10621 = vlog2.f32 %v7602_v19 }
 0xacc   :  { %v10622_v16 = vpop.eup %10621 }
 0xacd   :  { %v7604_v44 = vmul.f32 0.6931472, %v10622_v16 }
 0xacf   :  { %v7605_v14 = vadd.f32 %v7604_v44, %v7591_v60 }
 0xad1   :  { %v7613_v18 = vsub.f32 %v7605_v14, %v7612_v24 }
 0xad3   :  { %v7614_v53 = vsel %vm7573_vm8, %v7613_v18, 0.0 }
 0xad4   :  { %7615 = vadd.xlane.f32.xlu0 %v7614_v53 }
 0xb0c   :  { %v7576_v9 = vpop.xlane.xlu1 %7575 }
 0xb0d   :  { %v7577_v31 = vrot.slane %v7576_v9, 4 }
 0xb0f   :  { %v7578_v54 = vadd.f32 %v7577_v31, %v7576_v9 }
 0xb11   :  { %v7579_v6 = vrot.slane %v7578_v54, 2 }
 0xb13   :  { %v7580_v33 = vadd.f32 %v7579_v6, %v7578_v54 }
 0xb15   :  { %v7581_v29 = vrot.slane %v7580_v33, 1 }
 0xb17   :  { %v7582_v43 = vadd.f32 %v7581_v29, %v7580_v33 }
 0xb19   :  { %8016 = vpush %v7582_v43 }
 0xb4a   :  { %s8017_s1 = spop %8016 }
 0xb4b   :  { %s7586_s14 = smul.f32 0.5, %s8017_s1 }
 0xb61   :  { %v7616_v38 = vpop.xlane.xlu0 %7615 }
 0xb62   :  { %v7617_v50 = vrot.slane %v7616_v38, 4 }
 0xb64   :  { %v7618_v8 = vadd.f32 %v7617_v50, %v7616_v38 }
 0xb66   :  { %v7619_v20 = vrot.slane %v7618_v8, 2 }
 0xb68   :  { %v7620_v47 = vadd.f32 %v7619_v20, %v7618_v8 }
 0xb6a   :  { %v7621_v30 = vrot.slane %v7620_v47, 1 }
 0xb6c   :  { %v7622_v52 = vadd.f32 %v7621_v30, %v7620_v47 }
 0xb6e   :  { %8018 = vpush %v7622_v52 }
 0xb9f   :  { %s8019_s17 = spop %8018 }
 0xba0   :  { %s7626_s23 = smul.f32 0.5, %s8019_s17 }
 0xba2   :  { %s7627_s30 = sadd.f32 %s7626_s23, %s7586_s14 }
 0xba4   :  { %s7630_s8 = smul.f32 0.5, %s7627_s30 }
 0xba6   :  { %v7631_v48 = vstv %s7630_s8 }
 0xba7   :  { %7633 = vst.msk [vmem:[#allocation4] sm:$0x1] %vm7632_vm9, %v7631_v48 }
 0xba8   :  { %10683 = shalt.err (!%p10680_p4)
}
 0xba9   :  { %s10684_s10 = scalar_lea.hbm %s16818_s15, 16 }
 0xbaa   :  { %p10685_p5 = scmp.ne.s32.totalorder %s16818_s15, %s10684_s10  ;;  %p10688_p6 = scmp.lt.u32.totalorder %s10684_s10, %s16818_s15 }
 0xbac   :  { %p10690_p7 = pnand %p10688_p6, %p10685_p5 }
 0xbae   :  { %10693 = shalt.err (!%p10690_p7)
}
 0xbaf   :  { %7645 = dma.vmem_to_hbm [thread:$0]  %s7643_s2, 16, %s16818_s15, [#allocation5]  }
 0xbb0   :  { %10694 = dma.done.wait [#allocation5], 16  }
 0xbb1   :  { %10695 = vsyncadd [#allocation5], 4294967280 }
 0xbb2   :  { %7651 = vsyncpa [#allocation5], 1 }

</bundles_post_ra>
